<compile_context>
chip_gen: v5e
topology: v5e:2x2
jax: 0.10.0
libtpu: 0.0.40
codegen_flags: <defaults>
</compile_context>

<pallas_src>
import jax
import jax.numpy as jnp
from jax.experimental import pallas as pl
from jax.experimental.pallas import tpu as pltpu

KSIZE = 7
PAD = (KSIZE - 1) // 2          # = 3
NTAPS = 2 * KSIZE * KSIZE       # 98 conv taps (2 in-channels -> 1 out-channel)
PBR = NTAPS + 1                 # params per branch: 98 taps + 1 BN-folded bias
MAX_TB = 8                      # cap on batch elements per grid step (bounds unroll)


def _sigmoid(z):
    # Exact formulation (exp saturation handles +/-inf correctly).  The EUP
    # approx-reciprocal variant was skipped deliberately: the divide is gate-map
    # sized (tiny) and exactness keeps the 1e-4 check tight.
    return 1.0 / (1.0 + jnp.exp(-z))


def _branch_params(params_ref, branch):
    """Hoist the 98 taps + folded bias of one branch out of all loops (99 slds)."""
    base = branch * PBR
    taps = [params_ref[base + t] for t in range(NTAPS)]
    bias = params_ref[base + NTAPS]
    return taps, bias


def _conv7x7_gate(pad_ref, taps, bias, rows, cols):
    """7x7 (2ch -> 1ch) conv over a zero-padded map in VMEM scratch, + sigmoid.

    Lane-direction shifts are hoisted out of the tap loop: one lane-offset load
    per (channel, dj) (14 total) and sublane-only slices inside, accumulated
    into 4 independent partial sums for VPU ILP (no single-op f32 FMA).
    """
    accs = [jnp.zeros((rows, cols), jnp.float32) for _ in range(4)]
    t = 0
    for ch in range(2):
        for dj in range(KSIZE):
            col = pad_ref[ch, :, dj:dj + cols]            # (rows+6, cols) lane-shifted load
            for di in range(KSIZE):
                w = taps[ch * KSIZE * KSIZE + di * KSIZE + dj]
                accs[t % 4] = accs[t % 4] + w * col[di:di + rows, :]
                t += 1
    z = ((accs[0] + accs[1]) + (accs[2] + accs[3])) + bias
    return _sigmoid(z)


def _zero_halo(pad_ref):
    """Zero only the 3-wide halo bands; interiors are rewritten every element.

    Done every grid step (not only at program_id==0) so it stays correct when the
    parallel batch axis is sharded across TensorCores (separate scratch per core).
    """
    _, rp, cp = pad_ref.shape
    z_rows = jnp.zeros((2, PAD, cp), jnp.float32)
    z_cols = jnp.zeros((2, rp, PAD), jnp.float32)
    pad_ref[:, :PAD, :] = z_rows
    pad_ref[:, rp - PAD:, :] = z_rows
    pad_ref[:, :, :PAD] = z_cols
    pad_ref[:, :, cp - PAD:] = z_cols


def _tam_kernel(params_ref, x_ref, o_ref, pad_hw, pad_cw, pad_hc):
    """TB batch elements per step: all three gates + fused average.

    params_ref : (3*PBR,) SMEM f32   branch order [hw, cw, hc]; BN pre-folded;
                 hc taps spatially pre-transposed on the host.
    x_ref/o_ref: (TB, C, H, W) VMEM blocks
    pad_*      : zero-padded pooled maps (2 channels each) in VMEM scratch
    """
    TB, C, H, W = x_ref.shape

    # ---- hoist all SMEM scalar reads out of the element/tap loops -----------
    w_hw, b_hw = _branch_params(params_ref, 0)
    w_cw, b_cw = _branch_params(params_ref, 1)
    w_hc, b_hc = _branch_params(params_ref, 2)

    # ---- halo bands zeroed once per step; interiors rewritten per element ----
    _zero_halo(pad_hw)
    _zero_halo(pad_cw)
    _zero_halo(pad_hc)

    third = jnp.float32(1.0 / 3.0)

    for tb in range(TB):                                   # TB <= MAX_TB (static)
        # ---- ZPool (max + mean) for all three branches: bulk reductions ------
        # Only one element is promoted to f32 at a time (bounds VMEM/vreg use);
        # x3 is dead after pooling (x is re-read from the input block at combine).
        x3 = x_ref[tb].astype(jnp.float32)                 # (C, H, W)
        pad_hw[0, PAD:PAD + H, PAD:PAD + W] = jnp.max(x3, axis=0)    # pool over C
        pad_hw[1, PAD:PAD + H, PAD:PAD + W] = jnp.mean(x3, axis=0)
        pad_cw[0, PAD:PAD + C, PAD:PAD + W] = jnp.max(x3, axis=1)    # pool over H
        pad_cw[1, PAD:PAD + C, PAD:PAD + W] = jnp.mean(x3, axis=1)
        # hc branch pools over W; maps are built directly in (C, H) layout via a
        # single bulk lane reduction.  The host packed this branch's taps
        # transposed, so convolving in (C, H) layout is mathematically identical
        # to the torch conv over the (H, C) plane -> no in-kernel transpose.
        pad_hc[0, PAD:PAD + C, PAD:PAD + H] = jnp.max(x3, axis=2)    # pool over W
        pad_hc[1, PAD:PAD + C, PAD:PAD + H] = jnp.mean(x3, axis=2)

        # ---- 7x7 conv (+BN folded) + sigmoid per branch (scaled by 1/3) ------
        s_hw = _conv7x7_gate(pad_hw, w_hw, b_hw, H, W) * third       # (H, W)
        s_cw = _conv7x7_gate(pad_cw, w_cw, b_cw, C, W) * third       # (C, W)
        s_hc = _conv7x7_gate(pad_hc, w_hc, b_hc, C, H) * third       # (C, H)

        # ---- fused combine: one broadcasted gate sum + ONE store per element --
        total = s_hw[None, :, :] + s_cw[:, None, :] + s_hc[:, :, None]   # (C,H,W)
        o_ref[tb] = (x_ref[tb].astype(jnp.float32) * total).astype(o_ref.dtype)


def _pack_branch(w, b, bn_scale, bn_shift, transpose_taps=False):
    """Flatten Conv2d(2,1,7) weights with BatchNorm folded in -> (99,) f32."""
    w = jnp.asarray(w, jnp.float32).reshape(2, KSIZE, KSIZE)
    if transpose_taps:
        w = jnp.swapaxes(w, -1, -2)        # hc branch: conv runs in (C, H) layout
    b = jnp.asarray(b, jnp.float32).reshape(())
    bn_scale = jnp.asarray(bn_scale, jnp.float32).reshape(())
    bn_shift = jnp.asarray(bn_shift, jnp.float32).reshape(())
    w_eff = (w * bn_scale).reshape(-1)                     # (98,)
    b_eff = (b * bn_scale + bn_shift).reshape(1)           # (1,)
    return jnp.concatenate([w_eff, b_eff])                 # (99,)


def _vmem_limit_bytes():
    """~80% of this chip's VMEM (>=100 MiB class on v5e/v6e, ~51 MiB on v7x)."""
    default = 64 * 1024 * 1024
    try:
        cap = int(getattr(pltpu.get_tpu_info(), "vmem_capacity_bytes", default))
    except Exception:
        cap = default
    return int(min(max(int(cap * 0.8), 32 * 1024 * 1024), 100 * 1024 * 1024))


def _choose_tb(B, C, H, W, itemsize, vmem_budget):
    """Batch elements per grid step, sized to VMEM and divisor of B."""
    elem = C * H * W
    # Per element in flight: double-buffered input + output blocks plus ~3
    # element-sized f32 temporaries (pool source, gate sum, product).
    per_elem = 4 * elem * itemsize + 3 * elem * 4
    tb = int(min(B, MAX_TB, max(1, (vmem_budget // 2) // max(per_elem, 1))))
    tb = max(tb, 1)
    if B >= 2:
        tb = min(tb, (B + 1) // 2)   # keep >= 2 grid steps so both TCs get work
    while B % tb:
        tb -= 1
    return tb


def tam_forward(x, params):
    """Fused TAM forward (no_spatial=False).  x: (B, C, H, W) NCHW.

    params: dict with keys 'hw', 'cw', 'hc', each (w(1,2,7,7), b, bn_scale, bn_shift).
    """
    B, C, H, W = x.shape
    packed = jnp.concatenate([
        _pack_branch(*params["hw"]),
        _pack_branch(*params["cw"]),
        _pack_branch(*params["hc"], transpose_taps=True),  # conv in (C,H) layout
    ])                                                     # (3*99,)

    vmem_limit = _vmem_limit_bytes()
    TB = _choose_tb(B, C, H, W, x.dtype.itemsize, vmem_limit)

    return pl.pallas_call(
        _tam_kernel,
        out_shape=jax.ShapeDtypeStruct((B, C, H, W), x.dtype),
        grid=(B // TB,),
        in_specs=[
            pl.BlockSpec(memory_space=pltpu.MemorySpace.SMEM),        # packed params
            pl.BlockSpec((TB, C, H, W), lambda b: (b, 0, 0, 0)),      # x
        ],
        out_specs=pl.BlockSpec((TB, C, H, W), lambda b: (b, 0, 0, 0)),
        scratch_shapes=[
            pltpu.VMEM((2, H + 2 * PAD, W + 2 * PAD), jnp.float32),   # hw pads
            pltpu.VMEM((2, C + 2 * PAD, W + 2 * PAD), jnp.float32),   # cw pads
            pltpu.VMEM((2, C + 2 * PAD, H + 2 * PAD), jnp.float32),   # hc pads (C,H)
        ],
        compiler_params=pltpu.CompilerParams(
            dimension_semantics=("parallel",),            # batch-block axis
            vmem_limit_bytes=vmem_limit,
        ),
    )(packed, x)


# ----------------------- pure-JAX reference (for checking) ------------------
def _gate_ref(x, w, b, bn_scale, bn_shift):
    mx = jnp.max(x, axis=1, keepdims=True)
    mn = jnp.mean(x, axis=1, keepdims=True)
    pooled = jnp.concatenate([mx, mn], axis=1)
    z = jax.lax.conv_general_dilated(
        pooled, w, (1, 1), ((PAD, PAD), (PAD, PAD)),
        dimension_numbers=("NCHW", "OIHW", "NCHW"),
        precision=jax.lax.Precision.HIGHEST,
    ) + b
    z = z * bn_scale + bn_shift
    return x * jax.nn.sigmoid(z)


def _tam_ref(x, params):
    x_perm1 = jnp.transpose(x, (0, 2, 1, 3))
    x_out11 = jnp.transpose(_gate_ref(x_perm1, *params["cw"]), (0, 2, 1, 3))
    x_perm2 = jnp.transpose(x, (0, 3, 2, 1))
    x_out21 = jnp.transpose(_gate_ref(x_perm2, *params["hc"]), (0, 3, 2, 1))
    x_out = _gate_ref(x, *params["hw"])
    return (1.0 / 3.0) * (x_out + x_out11 + x_out21)


if __name__ == "__main__":
    key = jax.random.PRNGKey(0)
    B, C, H, W = 2, 4, 16, 16
    kx, kcw, khc, khw = jax.random.split(key, 4)
    x = jax.random.normal(kx, (B, C, H, W), jnp.float32)

    def init_gate(k):
        # Conv2d(2, 1, 7) params, deterministic (kaiming-uniform-style bound).
        kw, kb = jax.random.split(k)
        fan_in = 2 * KSIZE * KSIZE
        bound = 1.0 / (fan_in ** 0.5)
        w = jax.random.uniform(kw, (1, 2, KSIZE, KSIZE), jnp.float32, -bound, bound)
        b = jax.random.uniform(kb, (), jnp.float32, -bound, bound)
        # Eval-mode BatchNorm2d(1) with default params / running stats.
        gamma, beta, r_mean, r_var, eps = 1.0, 0.0, 0.0, 1.0, 1e-5
        bn_scale = jnp.float32(gamma / (r_var + eps) ** 0.5)
        bn_shift = jnp.float32(beta - r_mean * float(bn_scale))
        return (w, b, bn_scale, bn_shift)

    params = {"cw": init_gate(kcw), "hc": init_gate(khc), "hw": init_gate(khw)}

    out = tam_forward(x, params)
    jax.block_until_ready(out)

    ref = _tam_ref(x, params)
    assert out.shape == (B, C, H, W)
    assert bool(jnp.allclose(out, ref, atol=1e-4, rtol=1e-4))

    print("KERNEL_OK")
</pallas_src>

<mosaic_0001>
module attributes {stable_mosaic.version = 11 : i64} {
  func.func @_tam_kernel(%arg0: i32, %arg1: memref<297xf32, #tpu.memory_space<smem>>, %arg2: memref<1x4x16x16xf32, #tpu.memory_space<vmem>>, %arg3: memref<1x4x16x16xf32, #tpu.memory_space<vmem>>, %arg4: memref<2x22x22xf32, #tpu.memory_space<vmem>>, %arg5: memref<2x10x22xf32, #tpu.memory_space<vmem>>, %arg6: memref<2x10x22xf32, #tpu.memory_space<vmem>>) attributes {dimension_semantics = [#tpu.dimension_semantics<parallel>], iteration_bounds = array<i64: 2>, scalar_prefetch = 0 : i64, scratch_operands = 3 : i64, tpu.core_type = #tpu.core_type<tc>, window_params = [{transform_indices = @transform_0, window_bounds = array<i64: 297>}, {transform_indices = @transform_1, window_bounds = array<i64: 1, 4, 16, 16>}, {transform_indices = @transform_2, window_bounds = array<i64: 1, 4, 16, 16>}]} {
    %c0 = arith.constant 0 : index
    %0 = memref.load %arg1[%c0] : memref<297xf32, #tpu.memory_space<smem>>
    %c1 = arith.constant 1 : index
    %1 = memref.load %arg1[%c1] : memref<297xf32, #tpu.memory_space<smem>>
    %c2 = arith.constant 2 : index
    %2 = memref.load %arg1[%c2] : memref<297xf32, #tpu.memory_space<smem>>
    %c3 = arith.constant 3 : index
    %3 = memref.load %arg1[%c3] : memref<297xf32, #tpu.memory_space<smem>>
    %c4 = arith.constant 4 : index
    %4 = memref.load %arg1[%c4] : memref<297xf32, #tpu.memory_space<smem>>
    %c5 = arith.constant 5 : index
    %5 = memref.load %arg1[%c5] : memref<297xf32, #tpu.memory_space<smem>>
    %c6 = arith.constant 6 : index
    %6 = memref.load %arg1[%c6] : memref<297xf32, #tpu.memory_space<smem>>
    %c7 = arith.constant 7 : index
    %7 = memref.load %arg1[%c7] : memref<297xf32, #tpu.memory_space<smem>>
    %c8 = arith.constant 8 : index
    %8 = memref.load %arg1[%c8] : memref<297xf32, #tpu.memory_space<smem>>
    %c9 = arith.constant 9 : index
    %9 = memref.load %arg1[%c9] : memref<297xf32, #tpu.memory_space<smem>>
    %c10 = arith.constant 10 : index
    %10 = memref.load %arg1[%c10] : memref<297xf32, #tpu.memory_space<smem>>
    %c11 = arith.constant 11 : index
    %11 = memref.load %arg1[%c11] : memref<297xf32, #tpu.memory_space<smem>>
    %c12 = arith.constant 12 : index
    %12 = memref.load %arg1[%c12] : memref<297xf32, #tpu.memory_space<smem>>
    %c13 = arith.constant 13 : index
    %13 = memref.load %arg1[%c13] : memref<297xf32, #tpu.memory_space<smem>>
    %c14 = arith.constant 14 : index
    %14 = memref.load %arg1[%c14] : memref<297xf32, #tpu.memory_space<smem>>
    %c15 = arith.constant 15 : index
    %15 = memref.load %arg1[%c15] : memref<297xf32, #tpu.memory_space<smem>>
    %c16 = arith.constant 16 : index
    %16 = memref.load %arg1[%c16] : memref<297xf32, #tpu.memory_space<smem>>
    %c17 = arith.constant 17 : index
    %17 = memref.load %arg1[%c17] : memref<297xf32, #tpu.memory_space<smem>>
    %c18 = arith.constant 18 : index
    %18 = memref.load %arg1[%c18] : memref<297xf32, #tpu.memory_space<smem>>
    %c19 = arith.constant 19 : index
    %19 = memref.load %arg1[%c19] : memref<297xf32, #tpu.memory_space<smem>>
    %c20 = arith.constant 20 : index
    %20 = memref.load %arg1[%c20] : memref<297xf32, #tpu.memory_space<smem>>
    %c21 = arith.constant 21 : index
    %21 = memref.load %arg1[%c21] : memref<297xf32, #tpu.memory_space<smem>>
    %c22 = arith.constant 22 : index
    %22 = memref.load %arg1[%c22] : memref<297xf32, #tpu.memory_space<smem>>
    %c23 = arith.constant 23 : index
    %23 = memref.load %arg1[%c23] : memref<297xf32, #tpu.memory_space<smem>>
    %c24 = arith.constant 24 : index
    %24 = memref.load %arg1[%c24] : memref<297xf32, #tpu.memory_space<smem>>
    %c25 = arith.constant 25 : index
    %25 = memref.load %arg1[%c25] : memref<297xf32, #tpu.memory_space<smem>>
    %c26 = arith.constant 26 : index
    %26 = memref.load %arg1[%c26] : memref<297xf32, #tpu.memory_space<smem>>
    %c27 = arith.constant 27 : index
    %27 = memref.load %arg1[%c27] : memref<297xf32, #tpu.memory_space<smem>>
    %c28 = arith.constant 28 : index
    %28 = memref.load %arg1[%c28] : memref<297xf32, #tpu.memory_space<smem>>
    %c29 = arith.constant 29 : index
    %29 = memref.load %arg1[%c29] : memref<297xf32, #tpu.memory_space<smem>>
    %c30 = arith.constant 30 : index
    %30 = memref.load %arg1[%c30] : memref<297xf32, #tpu.memory_space<smem>>
    %c31 = arith.constant 31 : index
    %31 = memref.load %arg1[%c31] : memref<297xf32, #tpu.memory_space<smem>>
    %c32 = arith.constant 32 : index
    %32 = memref.load %arg1[%c32] : memref<297xf32, #tpu.memory_space<smem>>
    %c33 = arith.constant 33 : index
    %33 = memref.load %arg1[%c33] : memref<297xf32, #tpu.memory_space<smem>>
    %c34 = arith.constant 34 : index
    %34 = memref.load %arg1[%c34] : memref<297xf32, #tpu.memory_space<smem>>
    %c35 = arith.constant 35 : index
    %35 = memref.load %arg1[%c35] : memref<297xf32, #tpu.memory_space<smem>>
    %c36 = arith.constant 36 : index
    %36 = memref.load %arg1[%c36] : memref<297xf32, #tpu.memory_space<smem>>
    %c37 = arith.constant 37 : index
    %37 = memref.load %arg1[%c37] : memref<297xf32, #tpu.memory_space<smem>>
    %c38 = arith.constant 38 : index
    %38 = memref.load %arg1[%c38] : memref<297xf32, #tpu.memory_space<smem>>
    %c39 = arith.constant 39 : index
    %39 = memref.load %arg1[%c39] : memref<297xf32, #tpu.memory_space<smem>>
    %c40 = arith.constant 40 : index
    %40 = memref.load %arg1[%c40] : memref<297xf32, #tpu.memory_space<smem>>
    %c41 = arith.constant 41 : index
    %41 = memref.load %arg1[%c41] : memref<297xf32, #tpu.memory_space<smem>>
    %c42 = arith.constant 42 : index
    %42 = memref.load %arg1[%c42] : memref<297xf32, #tpu.memory_space<smem>>
    %c43 = arith.constant 43 : index
    %43 = memref.load %arg1[%c43] : memref<297xf32, #tpu.memory_space<smem>>
    %c44 = arith.constant 44 : index
    %44 = memref.load %arg1[%c44] : memref<297xf32, #tpu.memory_space<smem>>
    %c45 = arith.constant 45 : index
    %45 = memref.load %arg1[%c45] : memref<297xf32, #tpu.memory_space<smem>>
    %c46 = arith.constant 46 : index
    %46 = memref.load %arg1[%c46] : memref<297xf32, #tpu.memory_space<smem>>
    %c47 = arith.constant 47 : index
    %47 = memref.load %arg1[%c47] : memref<297xf32, #tpu.memory_space<smem>>
    %c48 = arith.constant 48 : index
    %48 = memref.load %arg1[%c48] : memref<297xf32, #tpu.memory_space<smem>>
    %c49 = arith.constant 49 : index
    %49 = memref.load %arg1[%c49] : memref<297xf32, #tpu.memory_space<smem>>
    %c50 = arith.constant 50 : index
    %50 = memref.load %arg1[%c50] : memref<297xf32, #tpu.memory_space<smem>>
    %c51 = arith.constant 51 : index
    %51 = memref.load %arg1[%c51] : memref<297xf32, #tpu.memory_space<smem>>
    %c52 = arith.constant 52 : index
    %52 = memref.load %arg1[%c52] : memref<297xf32, #tpu.memory_space<smem>>
    %c53 = arith.constant 53 : index
    %53 = memref.load %arg1[%c53] : memref<297xf32, #tpu.memory_space<smem>>
    %c54 = arith.constant 54 : index
    %54 = memref.load %arg1[%c54] : memref<297xf32, #tpu.memory_space<smem>>
    %c55 = arith.constant 55 : index
    %55 = memref.load %arg1[%c55] : memref<297xf32, #tpu.memory_space<smem>>
    %c56 = arith.constant 56 : index
    %56 = memref.load %arg1[%c56] : memref<297xf32, #tpu.memory_space<smem>>
    %c57 = arith.constant 57 : index
    %57 = memref.load %arg1[%c57] : memref<297xf32, #tpu.memory_space<smem>>
    %c58 = arith.constant 58 : index
    %58 = memref.load %arg1[%c58] : memref<297xf32, #tpu.memory_space<smem>>
    %c59 = arith.constant 59 : index
    %59 = memref.load %arg1[%c59] : memref<297xf32, #tpu.memory_space<smem>>
    %c60 = arith.constant 60 : index
    %60 = memref.load %arg1[%c60] : memref<297xf32, #tpu.memory_space<smem>>
    %c61 = arith.constant 61 : index
    %61 = memref.load %arg1[%c61] : memref<297xf32, #tpu.memory_space<smem>>
    %c62 = arith.constant 62 : index
    %62 = memref.load %arg1[%c62] : memref<297xf32, #tpu.memory_space<smem>>
    %c63 = arith.constant 63 : index
    %63 = memref.load %arg1[%c63] : memref<297xf32, #tpu.memory_space<smem>>
    %c64 = arith.constant 64 : index
    %64 = memref.load %arg1[%c64] : memref<297xf32, #tpu.memory_space<smem>>
    %c65 = arith.constant 65 : index
    %65 = memref.load %arg1[%c65] : memref<297xf32, #tpu.memory_space<smem>>
    %c66 = arith.constant 66 : index
    %66 = memref.load %arg1[%c66] : memref<297xf32, #tpu.memory_space<smem>>
    %c67 = arith.constant 67 : index
    %67 = memref.load %arg1[%c67] : memref<297xf32, #tpu.memory_space<smem>>
    %c68 = arith.constant 68 : index
    %68 = memref.load %arg1[%c68] : memref<297xf32, #tpu.memory_space<smem>>
    %c69 = arith.constant 69 : index
    %69 = memref.load %arg1[%c69] : memref<297xf32, #tpu.memory_space<smem>>
    %c70 = arith.constant 70 : index
    %70 = memref.load %arg1[%c70] : memref<297xf32, #tpu.memory_space<smem>>
    %c71 = arith.constant 71 : index
    %71 = memref.load %arg1[%c71] : memref<297xf32, #tpu.memory_space<smem>>
    %c72 = arith.constant 72 : index
    %72 = memref.load %arg1[%c72] : memref<297xf32, #tpu.memory_space<smem>>
    %c73 = arith.constant 73 : index
    %73 = memref.load %arg1[%c73] : memref<297xf32, #tpu.memory_space<smem>>
    %c74 = arith.constant 74 : index
    %74 = memref.load %arg1[%c74] : memref<297xf32, #tpu.memory_space<smem>>
    %c75 = arith.constant 75 : index
    %75 = memref.load %arg1[%c75] : memref<297xf32, #tpu.memory_space<smem>>
    %c76 = arith.constant 76 : index
    %76 = memref.load %arg1[%c76] : memref<297xf32, #tpu.memory_space<smem>>
    %c77 = arith.constant 77 : index
    %77 = memref.load %arg1[%c77] : memref<297xf32, #tpu.memory_space<smem>>
    %c78 = arith.constant 78 : index
    %78 = memref.load %arg1[%c78] : memref<297xf32, #tpu.memory_space<smem>>
    %c79 = arith.constant 79 : index
    %79 = memref.load %arg1[%c79] : memref<297xf32, #tpu.memory_space<smem>>
    %c80 = arith.constant 80 : index
    %80 = memref.load %arg1[%c80] : memref<297xf32, #tpu.memory_space<smem>>
    %c81 = arith.constant 81 : index
    %81 = memref.load %arg1[%c81] : memref<297xf32, #tpu.memory_space<smem>>
    %c82 = arith.constant 82 : index
    %82 = memref.load %arg1[%c82] : memref<297xf32, #tpu.memory_space<smem>>
    %c83 = arith.constant 83 : index
    %83 = memref.load %arg1[%c83] : memref<297xf32, #tpu.memory_space<smem>>
    %c84 = arith.constant 84 : index
    %84 = memref.load %arg1[%c84] : memref<297xf32, #tpu.memory_space<smem>>
    %c85 = arith.constant 85 : index
    %85 = memref.load %arg1[%c85] : memref<297xf32, #tpu.memory_space<smem>>
    %c86 = arith.constant 86 : index
    %86 = memref.load %arg1[%c86] : memref<297xf32, #tpu.memory_space<smem>>
    %c87 = arith.constant 87 : index
    %87 = memref.load %arg1[%c87] : memref<297xf32, #tpu.memory_space<smem>>
    %c88 = arith.constant 88 : index
    %88 = memref.load %arg1[%c88] : memref<297xf32, #tpu.memory_space<smem>>
    %c89 = arith.constant 89 : index
    %89 = memref.load %arg1[%c89] : memref<297xf32, #tpu.memory_space<smem>>
    %c90 = arith.constant 90 : index
    %90 = memref.load %arg1[%c90] : memref<297xf32, #tpu.memory_space<smem>>
    %c91 = arith.constant 91 : index
    %91 = memref.load %arg1[%c91] : memref<297xf32, #tpu.memory_space<smem>>
    %c92 = arith.constant 92 : index
    %92 = memref.load %arg1[%c92] : memref<297xf32, #tpu.memory_space<smem>>
    %c93 = arith.constant 93 : index
    %93 = memref.load %arg1[%c93] : memref<297xf32, #tpu.memory_space<smem>>
    %c94 = arith.constant 94 : index
    %94 = memref.load %arg1[%c94] : memref<297xf32, #tpu.memory_space<smem>>
    %c95 = arith.constant 95 : index
    %95 = memref.load %arg1[%c95] : memref<297xf32, #tpu.memory_space<smem>>
    %c96 = arith.constant 96 : index
    %96 = memref.load %arg1[%c96] : memref<297xf32, #tpu.memory_space<smem>>
    %c97 = arith.constant 97 : index
    %97 = memref.load %arg1[%c97] : memref<297xf32, #tpu.memory_space<smem>>
    %c98 = arith.constant 98 : index
    %98 = memref.load %arg1[%c98] : memref<297xf32, #tpu.memory_space<smem>>
    %c99 = arith.constant 99 : index
    %99 = memref.load %arg1[%c99] : memref<297xf32, #tpu.memory_space<smem>>
    %c100 = arith.constant 100 : index
    %100 = memref.load %arg1[%c100] : memref<297xf32, #tpu.memory_space<smem>>
    %c101 = arith.constant 101 : index
    %101 = memref.load %arg1[%c101] : memref<297xf32, #tpu.memory_space<smem>>
    %c102 = arith.constant 102 : index
    %102 = memref.load %arg1[%c102] : memref<297xf32, #tpu.memory_space<smem>>
    %c103 = arith.constant 103 : index
    %103 = memref.load %arg1[%c103] : memref<297xf32, #tpu.memory_space<smem>>
    %c104 = arith.constant 104 : index
    %104 = memref.load %arg1[%c104] : memref<297xf32, #tpu.memory_space<smem>>
    %c105 = arith.constant 105 : index
    %105 = memref.load %arg1[%c105] : memref<297xf32, #tpu.memory_space<smem>>
    %c106 = arith.constant 106 : index
    %106 = memref.load %arg1[%c106] : memref<297xf32, #tpu.memory_space<smem>>
    %c107 = arith.constant 107 : index
    %107 = memref.load %arg1[%c107] : memref<297xf32, #tpu.memory_space<smem>>
    %c108 = arith.constant 108 : index
    %108 = memref.load %arg1[%c108] : memref<297xf32, #tpu.memory_space<smem>>
    %c109 = arith.constant 109 : index
    %109 = memref.load %arg1[%c109] : memref<297xf32, #tpu.memory_space<smem>>
    %c110 = arith.constant 110 : index
    %110 = memref.load %arg1[%c110] : memref<297xf32, #tpu.memory_space<smem>>
    %c111 = arith.constant 111 : index
    %111 = memref.load %arg1[%c111] : memref<297xf32, #tpu.memory_space<smem>>
    %c112 = arith.constant 112 : index
    %112 = memref.load %arg1[%c112] : memref<297xf32, #tpu.memory_space<smem>>
    %c113 = arith.constant 113 : index
    %113 = memref.load %arg1[%c113] : memref<297xf32, #tpu.memory_space<smem>>
    %c114 = arith.constant 114 : index
    %114 = memref.load %arg1[%c114] : memref<297xf32, #tpu.memory_space<smem>>
    %c115 = arith.constant 115 : index
    %115 = memref.load %arg1[%c115] : memref<297xf32, #tpu.memory_space<smem>>
    %c116 = arith.constant 116 : index
    %116 = memref.load %arg1[%c116] : memref<297xf32, #tpu.memory_space<smem>>
    %c117 = arith.constant 117 : index
    %117 = memref.load %arg1[%c117] : memref<297xf32, #tpu.memory_space<smem>>
    %c118 = arith.constant 118 : index
    %118 = memref.load %arg1[%c118] : memref<297xf32, #tpu.memory_space<smem>>
    %c119 = arith.constant 119 : index
    %119 = memref.load %arg1[%c119] : memref<297xf32, #tpu.memory_space<smem>>
    %c120 = arith.constant 120 : index
    %120 = memref.load %arg1[%c120] : memref<297xf32, #tpu.memory_space<smem>>
    %c121 = arith.constant 121 : index
    %121 = memref.load %arg1[%c121] : memref<297xf32, #tpu.memory_space<smem>>
    %c122 = arith.constant 122 : index
    %122 = memref.load %arg1[%c122] : memref<297xf32, #tpu.memory_space<smem>>
    %c123 = arith.constant 123 : index
    %123 = memref.load %arg1[%c123] : memref<297xf32, #tpu.memory_space<smem>>
    %c124 = arith.constant 124 : index
    %124 = memref.load %arg1[%c124] : memref<297xf32, #tpu.memory_space<smem>>
    %c125 = arith.constant 125 : index
    %125 = memref.load %arg1[%c125] : memref<297xf32, #tpu.memory_space<smem>>
    %c126 = arith.constant 126 : index
    %126 = memref.load %arg1[%c126] : memref<297xf32, #tpu.memory_space<smem>>
    %c127 = arith.constant 127 : index
    %127 = memref.load %arg1[%c127] : memref<297xf32, #tpu.memory_space<smem>>
    %c128 = arith.constant 128 : index
    %128 = memref.load %arg1[%c128] : memref<297xf32, #tpu.memory_space<smem>>
    %c129 = arith.constant 129 : index
    %129 = memref.load %arg1[%c129] : memref<297xf32, #tpu.memory_space<smem>>
    %c130 = arith.constant 130 : index
    %130 = memref.load %arg1[%c130] : memref<297xf32, #tpu.memory_space<smem>>
    %c131 = arith.constant 131 : index
    %131 = memref.load %arg1[%c131] : memref<297xf32, #tpu.memory_space<smem>>
    %c132 = arith.constant 132 : index
    %132 = memref.load %arg1[%c132] : memref<297xf32, #tpu.memory_space<smem>>
    %c133 = arith.constant 133 : index
    %133 = memref.load %arg1[%c133] : memref<297xf32, #tpu.memory_space<smem>>
    %c134 = arith.constant 134 : index
    %134 = memref.load %arg1[%c134] : memref<297xf32, #tpu.memory_space<smem>>
    %c135 = arith.constant 135 : index
    %135 = memref.load %arg1[%c135] : memref<297xf32, #tpu.memory_space<smem>>
    %c136 = arith.constant 136 : index
    %136 = memref.load %arg1[%c136] : memref<297xf32, #tpu.memory_space<smem>>
    %c137 = arith.constant 137 : index
    %137 = memref.load %arg1[%c137] : memref<297xf32, #tpu.memory_space<smem>>
    %c138 = arith.constant 138 : index
    %138 = memref.load %arg1[%c138] : memref<297xf32, #tpu.memory_space<smem>>
    %c139 = arith.constant 139 : index
    %139 = memref.load %arg1[%c139] : memref<297xf32, #tpu.memory_space<smem>>
    %c140 = arith.constant 140 : index
    %140 = memref.load %arg1[%c140] : memref<297xf32, #tpu.memory_space<smem>>
    %c141 = arith.constant 141 : index
    %141 = memref.load %arg1[%c141] : memref<297xf32, #tpu.memory_space<smem>>
    %c142 = arith.constant 142 : index
    %142 = memref.load %arg1[%c142] : memref<297xf32, #tpu.memory_space<smem>>
    %c143 = arith.constant 143 : index
    %143 = memref.load %arg1[%c143] : memref<297xf32, #tpu.memory_space<smem>>
    %c144 = arith.constant 144 : index
    %144 = memref.load %arg1[%c144] : memref<297xf32, #tpu.memory_space<smem>>
    %c145 = arith.constant 145 : index
    %145 = memref.load %arg1[%c145] : memref<297xf32, #tpu.memory_space<smem>>
    %c146 = arith.constant 146 : index
    %146 = memref.load %arg1[%c146] : memref<297xf32, #tpu.memory_space<smem>>
    %c147 = arith.constant 147 : index
    %147 = memref.load %arg1[%c147] : memref<297xf32, #tpu.memory_space<smem>>
    %c148 = arith.constant 148 : index
    %148 = memref.load %arg1[%c148] : memref<297xf32, #tpu.memory_space<smem>>
    %c149 = arith.constant 149 : index
    %149 = memref.load %arg1[%c149] : memref<297xf32, #tpu.memory_space<smem>>
    %c150 = arith.constant 150 : index
    %150 = memref.load %arg1[%c150] : memref<297xf32, #tpu.memory_space<smem>>
    %c151 = arith.constant 151 : index
    %151 = memref.load %arg1[%c151] : memref<297xf32, #tpu.memory_space<smem>>
    %c152 = arith.constant 152 : index
    %152 = memref.load %arg1[%c152] : memref<297xf32, #tpu.memory_space<smem>>
    %c153 = arith.constant 153 : index
    %153 = memref.load %arg1[%c153] : memref<297xf32, #tpu.memory_space<smem>>
    %c154 = arith.constant 154 : index
    %154 = memref.load %arg1[%c154] : memref<297xf32, #tpu.memory_space<smem>>
    %c155 = arith.constant 155 : index
    %155 = memref.load %arg1[%c155] : memref<297xf32, #tpu.memory_space<smem>>
    %c156 = arith.constant 156 : index
    %156 = memref.load %arg1[%c156] : memref<297xf32, #tpu.memory_space<smem>>
    %c157 = arith.constant 157 : index
    %157 = memref.load %arg1[%c157] : memref<297xf32, #tpu.memory_space<smem>>
    %c158 = arith.constant 158 : index
    %158 = memref.load %arg1[%c158] : memref<297xf32, #tpu.memory_space<smem>>
    %c159 = arith.constant 159 : index
    %159 = memref.load %arg1[%c159] : memref<297xf32, #tpu.memory_space<smem>>
    %c160 = arith.constant 160 : index
    %160 = memref.load %arg1[%c160] : memref<297xf32, #tpu.memory_space<smem>>
    %c161 = arith.constant 161 : index
    %161 = memref.load %arg1[%c161] : memref<297xf32, #tpu.memory_space<smem>>
    %c162 = arith.constant 162 : index
    %162 = memref.load %arg1[%c162] : memref<297xf32, #tpu.memory_space<smem>>
    %c163 = arith.constant 163 : index
    %163 = memref.load %arg1[%c163] : memref<297xf32, #tpu.memory_space<smem>>
    %c164 = arith.constant 164 : index
    %164 = memref.load %arg1[%c164] : memref<297xf32, #tpu.memory_space<smem>>
    %c165 = arith.constant 165 : index
    %165 = memref.load %arg1[%c165] : memref<297xf32, #tpu.memory_space<smem>>
    %c166 = arith.constant 166 : index
    %166 = memref.load %arg1[%c166] : memref<297xf32, #tpu.memory_space<smem>>
    %c167 = arith.constant 167 : index
    %167 = memref.load %arg1[%c167] : memref<297xf32, #tpu.memory_space<smem>>
    %c168 = arith.constant 168 : index
    %168 = memref.load %arg1[%c168] : memref<297xf32, #tpu.memory_space<smem>>
    %c169 = arith.constant 169 : index
    %169 = memref.load %arg1[%c169] : memref<297xf32, #tpu.memory_space<smem>>
    %c170 = arith.constant 170 : index
    %170 = memref.load %arg1[%c170] : memref<297xf32, #tpu.memory_space<smem>>
    %c171 = arith.constant 171 : index
    %171 = memref.load %arg1[%c171] : memref<297xf32, #tpu.memory_space<smem>>
    %c172 = arith.constant 172 : index
    %172 = memref.load %arg1[%c172] : memref<297xf32, #tpu.memory_space<smem>>
    %c173 = arith.constant 173 : index
    %173 = memref.load %arg1[%c173] : memref<297xf32, #tpu.memory_space<smem>>
    %c174 = arith.constant 174 : index
    %174 = memref.load %arg1[%c174] : memref<297xf32, #tpu.memory_space<smem>>
    %c175 = arith.constant 175 : index
    %175 = memref.load %arg1[%c175] : memref<297xf32, #tpu.memory_space<smem>>
    %c176 = arith.constant 176 : index
    %176 = memref.load %arg1[%c176] : memref<297xf32, #tpu.memory_space<smem>>
    %c177 = arith.constant 177 : index
    %177 = memref.load %arg1[%c177] : memref<297xf32, #tpu.memory_space<smem>>
    %c178 = arith.constant 178 : index
    %178 = memref.load %arg1[%c178] : memref<297xf32, #tpu.memory_space<smem>>
    %c179 = arith.constant 179 : index
    %179 = memref.load %arg1[%c179] : memref<297xf32, #tpu.memory_space<smem>>
    %c180 = arith.constant 180 : index
    %180 = memref.load %arg1[%c180] : memref<297xf32, #tpu.memory_space<smem>>
    %c181 = arith.constant 181 : index
    %181 = memref.load %arg1[%c181] : memref<297xf32, #tpu.memory_space<smem>>
    %c182 = arith.constant 182 : index
    %182 = memref.load %arg1[%c182] : memref<297xf32, #tpu.memory_space<smem>>
    %c183 = arith.constant 183 : index
    %183 = memref.load %arg1[%c183] : memref<297xf32, #tpu.memory_space<smem>>
    %c184 = arith.constant 184 : index
    %184 = memref.load %arg1[%c184] : memref<297xf32, #tpu.memory_space<smem>>
    %c185 = arith.constant 185 : index
    %185 = memref.load %arg1[%c185] : memref<297xf32, #tpu.memory_space<smem>>
    %c186 = arith.constant 186 : index
    %186 = memref.load %arg1[%c186] : memref<297xf32, #tpu.memory_space<smem>>
    %c187 = arith.constant 187 : index
    %187 = memref.load %arg1[%c187] : memref<297xf32, #tpu.memory_space<smem>>
    %c188 = arith.constant 188 : index
    %188 = memref.load %arg1[%c188] : memref<297xf32, #tpu.memory_space<smem>>
    %c189 = arith.constant 189 : index
    %189 = memref.load %arg1[%c189] : memref<297xf32, #tpu.memory_space<smem>>
    %c190 = arith.constant 190 : index
    %190 = memref.load %arg1[%c190] : memref<297xf32, #tpu.memory_space<smem>>
    %c191 = arith.constant 191 : index
    %191 = memref.load %arg1[%c191] : memref<297xf32, #tpu.memory_space<smem>>
    %c192 = arith.constant 192 : index
    %192 = memref.load %arg1[%c192] : memref<297xf32, #tpu.memory_space<smem>>
    %c193 = arith.constant 193 : index
    %193 = memref.load %arg1[%c193] : memref<297xf32, #tpu.memory_space<smem>>
    %c194 = arith.constant 194 : index
    %194 = memref.load %arg1[%c194] : memref<297xf32, #tpu.memory_space<smem>>
    %c195 = arith.constant 195 : index
    %195 = memref.load %arg1[%c195] : memref<297xf32, #tpu.memory_space<smem>>
    %c196 = arith.constant 196 : index
    %196 = memref.load %arg1[%c196] : memref<297xf32, #tpu.memory_space<smem>>
    %c197 = arith.constant 197 : index
    %197 = memref.load %arg1[%c197] : memref<297xf32, #tpu.memory_space<smem>>
    %c198 = arith.constant 198 : index
    %198 = memref.load %arg1[%c198] : memref<297xf32, #tpu.memory_space<smem>>
    %c199 = arith.constant 199 : index
    %199 = memref.load %arg1[%c199] : memref<297xf32, #tpu.memory_space<smem>>
    %c200 = arith.constant 200 : index
    %200 = memref.load %arg1[%c200] : memref<297xf32, #tpu.memory_space<smem>>
    %c201 = arith.constant 201 : index
    %201 = memref.load %arg1[%c201] : memref<297xf32, #tpu.memory_space<smem>>
    %c202 = arith.constant 202 : index
    %202 = memref.load %arg1[%c202] : memref<297xf32, #tpu.memory_space<smem>>
    %c203 = arith.constant 203 : index
    %203 = memref.load %arg1[%c203] : memref<297xf32, #tpu.memory_space<smem>>
    %c204 = arith.constant 204 : index
    %204 = memref.load %arg1[%c204] : memref<297xf32, #tpu.memory_space<smem>>
    %c205 = arith.constant 205 : index
    %205 = memref.load %arg1[%c205] : memref<297xf32, #tpu.memory_space<smem>>
    %c206 = arith.constant 206 : index
    %206 = memref.load %arg1[%c206] : memref<297xf32, #tpu.memory_space<smem>>
    %c207 = arith.constant 207 : index
    %207 = memref.load %arg1[%c207] : memref<297xf32, #tpu.memory_space<smem>>
    %c208 = arith.constant 208 : index
    %208 = memref.load %arg1[%c208] : memref<297xf32, #tpu.memory_space<smem>>
    %c209 = arith.constant 209 : index
    %209 = memref.load %arg1[%c209] : memref<297xf32, #tpu.memory_space<smem>>
    %c210 = arith.constant 210 : index
    %210 = memref.load %arg1[%c210] : memref<297xf32, #tpu.memory_space<smem>>
    %c211 = arith.constant 211 : index
    %211 = memref.load %arg1[%c211] : memref<297xf32, #tpu.memory_space<smem>>
    %c212 = arith.constant 212 : index
    %212 = memref.load %arg1[%c212] : memref<297xf32, #tpu.memory_space<smem>>
    %c213 = arith.constant 213 : index
    %213 = memref.load %arg1[%c213] : memref<297xf32, #tpu.memory_space<smem>>
    %c214 = arith.constant 214 : index
    %214 = memref.load %arg1[%c214] : memref<297xf32, #tpu.memory_space<smem>>
    %c215 = arith.constant 215 : index
    %215 = memref.load %arg1[%c215] : memref<297xf32, #tpu.memory_space<smem>>
    %c216 = arith.constant 216 : index
    %216 = memref.load %arg1[%c216] : memref<297xf32, #tpu.memory_space<smem>>
    %c217 = arith.constant 217 : index
    %217 = memref.load %arg1[%c217] : memref<297xf32, #tpu.memory_space<smem>>
    %c218 = arith.constant 218 : index
    %218 = memref.load %arg1[%c218] : memref<297xf32, #tpu.memory_space<smem>>
    %c219 = arith.constant 219 : index
    %219 = memref.load %arg1[%c219] : memref<297xf32, #tpu.memory_space<smem>>
    %c220 = arith.constant 220 : index
    %220 = memref.load %arg1[%c220] : memref<297xf32, #tpu.memory_space<smem>>
    %c221 = arith.constant 221 : index
    %221 = memref.load %arg1[%c221] : memref<297xf32, #tpu.memory_space<smem>>
    %c222 = arith.constant 222 : index
    %222 = memref.load %arg1[%c222] : memref<297xf32, #tpu.memory_space<smem>>
    %c223 = arith.constant 223 : index
    %223 = memref.load %arg1[%c223] : memref<297xf32, #tpu.memory_space<smem>>
    %c224 = arith.constant 224 : index
    %224 = memref.load %arg1[%c224] : memref<297xf32, #tpu.memory_space<smem>>
    %c225 = arith.constant 225 : index
    %225 = memref.load %arg1[%c225] : memref<297xf32, #tpu.memory_space<smem>>
    %c226 = arith.constant 226 : index
    %226 = memref.load %arg1[%c226] : memref<297xf32, #tpu.memory_space<smem>>
    %c227 = arith.constant 227 : index
    %227 = memref.load %arg1[%c227] : memref<297xf32, #tpu.memory_space<smem>>
    %c228 = arith.constant 228 : index
    %228 = memref.load %arg1[%c228] : memref<297xf32, #tpu.memory_space<smem>>
    %c229 = arith.constant 229 : index
    %229 = memref.load %arg1[%c229] : memref<297xf32, #tpu.memory_space<smem>>
    %c230 = arith.constant 230 : index
    %230 = memref.load %arg1[%c230] : memref<297xf32, #tpu.memory_space<smem>>
    %c231 = arith.constant 231 : index
    %231 = memref.load %arg1[%c231] : memref<297xf32, #tpu.memory_space<smem>>
    %c232 = arith.constant 232 : index
    %232 = memref.load %arg1[%c232] : memref<297xf32, #tpu.memory_space<smem>>
    %c233 = arith.constant 233 : index
    %233 = memref.load %arg1[%c233] : memref<297xf32, #tpu.memory_space<smem>>
    %c234 = arith.constant 234 : index
    %234 = memref.load %arg1[%c234] : memref<297xf32, #tpu.memory_space<smem>>
    %c235 = arith.constant 235 : index
    %235 = memref.load %arg1[%c235] : memref<297xf32, #tpu.memory_space<smem>>
    %c236 = arith.constant 236 : index
    %236 = memref.load %arg1[%c236] : memref<297xf32, #tpu.memory_space<smem>>
    %c237 = arith.constant 237 : index
    %237 = memref.load %arg1[%c237] : memref<297xf32, #tpu.memory_space<smem>>
    %c238 = arith.constant 238 : index
    %238 = memref.load %arg1[%c238] : memref<297xf32, #tpu.memory_space<smem>>
    %c239 = arith.constant 239 : index
    %239 = memref.load %arg1[%c239] : memref<297xf32, #tpu.memory_space<smem>>
    %c240 = arith.constant 240 : index
    %240 = memref.load %arg1[%c240] : memref<297xf32, #tpu.memory_space<smem>>
    %c241 = arith.constant 241 : index
    %241 = memref.load %arg1[%c241] : memref<297xf32, #tpu.memory_space<smem>>
    %c242 = arith.constant 242 : index
    %242 = memref.load %arg1[%c242] : memref<297xf32, #tpu.memory_space<smem>>
    %c243 = arith.constant 243 : index
    %243 = memref.load %arg1[%c243] : memref<297xf32, #tpu.memory_space<smem>>
    %c244 = arith.constant 244 : index
    %244 = memref.load %arg1[%c244] : memref<297xf32, #tpu.memory_space<smem>>
    %c245 = arith.constant 245 : index
    %245 = memref.load %arg1[%c245] : memref<297xf32, #tpu.memory_space<smem>>
    %c246 = arith.constant 246 : index
    %246 = memref.load %arg1[%c246] : memref<297xf32, #tpu.memory_space<smem>>
    %c247 = arith.constant 247 : index
    %247 = memref.load %arg1[%c247] : memref<297xf32, #tpu.memory_space<smem>>
    %c248 = arith.constant 248 : index
    %248 = memref.load %arg1[%c248] : memref<297xf32, #tpu.memory_space<smem>>
    %c249 = arith.constant 249 : index
    %249 = memref.load %arg1[%c249] : memref<297xf32, #tpu.memory_space<smem>>
    %c250 = arith.constant 250 : index
    %250 = memref.load %arg1[%c250] : memref<297xf32, #tpu.memory_space<smem>>
    %c251 = arith.constant 251 : index
    %251 = memref.load %arg1[%c251] : memref<297xf32, #tpu.memory_space<smem>>
    %c252 = arith.constant 252 : index
    %252 = memref.load %arg1[%c252] : memref<297xf32, #tpu.memory_space<smem>>
    %c253 = arith.constant 253 : index
    %253 = memref.load %arg1[%c253] : memref<297xf32, #tpu.memory_space<smem>>
    %c254 = arith.constant 254 : index
    %254 = memref.load %arg1[%c254] : memref<297xf32, #tpu.memory_space<smem>>
    %c255 = arith.constant 255 : index
    %255 = memref.load %arg1[%c255] : memref<297xf32, #tpu.memory_space<smem>>
    %c256 = arith.constant 256 : index
    %256 = memref.load %arg1[%c256] : memref<297xf32, #tpu.memory_space<smem>>
    %c257 = arith.constant 257 : index
    %257 = memref.load %arg1[%c257] : memref<297xf32, #tpu.memory_space<smem>>
    %c258 = arith.constant 258 : index
    %258 = memref.load %arg1[%c258] : memref<297xf32, #tpu.memory_space<smem>>
    %c259 = arith.constant 259 : index
    %259 = memref.load %arg1[%c259] : memref<297xf32, #tpu.memory_space<smem>>
    %c260 = arith.constant 260 : index
    %260 = memref.load %arg1[%c260] : memref<297xf32, #tpu.memory_space<smem>>
    %c261 = arith.constant 261 : index
    %261 = memref.load %arg1[%c261] : memref<297xf32, #tpu.memory_space<smem>>
    %c262 = arith.constant 262 : index
    %262 = memref.load %arg1[%c262] : memref<297xf32, #tpu.memory_space<smem>>
    %c263 = arith.constant 263 : index
    %263 = memref.load %arg1[%c263] : memref<297xf32, #tpu.memory_space<smem>>
    %c264 = arith.constant 264 : index
    %264 = memref.load %arg1[%c264] : memref<297xf32, #tpu.memory_space<smem>>
    %c265 = arith.constant 265 : index
    %265 = memref.load %arg1[%c265] : memref<297xf32, #tpu.memory_space<smem>>
    %c266 = arith.constant 266 : index
    %266 = memref.load %arg1[%c266] : memref<297xf32, #tpu.memory_space<smem>>
    %c267 = arith.constant 267 : index
    %267 = memref.load %arg1[%c267] : memref<297xf32, #tpu.memory_space<smem>>
    %c268 = arith.constant 268 : index
    %268 = memref.load %arg1[%c268] : memref<297xf32, #tpu.memory_space<smem>>
    %c269 = arith.constant 269 : index
    %269 = memref.load %arg1[%c269] : memref<297xf32, #tpu.memory_space<smem>>
    %c270 = arith.constant 270 : index
    %270 = memref.load %arg1[%c270] : memref<297xf32, #tpu.memory_space<smem>>
    %c271 = arith.constant 271 : index
    %271 = memref.load %arg1[%c271] : memref<297xf32, #tpu.memory_space<smem>>
    %c272 = arith.constant 272 : index
    %272 = memref.load %arg1[%c272] : memref<297xf32, #tpu.memory_space<smem>>
    %c273 = arith.constant 273 : index
    %273 = memref.load %arg1[%c273] : memref<297xf32, #tpu.memory_space<smem>>
    %c274 = arith.constant 274 : index
    %274 = memref.load %arg1[%c274] : memref<297xf32, #tpu.memory_space<smem>>
    %c275 = arith.constant 275 : index
    %275 = memref.load %arg1[%c275] : memref<297xf32, #tpu.memory_space<smem>>
    %c276 = arith.constant 276 : index
    %276 = memref.load %arg1[%c276] : memref<297xf32, #tpu.memory_space<smem>>
    %c277 = arith.constant 277 : index
    %277 = memref.load %arg1[%c277] : memref<297xf32, #tpu.memory_space<smem>>
    %c278 = arith.constant 278 : index
    %278 = memref.load %arg1[%c278] : memref<297xf32, #tpu.memory_space<smem>>
    %c279 = arith.constant 279 : index
    %279 = memref.load %arg1[%c279] : memref<297xf32, #tpu.memory_space<smem>>
    %c280 = arith.constant 280 : index
    %280 = memref.load %arg1[%c280] : memref<297xf32, #tpu.memory_space<smem>>
    %c281 = arith.constant 281 : index
    %281 = memref.load %arg1[%c281] : memref<297xf32, #tpu.memory_space<smem>>
    %c282 = arith.constant 282 : index
    %282 = memref.load %arg1[%c282] : memref<297xf32, #tpu.memory_space<smem>>
    %c283 = arith.constant 283 : index
    %283 = memref.load %arg1[%c283] : memref<297xf32, #tpu.memory_space<smem>>
    %c284 = arith.constant 284 : index
    %284 = memref.load %arg1[%c284] : memref<297xf32, #tpu.memory_space<smem>>
    %c285 = arith.constant 285 : index
    %285 = memref.load %arg1[%c285] : memref<297xf32, #tpu.memory_space<smem>>
    %c286 = arith.constant 286 : index
    %286 = memref.load %arg1[%c286] : memref<297xf32, #tpu.memory_space<smem>>
    %c287 = arith.constant 287 : index
    %287 = memref.load %arg1[%c287] : memref<297xf32, #tpu.memory_space<smem>>
    %c288 = arith.constant 288 : index
    %288 = memref.load %arg1[%c288] : memref<297xf32, #tpu.memory_space<smem>>
    %c289 = arith.constant 289 : index
    %289 = memref.load %arg1[%c289] : memref<297xf32, #tpu.memory_space<smem>>
    %c290 = arith.constant 290 : index
    %290 = memref.load %arg1[%c290] : memref<297xf32, #tpu.memory_space<smem>>
    %c291 = arith.constant 291 : index
    %291 = memref.load %arg1[%c291] : memref<297xf32, #tpu.memory_space<smem>>
    %c292 = arith.constant 292 : index
    %292 = memref.load %arg1[%c292] : memref<297xf32, #tpu.memory_space<smem>>
    %c293 = arith.constant 293 : index
    %293 = memref.load %arg1[%c293] : memref<297xf32, #tpu.memory_space<smem>>
    %c294 = arith.constant 294 : index
    %294 = memref.load %arg1[%c294] : memref<297xf32, #tpu.memory_space<smem>>
    %c295 = arith.constant 295 : index
    %295 = memref.load %arg1[%c295] : memref<297xf32, #tpu.memory_space<smem>>
    %c296 = arith.constant 296 : index
    %296 = memref.load %arg1[%c296] : memref<297xf32, #tpu.memory_space<smem>>
    %cst = arith.constant 0.000000e+00 : f32
    %297 = vector.broadcast %cst : f32 to vector<2x3x22xf32>
    %cst_0 = arith.constant 0.000000e+00 : f32
    %298 = vector.broadcast %cst_0 : f32 to vector<2x22x3xf32>
    %c0_1 = arith.constant 0 : index
    %c0_2 = arith.constant 0 : index
    %c0_3 = arith.constant 0 : index
    %299 = vector.load %arg4[%c0_1, %c0_2, %c0_3] : memref<2x22x22xf32, #tpu.memory_space<vmem>>, vector<2x3x22xf32>
    tpu.vector_store %arg4[%c0_1, %c0_2, %c0_3], %297 {strides = array<i32>} : memref<2x22x22xf32, #tpu.memory_space<vmem>>, vector<2x3x22xf32>,
    %c0_4 = arith.constant 0 : index
    %c19_5 = arith.constant 19 : index
    %c0_6 = arith.constant 0 : index
    %300 = vector.load %arg4[%c0_4, %c19_5, %c0_6] : memref<2x22x22xf32, #tpu.memory_space<vmem>>, vector<2x3x22xf32>
    tpu.vector_store %arg4[%c0_4, %c19_5, %c0_6], %297 {strides = array<i32>} : memref<2x22x22xf32, #tpu.memory_space<vmem>>, vector<2x3x22xf32>,
    %c0_7 = arith.constant 0 : index
    %c0_8 = arith.constant 0 : index
    %c0_9 = arith.constant 0 : index
    %301 = vector.load %arg4[%c0_7, %c0_8, %c0_9] : memref<2x22x22xf32, #tpu.memory_space<vmem>>, vector<2x22x3xf32>
    tpu.vector_store %arg4[%c0_7, %c0_8, %c0_9], %298 {strides = array<i32>} : memref<2x22x22xf32, #tpu.memory_space<vmem>>, vector<2x22x3xf32>,
    %c0_10 = arith.constant 0 : index
    %c0_11 = arith.constant 0 : index
    %c19_12 = arith.constant 19 : index
    %302 = vector.load %arg4[%c0_10, %c0_11, %c19_12] : memref<2x22x22xf32, #tpu.memory_space<vmem>>, vector<2x22x3xf32>
    tpu.vector_store %arg4[%c0_10, %c0_11, %c19_12], %298 {strides = array<i32>} : memref<2x22x22xf32, #tpu.memory_space<vmem>>, vector<2x22x3xf32>,
    %cst_13 = arith.constant 0.000000e+00 : f32
    %303 = vector.broadcast %cst_13 : f32 to vector<2x3x22xf32>
    %cst_14 = arith.constant 0.000000e+00 : f32
    %304 = vector.broadcast %cst_14 : f32 to vector<2x10x3xf32>
    %c0_15 = arith.constant 0 : index
    %c0_16 = arith.constant 0 : index
    %c0_17 = arith.constant 0 : index
    %305 = vector.load %arg5[%c0_15, %c0_16, %c0_17] : memref<2x10x22xf32, #tpu.memory_space<vmem>>, vector<2x3x22xf32>
    tpu.vector_store %arg5[%c0_15, %c0_16, %c0_17], %303 {strides = array<i32>} : memref<2x10x22xf32, #tpu.memory_space<vmem>>, vector<2x3x22xf32>,
    %c0_18 = arith.constant 0 : index
    %c7_19 = arith.constant 7 : index
    %c0_20 = arith.constant 0 : index
    %306 = vector.load %arg5[%c0_18, %c7_19, %c0_20] : memref<2x10x22xf32, #tpu.memory_space<vmem>>, vector<2x3x22xf32>
    tpu.vector_store %arg5[%c0_18, %c7_19, %c0_20], %303 {strides = array<i32>} : memref<2x10x22xf32, #tpu.memory_space<vmem>>, vector<2x3x22xf32>,
    %c0_21 = arith.constant 0 : index
    %c0_22 = arith.constant 0 : index
    %c0_23 = arith.constant 0 : index
    %307 = vector.load %arg5[%c0_21, %c0_22, %c0_23] : memref<2x10x22xf32, #tpu.memory_space<vmem>>, vector<2x10x3xf32>
    tpu.vector_store %arg5[%c0_21, %c0_22, %c0_23], %304 {strides = array<i32>} : memref<2x10x22xf32, #tpu.memory_space<vmem>>, vector<2x10x3xf32>,
    %c0_24 = arith.constant 0 : index
    %c0_25 = arith.constant 0 : index
    %c19_26 = arith.constant 19 : index
    %308 = vector.load %arg5[%c0_24, %c0_25, %c19_26] : memref<2x10x22xf32, #tpu.memory_space<vmem>>, vector<2x10x3xf32>
    tpu.vector_store %arg5[%c0_24, %c0_25, %c19_26], %304 {strides = array<i32>} : memref<2x10x22xf32, #tpu.memory_space<vmem>>, vector<2x10x3xf32>,
    %cst_27 = arith.constant 0.000000e+00 : f32
    %309 = vector.broadcast %cst_27 : f32 to vector<2x3x22xf32>
    %cst_28 = arith.constant 0.000000e+00 : f32
    %310 = vector.broadcast %cst_28 : f32 to vector<2x10x3xf32>
    %c0_29 = arith.constant 0 : index
    %c0_30 = arith.constant 0 : index
    %c0_31 = arith.constant 0 : index
    %311 = vector.load %arg6[%c0_29, %c0_30, %c0_31] : memref<2x10x22xf32, #tpu.memory_space<vmem>>, vector<2x3x22xf32>
    tpu.vector_store %arg6[%c0_29, %c0_30, %c0_31], %309 {strides = array<i32>} : memref<2x10x22xf32, #tpu.memory_space<vmem>>, vector<2x3x22xf32>,
    %c0_32 = arith.constant 0 : index
    %c7_33 = arith.constant 7 : index
    %c0_34 = arith.constant 0 : index
    %312 = vector.load %arg6[%c0_32, %c7_33, %c0_34] : memref<2x10x22xf32, #tpu.memory_space<vmem>>, vector<2x3x22xf32>
    tpu.vector_store %arg6[%c0_32, %c7_33, %c0_34], %309 {strides = array<i32>} : memref<2x10x22xf32, #tpu.memory_space<vmem>>, vector<2x3x22xf32>,
    %c0_35 = arith.constant 0 : index
    %c0_36 = arith.constant 0 : index
    %c0_37 = arith.constant 0 : index
    %313 = vector.load %arg6[%c0_35, %c0_36, %c0_37] : memref<2x10x22xf32, #tpu.memory_space<vmem>>, vector<2x10x3xf32>
    tpu.vector_store %arg6[%c0_35, %c0_36, %c0_37], %310 {strides = array<i32>} : memref<2x10x22xf32, #tpu.memory_space<vmem>>, vector<2x10x3xf32>,
    %c0_38 = arith.constant 0 : index
    %c0_39 = arith.constant 0 : index
    %c19_40 = arith.constant 19 : index
    %314 = vector.load %arg6[%c0_38, %c0_39, %c19_40] : memref<2x10x22xf32, #tpu.memory_space<vmem>>, vector<2x10x3xf32>
    tpu.vector_store %arg6[%c0_38, %c0_39, %c19_40], %310 {strides = array<i32>} : memref<2x10x22xf32, #tpu.memory_space<vmem>>, vector<2x10x3xf32>,
    %c0_41 = arith.constant 0 : index
    %c0_42 = arith.constant 0 : index
    %c0_43 = arith.constant 0 : index
    %c0_44 = arith.constant 0 : index
    %315 = vector.load %arg2[%c0_41, %c0_42, %c0_43, %c0_44] : memref<1x4x16x16xf32, #tpu.memory_space<vmem>>, vector<1x4x16x16xf32>
    %316 = vector.shape_cast %315 : vector<1x4x16x16xf32> to vector<4x16x16xf32>
    %cst_45 = arith.constant dense<0xFF800000> : vector<16x16xf32>
    %317 = vector.multi_reduction <maximumf>, %316, %cst_45 [0] : vector<4x16x16xf32> to vector<16x16xf32>
    %c0_46 = arith.constant 0 : index
    %c3_47 = arith.constant 3 : index
    %c3_48 = arith.constant 3 : index
    %318 = vector.load %arg4[%c0_46, %c3_47, %c3_48] : memref<2x22x22xf32, #tpu.memory_space<vmem>>, vector<1x16x16xf32>
    %319 = vector.shape_cast %318 : vector<1x16x16xf32> to vector<16x16xf32>
    %320 = vector.shape_cast %317 : vector<16x16xf32> to vector<1x16x16xf32>
    tpu.vector_store %arg4[%c0_46, %c3_47, %c3_48], %320 {strides = array<i32>} : memref<2x22x22xf32, #tpu.memory_space<vmem>>, vector<1x16x16xf32>,
    %cst_49 = arith.constant dense<0.000000e+00> : vector<16x16xf32>
    %321 = vector.multi_reduction <add>, %316, %cst_49 [0] : vector<4x16x16xf32> to vector<16x16xf32>
    %cst_50 = arith.constant 4.000000e+00 : f32
    %322 = vector.broadcast %cst_50 : f32 to vector<16x16xf32>
    %323 = arith.divf %321, %322 : vector<16x16xf32>
    %c1_51 = arith.constant 1 : index
    %c3_52 = arith.constant 3 : index
    %c3_53 = arith.constant 3 : index
    %324 = vector.load %arg4[%c1_51, %c3_52, %c3_53] : memref<2x22x22xf32, #tpu.memory_space<vmem>>, vector<1x16x16xf32>
    %325 = vector.shape_cast %324 : vector<1x16x16xf32> to vector<16x16xf32>
    %326 = vector.shape_cast %323 : vector<16x16xf32> to vector<1x16x16xf32>
    tpu.vector_store %arg4[%c1_51, %c3_52, %c3_53], %326 {strides = array<i32>} : memref<2x22x22xf32, #tpu.memory_space<vmem>>, vector<1x16x16xf32>,
    %cst_54 = arith.constant dense<0xFF800000> : vector<4x16xf32>
    %327 = vector.multi_reduction <maximumf>, %316, %cst_54 [1] : vector<4x16x16xf32> to vector<4x16xf32>
    %c0_55 = arith.constant 0 : index
    %c3_56 = arith.constant 3 : index
    %c3_57 = arith.constant 3 : index
    %328 = vector.load %arg5[%c0_55, %c3_56, %c3_57] : memref<2x10x22xf32, #tpu.memory_space<vmem>>, vector<1x4x16xf32>
    %329 = vector.shape_cast %328 : vector<1x4x16xf32> to vector<4x16xf32>
    %330 = vector.shape_cast %327 : vector<4x16xf32> to vector<1x4x16xf32>
    tpu.vector_store %arg5[%c0_55, %c3_56, %c3_57], %330 {strides = array<i32>} : memref<2x10x22xf32, #tpu.memory_space<vmem>>, vector<1x4x16xf32>,
    %cst_58 = arith.constant dense<0.000000e+00> : vector<4x16xf32>
    %331 = vector.multi_reduction <add>, %316, %cst_58 [1] : vector<4x16x16xf32> to vector<4x16xf32>
    %cst_59 = arith.constant 1.600000e+01 : f32
    %332 = vector.broadcast %cst_59 : f32 to vector<4x16xf32>
    %333 = arith.divf %331, %332 : vector<4x16xf32>
    %c1_60 = arith.constant 1 : index
    %c3_61 = arith.constant 3 : index
    %c3_62 = arith.constant 3 : index
    %334 = vector.load %arg5[%c1_60, %c3_61, %c3_62] : memref<2x10x22xf32, #tpu.memory_space<vmem>>, vector<1x4x16xf32>
    %335 = vector.shape_cast %334 : vector<1x4x16xf32> to vector<4x16xf32>
    %336 = vector.shape_cast %333 : vector<4x16xf32> to vector<1x4x16xf32>
    tpu.vector_store %arg5[%c1_60, %c3_61, %c3_62], %336 {strides = array<i32>} : memref<2x10x22xf32, #tpu.memory_space<vmem>>, vector<1x4x16xf32>,
    %cst_63 = arith.constant dense<0xFF800000> : vector<4x16xf32>
    %337 = vector.multi_reduction <maximumf>, %316, %cst_63 [2] : vector<4x16x16xf32> to vector<4x16xf32>
    %c0_64 = arith.constant 0 : index
    %c3_65 = arith.constant 3 : index
    %c3_66 = arith.constant 3 : index
    %338 = vector.load %arg6[%c0_64, %c3_65, %c3_66] : memref<2x10x22xf32, #tpu.memory_space<vmem>>, vector<1x4x16xf32>
    %339 = vector.shape_cast %338 : vector<1x4x16xf32> to vector<4x16xf32>
    %340 = vector.shape_cast %337 : vector<4x16xf32> to vector<1x4x16xf32>
    tpu.vector_store %arg6[%c0_64, %c3_65, %c3_66], %340 {strides = array<i32>} : memref<2x10x22xf32, #tpu.memory_space<vmem>>, vector<1x4x16xf32>,
    %cst_67 = arith.constant dense<0.000000e+00> : vector<4x16xf32>
    %341 = vector.multi_reduction <add>, %316, %cst_67 [2] : vector<4x16x16xf32> to vector<4x16xf32>
    %cst_68 = arith.constant 1.600000e+01 : f32
    %342 = vector.broadcast %cst_68 : f32 to vector<4x16xf32>
    %343 = arith.divf %341, %342 : vector<4x16xf32>
    %c1_69 = arith.constant 1 : index
    %c3_70 = arith.constant 3 : index
    %c3_71 = arith.constant 3 : index
    %344 = vector.load %arg6[%c1_69, %c3_70, %c3_71] : memref<2x10x22xf32, #tpu.memory_space<vmem>>, vector<1x4x16xf32>
    %345 = vector.shape_cast %344 : vector<1x4x16xf32> to vector<4x16xf32>
    %346 = vector.shape_cast %343 : vector<4x16xf32> to vector<1x4x16xf32>
    tpu.vector_store %arg6[%c1_69, %c3_70, %c3_71], %346 {strides = array<i32>} : memref<2x10x22xf32, #tpu.memory_space<vmem>>, vector<1x4x16xf32>,
    %cst_72 = arith.constant 0.000000e+00 : f32
    %347 = vector.broadcast %cst_72 : f32 to vector<16x16xf32>
    %cst_73 = arith.constant 0.000000e+00 : f32
    %348 = vector.broadcast %cst_73 : f32 to vector<16x16xf32>
    %cst_74 = arith.constant 0.000000e+00 : f32
    %349 = vector.broadcast %cst_74 : f32 to vector<16x16xf32>
    %cst_75 = arith.constant 0.000000e+00 : f32
    %350 = vector.broadcast %cst_75 : f32 to vector<16x16xf32>
    %c0_76 = arith.constant 0 : index
    %c0_77 = arith.constant 0 : index
    %c0_78 = arith.constant 0 : index
    %351 = vector.load %arg4[%c0_76, %c0_77, %c0_78] : memref<2x22x22xf32, #tpu.memory_space<vmem>>, vector<1x22x16xf32>
    %352 = vector.shape_cast %351 : vector<1x22x16xf32> to vector<22x16xf32>
    %353 = vector.extract_strided_slice %352 {offsets = [0, 0], sizes = [16, 16], strides = [1, 1]} : vector<22x16xf32> to vector<16x16xf32>
    %354 = vector.broadcast %0 : f32 to vector<16x16xf32>
    %355 = arith.mulf %354, %353 : vector<16x16xf32>
    %356 = arith.addf %347, %355 : vector<16x16xf32>
    %357 = vector.extract_strided_slice %352 {offsets = [1, 0], sizes = [16, 16], strides = [1, 1]} : vector<22x16xf32> to vector<16x16xf32>
    %358 = vector.broadcast %7 : f32 to vector<16x16xf32>
    %359 = arith.mulf %358, %357 : vector<16x16xf32>
    %360 = arith.addf %348, %359 : vector<16x16xf32>
    %361 = vector.extract_strided_slice %352 {offsets = [2, 0], sizes = [16, 16], strides = [1, 1]} : vector<22x16xf32> to vector<16x16xf32>
    %362 = vector.broadcast %14 : f32 to vector<16x16xf32>
    %363 = arith.mulf %362, %361 : vector<16x16xf32>
    %364 = arith.addf %349, %363 : vector<16x16xf32>
    %365 = vector.extract_strided_slice %352 {offsets = [3, 0], sizes = [16, 16], strides = [1, 1]} : vector<22x16xf32> to vector<16x16xf32>
    %366 = vector.broadcast %21 : f32 to vector<16x16xf32>
    %367 = arith.mulf %366, %365 : vector<16x16xf32>
    %368 = arith.addf %350, %367 : vector<16x16xf32>
    %369 = vector.extract_strided_slice %352 {offsets = [4, 0], sizes = [16, 16], strides = [1, 1]} : vector<22x16xf32> to vector<16x16xf32>
    %370 = vector.broadcast %28 : f32 to vector<16x16xf32>
    %371 = arith.mulf %370, %369 : vector<16x16xf32>
    %372 = arith.addf %356, %371 : vector<16x16xf32>
    %373 = vector.extract_strided_slice %352 {offsets = [5, 0], sizes = [16, 16], strides = [1, 1]} : vector<22x16xf32> to vector<16x16xf32>
    %374 = vector.broadcast %35 : f32 to vector<16x16xf32>
    %375 = arith.mulf %374, %373 : vector<16x16xf32>
    %376 = arith.addf %360, %375 : vector<16x16xf32>
    %377 = vector.extract_strided_slice %352 {offsets = [6, 0], sizes = [16, 16], strides = [1, 1]} : vector<22x16xf32> to vector<16x16xf32>
    %378 = vector.broadcast %42 : f32 to vector<16x16xf32>
    %379 = arith.mulf %378, %377 : vector<16x16xf32>
    %380 = arith.addf %364, %379 : vector<16x16xf32>
    %c0_79 = arith.constant 0 : index
    %c0_80 = arith.constant 0 : index
    %c1_81 = arith.constant 1 : index
    %381 = vector.load %arg4[%c0_79, %c0_80, %c1_81] : memref<2x22x22xf32, #tpu.memory_space<vmem>>, vector<1x22x16xf32>
    %382 = vector.shape_cast %381 : vector<1x22x16xf32> to vector<22x16xf32>
    %383 = vector.extract_strided_slice %382 {offsets = [0, 0], sizes = [16, 16], strides = [1, 1]} : vector<22x16xf32> to vector<16x16xf32>
    %384 = vector.broadcast %1 : f32 to vector<16x16xf32>
    %385 = arith.mulf %384, %383 : vector<16x16xf32>
    %386 = arith.addf %368, %385 : vector<16x16xf32>
    %387 = vector.extract_strided_slice %382 {offsets = [1, 0], sizes = [16, 16], strides = [1, 1]} : vector<22x16xf32> to vector<16x16xf32>
    %388 = vector.broadcast %8 : f32 to vector<16x16xf32>
    %389 = arith.mulf %388, %387 : vector<16x16xf32>
    %390 = arith.addf %372, %389 : vector<16x16xf32>
    %391 = vector.extract_strided_slice %382 {offsets = [2, 0], sizes = [16, 16], strides = [1, 1]} : vector<22x16xf32> to vector<16x16xf32>
    %392 = vector.broadcast %15 : f32 to vector<16x16xf32>
    %393 = arith.mulf %392, %391 : vector<16x16xf32>
    %394 = arith.addf %376, %393 : vector<16x16xf32>
    %395 = vector.extract_strided_slice %382 {offsets = [3, 0], sizes = [16, 16], strides = [1, 1]} : vector<22x16xf32> to vector<16x16xf32>
    %396 = vector.broadcast %22 : f32 to vector<16x16xf32>
    %397 = arith.mulf %396, %395 : vector<16x16xf32>
    %398 = arith.addf %380, %397 : vector<16x16xf32>
    %399 = vector.extract_strided_slice %382 {offsets = [4, 0], sizes = [16, 16], strides = [1, 1]} : vector<22x16xf32> to vector<16x16xf32>
    %400 = vector.broadcast %29 : f32 to vector<16x16xf32>
    %401 = arith.mulf %400, %399 : vector<16x16xf32>
    %402 = arith.addf %386, %401 : vector<16x16xf32>
    %403 = vector.extract_strided_slice %382 {offsets = [5, 0], sizes = [16, 16], strides = [1, 1]} : vector<22x16xf32> to vector<16x16xf32>
    %404 = vector.broadcast %36 : f32 to vector<16x16xf32>
    %405 = arith.mulf %404, %403 : vector<16x16xf32>
    %406 = arith.addf %390, %405 : vector<16x16xf32>
    %407 = vector.extract_strided_slice %382 {offsets = [6, 0], sizes = [16, 16], strides = [1, 1]} : vector<22x16xf32> to vector<16x16xf32>
    %408 = vector.broadcast %43 : f32 to vector<16x16xf32>
    %409 = arith.mulf %408, %407 : vector<16x16xf32>
    %410 = arith.addf %394, %409 : vector<16x16xf32>
    %c0_82 = arith.constant 0 : index
    %c0_83 = arith.constant 0 : index
    %c2_84 = arith.constant 2 : index
    %411 = vector.load %arg4[%c0_82, %c0_83, %c2_84] : memref<2x22x22xf32, #tpu.memory_space<vmem>>, vector<1x22x16xf32>
    %412 = vector.shape_cast %411 : vector<1x22x16xf32> to vector<22x16xf32>
    %413 = vector.extract_strided_slice %412 {offsets = [0, 0], sizes = [16, 16], strides = [1, 1]} : vector<22x16xf32> to vector<16x16xf32>
    %414 = vector.broadcast %2 : f32 to vector<16x16xf32>
    %415 = arith.mulf %414, %413 : vector<16x16xf32>
    %416 = arith.addf %398, %415 : vector<16x16xf32>
    %417 = vector.extract_strided_slice %412 {offsets = [1, 0], sizes = [16, 16], strides = [1, 1]} : vector<22x16xf32> to vector<16x16xf32>
    %418 = vector.broadcast %9 : f32 to vector<16x16xf32>
    %419 = arith.mulf %418, %417 : vector<16x16xf32>
    %420 = arith.addf %402, %419 : vector<16x16xf32>
    %421 = vector.extract_strided_slice %412 {offsets = [2, 0], sizes = [16, 16], strides = [1, 1]} : vector<22x16xf32> to vector<16x16xf32>
    %422 = vector.broadcast %16 : f32 to vector<16x16xf32>
    %423 = arith.mulf %422, %421 : vector<16x16xf32>
    %424 = arith.addf %406, %423 : vector<16x16xf32>
    %425 = vector.extract_strided_slice %412 {offsets = [3, 0], sizes = [16, 16], strides = [1, 1]} : vector<22x16xf32> to vector<16x16xf32>
    %426 = vector.broadcast %23 : f32 to vector<16x16xf32>
    %427 = arith.mulf %426, %425 : vector<16x16xf32>
    %428 = arith.addf %410, %427 : vector<16x16xf32>
    %429 = vector.extract_strided_slice %412 {offsets = [4, 0], sizes = [16, 16], strides = [1, 1]} : vector<22x16xf32> to vector<16x16xf32>
    %430 = vector.broadcast %30 : f32 to vector<16x16xf32>
    %431 = arith.mulf %430, %429 : vector<16x16xf32>
    %432 = arith.addf %416, %431 : vector<16x16xf32>
    %433 = vector.extract_strided_slice %412 {offsets = [5, 0], sizes = [16, 16], strides = [1, 1]} : vector<22x16xf32> to vector<16x16xf32>
    %434 = vector.broadcast %37 : f32 to vector<16x16xf32>
    %435 = arith.mulf %434, %433 : vector<16x16xf32>
    %436 = arith.addf %420, %435 : vector<16x16xf32>
    %437 = vector.extract_strided_slice %412 {offsets = [6, 0], sizes = [16, 16], strides = [1, 1]} : vector<22x16xf32> to vector<16x16xf32>
    %438 = vector.broadcast %44 : f32 to vector<16x16xf32>
    %439 = arith.mulf %438, %437 : vector<16x16xf32>
    %440 = arith.addf %424, %439 : vector<16x16xf32>
    %c0_85 = arith.constant 0 : index
    %c0_86 = arith.constant 0 : index
    %c3_87 = arith.constant 3 : index
    %441 = vector.load %arg4[%c0_85, %c0_86, %c3_87] : memref<2x22x22xf32, #tpu.memory_space<vmem>>, vector<1x22x16xf32>
    %442 = vector.shape_cast %441 : vector<1x22x16xf32> to vector<22x16xf32>
    %443 = vector.extract_strided_slice %442 {offsets = [0, 0], sizes = [16, 16], strides = [1, 1]} : vector<22x16xf32> to vector<16x16xf32>
    %444 = vector.broadcast %3 : f32 to vector<16x16xf32>
    %445 = arith.mulf %444, %443 : vector<16x16xf32>
    %446 = arith.addf %428, %445 : vector<16x16xf32>
    %447 = vector.extract_strided_slice %442 {offsets = [1, 0], sizes = [16, 16], strides = [1, 1]} : vector<22x16xf32> to vector<16x16xf32>
    %448 = vector.broadcast %10 : f32 to vector<16x16xf32>
    %449 = arith.mulf %448, %447 : vector<16x16xf32>
    %450 = arith.addf %432, %449 : vector<16x16xf32>
    %451 = vector.extract_strided_slice %442 {offsets = [2, 0], sizes = [16, 16], strides = [1, 1]} : vector<22x16xf32> to vector<16x16xf32>
    %452 = vector.broadcast %17 : f32 to vector<16x16xf32>
    %453 = arith.mulf %452, %451 : vector<16x16xf32>
    %454 = arith.addf %436, %453 : vector<16x16xf32>
    %455 = vector.extract_strided_slice %442 {offsets = [3, 0], sizes = [16, 16], strides = [1, 1]} : vector<22x16xf32> to vector<16x16xf32>
    %456 = vector.broadcast %24 : f32 to vector<16x16xf32>
    %457 = arith.mulf %456, %455 : vector<16x16xf32>
    %458 = arith.addf %440, %457 : vector<16x16xf32>
    %459 = vector.extract_strided_slice %442 {offsets = [4, 0], sizes = [16, 16], strides = [1, 1]} : vector<22x16xf32> to vector<16x16xf32>
    %460 = vector.broadcast %31 : f32 to vector<16x16xf32>
    %461 = arith.mulf %460, %459 : vector<16x16xf32>
    %462 = arith.addf %446, %461 : vector<16x16xf32>
    %463 = vector.extract_strided_slice %442 {offsets = [5, 0], sizes = [16, 16], strides = [1, 1]} : vector<22x16xf32> to vector<16x16xf32>
    %464 = vector.broadcast %38 : f32 to vector<16x16xf32>
    %465 = arith.mulf %464, %463 : vector<16x16xf32>
    %466 = arith.addf %450, %465 : vector<16x16xf32>
    %467 = vector.extract_strided_slice %442 {offsets = [6, 0], sizes = [16, 16], strides = [1, 1]} : vector<22x16xf32> to vector<16x16xf32>
    %468 = vector.broadcast %45 : f32 to vector<16x16xf32>
    %469 = arith.mulf %468, %467 : vector<16x16xf32>
    %470 = arith.addf %454, %469 : vector<16x16xf32>
    %c0_88 = arith.constant 0 : index
    %c0_89 = arith.constant 0 : index
    %c4_90 = arith.constant 4 : index
    %471 = vector.load %arg4[%c0_88, %c0_89, %c4_90] : memref<2x22x22xf32, #tpu.memory_space<vmem>>, vector<1x22x16xf32>
    %472 = vector.shape_cast %471 : vector<1x22x16xf32> to vector<22x16xf32>
    %473 = vector.extract_strided_slice %472 {offsets = [0, 0], sizes = [16, 16], strides = [1, 1]} : vector<22x16xf32> to vector<16x16xf32>
    %474 = vector.broadcast %4 : f32 to vector<16x16xf32>
    %475 = arith.mulf %474, %473 : vector<16x16xf32>
    %476 = arith.addf %458, %475 : vector<16x16xf32>
    %477 = vector.extract_strided_slice %472 {offsets = [1, 0], sizes = [16, 16], strides = [1, 1]} : vector<22x16xf32> to vector<16x16xf32>
    %478 = vector.broadcast %11 : f32 to vector<16x16xf32>
    %479 = arith.mulf %478, %477 : vector<16x16xf32>
    %480 = arith.addf %462, %479 : vector<16x16xf32>
    %481 = vector.extract_strided_slice %472 {offsets = [2, 0], sizes = [16, 16], strides = [1, 1]} : vector<22x16xf32> to vector<16x16xf32>
    %482 = vector.broadcast %18 : f32 to vector<16x16xf32>
    %483 = arith.mulf %482, %481 : vector<16x16xf32>
    %484 = arith.addf %466, %483 : vector<16x16xf32>
    %485 = vector.extract_strided_slice %472 {offsets = [3, 0], sizes = [16, 16], strides = [1, 1]} : vector<22x16xf32> to vector<16x16xf32>
    %486 = vector.broadcast %25 : f32 to vector<16x16xf32>
    %487 = arith.mulf %486, %485 : vector<16x16xf32>
    %488 = arith.addf %470, %487 : vector<16x16xf32>
    %489 = vector.extract_strided_slice %472 {offsets = [4, 0], sizes = [16, 16], strides = [1, 1]} : vector<22x16xf32> to vector<16x16xf32>
    %490 = vector.broadcast %32 : f32 to vector<16x16xf32>
    %491 = arith.mulf %490, %489 : vector<16x16xf32>
    %492 = arith.addf %476, %491 : vector<16x16xf32>
    %493 = vector.extract_strided_slice %472 {offsets = [5, 0], sizes = [16, 16], strides = [1, 1]} : vector<22x16xf32> to vector<16x16xf32>
    %494 = vector.broadcast %39 : f32 to vector<16x16xf32>
    %495 = arith.mulf %494, %493 : vector<16x16xf32>
    %496 = arith.addf %480, %495 : vector<16x16xf32>
    %497 = vector.extract_strided_slice %472 {offsets = [6, 0], sizes = [16, 16], strides = [1, 1]} : vector<22x16xf32> to vector<16x16xf32>
    %498 = vector.broadcast %46 : f32 to vector<16x16xf32>
    %499 = arith.mulf %498, %497 : vector<16x16xf32>
    %500 = arith.addf %484, %499 : vector<16x16xf32>
    %c0_91 = arith.constant 0 : index
    %c0_92 = arith.constant 0 : index
    %c5_93 = arith.constant 5 : index
    %501 = vector.load %arg4[%c0_91, %c0_92, %c5_93] : memref<2x22x22xf32, #tpu.memory_space<vmem>>, vector<1x22x16xf32>
    %502 = vector.shape_cast %501 : vector<1x22x16xf32> to vector<22x16xf32>
    %503 = vector.extract_strided_slice %502 {offsets = [0, 0], sizes = [16, 16], strides = [1, 1]} : vector<22x16xf32> to vector<16x16xf32>
    %504 = vector.broadcast %5 : f32 to vector<16x16xf32>
    %505 = arith.mulf %504, %503 : vector<16x16xf32>
    %506 = arith.addf %488, %505 : vector<16x16xf32>
    %507 = vector.extract_strided_slice %502 {offsets = [1, 0], sizes = [16, 16], strides = [1, 1]} : vector<22x16xf32> to vector<16x16xf32>
    %508 = vector.broadcast %12 : f32 to vector<16x16xf32>
    %509 = arith.mulf %508, %507 : vector<16x16xf32>
    %510 = arith.addf %492, %509 : vector<16x16xf32>
    %511 = vector.extract_strided_slice %502 {offsets = [2, 0], sizes = [16, 16], strides = [1, 1]} : vector<22x16xf32> to vector<16x16xf32>
    %512 = vector.broadcast %19 : f32 to vector<16x16xf32>
    %513 = arith.mulf %512, %511 : vector<16x16xf32>
    %514 = arith.addf %496, %513 : vector<16x16xf32>
    %515 = vector.extract_strided_slice %502 {offsets = [3, 0], sizes = [16, 16], strides = [1, 1]} : vector<22x16xf32> to vector<16x16xf32>
    %516 = vector.broadcast %26 : f32 to vector<16x16xf32>
    %517 = arith.mulf %516, %515 : vector<16x16xf32>
    %518 = arith.addf %500, %517 : vector<16x16xf32>
    %519 = vector.extract_strided_slice %502 {offsets = [4, 0], sizes = [16, 16], strides = [1, 1]} : vector<22x16xf32> to vector<16x16xf32>
    %520 = vector.broadcast %33 : f32 to vector<16x16xf32>
    %521 = arith.mulf %520, %519 : vector<16x16xf32>
    %522 = arith.addf %506, %521 : vector<16x16xf32>
    %523 = vector.extract_strided_slice %502 {offsets = [5, 0], sizes = [16, 16], strides = [1, 1]} : vector<22x16xf32> to vector<16x16xf32>
    %524 = vector.broadcast %40 : f32 to vector<16x16xf32>
    %525 = arith.mulf %524, %523 : vector<16x16xf32>
    %526 = arith.addf %510, %525 : vector<16x16xf32>
    %527 = vector.extract_strided_slice %502 {offsets = [6, 0], sizes = [16, 16], strides = [1, 1]} : vector<22x16xf32> to vector<16x16xf32>
    %528 = vector.broadcast %47 : f32 to vector<16x16xf32>
    %529 = arith.mulf %528, %527 : vector<16x16xf32>
    %530 = arith.addf %514, %529 : vector<16x16xf32>
    %c0_94 = arith.constant 0 : index
    %c0_95 = arith.constant 0 : index
    %c6_96 = arith.constant 6 : index
    %531 = vector.load %arg4[%c0_94, %c0_95, %c6_96] : memref<2x22x22xf32, #tpu.memory_space<vmem>>, vector<1x22x16xf32>
    %532 = vector.shape_cast %531 : vector<1x22x16xf32> to vector<22x16xf32>
    %533 = vector.extract_strided_slice %532 {offsets = [0, 0], sizes = [16, 16], strides = [1, 1]} : vector<22x16xf32> to vector<16x16xf32>
    %534 = vector.broadcast %6 : f32 to vector<16x16xf32>
    %535 = arith.mulf %534, %533 : vector<16x16xf32>
    %536 = arith.addf %518, %535 : vector<16x16xf32>
    %537 = vector.extract_strided_slice %532 {offsets = [1, 0], sizes = [16, 16], strides = [1, 1]} : vector<22x16xf32> to vector<16x16xf32>
    %538 = vector.broadcast %13 : f32 to vector<16x16xf32>
    %539 = arith.mulf %538, %537 : vector<16x16xf32>
    %540 = arith.addf %522, %539 : vector<16x16xf32>
    %541 = vector.extract_strided_slice %532 {offsets = [2, 0], sizes = [16, 16], strides = [1, 1]} : vector<22x16xf32> to vector<16x16xf32>
    %542 = vector.broadcast %20 : f32 to vector<16x16xf32>
    %543 = arith.mulf %542, %541 : vector<16x16xf32>
    %544 = arith.addf %526, %543 : vector<16x16xf32>
    %545 = vector.extract_strided_slice %532 {offsets = [3, 0], sizes = [16, 16], strides = [1, 1]} : vector<22x16xf32> to vector<16x16xf32>
    %546 = vector.broadcast %27 : f32 to vector<16x16xf32>
    %547 = arith.mulf %546, %545 : vector<16x16xf32>
    %548 = arith.addf %530, %547 : vector<16x16xf32>
    %549 = vector.extract_strided_slice %532 {offsets = [4, 0], sizes = [16, 16], strides = [1, 1]} : vector<22x16xf32> to vector<16x16xf32>
    %550 = vector.broadcast %34 : f32 to vector<16x16xf32>
    %551 = arith.mulf %550, %549 : vector<16x16xf32>
    %552 = arith.addf %536, %551 : vector<16x16xf32>
    %553 = vector.extract_strided_slice %532 {offsets = [5, 0], sizes = [16, 16], strides = [1, 1]} : vector<22x16xf32> to vector<16x16xf32>
    %554 = vector.broadcast %41 : f32 to vector<16x16xf32>
    %555 = arith.mulf %554, %553 : vector<16x16xf32>
    %556 = arith.addf %540, %555 : vector<16x16xf32>
    %557 = vector.extract_strided_slice %532 {offsets = [6, 0], sizes = [16, 16], strides = [1, 1]} : vector<22x16xf32> to vector<16x16xf32>
    %558 = vector.broadcast %48 : f32 to vector<16x16xf32>
    %559 = arith.mulf %558, %557 : vector<16x16xf32>
    %560 = arith.addf %544, %559 : vector<16x16xf32>
    %c1_97 = arith.constant 1 : index
    %c0_98 = arith.constant 0 : index
    %c0_99 = arith.constant 0 : index
    %561 = vector.load %arg4[%c1_97, %c0_98, %c0_99] : memref<2x22x22xf32, #tpu.memory_space<vmem>>, vector<1x22x16xf32>
    %562 = vector.shape_cast %561 : vector<1x22x16xf32> to vector<22x16xf32>
    %563 = vector.extract_strided_slice %562 {offsets = [0, 0], sizes = [16, 16], strides = [1, 1]} : vector<22x16xf32> to vector<16x16xf32>
    %564 = vector.broadcast %49 : f32 to vector<16x16xf32>
    %565 = arith.mulf %564, %563 : vector<16x16xf32>
    %566 = arith.addf %548, %565 : vector<16x16xf32>
    %567 = vector.extract_strided_slice %562 {offsets = [1, 0], sizes = [16, 16], strides = [1, 1]} : vector<22x16xf32> to vector<16x16xf32>
    %568 = vector.broadcast %56 : f32 to vector<16x16xf32>
    %569 = arith.mulf %568, %567 : vector<16x16xf32>
    %570 = arith.addf %552, %569 : vector<16x16xf32>
    %571 = vector.extract_strided_slice %562 {offsets = [2, 0], sizes = [16, 16], strides = [1, 1]} : vector<22x16xf32> to vector<16x16xf32>
    %572 = vector.broadcast %63 : f32 to vector<16x16xf32>
    %573 = arith.mulf %572, %571 : vector<16x16xf32>
    %574 = arith.addf %556, %573 : vector<16x16xf32>
    %575 = vector.extract_strided_slice %562 {offsets = [3, 0], sizes = [16, 16], strides = [1, 1]} : vector<22x16xf32> to vector<16x16xf32>
    %576 = vector.broadcast %70 : f32 to vector<16x16xf32>
    %577 = arith.mulf %576, %575 : vector<16x16xf32>
    %578 = arith.addf %560, %577 : vector<16x16xf32>
    %579 = vector.extract_strided_slice %562 {offsets = [4, 0], sizes = [16, 16], strides = [1, 1]} : vector<22x16xf32> to vector<16x16xf32>
    %580 = vector.broadcast %77 : f32 to vector<16x16xf32>
    %581 = arith.mulf %580, %579 : vector<16x16xf32>
    %582 = arith.addf %566, %581 : vector<16x16xf32>
    %583 = vector.extract_strided_slice %562 {offsets = [5, 0], sizes = [16, 16], strides = [1, 1]} : vector<22x16xf32> to vector<16x16xf32>
    %584 = vector.broadcast %84 : f32 to vector<16x16xf32>
    %585 = arith.mulf %584, %583 : vector<16x16xf32>
    %586 = arith.addf %570, %585 : vector<16x16xf32>
    %587 = vector.extract_strided_slice %562 {offsets = [6, 0], sizes = [16, 16], strides = [1, 1]} : vector<22x16xf32> to vector<16x16xf32>
    %588 = vector.broadcast %91 : f32 to vector<16x16xf32>
    %589 = arith.mulf %588, %587 : vector<16x16xf32>
    %590 = arith.addf %574, %589 : vector<16x16xf32>
    %c1_100 = arith.constant 1 : index
    %c0_101 = arith.constant 0 : index
    %c1_102 = arith.constant 1 : index
    %591 = vector.load %arg4[%c1_100, %c0_101, %c1_102] : memref<2x22x22xf32, #tpu.memory_space<vmem>>, vector<1x22x16xf32>
    %592 = vector.shape_cast %591 : vector<1x22x16xf32> to vector<22x16xf32>
    %593 = vector.extract_strided_slice %592 {offsets = [0, 0], sizes = [16, 16], strides = [1, 1]} : vector<22x16xf32> to vector<16x16xf32>
    %594 = vector.broadcast %50 : f32 to vector<16x16xf32>
    %595 = arith.mulf %594, %593 : vector<16x16xf32>
    %596 = arith.addf %578, %595 : vector<16x16xf32>
    %597 = vector.extract_strided_slice %592 {offsets = [1, 0], sizes = [16, 16], strides = [1, 1]} : vector<22x16xf32> to vector<16x16xf32>
    %598 = vector.broadcast %57 : f32 to vector<16x16xf32>
    %599 = arith.mulf %598, %597 : vector<16x16xf32>
    %600 = arith.addf %582, %599 : vector<16x16xf32>
    %601 = vector.extract_strided_slice %592 {offsets = [2, 0], sizes = [16, 16], strides = [1, 1]} : vector<22x16xf32> to vector<16x16xf32>
    %602 = vector.broadcast %64 : f32 to vector<16x16xf32>
    %603 = arith.mulf %602, %601 : vector<16x16xf32>
    %604 = arith.addf %586, %603 : vector<16x16xf32>
    %605 = vector.extract_strided_slice %592 {offsets = [3, 0], sizes = [16, 16], strides = [1, 1]} : vector<22x16xf32> to vector<16x16xf32>
    %606 = vector.broadcast %71 : f32 to vector<16x16xf32>
    %607 = arith.mulf %606, %605 : vector<16x16xf32>
    %608 = arith.addf %590, %607 : vector<16x16xf32>
    %609 = vector.extract_strided_slice %592 {offsets = [4, 0], sizes = [16, 16], strides = [1, 1]} : vector<22x16xf32> to vector<16x16xf32>
    %610 = vector.broadcast %78 : f32 to vector<16x16xf32>
    %611 = arith.mulf %610, %609 : vector<16x16xf32>
    %612 = arith.addf %596, %611 : vector<16x16xf32>
    %613 = vector.extract_strided_slice %592 {offsets = [5, 0], sizes = [16, 16], strides = [1, 1]} : vector<22x16xf32> to vector<16x16xf32>
    %614 = vector.broadcast %85 : f32 to vector<16x16xf32>
    %615 = arith.mulf %614, %613 : vector<16x16xf32>
    %616 = arith.addf %600, %615 : vector<16x16xf32>
    %617 = vector.extract_strided_slice %592 {offsets = [6, 0], sizes = [16, 16], strides = [1, 1]} : vector<22x16xf32> to vector<16x16xf32>
    %618 = vector.broadcast %92 : f32 to vector<16x16xf32>
    %619 = arith.mulf %618, %617 : vector<16x16xf32>
    %620 = arith.addf %604, %619 : vector<16x16xf32>
    %c1_103 = arith.constant 1 : index
    %c0_104 = arith.constant 0 : index
    %c2_105 = arith.constant 2 : index
    %621 = vector.load %arg4[%c1_103, %c0_104, %c2_105] : memref<2x22x22xf32, #tpu.memory_space<vmem>>, vector<1x22x16xf32>
    %622 = vector.shape_cast %621 : vector<1x22x16xf32> to vector<22x16xf32>
    %623 = vector.extract_strided_slice %622 {offsets = [0, 0], sizes = [16, 16], strides = [1, 1]} : vector<22x16xf32> to vector<16x16xf32>
    %624 = vector.broadcast %51 : f32 to vector<16x16xf32>
    %625 = arith.mulf %624, %623 : vector<16x16xf32>
    %626 = arith.addf %608, %625 : vector<16x16xf32>
    %627 = vector.extract_strided_slice %622 {offsets = [1, 0], sizes = [16, 16], strides = [1, 1]} : vector<22x16xf32> to vector<16x16xf32>
    %628 = vector.broadcast %58 : f32 to vector<16x16xf32>
    %629 = arith.mulf %628, %627 : vector<16x16xf32>
    %630 = arith.addf %612, %629 : vector<16x16xf32>
    %631 = vector.extract_strided_slice %622 {offsets = [2, 0], sizes = [16, 16], strides = [1, 1]} : vector<22x16xf32> to vector<16x16xf32>
    %632 = vector.broadcast %65 : f32 to vector<16x16xf32>
    %633 = arith.mulf %632, %631 : vector<16x16xf32>
    %634 = arith.addf %616, %633 : vector<16x16xf32>
    %635 = vector.extract_strided_slice %622 {offsets = [3, 0], sizes = [16, 16], strides = [1, 1]} : vector<22x16xf32> to vector<16x16xf32>
    %636 = vector.broadcast %72 : f32 to vector<16x16xf32>
    %637 = arith.mulf %636, %635 : vector<16x16xf32>
    %638 = arith.addf %620, %637 : vector<16x16xf32>
    %639 = vector.extract_strided_slice %622 {offsets = [4, 0], sizes = [16, 16], strides = [1, 1]} : vector<22x16xf32> to vector<16x16xf32>
    %640 = vector.broadcast %79 : f32 to vector<16x16xf32>
    %641 = arith.mulf %640, %639 : vector<16x16xf32>
    %642 = arith.addf %626, %641 : vector<16x16xf32>
    %643 = vector.extract_strided_slice %622 {offsets = [5, 0], sizes = [16, 16], strides = [1, 1]} : vector<22x16xf32> to vector<16x16xf32>
    %644 = vector.broadcast %86 : f32 to vector<16x16xf32>
    %645 = arith.mulf %644, %643 : vector<16x16xf32>
    %646 = arith.addf %630, %645 : vector<16x16xf32>
    %647 = vector.extract_strided_slice %622 {offsets = [6, 0], sizes = [16, 16], strides = [1, 1]} : vector<22x16xf32> to vector<16x16xf32>
    %648 = vector.broadcast %93 : f32 to vector<16x16xf32>
    %649 = arith.mulf %648, %647 : vector<16x16xf32>
    %650 = arith.addf %634, %649 : vector<16x16xf32>
    %c1_106 = arith.constant 1 : index
    %c0_107 = arith.constant 0 : index
    %c3_108 = arith.constant 3 : index
    %651 = vector.load %arg4[%c1_106, %c0_107, %c3_108] : memref<2x22x22xf32, #tpu.memory_space<vmem>>, vector<1x22x16xf32>
    %652 = vector.shape_cast %651 : vector<1x22x16xf32> to vector<22x16xf32>
    %653 = vector.extract_strided_slice %652 {offsets = [0, 0], sizes = [16, 16], strides = [1, 1]} : vector<22x16xf32> to vector<16x16xf32>
    %654 = vector.broadcast %52 : f32 to vector<16x16xf32>
    %655 = arith.mulf %654, %653 : vector<16x16xf32>
    %656 = arith.addf %638, %655 : vector<16x16xf32>
    %657 = vector.extract_strided_slice %652 {offsets = [1, 0], sizes = [16, 16], strides = [1, 1]} : vector<22x16xf32> to vector<16x16xf32>
    %658 = vector.broadcast %59 : f32 to vector<16x16xf32>
    %659 = arith.mulf %658, %657 : vector<16x16xf32>
    %660 = arith.addf %642, %659 : vector<16x16xf32>
    %661 = vector.extract_strided_slice %652 {offsets = [2, 0], sizes = [16, 16], strides = [1, 1]} : vector<22x16xf32> to vector<16x16xf32>
    %662 = vector.broadcast %66 : f32 to vector<16x16xf32>
    %663 = arith.mulf %662, %661 : vector<16x16xf32>
    %664 = arith.addf %646, %663 : vector<16x16xf32>
    %665 = vector.extract_strided_slice %652 {offsets = [3, 0], sizes = [16, 16], strides = [1, 1]} : vector<22x16xf32> to vector<16x16xf32>
    %666 = vector.broadcast %73 : f32 to vector<16x16xf32>
    %667 = arith.mulf %666, %665 : vector<16x16xf32>
    %668 = arith.addf %650, %667 : vector<16x16xf32>
    %669 = vector.extract_strided_slice %652 {offsets = [4, 0], sizes = [16, 16], strides = [1, 1]} : vector<22x16xf32> to vector<16x16xf32>
    %670 = vector.broadcast %80 : f32 to vector<16x16xf32>
    %671 = arith.mulf %670, %669 : vector<16x16xf32>
    %672 = arith.addf %656, %671 : vector<16x16xf32>
    %673 = vector.extract_strided_slice %652 {offsets = [5, 0], sizes = [16, 16], strides = [1, 1]} : vector<22x16xf32> to vector<16x16xf32>
    %674 = vector.broadcast %87 : f32 to vector<16x16xf32>
    %675 = arith.mulf %674, %673 : vector<16x16xf32>
    %676 = arith.addf %660, %675 : vector<16x16xf32>
    %677 = vector.extract_strided_slice %652 {offsets = [6, 0], sizes = [16, 16], strides = [1, 1]} : vector<22x16xf32> to vector<16x16xf32>
    %678 = vector.broadcast %94 : f32 to vector<16x16xf32>
    %679 = arith.mulf %678, %677 : vector<16x16xf32>
    %680 = arith.addf %664, %679 : vector<16x16xf32>
    %c1_109 = arith.constant 1 : index
    %c0_110 = arith.constant 0 : index
    %c4_111 = arith.constant 4 : index
    %681 = vector.load %arg4[%c1_109, %c0_110, %c4_111] : memref<2x22x22xf32, #tpu.memory_space<vmem>>, vector<1x22x16xf32>
    %682 = vector.shape_cast %681 : vector<1x22x16xf32> to vector<22x16xf32>
    %683 = vector.extract_strided_slice %682 {offsets = [0, 0], sizes = [16, 16], strides = [1, 1]} : vector<22x16xf32> to vector<16x16xf32>
    %684 = vector.broadcast %53 : f32 to vector<16x16xf32>
    %685 = arith.mulf %684, %683 : vector<16x16xf32>
    %686 = arith.addf %668, %685 : vector<16x16xf32>
    %687 = vector.extract_strided_slice %682 {offsets = [1, 0], sizes = [16, 16], strides = [1, 1]} : vector<22x16xf32> to vector<16x16xf32>
    %688 = vector.broadcast %60 : f32 to vector<16x16xf32>
    %689 = arith.mulf %688, %687 : vector<16x16xf32>
    %690 = arith.addf %672, %689 : vector<16x16xf32>
    %691 = vector.extract_strided_slice %682 {offsets = [2, 0], sizes = [16, 16], strides = [1, 1]} : vector<22x16xf32> to vector<16x16xf32>
    %692 = vector.broadcast %67 : f32 to vector<16x16xf32>
    %693 = arith.mulf %692, %691 : vector<16x16xf32>
    %694 = arith.addf %676, %693 : vector<16x16xf32>
    %695 = vector.extract_strided_slice %682 {offsets = [3, 0], sizes = [16, 16], strides = [1, 1]} : vector<22x16xf32> to vector<16x16xf32>
    %696 = vector.broadcast %74 : f32 to vector<16x16xf32>
    %697 = arith.mulf %696, %695 : vector<16x16xf32>
    %698 = arith.addf %680, %697 : vector<16x16xf32>
    %699 = vector.extract_strided_slice %682 {offsets = [4, 0], sizes = [16, 16], strides = [1, 1]} : vector<22x16xf32> to vector<16x16xf32>
    %700 = vector.broadcast %81 : f32 to vector<16x16xf32>
    %701 = arith.mulf %700, %699 : vector<16x16xf32>
    %702 = arith.addf %686, %701 : vector<16x16xf32>
    %703 = vector.extract_strided_slice %682 {offsets = [5, 0], sizes = [16, 16], strides = [1, 1]} : vector<22x16xf32> to vector<16x16xf32>
    %704 = vector.broadcast %88 : f32 to vector<16x16xf32>
    %705 = arith.mulf %704, %703 : vector<16x16xf32>
    %706 = arith.addf %690, %705 : vector<16x16xf32>
    %707 = vector.extract_strided_slice %682 {offsets = [6, 0], sizes = [16, 16], strides = [1, 1]} : vector<22x16xf32> to vector<16x16xf32>
    %708 = vector.broadcast %95 : f32 to vector<16x16xf32>
    %709 = arith.mulf %708, %707 : vector<16x16xf32>
    %710 = arith.addf %694, %709 : vector<16x16xf32>
    %c1_112 = arith.constant 1 : index
    %c0_113 = arith.constant 0 : index
    %c5_114 = arith.constant 5 : index
    %711 = vector.load %arg4[%c1_112, %c0_113, %c5_114] : memref<2x22x22xf32, #tpu.memory_space<vmem>>, vector<1x22x16xf32>
    %712 = vector.shape_cast %711 : vector<1x22x16xf32> to vector<22x16xf32>
    %713 = vector.extract_strided_slice %712 {offsets = [0, 0], sizes = [16, 16], strides = [1, 1]} : vector<22x16xf32> to vector<16x16xf32>
    %714 = vector.broadcast %54 : f32 to vector<16x16xf32>
    %715 = arith.mulf %714, %713 : vector<16x16xf32>
    %716 = arith.addf %698, %715 : vector<16x16xf32>
    %717 = vector.extract_strided_slice %712 {offsets = [1, 0], sizes = [16, 16], strides = [1, 1]} : vector<22x16xf32> to vector<16x16xf32>
    %718 = vector.broadcast %61 : f32 to vector<16x16xf32>
    %719 = arith.mulf %718, %717 : vector<16x16xf32>
    %720 = arith.addf %702, %719 : vector<16x16xf32>
    %721 = vector.extract_strided_slice %712 {offsets = [2, 0], sizes = [16, 16], strides = [1, 1]} : vector<22x16xf32> to vector<16x16xf32>
    %722 = vector.broadcast %68 : f32 to vector<16x16xf32>
    %723 = arith.mulf %722, %721 : vector<16x16xf32>
    %724 = arith.addf %706, %723 : vector<16x16xf32>
    %725 = vector.extract_strided_slice %712 {offsets = [3, 0], sizes = [16, 16], strides = [1, 1]} : vector<22x16xf32> to vector<16x16xf32>
    %726 = vector.broadcast %75 : f32 to vector<16x16xf32>
    %727 = arith.mulf %726, %725 : vector<16x16xf32>
    %728 = arith.addf %710, %727 : vector<16x16xf32>
    %729 = vector.extract_strided_slice %712 {offsets = [4, 0], sizes = [16, 16], strides = [1, 1]} : vector<22x16xf32> to vector<16x16xf32>
    %730 = vector.broadcast %82 : f32 to vector<16x16xf32>
    %731 = arith.mulf %730, %729 : vector<16x16xf32>
    %732 = arith.addf %716, %731 : vector<16x16xf32>
    %733 = vector.extract_strided_slice %712 {offsets = [5, 0], sizes = [16, 16], strides = [1, 1]} : vector<22x16xf32> to vector<16x16xf32>
    %734 = vector.broadcast %89 : f32 to vector<16x16xf32>
    %735 = arith.mulf %734, %733 : vector<16x16xf32>
    %736 = arith.addf %720, %735 : vector<16x16xf32>
    %737 = vector.extract_strided_slice %712 {offsets = [6, 0], sizes = [16, 16], strides = [1, 1]} : vector<22x16xf32> to vector<16x16xf32>
    %738 = vector.broadcast %96 : f32 to vector<16x16xf32>
    %739 = arith.mulf %738, %737 : vector<16x16xf32>
    %740 = arith.addf %724, %739 : vector<16x16xf32>
    %c1_115 = arith.constant 1 : index
    %c0_116 = arith.constant 0 : index
    %c6_117 = arith.constant 6 : index
    %741 = vector.load %arg4[%c1_115, %c0_116, %c6_117] : memref<2x22x22xf32, #tpu.memory_space<vmem>>, vector<1x22x16xf32>
    %742 = vector.shape_cast %741 : vector<1x22x16xf32> to vector<22x16xf32>
    %743 = vector.extract_strided_slice %742 {offsets = [0, 0], sizes = [16, 16], strides = [1, 1]} : vector<22x16xf32> to vector<16x16xf32>
    %744 = vector.broadcast %55 : f32 to vector<16x16xf32>
    %745 = arith.mulf %744, %743 : vector<16x16xf32>
    %746 = arith.addf %728, %745 : vector<16x16xf32>
    %747 = vector.extract_strided_slice %742 {offsets = [1, 0], sizes = [16, 16], strides = [1, 1]} : vector<22x16xf32> to vector<16x16xf32>
    %748 = vector.broadcast %62 : f32 to vector<16x16xf32>
    %749 = arith.mulf %748, %747 : vector<16x16xf32>
    %750 = arith.addf %732, %749 : vector<16x16xf32>
    %751 = vector.extract_strided_slice %742 {offsets = [2, 0], sizes = [16, 16], strides = [1, 1]} : vector<22x16xf32> to vector<16x16xf32>
    %752 = vector.broadcast %69 : f32 to vector<16x16xf32>
    %753 = arith.mulf %752, %751 : vector<16x16xf32>
    %754 = arith.addf %736, %753 : vector<16x16xf32>
    %755 = vector.extract_strided_slice %742 {offsets = [3, 0], sizes = [16, 16], strides = [1, 1]} : vector<22x16xf32> to vector<16x16xf32>
    %756 = vector.broadcast %76 : f32 to vector<16x16xf32>
    %757 = arith.mulf %756, %755 : vector<16x16xf32>
    %758 = arith.addf %740, %757 : vector<16x16xf32>
    %759 = vector.extract_strided_slice %742 {offsets = [4, 0], sizes = [16, 16], strides = [1, 1]} : vector<22x16xf32> to vector<16x16xf32>
    %760 = vector.broadcast %83 : f32 to vector<16x16xf32>
    %761 = arith.mulf %760, %759 : vector<16x16xf32>
    %762 = arith.addf %746, %761 : vector<16x16xf32>
    %763 = vector.extract_strided_slice %742 {offsets = [5, 0], sizes = [16, 16], strides = [1, 1]} : vector<22x16xf32> to vector<16x16xf32>
    %764 = vector.broadcast %90 : f32 to vector<16x16xf32>
    %765 = arith.mulf %764, %763 : vector<16x16xf32>
    %766 = arith.addf %750, %765 : vector<16x16xf32>
    %767 = vector.extract_strided_slice %742 {offsets = [6, 0], sizes = [16, 16], strides = [1, 1]} : vector<22x16xf32> to vector<16x16xf32>
    %768 = vector.broadcast %97 : f32 to vector<16x16xf32>
    %769 = arith.mulf %768, %767 : vector<16x16xf32>
    %770 = arith.addf %754, %769 : vector<16x16xf32>
    %771 = arith.addf %766, %770 : vector<16x16xf32>
    %772 = arith.addf %758, %762 : vector<16x16xf32>
    %773 = arith.addf %771, %772 : vector<16x16xf32>
    %774 = vector.broadcast %98 : f32 to vector<16x16xf32>
    %775 = arith.addf %773, %774 : vector<16x16xf32>
    %cst_118 = arith.constant 0.000000e+00 : f32
    %776 = vector.broadcast %cst_118 : f32 to vector<16x16xf32>
    %777 = arith.subf %776, %775 : vector<16x16xf32>
    %778 = math.exp %777 : vector<16x16xf32>
    %cst_119 = arith.constant 1.000000e+00 : f32
    %779 = vector.broadcast %cst_119 : f32 to vector<16x16xf32>
    %780 = arith.addf %779, %778 : vector<16x16xf32>
    %cst_120 = arith.constant 1.000000e+00 : f32
    %781 = vector.broadcast %cst_120 : f32 to vector<16x16xf32>
    %782 = arith.divf %781, %780 : vector<16x16xf32>
    %cst_121 = arith.constant 0.333333343 : f32
    %783 = vector.broadcast %cst_121 : f32 to vector<16x16xf32>
    %784 = arith.mulf %782, %783 : vector<16x16xf32>
    %cst_122 = arith.constant 0.000000e+00 : f32
    %785 = vector.broadcast %cst_122 : f32 to vector<4x16xf32>
    %cst_123 = arith.constant 0.000000e+00 : f32
    %786 = vector.broadcast %cst_123 : f32 to vector<4x16xf32>
    %cst_124 = arith.constant 0.000000e+00 : f32
    %787 = vector.broadcast %cst_124 : f32 to vector<4x16xf32>
    %cst_125 = arith.constant 0.000000e+00 : f32
    %788 = vector.broadcast %cst_125 : f32 to vector<4x16xf32>
    %c0_126 = arith.constant 0 : index
    %c0_127 = arith.constant 0 : index
    %c0_128 = arith.constant 0 : index
    %789 = vector.load %arg5[%c0_126, %c0_127, %c0_128] : memref<2x10x22xf32, #tpu.memory_space<vmem>>, vector<1x10x16xf32>
    %790 = vector.shape_cast %789 : vector<1x10x16xf32> to vector<10x16xf32>
    %791 = vector.extract_strided_slice %790 {offsets = [0, 0], sizes = [4, 16], strides = [1, 1]} : vector<10x16xf32> to vector<4x16xf32>
    %792 = vector.broadcast %99 : f32 to vector<4x16xf32>
    %793 = arith.mulf %792, %791 : vector<4x16xf32>
    %794 = arith.addf %785, %793 : vector<4x16xf32>
    %795 = vector.extract_strided_slice %790 {offsets = [1, 0], sizes = [4, 16], strides = [1, 1]} : vector<10x16xf32> to vector<4x16xf32>
    %796 = vector.broadcast %106 : f32 to vector<4x16xf32>
    %797 = arith.mulf %796, %795 : vector<4x16xf32>
    %798 = arith.addf %786, %797 : vector<4x16xf32>
    %799 = vector.extract_strided_slice %790 {offsets = [2, 0], sizes = [4, 16], strides = [1, 1]} : vector<10x16xf32> to vector<4x16xf32>
    %800 = vector.broadcast %113 : f32 to vector<4x16xf32>
    %801 = arith.mulf %800, %799 : vector<4x16xf32>
    %802 = arith.addf %787, %801 : vector<4x16xf32>
    %803 = vector.extract_strided_slice %790 {offsets = [3, 0], sizes = [4, 16], strides = [1, 1]} : vector<10x16xf32> to vector<4x16xf32>
    %804 = vector.broadcast %120 : f32 to vector<4x16xf32>
    %805 = arith.mulf %804, %803 : vector<4x16xf32>
    %806 = arith.addf %788, %805 : vector<4x16xf32>
    %807 = vector.extract_strided_slice %790 {offsets = [4, 0], sizes = [4, 16], strides = [1, 1]} : vector<10x16xf32> to vector<4x16xf32>
    %808 = vector.broadcast %127 : f32 to vector<4x16xf32>
    %809 = arith.mulf %808, %807 : vector<4x16xf32>
    %810 = arith.addf %794, %809 : vector<4x16xf32>
    %811 = vector.extract_strided_slice %790 {offsets = [5, 0], sizes = [4, 16], strides = [1, 1]} : vector<10x16xf32> to vector<4x16xf32>
    %812 = vector.broadcast %134 : f32 to vector<4x16xf32>
    %813 = arith.mulf %812, %811 : vector<4x16xf32>
    %814 = arith.addf %798, %813 : vector<4x16xf32>
    %815 = vector.extract_strided_slice %790 {offsets = [6, 0], sizes = [4, 16], strides = [1, 1]} : vector<10x16xf32> to vector<4x16xf32>
    %816 = vector.broadcast %141 : f32 to vector<4x16xf32>
    %817 = arith.mulf %816, %815 : vector<4x16xf32>
    %818 = arith.addf %802, %817 : vector<4x16xf32>
    %c0_129 = arith.constant 0 : index
    %c0_130 = arith.constant 0 : index
    %c1_131 = arith.constant 1 : index
    %819 = vector.load %arg5[%c0_129, %c0_130, %c1_131] : memref<2x10x22xf32, #tpu.memory_space<vmem>>, vector<1x10x16xf32>
    %820 = vector.shape_cast %819 : vector<1x10x16xf32> to vector<10x16xf32>
    %821 = vector.extract_strided_slice %820 {offsets = [0, 0], sizes = [4, 16], strides = [1, 1]} : vector<10x16xf32> to vector<4x16xf32>
    %822 = vector.broadcast %100 : f32 to vector<4x16xf32>
    %823 = arith.mulf %822, %821 : vector<4x16xf32>
    %824 = arith.addf %806, %823 : vector<4x16xf32>
    %825 = vector.extract_strided_slice %820 {offsets = [1, 0], sizes = [4, 16], strides = [1, 1]} : vector<10x16xf32> to vector<4x16xf32>
    %826 = vector.broadcast %107 : f32 to vector<4x16xf32>
    %827 = arith.mulf %826, %825 : vector<4x16xf32>
    %828 = arith.addf %810, %827 : vector<4x16xf32>
    %829 = vector.extract_strided_slice %820 {offsets = [2, 0], sizes = [4, 16], strides = [1, 1]} : vector<10x16xf32> to vector<4x16xf32>
    %830 = vector.broadcast %114 : f32 to vector<4x16xf32>
    %831 = arith.mulf %830, %829 : vector<4x16xf32>
    %832 = arith.addf %814, %831 : vector<4x16xf32>
    %833 = vector.extract_strided_slice %820 {offsets = [3, 0], sizes = [4, 16], strides = [1, 1]} : vector<10x16xf32> to vector<4x16xf32>
    %834 = vector.broadcast %121 : f32 to vector<4x16xf32>
    %835 = arith.mulf %834, %833 : vector<4x16xf32>
    %836 = arith.addf %818, %835 : vector<4x16xf32>
    %837 = vector.extract_strided_slice %820 {offsets = [4, 0], sizes = [4, 16], strides = [1, 1]} : vector<10x16xf32> to vector<4x16xf32>
    %838 = vector.broadcast %128 : f32 to vector<4x16xf32>
    %839 = arith.mulf %838, %837 : vector<4x16xf32>
    %840 = arith.addf %824, %839 : vector<4x16xf32>
    %841 = vector.extract_strided_slice %820 {offsets = [5, 0], sizes = [4, 16], strides = [1, 1]} : vector<10x16xf32> to vector<4x16xf32>
    %842 = vector.broadcast %135 : f32 to vector<4x16xf32>
    %843 = arith.mulf %842, %841 : vector<4x16xf32>
    %844 = arith.addf %828, %843 : vector<4x16xf32>
    %845 = vector.extract_strided_slice %820 {offsets = [6, 0], sizes = [4, 16], strides = [1, 1]} : vector<10x16xf32> to vector<4x16xf32>
    %846 = vector.broadcast %142 : f32 to vector<4x16xf32>
    %847 = arith.mulf %846, %845 : vector<4x16xf32>
    %848 = arith.addf %832, %847 : vector<4x16xf32>
    %c0_132 = arith.constant 0 : index
    %c0_133 = arith.constant 0 : index
    %c2_134 = arith.constant 2 : index
    %849 = vector.load %arg5[%c0_132, %c0_133, %c2_134] : memref<2x10x22xf32, #tpu.memory_space<vmem>>, vector<1x10x16xf32>
    %850 = vector.shape_cast %849 : vector<1x10x16xf32> to vector<10x16xf32>
    %851 = vector.extract_strided_slice %850 {offsets = [0, 0], sizes = [4, 16], strides = [1, 1]} : vector<10x16xf32> to vector<4x16xf32>
    %852 = vector.broadcast %101 : f32 to vector<4x16xf32>
    %853 = arith.mulf %852, %851 : vector<4x16xf32>
    %854 = arith.addf %836, %853 : vector<4x16xf32>
    %855 = vector.extract_strided_slice %850 {offsets = [1, 0], sizes = [4, 16], strides = [1, 1]} : vector<10x16xf32> to vector<4x16xf32>
    %856 = vector.broadcast %108 : f32 to vector<4x16xf32>
    %857 = arith.mulf %856, %855 : vector<4x16xf32>
    %858 = arith.addf %840, %857 : vector<4x16xf32>
    %859 = vector.extract_strided_slice %850 {offsets = [2, 0], sizes = [4, 16], strides = [1, 1]} : vector<10x16xf32> to vector<4x16xf32>
    %860 = vector.broadcast %115 : f32 to vector<4x16xf32>
    %861 = arith.mulf %860, %859 : vector<4x16xf32>
    %862 = arith.addf %844, %861 : vector<4x16xf32>
    %863 = vector.extract_strided_slice %850 {offsets = [3, 0], sizes = [4, 16], strides = [1, 1]} : vector<10x16xf32> to vector<4x16xf32>
    %864 = vector.broadcast %122 : f32 to vector<4x16xf32>
    %865 = arith.mulf %864, %863 : vector<4x16xf32>
    %866 = arith.addf %848, %865 : vector<4x16xf32>
    %867 = vector.extract_strided_slice %850 {offsets = [4, 0], sizes = [4, 16], strides = [1, 1]} : vector<10x16xf32> to vector<4x16xf32>
    %868 = vector.broadcast %129 : f32 to vector<4x16xf32>
    %869 = arith.mulf %868, %867 : vector<4x16xf32>
    %870 = arith.addf %854, %869 : vector<4x16xf32>
    %871 = vector.extract_strided_slice %850 {offsets = [5, 0], sizes = [4, 16], strides = [1, 1]} : vector<10x16xf32> to vector<4x16xf32>
    %872 = vector.broadcast %136 : f32 to vector<4x16xf32>
    %873 = arith.mulf %872, %871 : vector<4x16xf32>
    %874 = arith.addf %858, %873 : vector<4x16xf32>
    %875 = vector.extract_strided_slice %850 {offsets = [6, 0], sizes = [4, 16], strides = [1, 1]} : vector<10x16xf32> to vector<4x16xf32>
    %876 = vector.broadcast %143 : f32 to vector<4x16xf32>
    %877 = arith.mulf %876, %875 : vector<4x16xf32>
    %878 = arith.addf %862, %877 : vector<4x16xf32>
    %c0_135 = arith.constant 0 : index
    %c0_136 = arith.constant 0 : index
    %c3_137 = arith.constant 3 : index
    %879 = vector.load %arg5[%c0_135, %c0_136, %c3_137] : memref<2x10x22xf32, #tpu.memory_space<vmem>>, vector<1x10x16xf32>
    %880 = vector.shape_cast %879 : vector<1x10x16xf32> to vector<10x16xf32>
    %881 = vector.extract_strided_slice %880 {offsets = [0, 0], sizes = [4, 16], strides = [1, 1]} : vector<10x16xf32> to vector<4x16xf32>
    %882 = vector.broadcast %102 : f32 to vector<4x16xf32>
    %883 = arith.mulf %882, %881 : vector<4x16xf32>
    %884 = arith.addf %866, %883 : vector<4x16xf32>
    %885 = vector.extract_strided_slice %880 {offsets = [1, 0], sizes = [4, 16], strides = [1, 1]} : vector<10x16xf32> to vector<4x16xf32>
    %886 = vector.broadcast %109 : f32 to vector<4x16xf32>
    %887 = arith.mulf %886, %885 : vector<4x16xf32>
    %888 = arith.addf %870, %887 : vector<4x16xf32>
    %889 = vector.extract_strided_slice %880 {offsets = [2, 0], sizes = [4, 16], strides = [1, 1]} : vector<10x16xf32> to vector<4x16xf32>
    %890 = vector.broadcast %116 : f32 to vector<4x16xf32>
    %891 = arith.mulf %890, %889 : vector<4x16xf32>
    %892 = arith.addf %874, %891 : vector<4x16xf32>
    %893 = vector.extract_strided_slice %880 {offsets = [3, 0], sizes = [4, 16], strides = [1, 1]} : vector<10x16xf32> to vector<4x16xf32>
    %894 = vector.broadcast %123 : f32 to vector<4x16xf32>
    %895 = arith.mulf %894, %893 : vector<4x16xf32>
    %896 = arith.addf %878, %895 : vector<4x16xf32>
    %897 = vector.extract_strided_slice %880 {offsets = [4, 0], sizes = [4, 16], strides = [1, 1]} : vector<10x16xf32> to vector<4x16xf32>
    %898 = vector.broadcast %130 : f32 to vector<4x16xf32>
    %899 = arith.mulf %898, %897 : vector<4x16xf32>
    %900 = arith.addf %884, %899 : vector<4x16xf32>
    %901 = vector.extract_strided_slice %880 {offsets = [5, 0], sizes = [4, 16], strides = [1, 1]} : vector<10x16xf32> to vector<4x16xf32>
    %902 = vector.broadcast %137 : f32 to vector<4x16xf32>
    %903 = arith.mulf %902, %901 : vector<4x16xf32>
    %904 = arith.addf %888, %903 : vector<4x16xf32>
    %905 = vector.extract_strided_slice %880 {offsets = [6, 0], sizes = [4, 16], strides = [1, 1]} : vector<10x16xf32> to vector<4x16xf32>
    %906 = vector.broadcast %144 : f32 to vector<4x16xf32>
    %907 = arith.mulf %906, %905 : vector<4x16xf32>
    %908 = arith.addf %892, %907 : vector<4x16xf32>
    %c0_138 = arith.constant 0 : index
    %c0_139 = arith.constant 0 : index
    %c4_140 = arith.constant 4 : index
    %909 = vector.load %arg5[%c0_138, %c0_139, %c4_140] : memref<2x10x22xf32, #tpu.memory_space<vmem>>, vector<1x10x16xf32>
    %910 = vector.shape_cast %909 : vector<1x10x16xf32> to vector<10x16xf32>
    %911 = vector.extract_strided_slice %910 {offsets = [0, 0], sizes = [4, 16], strides = [1, 1]} : vector<10x16xf32> to vector<4x16xf32>
    %912 = vector.broadcast %103 : f32 to vector<4x16xf32>
    %913 = arith.mulf %912, %911 : vector<4x16xf32>
    %914 = arith.addf %896, %913 : vector<4x16xf32>
    %915 = vector.extract_strided_slice %910 {offsets = [1, 0], sizes = [4, 16], strides = [1, 1]} : vector<10x16xf32> to vector<4x16xf32>
    %916 = vector.broadcast %110 : f32 to vector<4x16xf32>
    %917 = arith.mulf %916, %915 : vector<4x16xf32>
    %918 = arith.addf %900, %917 : vector<4x16xf32>
    %919 = vector.extract_strided_slice %910 {offsets = [2, 0], sizes = [4, 16], strides = [1, 1]} : vector<10x16xf32> to vector<4x16xf32>
    %920 = vector.broadcast %117 : f32 to vector<4x16xf32>
    %921 = arith.mulf %920, %919 : vector<4x16xf32>
    %922 = arith.addf %904, %921 : vector<4x16xf32>
    %923 = vector.extract_strided_slice %910 {offsets = [3, 0], sizes = [4, 16], strides = [1, 1]} : vector<10x16xf32> to vector<4x16xf32>
    %924 = vector.broadcast %124 : f32 to vector<4x16xf32>
    %925 = arith.mulf %924, %923 : vector<4x16xf32>
    %926 = arith.addf %908, %925 : vector<4x16xf32>
    %927 = vector.extract_strided_slice %910 {offsets = [4, 0], sizes = [4, 16], strides = [1, 1]} : vector<10x16xf32> to vector<4x16xf32>
    %928 = vector.broadcast %131 : f32 to vector<4x16xf32>
    %929 = arith.mulf %928, %927 : vector<4x16xf32>
    %930 = arith.addf %914, %929 : vector<4x16xf32>
    %931 = vector.extract_strided_slice %910 {offsets = [5, 0], sizes = [4, 16], strides = [1, 1]} : vector<10x16xf32> to vector<4x16xf32>
    %932 = vector.broadcast %138 : f32 to vector<4x16xf32>
    %933 = arith.mulf %932, %931 : vector<4x16xf32>
    %934 = arith.addf %918, %933 : vector<4x16xf32>
    %935 = vector.extract_strided_slice %910 {offsets = [6, 0], sizes = [4, 16], strides = [1, 1]} : vector<10x16xf32> to vector<4x16xf32>
    %936 = vector.broadcast %145 : f32 to vector<4x16xf32>
    %937 = arith.mulf %936, %935 : vector<4x16xf32>
    %938 = arith.addf %922, %937 : vector<4x16xf32>
    %c0_141 = arith.constant 0 : index
    %c0_142 = arith.constant 0 : index
    %c5_143 = arith.constant 5 : index
    %939 = vector.load %arg5[%c0_141, %c0_142, %c5_143] : memref<2x10x22xf32, #tpu.memory_space<vmem>>, vector<1x10x16xf32>
    %940 = vector.shape_cast %939 : vector<1x10x16xf32> to vector<10x16xf32>
    %941 = vector.extract_strided_slice %940 {offsets = [0, 0], sizes = [4, 16], strides = [1, 1]} : vector<10x16xf32> to vector<4x16xf32>
    %942 = vector.broadcast %104 : f32 to vector<4x16xf32>
    %943 = arith.mulf %942, %941 : vector<4x16xf32>
    %944 = arith.addf %926, %943 : vector<4x16xf32>
    %945 = vector.extract_strided_slice %940 {offsets = [1, 0], sizes = [4, 16], strides = [1, 1]} : vector<10x16xf32> to vector<4x16xf32>
    %946 = vector.broadcast %111 : f32 to vector<4x16xf32>
    %947 = arith.mulf %946, %945 : vector<4x16xf32>
    %948 = arith.addf %930, %947 : vector<4x16xf32>
    %949 = vector.extract_strided_slice %940 {offsets = [2, 0], sizes = [4, 16], strides = [1, 1]} : vector<10x16xf32> to vector<4x16xf32>
    %950 = vector.broadcast %118 : f32 to vector<4x16xf32>
    %951 = arith.mulf %950, %949 : vector<4x16xf32>
    %952 = arith.addf %934, %951 : vector<4x16xf32>
    %953 = vector.extract_strided_slice %940 {offsets = [3, 0], sizes = [4, 16], strides = [1, 1]} : vector<10x16xf32> to vector<4x16xf32>
    %954 = vector.broadcast %125 : f32 to vector<4x16xf32>
    %955 = arith.mulf %954, %953 : vector<4x16xf32>
    %956 = arith.addf %938, %955 : vector<4x16xf32>
    %957 = vector.extract_strided_slice %940 {offsets = [4, 0], sizes = [4, 16], strides = [1, 1]} : vector<10x16xf32> to vector<4x16xf32>
    %958 = vector.broadcast %132 : f32 to vector<4x16xf32>
    %959 = arith.mulf %958, %957 : vector<4x16xf32>
    %960 = arith.addf %944, %959 : vector<4x16xf32>
    %961 = vector.extract_strided_slice %940 {offsets = [5, 0], sizes = [4, 16], strides = [1, 1]} : vector<10x16xf32> to vector<4x16xf32>
    %962 = vector.broadcast %139 : f32 to vector<4x16xf32>
    %963 = arith.mulf %962, %961 : vector<4x16xf32>
    %964 = arith.addf %948, %963 : vector<4x16xf32>
    %965 = vector.extract_strided_slice %940 {offsets = [6, 0], sizes = [4, 16], strides = [1, 1]} : vector<10x16xf32> to vector<4x16xf32>
    %966 = vector.broadcast %146 : f32 to vector<4x16xf32>
    %967 = arith.mulf %966, %965 : vector<4x16xf32>
    %968 = arith.addf %952, %967 : vector<4x16xf32>
    %c0_144 = arith.constant 0 : index
    %c0_145 = arith.constant 0 : index
    %c6_146 = arith.constant 6 : index
    %969 = vector.load %arg5[%c0_144, %c0_145, %c6_146] : memref<2x10x22xf32, #tpu.memory_space<vmem>>, vector<1x10x16xf32>
    %970 = vector.shape_cast %969 : vector<1x10x16xf32> to vector<10x16xf32>
    %971 = vector.extract_strided_slice %970 {offsets = [0, 0], sizes = [4, 16], strides = [1, 1]} : vector<10x16xf32> to vector<4x16xf32>
    %972 = vector.broadcast %105 : f32 to vector<4x16xf32>
    %973 = arith.mulf %972, %971 : vector<4x16xf32>
    %974 = arith.addf %956, %973 : vector<4x16xf32>
    %975 = vector.extract_strided_slice %970 {offsets = [1, 0], sizes = [4, 16], strides = [1, 1]} : vector<10x16xf32> to vector<4x16xf32>
    %976 = vector.broadcast %112 : f32 to vector<4x16xf32>
    %977 = arith.mulf %976, %975 : vector<4x16xf32>
    %978 = arith.addf %960, %977 : vector<4x16xf32>
    %979 = vector.extract_strided_slice %970 {offsets = [2, 0], sizes = [4, 16], strides = [1, 1]} : vector<10x16xf32> to vector<4x16xf32>
    %980 = vector.broadcast %119 : f32 to vector<4x16xf32>
    %981 = arith.mulf %980, %979 : vector<4x16xf32>
    %982 = arith.addf %964, %981 : vector<4x16xf32>
    %983 = vector.extract_strided_slice %970 {offsets = [3, 0], sizes = [4, 16], strides = [1, 1]} : vector<10x16xf32> to vector<4x16xf32>
    %984 = vector.broadcast %126 : f32 to vector<4x16xf32>
    %985 = arith.mulf %984, %983 : vector<4x16xf32>
    %986 = arith.addf %968, %985 : vector<4x16xf32>
    %987 = vector.extract_strided_slice %970 {offsets = [4, 0], sizes = [4, 16], strides = [1, 1]} : vector<10x16xf32> to vector<4x16xf32>
    %988 = vector.broadcast %133 : f32 to vector<4x16xf32>
    %989 = arith.mulf %988, %987 : vector<4x16xf32>
    %990 = arith.addf %974, %989 : vector<4x16xf32>
    %991 = vector.extract_strided_slice %970 {offsets = [5, 0], sizes = [4, 16], strides = [1, 1]} : vector<10x16xf32> to vector<4x16xf32>
    %992 = vector.broadcast %140 : f32 to vector<4x16xf32>
    %993 = arith.mulf %992, %991 : vector<4x16xf32>
    %994 = arith.addf %978, %993 : vector<4x16xf32>
    %995 = vector.extract_strided_slice %970 {offsets = [6, 0], sizes = [4, 16], strides = [1, 1]} : vector<10x16xf32> to vector<4x16xf32>
    %996 = vector.broadcast %147 : f32 to vector<4x16xf32>
    %997 = arith.mulf %996, %995 : vector<4x16xf32>
    %998 = arith.addf %982, %997 : vector<4x16xf32>
    %c1_147 = arith.constant 1 : index
    %c0_148 = arith.constant 0 : index
    %c0_149 = arith.constant 0 : index
    %999 = vector.load %arg5[%c1_147, %c0_148, %c0_149] : memref<2x10x22xf32, #tpu.memory_space<vmem>>, vector<1x10x16xf32>
    %1000 = vector.shape_cast %999 : vector<1x10x16xf32> to vector<10x16xf32>
    %1001 = vector.extract_strided_slice %1000 {offsets = [0, 0], sizes = [4, 16], strides = [1, 1]} : vector<10x16xf32> to vector<4x16xf32>
    %1002 = vector.broadcast %148 : f32 to vector<4x16xf32>
    %1003 = arith.mulf %1002, %1001 : vector<4x16xf32>
    %1004 = arith.addf %986, %1003 : vector<4x16xf32>
    %1005 = vector.extract_strided_slice %1000 {offsets = [1, 0], sizes = [4, 16], strides = [1, 1]} : vector<10x16xf32> to vector<4x16xf32>
    %1006 = vector.broadcast %155 : f32 to vector<4x16xf32>
    %1007 = arith.mulf %1006, %1005 : vector<4x16xf32>
    %1008 = arith.addf %990, %1007 : vector<4x16xf32>
    %1009 = vector.extract_strided_slice %1000 {offsets = [2, 0], sizes = [4, 16], strides = [1, 1]} : vector<10x16xf32> to vector<4x16xf32>
    %1010 = vector.broadcast %162 : f32 to vector<4x16xf32>
    %1011 = arith.mulf %1010, %1009 : vector<4x16xf32>
    %1012 = arith.addf %994, %1011 : vector<4x16xf32>
    %1013 = vector.extract_strided_slice %1000 {offsets = [3, 0], sizes = [4, 16], strides = [1, 1]} : vector<10x16xf32> to vector<4x16xf32>
    %1014 = vector.broadcast %169 : f32 to vector<4x16xf32>
    %1015 = arith.mulf %1014, %1013 : vector<4x16xf32>
    %1016 = arith.addf %998, %1015 : vector<4x16xf32>
    %1017 = vector.extract_strided_slice %1000 {offsets = [4, 0], sizes = [4, 16], strides = [1, 1]} : vector<10x16xf32> to vector<4x16xf32>
    %1018 = vector.broadcast %176 : f32 to vector<4x16xf32>
    %1019 = arith.mulf %1018, %1017 : vector<4x16xf32>
    %1020 = arith.addf %1004, %1019 : vector<4x16xf32>
    %1021 = vector.extract_strided_slice %1000 {offsets = [5, 0], sizes = [4, 16], strides = [1, 1]} : vector<10x16xf32> to vector<4x16xf32>
    %1022 = vector.broadcast %183 : f32 to vector<4x16xf32>
    %1023 = arith.mulf %1022, %1021 : vector<4x16xf32>
    %1024 = arith.addf %1008, %1023 : vector<4x16xf32>
    %1025 = vector.extract_strided_slice %1000 {offsets = [6, 0], sizes = [4, 16], strides = [1, 1]} : vector<10x16xf32> to vector<4x16xf32>
    %1026 = vector.broadcast %190 : f32 to vector<4x16xf32>
    %1027 = arith.mulf %1026, %1025 : vector<4x16xf32>
    %1028 = arith.addf %1012, %1027 : vector<4x16xf32>
    %c1_150 = arith.constant 1 : index
    %c0_151 = arith.constant 0 : index
    %c1_152 = arith.constant 1 : index
    %1029 = vector.load %arg5[%c1_150, %c0_151, %c1_152] : memref<2x10x22xf32, #tpu.memory_space<vmem>>, vector<1x10x16xf32>
    %1030 = vector.shape_cast %1029 : vector<1x10x16xf32> to vector<10x16xf32>
    %1031 = vector.extract_strided_slice %1030 {offsets = [0, 0], sizes = [4, 16], strides = [1, 1]} : vector<10x16xf32> to vector<4x16xf32>
    %1032 = vector.broadcast %149 : f32 to vector<4x16xf32>
    %1033 = arith.mulf %1032, %1031 : vector<4x16xf32>
    %1034 = arith.addf %1016, %1033 : vector<4x16xf32>
    %1035 = vector.extract_strided_slice %1030 {offsets = [1, 0], sizes = [4, 16], strides = [1, 1]} : vector<10x16xf32> to vector<4x16xf32>
    %1036 = vector.broadcast %156 : f32 to vector<4x16xf32>
    %1037 = arith.mulf %1036, %1035 : vector<4x16xf32>
    %1038 = arith.addf %1020, %1037 : vector<4x16xf32>
    %1039 = vector.extract_strided_slice %1030 {offsets = [2, 0], sizes = [4, 16], strides = [1, 1]} : vector<10x16xf32> to vector<4x16xf32>
    %1040 = vector.broadcast %163 : f32 to vector<4x16xf32>
    %1041 = arith.mulf %1040, %1039 : vector<4x16xf32>
    %1042 = arith.addf %1024, %1041 : vector<4x16xf32>
    %1043 = vector.extract_strided_slice %1030 {offsets = [3, 0], sizes = [4, 16], strides = [1, 1]} : vector<10x16xf32> to vector<4x16xf32>
    %1044 = vector.broadcast %170 : f32 to vector<4x16xf32>
    %1045 = arith.mulf %1044, %1043 : vector<4x16xf32>
    %1046 = arith.addf %1028, %1045 : vector<4x16xf32>
    %1047 = vector.extract_strided_slice %1030 {offsets = [4, 0], sizes = [4, 16], strides = [1, 1]} : vector<10x16xf32> to vector<4x16xf32>
    %1048 = vector.broadcast %177 : f32 to vector<4x16xf32>
    %1049 = arith.mulf %1048, %1047 : vector<4x16xf32>
    %1050 = arith.addf %1034, %1049 : vector<4x16xf32>
    %1051 = vector.extract_strided_slice %1030 {offsets = [5, 0], sizes = [4, 16], strides = [1, 1]} : vector<10x16xf32> to vector<4x16xf32>
    %1052 = vector.broadcast %184 : f32 to vector<4x16xf32>
    %1053 = arith.mulf %1052, %1051 : vector<4x16xf32>
    %1054 = arith.addf %1038, %1053 : vector<4x16xf32>
    %1055 = vector.extract_strided_slice %1030 {offsets = [6, 0], sizes = [4, 16], strides = [1, 1]} : vector<10x16xf32> to vector<4x16xf32>
    %1056 = vector.broadcast %191 : f32 to vector<4x16xf32>
    %1057 = arith.mulf %1056, %1055 : vector<4x16xf32>
    %1058 = arith.addf %1042, %1057 : vector<4x16xf32>
    %c1_153 = arith.constant 1 : index
    %c0_154 = arith.constant 0 : index
    %c2_155 = arith.constant 2 : index
    %1059 = vector.load %arg5[%c1_153, %c0_154, %c2_155] : memref<2x10x22xf32, #tpu.memory_space<vmem>>, vector<1x10x16xf32>
    %1060 = vector.shape_cast %1059 : vector<1x10x16xf32> to vector<10x16xf32>
    %1061 = vector.extract_strided_slice %1060 {offsets = [0, 0], sizes = [4, 16], strides = [1, 1]} : vector<10x16xf32> to vector<4x16xf32>
    %1062 = vector.broadcast %150 : f32 to vector<4x16xf32>
    %1063 = arith.mulf %1062, %1061 : vector<4x16xf32>
    %1064 = arith.addf %1046, %1063 : vector<4x16xf32>
    %1065 = vector.extract_strided_slice %1060 {offsets = [1, 0], sizes = [4, 16], strides = [1, 1]} : vector<10x16xf32> to vector<4x16xf32>
    %1066 = vector.broadcast %157 : f32 to vector<4x16xf32>
    %1067 = arith.mulf %1066, %1065 : vector<4x16xf32>
    %1068 = arith.addf %1050, %1067 : vector<4x16xf32>
    %1069 = vector.extract_strided_slice %1060 {offsets = [2, 0], sizes = [4, 16], strides = [1, 1]} : vector<10x16xf32> to vector<4x16xf32>
    %1070 = vector.broadcast %164 : f32 to vector<4x16xf32>
    %1071 = arith.mulf %1070, %1069 : vector<4x16xf32>
    %1072 = arith.addf %1054, %1071 : vector<4x16xf32>
    %1073 = vector.extract_strided_slice %1060 {offsets = [3, 0], sizes = [4, 16], strides = [1, 1]} : vector<10x16xf32> to vector<4x16xf32>
    %1074 = vector.broadcast %171 : f32 to vector<4x16xf32>
    %1075 = arith.mulf %1074, %1073 : vector<4x16xf32>
    %1076 = arith.addf %1058, %1075 : vector<4x16xf32>
    %1077 = vector.extract_strided_slice %1060 {offsets = [4, 0], sizes = [4, 16], strides = [1, 1]} : vector<10x16xf32> to vector<4x16xf32>
    %1078 = vector.broadcast %178 : f32 to vector<4x16xf32>
    %1079 = arith.mulf %1078, %1077 : vector<4x16xf32>
    %1080 = arith.addf %1064, %1079 : vector<4x16xf32>
    %1081 = vector.extract_strided_slice %1060 {offsets = [5, 0], sizes = [4, 16], strides = [1, 1]} : vector<10x16xf32> to vector<4x16xf32>
    %1082 = vector.broadcast %185 : f32 to vector<4x16xf32>
    %1083 = arith.mulf %1082, %1081 : vector<4x16xf32>
    %1084 = arith.addf %1068, %1083 : vector<4x16xf32>
    %1085 = vector.extract_strided_slice %1060 {offsets = [6, 0], sizes = [4, 16], strides = [1, 1]} : vector<10x16xf32> to vector<4x16xf32>
    %1086 = vector.broadcast %192 : f32 to vector<4x16xf32>
    %1087 = arith.mulf %1086, %1085 : vector<4x16xf32>
    %1088 = arith.addf %1072, %1087 : vector<4x16xf32>
    %c1_156 = arith.constant 1 : index
    %c0_157 = arith.constant 0 : index
    %c3_158 = arith.constant 3 : index
    %1089 = vector.load %arg5[%c1_156, %c0_157, %c3_158] : memref<2x10x22xf32, #tpu.memory_space<vmem>>, vector<1x10x16xf32>
    %1090 = vector.shape_cast %1089 : vector<1x10x16xf32> to vector<10x16xf32>
    %1091 = vector.extract_strided_slice %1090 {offsets = [0, 0], sizes = [4, 16], strides = [1, 1]} : vector<10x16xf32> to vector<4x16xf32>
    %1092 = vector.broadcast %151 : f32 to vector<4x16xf32>
    %1093 = arith.mulf %1092, %1091 : vector<4x16xf32>
    %1094 = arith.addf %1076, %1093 : vector<4x16xf32>
    %1095 = vector.extract_strided_slice %1090 {offsets = [1, 0], sizes = [4, 16], strides = [1, 1]} : vector<10x16xf32> to vector<4x16xf32>
    %1096 = vector.broadcast %158 : f32 to vector<4x16xf32>
    %1097 = arith.mulf %1096, %1095 : vector<4x16xf32>
    %1098 = arith.addf %1080, %1097 : vector<4x16xf32>
    %1099 = vector.extract_strided_slice %1090 {offsets = [2, 0], sizes = [4, 16], strides = [1, 1]} : vector<10x16xf32> to vector<4x16xf32>
    %1100 = vector.broadcast %165 : f32 to vector<4x16xf32>
    %1101 = arith.mulf %1100, %1099 : vector<4x16xf32>
    %1102 = arith.addf %1084, %1101 : vector<4x16xf32>
    %1103 = vector.extract_strided_slice %1090 {offsets = [3, 0], sizes = [4, 16], strides = [1, 1]} : vector<10x16xf32> to vector<4x16xf32>
    %1104 = vector.broadcast %172 : f32 to vector<4x16xf32>
    %1105 = arith.mulf %1104, %1103 : vector<4x16xf32>
    %1106 = arith.addf %1088, %1105 : vector<4x16xf32>
    %1107 = vector.extract_strided_slice %1090 {offsets = [4, 0], sizes = [4, 16], strides = [1, 1]} : vector<10x16xf32> to vector<4x16xf32>
    %1108 = vector.broadcast %179 : f32 to vector<4x16xf32>
    %1109 = arith.mulf %1108, %1107 : vector<4x16xf32>
    %1110 = arith.addf %1094, %1109 : vector<4x16xf32>
    %1111 = vector.extract_strided_slice %1090 {offsets = [5, 0], sizes = [4, 16], strides = [1, 1]} : vector<10x16xf32> to vector<4x16xf32>
    %1112 = vector.broadcast %186 : f32 to vector<4x16xf32>
    %1113 = arith.mulf %1112, %1111 : vector<4x16xf32>
    %1114 = arith.addf %1098, %1113 : vector<4x16xf32>
    %1115 = vector.extract_strided_slice %1090 {offsets = [6, 0], sizes = [4, 16], strides = [1, 1]} : vector<10x16xf32> to vector<4x16xf32>
    %1116 = vector.broadcast %193 : f32 to vector<4x16xf32>
    %1117 = arith.mulf %1116, %1115 : vector<4x16xf32>
    %1118 = arith.addf %1102, %1117 : vector<4x16xf32>
    %c1_159 = arith.constant 1 : index
    %c0_160 = arith.constant 0 : index
    %c4_161 = arith.constant 4 : index
    %1119 = vector.load %arg5[%c1_159, %c0_160, %c4_161] : memref<2x10x22xf32, #tpu.memory_space<vmem>>, vector<1x10x16xf32>
    %1120 = vector.shape_cast %1119 : vector<1x10x16xf32> to vector<10x16xf32>
    %1121 = vector.extract_strided_slice %1120 {offsets = [0, 0], sizes = [4, 16], strides = [1, 1]} : vector<10x16xf32> to vector<4x16xf32>
    %1122 = vector.broadcast %152 : f32 to vector<4x16xf32>
    %1123 = arith.mulf %1122, %1121 : vector<4x16xf32>
    %1124 = arith.addf %1106, %1123 : vector<4x16xf32>
    %1125 = vector.extract_strided_slice %1120 {offsets = [1, 0], sizes = [4, 16], strides = [1, 1]} : vector<10x16xf32> to vector<4x16xf32>
    %1126 = vector.broadcast %159 : f32 to vector<4x16xf32>
    %1127 = arith.mulf %1126, %1125 : vector<4x16xf32>
    %1128 = arith.addf %1110, %1127 : vector<4x16xf32>
    %1129 = vector.extract_strided_slice %1120 {offsets = [2, 0], sizes = [4, 16], strides = [1, 1]} : vector<10x16xf32> to vector<4x16xf32>
    %1130 = vector.broadcast %166 : f32 to vector<4x16xf32>
    %1131 = arith.mulf %1130, %1129 : vector<4x16xf32>
    %1132 = arith.addf %1114, %1131 : vector<4x16xf32>
    %1133 = vector.extract_strided_slice %1120 {offsets = [3, 0], sizes = [4, 16], strides = [1, 1]} : vector<10x16xf32> to vector<4x16xf32>
    %1134 = vector.broadcast %173 : f32 to vector<4x16xf32>
    %1135 = arith.mulf %1134, %1133 : vector<4x16xf32>
    %1136 = arith.addf %1118, %1135 : vector<4x16xf32>
    %1137 = vector.extract_strided_slice %1120 {offsets = [4, 0], sizes = [4, 16], strides = [1, 1]} : vector<10x16xf32> to vector<4x16xf32>
    %1138 = vector.broadcast %180 : f32 to vector<4x16xf32>
    %1139 = arith.mulf %1138, %1137 : vector<4x16xf32>
    %1140 = arith.addf %1124, %1139 : vector<4x16xf32>
    %1141 = vector.extract_strided_slice %1120 {offsets = [5, 0], sizes = [4, 16], strides = [1, 1]} : vector<10x16xf32> to vector<4x16xf32>
    %1142 = vector.broadcast %187 : f32 to vector<4x16xf32>
    %1143 = arith.mulf %1142, %1141 : vector<4x16xf32>
    %1144 = arith.addf %1128, %1143 : vector<4x16xf32>
    %1145 = vector.extract_strided_slice %1120 {offsets = [6, 0], sizes = [4, 16], strides = [1, 1]} : vector<10x16xf32> to vector<4x16xf32>
    %1146 = vector.broadcast %194 : f32 to vector<4x16xf32>
    %1147 = arith.mulf %1146, %1145 : vector<4x16xf32>
    %1148 = arith.addf %1132, %1147 : vector<4x16xf32>
    %c1_162 = arith.constant 1 : index
    %c0_163 = arith.constant 0 : index
    %c5_164 = arith.constant 5 : index
    %1149 = vector.load %arg5[%c1_162, %c0_163, %c5_164] : memref<2x10x22xf32, #tpu.memory_space<vmem>>, vector<1x10x16xf32>
    %1150 = vector.shape_cast %1149 : vector<1x10x16xf32> to vector<10x16xf32>
    %1151 = vector.extract_strided_slice %1150 {offsets = [0, 0], sizes = [4, 16], strides = [1, 1]} : vector<10x16xf32> to vector<4x16xf32>
    %1152 = vector.broadcast %153 : f32 to vector<4x16xf32>
    %1153 = arith.mulf %1152, %1151 : vector<4x16xf32>
    %1154 = arith.addf %1136, %1153 : vector<4x16xf32>
    %1155 = vector.extract_strided_slice %1150 {offsets = [1, 0], sizes = [4, 16], strides = [1, 1]} : vector<10x16xf32> to vector<4x16xf32>
    %1156 = vector.broadcast %160 : f32 to vector<4x16xf32>
    %1157 = arith.mulf %1156, %1155 : vector<4x16xf32>
    %1158 = arith.addf %1140, %1157 : vector<4x16xf32>
    %1159 = vector.extract_strided_slice %1150 {offsets = [2, 0], sizes = [4, 16], strides = [1, 1]} : vector<10x16xf32> to vector<4x16xf32>
    %1160 = vector.broadcast %167 : f32 to vector<4x16xf32>
    %1161 = arith.mulf %1160, %1159 : vector<4x16xf32>
    %1162 = arith.addf %1144, %1161 : vector<4x16xf32>
    %1163 = vector.extract_strided_slice %1150 {offsets = [3, 0], sizes = [4, 16], strides = [1, 1]} : vector<10x16xf32> to vector<4x16xf32>
    %1164 = vector.broadcast %174 : f32 to vector<4x16xf32>
    %1165 = arith.mulf %1164, %1163 : vector<4x16xf32>
    %1166 = arith.addf %1148, %1165 : vector<4x16xf32>
    %1167 = vector.extract_strided_slice %1150 {offsets = [4, 0], sizes = [4, 16], strides = [1, 1]} : vector<10x16xf32> to vector<4x16xf32>
    %1168 = vector.broadcast %181 : f32 to vector<4x16xf32>
    %1169 = arith.mulf %1168, %1167 : vector<4x16xf32>
    %1170 = arith.addf %1154, %1169 : vector<4x16xf32>
    %1171 = vector.extract_strided_slice %1150 {offsets = [5, 0], sizes = [4, 16], strides = [1, 1]} : vector<10x16xf32> to vector<4x16xf32>
    %1172 = vector.broadcast %188 : f32 to vector<4x16xf32>
    %1173 = arith.mulf %1172, %1171 : vector<4x16xf32>
    %1174 = arith.addf %1158, %1173 : vector<4x16xf32>
    %1175 = vector.extract_strided_slice %1150 {offsets = [6, 0], sizes = [4, 16], strides = [1, 1]} : vector<10x16xf32> to vector<4x16xf32>
    %1176 = vector.broadcast %195 : f32 to vector<4x16xf32>
    %1177 = arith.mulf %1176, %1175 : vector<4x16xf32>
    %1178 = arith.addf %1162, %1177 : vector<4x16xf32>
    %c1_165 = arith.constant 1 : index
    %c0_166 = arith.constant 0 : index
    %c6_167 = arith.constant 6 : index
    %1179 = vector.load %arg5[%c1_165, %c0_166, %c6_167] : memref<2x10x22xf32, #tpu.memory_space<vmem>>, vector<1x10x16xf32>
    %1180 = vector.shape_cast %1179 : vector<1x10x16xf32> to vector<10x16xf32>
    %1181 = vector.extract_strided_slice %1180 {offsets = [0, 0], sizes = [4, 16], strides = [1, 1]} : vector<10x16xf32> to vector<4x16xf32>
    %1182 = vector.broadcast %154 : f32 to vector<4x16xf32>
    %1183 = arith.mulf %1182, %1181 : vector<4x16xf32>
    %1184 = arith.addf %1166, %1183 : vector<4x16xf32>
    %1185 = vector.extract_strided_slice %1180 {offsets = [1, 0], sizes = [4, 16], strides = [1, 1]} : vector<10x16xf32> to vector<4x16xf32>
    %1186 = vector.broadcast %161 : f32 to vector<4x16xf32>
    %1187 = arith.mulf %1186, %1185 : vector<4x16xf32>
    %1188 = arith.addf %1170, %1187 : vector<4x16xf32>
    %1189 = vector.extract_strided_slice %1180 {offsets = [2, 0], sizes = [4, 16], strides = [1, 1]} : vector<10x16xf32> to vector<4x16xf32>
    %1190 = vector.broadcast %168 : f32 to vector<4x16xf32>
    %1191 = arith.mulf %1190, %1189 : vector<4x16xf32>
    %1192 = arith.addf %1174, %1191 : vector<4x16xf32>
    %1193 = vector.extract_strided_slice %1180 {offsets = [3, 0], sizes = [4, 16], strides = [1, 1]} : vector<10x16xf32> to vector<4x16xf32>
    %1194 = vector.broadcast %175 : f32 to vector<4x16xf32>
    %1195 = arith.mulf %1194, %1193 : vector<4x16xf32>
    %1196 = arith.addf %1178, %1195 : vector<4x16xf32>
    %1197 = vector.extract_strided_slice %1180 {offsets = [4, 0], sizes = [4, 16], strides = [1, 1]} : vector<10x16xf32> to vector<4x16xf32>
    %1198 = vector.broadcast %182 : f32 to vector<4x16xf32>
    %1199 = arith.mulf %1198, %1197 : vector<4x16xf32>
    %1200 = arith.addf %1184, %1199 : vector<4x16xf32>
    %1201 = vector.extract_strided_slice %1180 {offsets = [5, 0], sizes = [4, 16], strides = [1, 1]} : vector<10x16xf32> to vector<4x16xf32>
    %1202 = vector.broadcast %189 : f32 to vector<4x16xf32>
    %1203 = arith.mulf %1202, %1201 : vector<4x16xf32>
    %1204 = arith.addf %1188, %1203 : vector<4x16xf32>
    %1205 = vector.extract_strided_slice %1180 {offsets = [6, 0], sizes = [4, 16], strides = [1, 1]} : vector<10x16xf32> to vector<4x16xf32>
    %1206 = vector.broadcast %196 : f32 to vector<4x16xf32>
    %1207 = arith.mulf %1206, %1205 : vector<4x16xf32>
    %1208 = arith.addf %1192, %1207 : vector<4x16xf32>
    %1209 = arith.addf %1204, %1208 : vector<4x16xf32>
    %1210 = arith.addf %1196, %1200 : vector<4x16xf32>
    %1211 = arith.addf %1209, %1210 : vector<4x16xf32>
    %1212 = vector.broadcast %197 : f32 to vector<4x16xf32>
    %1213 = arith.addf %1211, %1212 : vector<4x16xf32>
    %cst_168 = arith.constant 0.000000e+00 : f32
    %1214 = vector.broadcast %cst_168 : f32 to vector<4x16xf32>
    %1215 = arith.subf %1214, %1213 : vector<4x16xf32>
    %1216 = math.exp %1215 : vector<4x16xf32>
    %cst_169 = arith.constant 1.000000e+00 : f32
    %1217 = vector.broadcast %cst_169 : f32 to vector<4x16xf32>
    %1218 = arith.addf %1217, %1216 : vector<4x16xf32>
    %cst_170 = arith.constant 1.000000e+00 : f32
    %1219 = vector.broadcast %cst_170 : f32 to vector<4x16xf32>
    %1220 = arith.divf %1219, %1218 : vector<4x16xf32>
    %cst_171 = arith.constant 0.333333343 : f32
    %1221 = vector.broadcast %cst_171 : f32 to vector<4x16xf32>
    %1222 = arith.mulf %1220, %1221 : vector<4x16xf32>
    %cst_172 = arith.constant 0.000000e+00 : f32
    %1223 = vector.broadcast %cst_172 : f32 to vector<4x16xf32>
    %cst_173 = arith.constant 0.000000e+00 : f32
    %1224 = vector.broadcast %cst_173 : f32 to vector<4x16xf32>
    %cst_174 = arith.constant 0.000000e+00 : f32
    %1225 = vector.broadcast %cst_174 : f32 to vector<4x16xf32>
    %cst_175 = arith.constant 0.000000e+00 : f32
    %1226 = vector.broadcast %cst_175 : f32 to vector<4x16xf32>
    %c0_176 = arith.constant 0 : index
    %c0_177 = arith.constant 0 : index
    %c0_178 = arith.constant 0 : index
    %1227 = vector.load %arg6[%c0_176, %c0_177, %c0_178] : memref<2x10x22xf32, #tpu.memory_space<vmem>>, vector<1x10x16xf32>
    %1228 = vector.shape_cast %1227 : vector<1x10x16xf32> to vector<10x16xf32>
    %1229 = vector.extract_strided_slice %1228 {offsets = [0, 0], sizes = [4, 16], strides = [1, 1]} : vector<10x16xf32> to vector<4x16xf32>
    %1230 = vector.broadcast %198 : f32 to vector<4x16xf32>
    %1231 = arith.mulf %1230, %1229 : vector<4x16xf32>
    %1232 = arith.addf %1223, %1231 : vector<4x16xf32>
    %1233 = vector.extract_strided_slice %1228 {offsets = [1, 0], sizes = [4, 16], strides = [1, 1]} : vector<10x16xf32> to vector<4x16xf32>
    %1234 = vector.broadcast %205 : f32 to vector<4x16xf32>
    %1235 = arith.mulf %1234, %1233 : vector<4x16xf32>
    %1236 = arith.addf %1224, %1235 : vector<4x16xf32>
    %1237 = vector.extract_strided_slice %1228 {offsets = [2, 0], sizes = [4, 16], strides = [1, 1]} : vector<10x16xf32> to vector<4x16xf32>
    %1238 = vector.broadcast %212 : f32 to vector<4x16xf32>
    %1239 = arith.mulf %1238, %1237 : vector<4x16xf32>
    %1240 = arith.addf %1225, %1239 : vector<4x16xf32>
    %1241 = vector.extract_strided_slice %1228 {offsets = [3, 0], sizes = [4, 16], strides = [1, 1]} : vector<10x16xf32> to vector<4x16xf32>
    %1242 = vector.broadcast %219 : f32 to vector<4x16xf32>
    %1243 = arith.mulf %1242, %1241 : vector<4x16xf32>
    %1244 = arith.addf %1226, %1243 : vector<4x16xf32>
    %1245 = vector.extract_strided_slice %1228 {offsets = [4, 0], sizes = [4, 16], strides = [1, 1]} : vector<10x16xf32> to vector<4x16xf32>
    %1246 = vector.broadcast %226 : f32 to vector<4x16xf32>
    %1247 = arith.mulf %1246, %1245 : vector<4x16xf32>
    %1248 = arith.addf %1232, %1247 : vector<4x16xf32>
    %1249 = vector.extract_strided_slice %1228 {offsets = [5, 0], sizes = [4, 16], strides = [1, 1]} : vector<10x16xf32> to vector<4x16xf32>
    %1250 = vector.broadcast %233 : f32 to vector<4x16xf32>
    %1251 = arith.mulf %1250, %1249 : vector<4x16xf32>
    %1252 = arith.addf %1236, %1251 : vector<4x16xf32>
    %1253 = vector.extract_strided_slice %1228 {offsets = [6, 0], sizes = [4, 16], strides = [1, 1]} : vector<10x16xf32> to vector<4x16xf32>
    %1254 = vector.broadcast %240 : f32 to vector<4x16xf32>
    %1255 = arith.mulf %1254, %1253 : vector<4x16xf32>
    %1256 = arith.addf %1240, %1255 : vector<4x16xf32>
    %c0_179 = arith.constant 0 : index
    %c0_180 = arith.constant 0 : index
    %c1_181 = arith.constant 1 : index
    %1257 = vector.load %arg6[%c0_179, %c0_180, %c1_181] : memref<2x10x22xf32, #tpu.memory_space<vmem>>, vector<1x10x16xf32>
    %1258 = vector.shape_cast %1257 : vector<1x10x16xf32> to vector<10x16xf32>
    %1259 = vector.extract_strided_slice %1258 {offsets = [0, 0], sizes = [4, 16], strides = [1, 1]} : vector<10x16xf32> to vector<4x16xf32>
    %1260 = vector.broadcast %199 : f32 to vector<4x16xf32>
    %1261 = arith.mulf %1260, %1259 : vector<4x16xf32>
    %1262 = arith.addf %1244, %1261 : vector<4x16xf32>
    %1263 = vector.extract_strided_slice %1258 {offsets = [1, 0], sizes = [4, 16], strides = [1, 1]} : vector<10x16xf32> to vector<4x16xf32>
    %1264 = vector.broadcast %206 : f32 to vector<4x16xf32>
    %1265 = arith.mulf %1264, %1263 : vector<4x16xf32>
    %1266 = arith.addf %1248, %1265 : vector<4x16xf32>
    %1267 = vector.extract_strided_slice %1258 {offsets = [2, 0], sizes = [4, 16], strides = [1, 1]} : vector<10x16xf32> to vector<4x16xf32>
    %1268 = vector.broadcast %213 : f32 to vector<4x16xf32>
    %1269 = arith.mulf %1268, %1267 : vector<4x16xf32>
    %1270 = arith.addf %1252, %1269 : vector<4x16xf32>
    %1271 = vector.extract_strided_slice %1258 {offsets = [3, 0], sizes = [4, 16], strides = [1, 1]} : vector<10x16xf32> to vector<4x16xf32>
    %1272 = vector.broadcast %220 : f32 to vector<4x16xf32>
    %1273 = arith.mulf %1272, %1271 : vector<4x16xf32>
    %1274 = arith.addf %1256, %1273 : vector<4x16xf32>
    %1275 = vector.extract_strided_slice %1258 {offsets = [4, 0], sizes = [4, 16], strides = [1, 1]} : vector<10x16xf32> to vector<4x16xf32>
    %1276 = vector.broadcast %227 : f32 to vector<4x16xf32>
    %1277 = arith.mulf %1276, %1275 : vector<4x16xf32>
    %1278 = arith.addf %1262, %1277 : vector<4x16xf32>
    %1279 = vector.extract_strided_slice %1258 {offsets = [5, 0], sizes = [4, 16], strides = [1, 1]} : vector<10x16xf32> to vector<4x16xf32>
    %1280 = vector.broadcast %234 : f32 to vector<4x16xf32>
    %1281 = arith.mulf %1280, %1279 : vector<4x16xf32>
    %1282 = arith.addf %1266, %1281 : vector<4x16xf32>
    %1283 = vector.extract_strided_slice %1258 {offsets = [6, 0], sizes = [4, 16], strides = [1, 1]} : vector<10x16xf32> to vector<4x16xf32>
    %1284 = vector.broadcast %241 : f32 to vector<4x16xf32>
    %1285 = arith.mulf %1284, %1283 : vector<4x16xf32>
    %1286 = arith.addf %1270, %1285 : vector<4x16xf32>
    %c0_182 = arith.constant 0 : index
    %c0_183 = arith.constant 0 : index
    %c2_184 = arith.constant 2 : index
    %1287 = vector.load %arg6[%c0_182, %c0_183, %c2_184] : memref<2x10x22xf32, #tpu.memory_space<vmem>>, vector<1x10x16xf32>
    %1288 = vector.shape_cast %1287 : vector<1x10x16xf32> to vector<10x16xf32>
    %1289 = vector.extract_strided_slice %1288 {offsets = [0, 0], sizes = [4, 16], strides = [1, 1]} : vector<10x16xf32> to vector<4x16xf32>
    %1290 = vector.broadcast %200 : f32 to vector<4x16xf32>
    %1291 = arith.mulf %1290, %1289 : vector<4x16xf32>
    %1292 = arith.addf %1274, %1291 : vector<4x16xf32>
    %1293 = vector.extract_strided_slice %1288 {offsets = [1, 0], sizes = [4, 16], strides = [1, 1]} : vector<10x16xf32> to vector<4x16xf32>
    %1294 = vector.broadcast %207 : f32 to vector<4x16xf32>
    %1295 = arith.mulf %1294, %1293 : vector<4x16xf32>
    %1296 = arith.addf %1278, %1295 : vector<4x16xf32>
    %1297 = vector.extract_strided_slice %1288 {offsets = [2, 0], sizes = [4, 16], strides = [1, 1]} : vector<10x16xf32> to vector<4x16xf32>
    %1298 = vector.broadcast %214 : f32 to vector<4x16xf32>
    %1299 = arith.mulf %1298, %1297 : vector<4x16xf32>
    %1300 = arith.addf %1282, %1299 : vector<4x16xf32>
    %1301 = vector.extract_strided_slice %1288 {offsets = [3, 0], sizes = [4, 16], strides = [1, 1]} : vector<10x16xf32> to vector<4x16xf32>
    %1302 = vector.broadcast %221 : f32 to vector<4x16xf32>
    %1303 = arith.mulf %1302, %1301 : vector<4x16xf32>
    %1304 = arith.addf %1286, %1303 : vector<4x16xf32>
    %1305 = vector.extract_strided_slice %1288 {offsets = [4, 0], sizes = [4, 16], strides = [1, 1]} : vector<10x16xf32> to vector<4x16xf32>
    %1306 = vector.broadcast %228 : f32 to vector<4x16xf32>
    %1307 = arith.mulf %1306, %1305 : vector<4x16xf32>
    %1308 = arith.addf %1292, %1307 : vector<4x16xf32>
    %1309 = vector.extract_strided_slice %1288 {offsets = [5, 0], sizes = [4, 16], strides = [1, 1]} : vector<10x16xf32> to vector<4x16xf32>
    %1310 = vector.broadcast %235 : f32 to vector<4x16xf32>
    %1311 = arith.mulf %1310, %1309 : vector<4x16xf32>
    %1312 = arith.addf %1296, %1311 : vector<4x16xf32>
    %1313 = vector.extract_strided_slice %1288 {offsets = [6, 0], sizes = [4, 16], strides = [1, 1]} : vector<10x16xf32> to vector<4x16xf32>
    %1314 = vector.broadcast %242 : f32 to vector<4x16xf32>
    %1315 = arith.mulf %1314, %1313 : vector<4x16xf32>
    %1316 = arith.addf %1300, %1315 : vector<4x16xf32>
    %c0_185 = arith.constant 0 : index
    %c0_186 = arith.constant 0 : index
    %c3_187 = arith.constant 3 : index
    %1317 = vector.load %arg6[%c0_185, %c0_186, %c3_187] : memref<2x10x22xf32, #tpu.memory_space<vmem>>, vector<1x10x16xf32>
    %1318 = vector.shape_cast %1317 : vector<1x10x16xf32> to vector<10x16xf32>
    %1319 = vector.extract_strided_slice %1318 {offsets = [0, 0], sizes = [4, 16], strides = [1, 1]} : vector<10x16xf32> to vector<4x16xf32>
    %1320 = vector.broadcast %201 : f32 to vector<4x16xf32>
    %1321 = arith.mulf %1320, %1319 : vector<4x16xf32>
    %1322 = arith.addf %1304, %1321 : vector<4x16xf32>
    %1323 = vector.extract_strided_slice %1318 {offsets = [1, 0], sizes = [4, 16], strides = [1, 1]} : vector<10x16xf32> to vector<4x16xf32>
    %1324 = vector.broadcast %208 : f32 to vector<4x16xf32>
    %1325 = arith.mulf %1324, %1323 : vector<4x16xf32>
    %1326 = arith.addf %1308, %1325 : vector<4x16xf32>
    %1327 = vector.extract_strided_slice %1318 {offsets = [2, 0], sizes = [4, 16], strides = [1, 1]} : vector<10x16xf32> to vector<4x16xf32>
    %1328 = vector.broadcast %215 : f32 to vector<4x16xf32>
    %1329 = arith.mulf %1328, %1327 : vector<4x16xf32>
    %1330 = arith.addf %1312, %1329 : vector<4x16xf32>
    %1331 = vector.extract_strided_slice %1318 {offsets = [3, 0], sizes = [4, 16], strides = [1, 1]} : vector<10x16xf32> to vector<4x16xf32>
    %1332 = vector.broadcast %222 : f32 to vector<4x16xf32>
    %1333 = arith.mulf %1332, %1331 : vector<4x16xf32>
    %1334 = arith.addf %1316, %1333 : vector<4x16xf32>
    %1335 = vector.extract_strided_slice %1318 {offsets = [4, 0], sizes = [4, 16], strides = [1, 1]} : vector<10x16xf32> to vector<4x16xf32>
    %1336 = vector.broadcast %229 : f32 to vector<4x16xf32>
    %1337 = arith.mulf %1336, %1335 : vector<4x16xf32>
    %1338 = arith.addf %1322, %1337 : vector<4x16xf32>
    %1339 = vector.extract_strided_slice %1318 {offsets = [5, 0], sizes = [4, 16], strides = [1, 1]} : vector<10x16xf32> to vector<4x16xf32>
    %1340 = vector.broadcast %236 : f32 to vector<4x16xf32>
    %1341 = arith.mulf %1340, %1339 : vector<4x16xf32>
    %1342 = arith.addf %1326, %1341 : vector<4x16xf32>
    %1343 = vector.extract_strided_slice %1318 {offsets = [6, 0], sizes = [4, 16], strides = [1, 1]} : vector<10x16xf32> to vector<4x16xf32>
    %1344 = vector.broadcast %243 : f32 to vector<4x16xf32>
    %1345 = arith.mulf %1344, %1343 : vector<4x16xf32>
    %1346 = arith.addf %1330, %1345 : vector<4x16xf32>
    %c0_188 = arith.constant 0 : index
    %c0_189 = arith.constant 0 : index
    %c4_190 = arith.constant 4 : index
    %1347 = vector.load %arg6[%c0_188, %c0_189, %c4_190] : memref<2x10x22xf32, #tpu.memory_space<vmem>>, vector<1x10x16xf32>
    %1348 = vector.shape_cast %1347 : vector<1x10x16xf32> to vector<10x16xf32>
    %1349 = vector.extract_strided_slice %1348 {offsets = [0, 0], sizes = [4, 16], strides = [1, 1]} : vector<10x16xf32> to vector<4x16xf32>
    %1350 = vector.broadcast %202 : f32 to vector<4x16xf32>
    %1351 = arith.mulf %1350, %1349 : vector<4x16xf32>
    %1352 = arith.addf %1334, %1351 : vector<4x16xf32>
    %1353 = vector.extract_strided_slice %1348 {offsets = [1, 0], sizes = [4, 16], strides = [1, 1]} : vector<10x16xf32> to vector<4x16xf32>
    %1354 = vector.broadcast %209 : f32 to vector<4x16xf32>
    %1355 = arith.mulf %1354, %1353 : vector<4x16xf32>
    %1356 = arith.addf %1338, %1355 : vector<4x16xf32>
    %1357 = vector.extract_strided_slice %1348 {offsets = [2, 0], sizes = [4, 16], strides = [1, 1]} : vector<10x16xf32> to vector<4x16xf32>
    %1358 = vector.broadcast %216 : f32 to vector<4x16xf32>
    %1359 = arith.mulf %1358, %1357 : vector<4x16xf32>
    %1360 = arith.addf %1342, %1359 : vector<4x16xf32>
    %1361 = vector.extract_strided_slice %1348 {offsets = [3, 0], sizes = [4, 16], strides = [1, 1]} : vector<10x16xf32> to vector<4x16xf32>
    %1362 = vector.broadcast %223 : f32 to vector<4x16xf32>
    %1363 = arith.mulf %1362, %1361 : vector<4x16xf32>
    %1364 = arith.addf %1346, %1363 : vector<4x16xf32>
    %1365 = vector.extract_strided_slice %1348 {offsets = [4, 0], sizes = [4, 16], strides = [1, 1]} : vector<10x16xf32> to vector<4x16xf32>
    %1366 = vector.broadcast %230 : f32 to vector<4x16xf32>
    %1367 = arith.mulf %1366, %1365 : vector<4x16xf32>
    %1368 = arith.addf %1352, %1367 : vector<4x16xf32>
    %1369 = vector.extract_strided_slice %1348 {offsets = [5, 0], sizes = [4, 16], strides = [1, 1]} : vector<10x16xf32> to vector<4x16xf32>
    %1370 = vector.broadcast %237 : f32 to vector<4x16xf32>
    %1371 = arith.mulf %1370, %1369 : vector<4x16xf32>
    %1372 = arith.addf %1356, %1371 : vector<4x16xf32>
    %1373 = vector.extract_strided_slice %1348 {offsets = [6, 0], sizes = [4, 16], strides = [1, 1]} : vector<10x16xf32> to vector<4x16xf32>
    %1374 = vector.broadcast %244 : f32 to vector<4x16xf32>
    %1375 = arith.mulf %1374, %1373 : vector<4x16xf32>
    %1376 = arith.addf %1360, %1375 : vector<4x16xf32>
    %c0_191 = arith.constant 0 : index
    %c0_192 = arith.constant 0 : index
    %c5_193 = arith.constant 5 : index
    %1377 = vector.load %arg6[%c0_191, %c0_192, %c5_193] : memref<2x10x22xf32, #tpu.memory_space<vmem>>, vector<1x10x16xf32>
    %1378 = vector.shape_cast %1377 : vector<1x10x16xf32> to vector<10x16xf32>
    %1379 = vector.extract_strided_slice %1378 {offsets = [0, 0], sizes = [4, 16], strides = [1, 1]} : vector<10x16xf32> to vector<4x16xf32>
    %1380 = vector.broadcast %203 : f32 to vector<4x16xf32>
    %1381 = arith.mulf %1380, %1379 : vector<4x16xf32>
    %1382 = arith.addf %1364, %1381 : vector<4x16xf32>
    %1383 = vector.extract_strided_slice %1378 {offsets = [1, 0], sizes = [4, 16], strides = [1, 1]} : vector<10x16xf32> to vector<4x16xf32>
    %1384 = vector.broadcast %210 : f32 to vector<4x16xf32>
    %1385 = arith.mulf %1384, %1383 : vector<4x16xf32>
    %1386 = arith.addf %1368, %1385 : vector<4x16xf32>
    %1387 = vector.extract_strided_slice %1378 {offsets = [2, 0], sizes = [4, 16], strides = [1, 1]} : vector<10x16xf32> to vector<4x16xf32>
    %1388 = vector.broadcast %217 : f32 to vector<4x16xf32>
    %1389 = arith.mulf %1388, %1387 : vector<4x16xf32>
    %1390 = arith.addf %1372, %1389 : vector<4x16xf32>
    %1391 = vector.extract_strided_slice %1378 {offsets = [3, 0], sizes = [4, 16], strides = [1, 1]} : vector<10x16xf32> to vector<4x16xf32>
    %1392 = vector.broadcast %224 : f32 to vector<4x16xf32>
    %1393 = arith.mulf %1392, %1391 : vector<4x16xf32>
    %1394 = arith.addf %1376, %1393 : vector<4x16xf32>
    %1395 = vector.extract_strided_slice %1378 {offsets = [4, 0], sizes = [4, 16], strides = [1, 1]} : vector<10x16xf32> to vector<4x16xf32>
    %1396 = vector.broadcast %231 : f32 to vector<4x16xf32>
    %1397 = arith.mulf %1396, %1395 : vector<4x16xf32>
    %1398 = arith.addf %1382, %1397 : vector<4x16xf32>
    %1399 = vector.extract_strided_slice %1378 {offsets = [5, 0], sizes = [4, 16], strides = [1, 1]} : vector<10x16xf32> to vector<4x16xf32>
    %1400 = vector.broadcast %238 : f32 to vector<4x16xf32>
    %1401 = arith.mulf %1400, %1399 : vector<4x16xf32>
    %1402 = arith.addf %1386, %1401 : vector<4x16xf32>
    %1403 = vector.extract_strided_slice %1378 {offsets = [6, 0], sizes = [4, 16], strides = [1, 1]} : vector<10x16xf32> to vector<4x16xf32>
    %1404 = vector.broadcast %245 : f32 to vector<4x16xf32>
    %1405 = arith.mulf %1404, %1403 : vector<4x16xf32>
    %1406 = arith.addf %1390, %1405 : vector<4x16xf32>
    %c0_194 = arith.constant 0 : index
    %c0_195 = arith.constant 0 : index
    %c6_196 = arith.constant 6 : index
    %1407 = vector.load %arg6[%c0_194, %c0_195, %c6_196] : memref<2x10x22xf32, #tpu.memory_space<vmem>>, vector<1x10x16xf32>
    %1408 = vector.shape_cast %1407 : vector<1x10x16xf32> to vector<10x16xf32>
    %1409 = vector.extract_strided_slice %1408 {offsets = [0, 0], sizes = [4, 16], strides = [1, 1]} : vector<10x16xf32> to vector<4x16xf32>
    %1410 = vector.broadcast %204 : f32 to vector<4x16xf32>
    %1411 = arith.mulf %1410, %1409 : vector<4x16xf32>
    %1412 = arith.addf %1394, %1411 : vector<4x16xf32>
    %1413 = vector.extract_strided_slice %1408 {offsets = [1, 0], sizes = [4, 16], strides = [1, 1]} : vector<10x16xf32> to vector<4x16xf32>
    %1414 = vector.broadcast %211 : f32 to vector<4x16xf32>
    %1415 = arith.mulf %1414, %1413 : vector<4x16xf32>
    %1416 = arith.addf %1398, %1415 : vector<4x16xf32>
    %1417 = vector.extract_strided_slice %1408 {offsets = [2, 0], sizes = [4, 16], strides = [1, 1]} : vector<10x16xf32> to vector<4x16xf32>
    %1418 = vector.broadcast %218 : f32 to vector<4x16xf32>
    %1419 = arith.mulf %1418, %1417 : vector<4x16xf32>
    %1420 = arith.addf %1402, %1419 : vector<4x16xf32>
    %1421 = vector.extract_strided_slice %1408 {offsets = [3, 0], sizes = [4, 16], strides = [1, 1]} : vector<10x16xf32> to vector<4x16xf32>
    %1422 = vector.broadcast %225 : f32 to vector<4x16xf32>
    %1423 = arith.mulf %1422, %1421 : vector<4x16xf32>
    %1424 = arith.addf %1406, %1423 : vector<4x16xf32>
    %1425 = vector.extract_strided_slice %1408 {offsets = [4, 0], sizes = [4, 16], strides = [1, 1]} : vector<10x16xf32> to vector<4x16xf32>
    %1426 = vector.broadcast %232 : f32 to vector<4x16xf32>
    %1427 = arith.mulf %1426, %1425 : vector<4x16xf32>
    %1428 = arith.addf %1412, %1427 : vector<4x16xf32>
    %1429 = vector.extract_strided_slice %1408 {offsets = [5, 0], sizes = [4, 16], strides = [1, 1]} : vector<10x16xf32> to vector<4x16xf32>
    %1430 = vector.broadcast %239 : f32 to vector<4x16xf32>
    %1431 = arith.mulf %1430, %1429 : vector<4x16xf32>
    %1432 = arith.addf %1416, %1431 : vector<4x16xf32>
    %1433 = vector.extract_strided_slice %1408 {offsets = [6, 0], sizes = [4, 16], strides = [1, 1]} : vector<10x16xf32> to vector<4x16xf32>
    %1434 = vector.broadcast %246 : f32 to vector<4x16xf32>
    %1435 = arith.mulf %1434, %1433 : vector<4x16xf32>
    %1436 = arith.addf %1420, %1435 : vector<4x16xf32>
    %c1_197 = arith.constant 1 : index
    %c0_198 = arith.constant 0 : index
    %c0_199 = arith.constant 0 : index
    %1437 = vector.load %arg6[%c1_197, %c0_198, %c0_199] : memref<2x10x22xf32, #tpu.memory_space<vmem>>, vector<1x10x16xf32>
    %1438 = vector.shape_cast %1437 : vector<1x10x16xf32> to vector<10x16xf32>
    %1439 = vector.extract_strided_slice %1438 {offsets = [0, 0], sizes = [4, 16], strides = [1, 1]} : vector<10x16xf32> to vector<4x16xf32>
    %1440 = vector.broadcast %247 : f32 to vector<4x16xf32>
    %1441 = arith.mulf %1440, %1439 : vector<4x16xf32>
    %1442 = arith.addf %1424, %1441 : vector<4x16xf32>
    %1443 = vector.extract_strided_slice %1438 {offsets = [1, 0], sizes = [4, 16], strides = [1, 1]} : vector<10x16xf32> to vector<4x16xf32>
    %1444 = vector.broadcast %254 : f32 to vector<4x16xf32>
    %1445 = arith.mulf %1444, %1443 : vector<4x16xf32>
    %1446 = arith.addf %1428, %1445 : vector<4x16xf32>
    %1447 = vector.extract_strided_slice %1438 {offsets = [2, 0], sizes = [4, 16], strides = [1, 1]} : vector<10x16xf32> to vector<4x16xf32>
    %1448 = vector.broadcast %261 : f32 to vector<4x16xf32>
    %1449 = arith.mulf %1448, %1447 : vector<4x16xf32>
    %1450 = arith.addf %1432, %1449 : vector<4x16xf32>
    %1451 = vector.extract_strided_slice %1438 {offsets = [3, 0], sizes = [4, 16], strides = [1, 1]} : vector<10x16xf32> to vector<4x16xf32>
    %1452 = vector.broadcast %268 : f32 to vector<4x16xf32>
    %1453 = arith.mulf %1452, %1451 : vector<4x16xf32>
    %1454 = arith.addf %1436, %1453 : vector<4x16xf32>
    %1455 = vector.extract_strided_slice %1438 {offsets = [4, 0], sizes = [4, 16], strides = [1, 1]} : vector<10x16xf32> to vector<4x16xf32>
    %1456 = vector.broadcast %275 : f32 to vector<4x16xf32>
    %1457 = arith.mulf %1456, %1455 : vector<4x16xf32>
    %1458 = arith.addf %1442, %1457 : vector<4x16xf32>
    %1459 = vector.extract_strided_slice %1438 {offsets = [5, 0], sizes = [4, 16], strides = [1, 1]} : vector<10x16xf32> to vector<4x16xf32>
    %1460 = vector.broadcast %282 : f32 to vector<4x16xf32>
    %1461 = arith.mulf %1460, %1459 : vector<4x16xf32>
    %1462 = arith.addf %1446, %1461 : vector<4x16xf32>
    %1463 = vector.extract_strided_slice %1438 {offsets = [6, 0], sizes = [4, 16], strides = [1, 1]} : vector<10x16xf32> to vector<4x16xf32>
    %1464 = vector.broadcast %289 : f32 to vector<4x16xf32>
    %1465 = arith.mulf %1464, %1463 : vector<4x16xf32>
    %1466 = arith.addf %1450, %1465 : vector<4x16xf32>
    %c1_200 = arith.constant 1 : index
    %c0_201 = arith.constant 0 : index
    %c1_202 = arith.constant 1 : index
    %1467 = vector.load %arg6[%c1_200, %c0_201, %c1_202] : memref<2x10x22xf32, #tpu.memory_space<vmem>>, vector<1x10x16xf32>
    %1468 = vector.shape_cast %1467 : vector<1x10x16xf32> to vector<10x16xf32>
    %1469 = vector.extract_strided_slice %1468 {offsets = [0, 0], sizes = [4, 16], strides = [1, 1]} : vector<10x16xf32> to vector<4x16xf32>
    %1470 = vector.broadcast %248 : f32 to vector<4x16xf32>
    %1471 = arith.mulf %1470, %1469 : vector<4x16xf32>
    %1472 = arith.addf %1454, %1471 : vector<4x16xf32>
    %1473 = vector.extract_strided_slice %1468 {offsets = [1, 0], sizes = [4, 16], strides = [1, 1]} : vector<10x16xf32> to vector<4x16xf32>
    %1474 = vector.broadcast %255 : f32 to vector<4x16xf32>
    %1475 = arith.mulf %1474, %1473 : vector<4x16xf32>
    %1476 = arith.addf %1458, %1475 : vector<4x16xf32>
    %1477 = vector.extract_strided_slice %1468 {offsets = [2, 0], sizes = [4, 16], strides = [1, 1]} : vector<10x16xf32> to vector<4x16xf32>
    %1478 = vector.broadcast %262 : f32 to vector<4x16xf32>
    %1479 = arith.mulf %1478, %1477 : vector<4x16xf32>
    %1480 = arith.addf %1462, %1479 : vector<4x16xf32>
    %1481 = vector.extract_strided_slice %1468 {offsets = [3, 0], sizes = [4, 16], strides = [1, 1]} : vector<10x16xf32> to vector<4x16xf32>
    %1482 = vector.broadcast %269 : f32 to vector<4x16xf32>
    %1483 = arith.mulf %1482, %1481 : vector<4x16xf32>
    %1484 = arith.addf %1466, %1483 : vector<4x16xf32>
    %1485 = vector.extract_strided_slice %1468 {offsets = [4, 0], sizes = [4, 16], strides = [1, 1]} : vector<10x16xf32> to vector<4x16xf32>
    %1486 = vector.broadcast %276 : f32 to vector<4x16xf32>
    %1487 = arith.mulf %1486, %1485 : vector<4x16xf32>
    %1488 = arith.addf %1472, %1487 : vector<4x16xf32>
    %1489 = vector.extract_strided_slice %1468 {offsets = [5, 0], sizes = [4, 16], strides = [1, 1]} : vector<10x16xf32> to vector<4x16xf32>
    %1490 = vector.broadcast %283 : f32 to vector<4x16xf32>
    %1491 = arith.mulf %1490, %1489 : vector<4x16xf32>
    %1492 = arith.addf %1476, %1491 : vector<4x16xf32>
    %1493 = vector.extract_strided_slice %1468 {offsets = [6, 0], sizes = [4, 16], strides = [1, 1]} : vector<10x16xf32> to vector<4x16xf32>
    %1494 = vector.broadcast %290 : f32 to vector<4x16xf32>
    %1495 = arith.mulf %1494, %1493 : vector<4x16xf32>
    %1496 = arith.addf %1480, %1495 : vector<4x16xf32>
    %c1_203 = arith.constant 1 : index
    %c0_204 = arith.constant 0 : index
    %c2_205 = arith.constant 2 : index
    %1497 = vector.load %arg6[%c1_203, %c0_204, %c2_205] : memref<2x10x22xf32, #tpu.memory_space<vmem>>, vector<1x10x16xf32>
    %1498 = vector.shape_cast %1497 : vector<1x10x16xf32> to vector<10x16xf32>
    %1499 = vector.extract_strided_slice %1498 {offsets = [0, 0], sizes = [4, 16], strides = [1, 1]} : vector<10x16xf32> to vector<4x16xf32>
    %1500 = vector.broadcast %249 : f32 to vector<4x16xf32>
    %1501 = arith.mulf %1500, %1499 : vector<4x16xf32>
    %1502 = arith.addf %1484, %1501 : vector<4x16xf32>
    %1503 = vector.extract_strided_slice %1498 {offsets = [1, 0], sizes = [4, 16], strides = [1, 1]} : vector<10x16xf32> to vector<4x16xf32>
    %1504 = vector.broadcast %256 : f32 to vector<4x16xf32>
    %1505 = arith.mulf %1504, %1503 : vector<4x16xf32>
    %1506 = arith.addf %1488, %1505 : vector<4x16xf32>
    %1507 = vector.extract_strided_slice %1498 {offsets = [2, 0], sizes = [4, 16], strides = [1, 1]} : vector<10x16xf32> to vector<4x16xf32>
    %1508 = vector.broadcast %263 : f32 to vector<4x16xf32>
    %1509 = arith.mulf %1508, %1507 : vector<4x16xf32>
    %1510 = arith.addf %1492, %1509 : vector<4x16xf32>
    %1511 = vector.extract_strided_slice %1498 {offsets = [3, 0], sizes = [4, 16], strides = [1, 1]} : vector<10x16xf32> to vector<4x16xf32>
    %1512 = vector.broadcast %270 : f32 to vector<4x16xf32>
    %1513 = arith.mulf %1512, %1511 : vector<4x16xf32>
    %1514 = arith.addf %1496, %1513 : vector<4x16xf32>
    %1515 = vector.extract_strided_slice %1498 {offsets = [4, 0], sizes = [4, 16], strides = [1, 1]} : vector<10x16xf32> to vector<4x16xf32>
    %1516 = vector.broadcast %277 : f32 to vector<4x16xf32>
    %1517 = arith.mulf %1516, %1515 : vector<4x16xf32>
    %1518 = arith.addf %1502, %1517 : vector<4x16xf32>
    %1519 = vector.extract_strided_slice %1498 {offsets = [5, 0], sizes = [4, 16], strides = [1, 1]} : vector<10x16xf32> to vector<4x16xf32>
    %1520 = vector.broadcast %284 : f32 to vector<4x16xf32>
    %1521 = arith.mulf %1520, %1519 : vector<4x16xf32>
    %1522 = arith.addf %1506, %1521 : vector<4x16xf32>
    %1523 = vector.extract_strided_slice %1498 {offsets = [6, 0], sizes = [4, 16], strides = [1, 1]} : vector<10x16xf32> to vector<4x16xf32>
    %1524 = vector.broadcast %291 : f32 to vector<4x16xf32>
    %1525 = arith.mulf %1524, %1523 : vector<4x16xf32>
    %1526 = arith.addf %1510, %1525 : vector<4x16xf32>
    %c1_206 = arith.constant 1 : index
    %c0_207 = arith.constant 0 : index
    %c3_208 = arith.constant 3 : index
    %1527 = vector.load %arg6[%c1_206, %c0_207, %c3_208] : memref<2x10x22xf32, #tpu.memory_space<vmem>>, vector<1x10x16xf32>
    %1528 = vector.shape_cast %1527 : vector<1x10x16xf32> to vector<10x16xf32>
    %1529 = vector.extract_strided_slice %1528 {offsets = [0, 0], sizes = [4, 16], strides = [1, 1]} : vector<10x16xf32> to vector<4x16xf32>
    %1530 = vector.broadcast %250 : f32 to vector<4x16xf32>
    %1531 = arith.mulf %1530, %1529 : vector<4x16xf32>
    %1532 = arith.addf %1514, %1531 : vector<4x16xf32>
    %1533 = vector.extract_strided_slice %1528 {offsets = [1, 0], sizes = [4, 16], strides = [1, 1]} : vector<10x16xf32> to vector<4x16xf32>
    %1534 = vector.broadcast %257 : f32 to vector<4x16xf32>
    %1535 = arith.mulf %1534, %1533 : vector<4x16xf32>
    %1536 = arith.addf %1518, %1535 : vector<4x16xf32>
    %1537 = vector.extract_strided_slice %1528 {offsets = [2, 0], sizes = [4, 16], strides = [1, 1]} : vector<10x16xf32> to vector<4x16xf32>
    %1538 = vector.broadcast %264 : f32 to vector<4x16xf32>
    %1539 = arith.mulf %1538, %1537 : vector<4x16xf32>
    %1540 = arith.addf %1522, %1539 : vector<4x16xf32>
    %1541 = vector.extract_strided_slice %1528 {offsets = [3, 0], sizes = [4, 16], strides = [1, 1]} : vector<10x16xf32> to vector<4x16xf32>
    %1542 = vector.broadcast %271 : f32 to vector<4x16xf32>
    %1543 = arith.mulf %1542, %1541 : vector<4x16xf32>
    %1544 = arith.addf %1526, %1543 : vector<4x16xf32>
    %1545 = vector.extract_strided_slice %1528 {offsets = [4, 0], sizes = [4, 16], strides = [1, 1]} : vector<10x16xf32> to vector<4x16xf32>
    %1546 = vector.broadcast %278 : f32 to vector<4x16xf32>
    %1547 = arith.mulf %1546, %1545 : vector<4x16xf32>
    %1548 = arith.addf %1532, %1547 : vector<4x16xf32>
    %1549 = vector.extract_strided_slice %1528 {offsets = [5, 0], sizes = [4, 16], strides = [1, 1]} : vector<10x16xf32> to vector<4x16xf32>
    %1550 = vector.broadcast %285 : f32 to vector<4x16xf32>
    %1551 = arith.mulf %1550, %1549 : vector<4x16xf32>
    %1552 = arith.addf %1536, %1551 : vector<4x16xf32>
    %1553 = vector.extract_strided_slice %1528 {offsets = [6, 0], sizes = [4, 16], strides = [1, 1]} : vector<10x16xf32> to vector<4x16xf32>
    %1554 = vector.broadcast %292 : f32 to vector<4x16xf32>
    %1555 = arith.mulf %1554, %1553 : vector<4x16xf32>
    %1556 = arith.addf %1540, %1555 : vector<4x16xf32>
    %c1_209 = arith.constant 1 : index
    %c0_210 = arith.constant 0 : index
    %c4_211 = arith.constant 4 : index
    %1557 = vector.load %arg6[%c1_209, %c0_210, %c4_211] : memref<2x10x22xf32, #tpu.memory_space<vmem>>, vector<1x10x16xf32>
    %1558 = vector.shape_cast %1557 : vector<1x10x16xf32> to vector<10x16xf32>
    %1559 = vector.extract_strided_slice %1558 {offsets = [0, 0], sizes = [4, 16], strides = [1, 1]} : vector<10x16xf32> to vector<4x16xf32>
    %1560 = vector.broadcast %251 : f32 to vector<4x16xf32>
    %1561 = arith.mulf %1560, %1559 : vector<4x16xf32>
    %1562 = arith.addf %1544, %1561 : vector<4x16xf32>
    %1563 = vector.extract_strided_slice %1558 {offsets = [1, 0], sizes = [4, 16], strides = [1, 1]} : vector<10x16xf32> to vector<4x16xf32>
    %1564 = vector.broadcast %258 : f32 to vector<4x16xf32>
    %1565 = arith.mulf %1564, %1563 : vector<4x16xf32>
    %1566 = arith.addf %1548, %1565 : vector<4x16xf32>
    %1567 = vector.extract_strided_slice %1558 {offsets = [2, 0], sizes = [4, 16], strides = [1, 1]} : vector<10x16xf32> to vector<4x16xf32>
    %1568 = vector.broadcast %265 : f32 to vector<4x16xf32>
    %1569 = arith.mulf %1568, %1567 : vector<4x16xf32>
    %1570 = arith.addf %1552, %1569 : vector<4x16xf32>
    %1571 = vector.extract_strided_slice %1558 {offsets = [3, 0], sizes = [4, 16], strides = [1, 1]} : vector<10x16xf32> to vector<4x16xf32>
    %1572 = vector.broadcast %272 : f32 to vector<4x16xf32>
    %1573 = arith.mulf %1572, %1571 : vector<4x16xf32>
    %1574 = arith.addf %1556, %1573 : vector<4x16xf32>
    %1575 = vector.extract_strided_slice %1558 {offsets = [4, 0], sizes = [4, 16], strides = [1, 1]} : vector<10x16xf32> to vector<4x16xf32>
    %1576 = vector.broadcast %279 : f32 to vector<4x16xf32>
    %1577 = arith.mulf %1576, %1575 : vector<4x16xf32>
    %1578 = arith.addf %1562, %1577 : vector<4x16xf32>
    %1579 = vector.extract_strided_slice %1558 {offsets = [5, 0], sizes = [4, 16], strides = [1, 1]} : vector<10x16xf32> to vector<4x16xf32>
    %1580 = vector.broadcast %286 : f32 to vector<4x16xf32>
    %1581 = arith.mulf %1580, %1579 : vector<4x16xf32>
    %1582 = arith.addf %1566, %1581 : vector<4x16xf32>
    %1583 = vector.extract_strided_slice %1558 {offsets = [6, 0], sizes = [4, 16], strides = [1, 1]} : vector<10x16xf32> to vector<4x16xf32>
    %1584 = vector.broadcast %293 : f32 to vector<4x16xf32>
    %1585 = arith.mulf %1584, %1583 : vector<4x16xf32>
    %1586 = arith.addf %1570, %1585 : vector<4x16xf32>
    %c1_212 = arith.constant 1 : index
    %c0_213 = arith.constant 0 : index
    %c5_214 = arith.constant 5 : index
    %1587 = vector.load %arg6[%c1_212, %c0_213, %c5_214] : memref<2x10x22xf32, #tpu.memory_space<vmem>>, vector<1x10x16xf32>
    %1588 = vector.shape_cast %1587 : vector<1x10x16xf32> to vector<10x16xf32>
    %1589 = vector.extract_strided_slice %1588 {offsets = [0, 0], sizes = [4, 16], strides = [1, 1]} : vector<10x16xf32> to vector<4x16xf32>
    %1590 = vector.broadcast %252 : f32 to vector<4x16xf32>
    %1591 = arith.mulf %1590, %1589 : vector<4x16xf32>
    %1592 = arith.addf %1574, %1591 : vector<4x16xf32>
    %1593 = vector.extract_strided_slice %1588 {offsets = [1, 0], sizes = [4, 16], strides = [1, 1]} : vector<10x16xf32> to vector<4x16xf32>
    %1594 = vector.broadcast %259 : f32 to vector<4x16xf32>
    %1595 = arith.mulf %1594, %1593 : vector<4x16xf32>
    %1596 = arith.addf %1578, %1595 : vector<4x16xf32>
    %1597 = vector.extract_strided_slice %1588 {offsets = [2, 0], sizes = [4, 16], strides = [1, 1]} : vector<10x16xf32> to vector<4x16xf32>
    %1598 = vector.broadcast %266 : f32 to vector<4x16xf32>
    %1599 = arith.mulf %1598, %1597 : vector<4x16xf32>
    %1600 = arith.addf %1582, %1599 : vector<4x16xf32>
    %1601 = vector.extract_strided_slice %1588 {offsets = [3, 0], sizes = [4, 16], strides = [1, 1]} : vector<10x16xf32> to vector<4x16xf32>
    %1602 = vector.broadcast %273 : f32 to vector<4x16xf32>
    %1603 = arith.mulf %1602, %1601 : vector<4x16xf32>
    %1604 = arith.addf %1586, %1603 : vector<4x16xf32>
    %1605 = vector.extract_strided_slice %1588 {offsets = [4, 0], sizes = [4, 16], strides = [1, 1]} : vector<10x16xf32> to vector<4x16xf32>
    %1606 = vector.broadcast %280 : f32 to vector<4x16xf32>
    %1607 = arith.mulf %1606, %1605 : vector<4x16xf32>
    %1608 = arith.addf %1592, %1607 : vector<4x16xf32>
    %1609 = vector.extract_strided_slice %1588 {offsets = [5, 0], sizes = [4, 16], strides = [1, 1]} : vector<10x16xf32> to vector<4x16xf32>
    %1610 = vector.broadcast %287 : f32 to vector<4x16xf32>
    %1611 = arith.mulf %1610, %1609 : vector<4x16xf32>
    %1612 = arith.addf %1596, %1611 : vector<4x16xf32>
    %1613 = vector.extract_strided_slice %1588 {offsets = [6, 0], sizes = [4, 16], strides = [1, 1]} : vector<10x16xf32> to vector<4x16xf32>
    %1614 = vector.broadcast %294 : f32 to vector<4x16xf32>
    %1615 = arith.mulf %1614, %1613 : vector<4x16xf32>
    %1616 = arith.addf %1600, %1615 : vector<4x16xf32>
    %c1_215 = arith.constant 1 : index
    %c0_216 = arith.constant 0 : index
    %c6_217 = arith.constant 6 : index
    %1617 = vector.load %arg6[%c1_215, %c0_216, %c6_217] : memref<2x10x22xf32, #tpu.memory_space<vmem>>, vector<1x10x16xf32>
    %1618 = vector.shape_cast %1617 : vector<1x10x16xf32> to vector<10x16xf32>
    %1619 = vector.extract_strided_slice %1618 {offsets = [0, 0], sizes = [4, 16], strides = [1, 1]} : vector<10x16xf32> to vector<4x16xf32>
    %1620 = vector.broadcast %253 : f32 to vector<4x16xf32>
    %1621 = arith.mulf %1620, %1619 : vector<4x16xf32>
    %1622 = arith.addf %1604, %1621 : vector<4x16xf32>
    %1623 = vector.extract_strided_slice %1618 {offsets = [1, 0], sizes = [4, 16], strides = [1, 1]} : vector<10x16xf32> to vector<4x16xf32>
    %1624 = vector.broadcast %260 : f32 to vector<4x16xf32>
    %1625 = arith.mulf %1624, %1623 : vector<4x16xf32>
    %1626 = arith.addf %1608, %1625 : vector<4x16xf32>
    %1627 = vector.extract_strided_slice %1618 {offsets = [2, 0], sizes = [4, 16], strides = [1, 1]} : vector<10x16xf32> to vector<4x16xf32>
    %1628 = vector.broadcast %267 : f32 to vector<4x16xf32>
    %1629 = arith.mulf %1628, %1627 : vector<4x16xf32>
    %1630 = arith.addf %1612, %1629 : vector<4x16xf32>
    %1631 = vector.extract_strided_slice %1618 {offsets = [3, 0], sizes = [4, 16], strides = [1, 1]} : vector<10x16xf32> to vector<4x16xf32>
    %1632 = vector.broadcast %274 : f32 to vector<4x16xf32>
    %1633 = arith.mulf %1632, %1631 : vector<4x16xf32>
    %1634 = arith.addf %1616, %1633 : vector<4x16xf32>
    %1635 = vector.extract_strided_slice %1618 {offsets = [4, 0], sizes = [4, 16], strides = [1, 1]} : vector<10x16xf32> to vector<4x16xf32>
    %1636 = vector.broadcast %281 : f32 to vector<4x16xf32>
    %1637 = arith.mulf %1636, %1635 : vector<4x16xf32>
    %1638 = arith.addf %1622, %1637 : vector<4x16xf32>
    %1639 = vector.extract_strided_slice %1618 {offsets = [5, 0], sizes = [4, 16], strides = [1, 1]} : vector<10x16xf32> to vector<4x16xf32>
    %1640 = vector.broadcast %288 : f32 to vector<4x16xf32>
    %1641 = arith.mulf %1640, %1639 : vector<4x16xf32>
    %1642 = arith.addf %1626, %1641 : vector<4x16xf32>
    %1643 = vector.extract_strided_slice %1618 {offsets = [6, 0], sizes = [4, 16], strides = [1, 1]} : vector<10x16xf32> to vector<4x16xf32>
    %1644 = vector.broadcast %295 : f32 to vector<4x16xf32>
    %1645 = arith.mulf %1644, %1643 : vector<4x16xf32>
    %1646 = arith.addf %1630, %1645 : vector<4x16xf32>
    %1647 = arith.addf %1642, %1646 : vector<4x16xf32>
    %1648 = arith.addf %1634, %1638 : vector<4x16xf32>
    %1649 = arith.addf %1647, %1648 : vector<4x16xf32>
    %1650 = vector.broadcast %296 : f32 to vector<4x16xf32>
    %1651 = arith.addf %1649, %1650 : vector<4x16xf32>
    %cst_218 = arith.constant 0.000000e+00 : f32
    %1652 = vector.broadcast %cst_218 : f32 to vector<4x16xf32>
    %1653 = arith.subf %1652, %1651 : vector<4x16xf32>
    %1654 = math.exp %1653 : vector<4x16xf32>
    %cst_219 = arith.constant 1.000000e+00 : f32
    %1655 = vector.broadcast %cst_219 : f32 to vector<4x16xf32>
    %1656 = arith.addf %1655, %1654 : vector<4x16xf32>
    %cst_220 = arith.constant 1.000000e+00 : f32
    %1657 = vector.broadcast %cst_220 : f32 to vector<4x16xf32>
    %1658 = arith.divf %1657, %1656 : vector<4x16xf32>
    %cst_221 = arith.constant 0.333333343 : f32
    %1659 = vector.broadcast %cst_221 : f32 to vector<4x16xf32>
    %1660 = arith.mulf %1658, %1659 : vector<4x16xf32>
    %1661 = vector.shape_cast %784 : vector<16x16xf32> to vector<1x16x16xf32>
    %1662 = vector.shape_cast %1222 : vector<4x16xf32> to vector<4x1x16xf32>
    %1663 = vector.broadcast %1661 : vector<1x16x16xf32> to vector<4x16x16xf32>
    %1664 = vector.broadcast %1662 : vector<4x1x16xf32> to vector<4x16x16xf32>
    %1665 = arith.addf %1663, %1664 : vector<4x16x16xf32>
    %1666 = vector.shape_cast %1660 : vector<4x16xf32> to vector<4x16x1xf32>
    %1667 = vector.broadcast %1666 : vector<4x16x1xf32> to vector<4x16x16xf32>
    %1668 = arith.addf %1665, %1667 : vector<4x16x16xf32>
    %c0_222 = arith.constant 0 : index
    %c0_223 = arith.constant 0 : index
    %c0_224 = arith.constant 0 : index
    %c0_225 = arith.constant 0 : index
    %1669 = vector.load %arg2[%c0_222, %c0_223, %c0_224, %c0_225] : memref<1x4x16x16xf32, #tpu.memory_space<vmem>>, vector<1x4x16x16xf32>
    %1670 = vector.shape_cast %1669 : vector<1x4x16x16xf32> to vector<4x16x16xf32>
    %1671 = arith.mulf %1670, %1668 : vector<4x16x16xf32>
    %c0_226 = arith.constant 0 : index
    %c0_227 = arith.constant 0 : index
    %c0_228 = arith.constant 0 : index
    %c0_229 = arith.constant 0 : index
    %1672 = vector.load %arg3[%c0_226, %c0_227, %c0_228, %c0_229] : memref<1x4x16x16xf32, #tpu.memory_space<vmem>>, vector<1x4x16x16xf32>
    %1673 = vector.shape_cast %1672 : vector<1x4x16x16xf32> to vector<4x16x16xf32>
    %1674 = vector.shape_cast %1671 : vector<4x16x16xf32> to vector<1x4x16x16xf32>
    tpu.vector_store %arg3[%c0_226, %c0_227, %c0_228, %c0_229], %1674 {strides = array<i32>} : memref<1x4x16x16xf32, #tpu.memory_space<vmem>>, vector<1x4x16x16xf32>,
    return
  }
  func.func @transform_0(%arg0: i32) -> i32 {
    %c0_i32 = arith.constant 0 : i32
    %c0_i32_0 = arith.constant 0 : i32
    return %c0_i32 : i32
  }
  func.func @transform_1(%arg0: i32) -> (i32, i32, i32, i32) {
    %c0_i32 = arith.constant 0 : i32
    %c0_i32_0 = arith.constant 0 : i32
    %c0_i32_1 = arith.constant 0 : i32
    %c0_i32_2 = arith.constant 0 : i32
    return %arg0, %c0_i32, %c0_i32_0, %c0_i32_1 : i32, i32, i32, i32
  }
  func.func @transform_2(%arg0: i32) -> (i32, i32, i32, i32) {
    %c0_i32 = arith.constant 0 : i32
    %c0_i32_0 = arith.constant 0 : i32
    %c0_i32_1 = arith.constant 0 : i32
    %c0_i32_2 = arith.constant 0 : i32
    return %arg0, %c0_i32, %c0_i32_0, %c0_i32_1 : i32, i32, i32, i32
  }
}

</mosaic_0001>

<bundles_post_ra>
// kernel: tpu_custom_call.1
= control target key start
LH: loop header
LB: loop body
LE: loop exit
PB: predicated region body
PF: predicated region fallthrough
CT: control target
= control target key end

     0   :  { %7 = vsyncpa [#allocation8], 0  ;;  %s8550_s0 = inlined_call_operand.hbm [shape: f32[297], index: 0, kind: input, shape index: {}]   ;;  %s8551_s1 = inlined_call_operand.hbm [shape: f32[2,4,16,16], index: 1, kind: input, shape index: {}]   ;;  %s8552_s2 = inlined_call_operand.hbm [shape: f32[2,4,16,16], index: 2, kind: output, shape index: {}]  }
   0x1   :  { %8 = vsyncpa [#allocation6], 0 }
   0x2   :  { %10 = vsyncpa [#allocation6 + $0x1], 0 }
   0x3   :  { %11 = vsyncpa [#allocation7], 0 }
   0x4   :  { %13 = vsyncpa [#allocation7 + $0x1], 0  ;;  %s5445_s9 = smov 0   ;;  %s5447_s10 = smov 0  }
   0x5   :  { %s5449_s11 = smov 0   ;;  %s5451_s12 = smov 0  }
   0x6 LB: > { %s5466_s13 = sadd.s32 4294967295, %s5413_s12   ;;  %s4867_s14 = sadd.s32 4294967294, %s5413_s12   ;;  %s5413_s12 = sphi %s5451_s12, %s9037_s12   ;;  %s5409_s11 = sphi %s5449_s11, %s9036_s11   ;;  %s5405_s10 = sphi %s5447_s10, %s9035_s10   ;;  %s5401_s9 = sphi %s5445_s9, %s9034_s9  }
   0x7   : > { %s5470_s15 = sadd.s32 1, %s5413_s12   ;;  %s47_s16 = sadd.s32 1, %s5409_s11 }
   0x8   : > { %s44_s17 = ssub.s32 %s5413_s12, %s5470_s15  ;;  %p54_p0 = scmp.ne.s32.totalorder %s5409_s11, %s5405_s10 }
   0x9   : > { %p45_p1 = scmp.eq.s32.totalorder %s44_s17, 0  ;;  %p55_p2 = scmp.eq.s32.totalorder %s5413_s12, 0 }
   0xa   : > { %p60_p3 = scmp.ne.s32.totalorder %s5405_s10, %s5401_s9  ;;  %p61_p4 = scmp.eq.s32.totalorder %s5466_s13, 0 }
   0xb   : > { %s5482_s18 = scalar_select %p45_p1, %s5409_s11, %s47_s16  }
   0xc   : > { %p5484_p5 = por %p55_p2, %p54_p0  ;;  %p5490_p6 = por %p61_p4, %p60_p3 }
   0xd   : > { %p84_p7 = scmp.eq.s32.totalorder %s5466_s13, 1  ;;  %p90_p8 = scmp.eq.s32.totalorder %s4867_s14, 1 }
   0xe   : > { %p4868_p9 = scmp.ge.s32.totalorder %s5413_s12, 1  ;;  %p97_p10 = scmp.lt.s32.totalorder %s5413_s12, 3 }
   0xf   : > { %p5497_p11 = por %p84_p7, %p54_p0  ;;  %p5501_p12 = por %p90_p8, %p60_p3 }
  0x10   : > { %p5505_p13 = pnand %p4868_p9, %p97_p10  ;;  %s109_s26 = sshll.u32 %s8550_s0, 4  ;;  %s110_s26 = int_to_ptr.hbm [resolvable:$true] %s109_s26 }
  0x11   : > { %p5202_p2 = scmp.lt.s32.totalorder %s5413_s12, 2  ;;  %s120_s27 = sand.u32 1, %s5409_s11  }
  0x12   : > { %p5189_p1 = pneg %p5505_p13  ;;  %s4871_s29 = sshll.u32 %s120_s27, 6 }
  0x13   : > { %p5521_p3 = pnand %p5202_p2, %p5484_p5  ;;  %s5415_s30 = smov [#allocation5]  }
  0x14   : > { %p5190_p7 = pnand %p5189_p1, %p61_p4  ;;  %s5179_s3 = sshll.u32 %s5413_s12, 6 }
  0x15   : > { %s124_s4 = scalar_lea.vmem [#allocation9], %s4871_s29  ;;  %s129_s8 = scalar_lea.hbm %s8551_s1, %s5179_s3 }
  0x16   : > { %5192 = dma.hbm_to_smem (!%p5190_p7), %s110_s26, 48, %s5415_s30, [#allocation8]  }
  0x17   : > { %s132_s5 = sshll.u32 %s124_s4, 4  ;;  %s130_s14 = sshll.u32 %s129_s8, 4  ;;  %s133_s5 = int_to_ptr.vmem [resolvable:$true] %s132_s5  ;;  %s131_s14 = int_to_ptr.hbm [resolvable:$true] %s130_s14 }
  0x18   : > { %s121_s16 = scalar_lea.sflag [#allocation6], %s120_s27  ;;  %s5313_s17 = sshra.s32 %s131_s14, 4  ;;  %s5314_s17 = int_to_ptr.hbm [resolvable:$true] %s5313_s17 }
  0x19   : > { %s5315_s19 = scalar_lea.hbm %s5314_s17, 64  ;;  %p5317_p8 = pneg %p5521_p3 }
  0x1a   : > { %p5316_p5 = scmp.ne.s32.totalorder %s5314_s17, %s5315_s19  ;;  %s5320_s26 = scalar_lea.hbm %s8551_s1, 128 }
  0x1b   : > { %p5321_p1 = scmp.lt.s32.totalorder %s5314_s17, %s8551_s1  ;;  %p5322_p2 = scmp.lt.s32.totalorder %s5320_s26, %s5315_s19 }
  0x1c   : > { %p5318_p9 = pnand %p5317_p8, %p5316_p5 }
  0x1d   : > { %p5323_p7 = por %p5322_p2, %p5321_p1 }
  0x1e   : > { %p5319_p10 = pneg %p5318_p9 }
  0x20   : > { %p5324_p0 = pnand %p5323_p7, %p5319_p10 }
  0x22   : > { %5327 = shalt.err (!%p5324_p0)
}
  0x23   : > { %s5416_s27 = smov 128   ;;  %s5417_s3 = smov 8  }
  0x24   : > { %5196 = dma.hbm_to_vmem [thread:$0]  (!%p5521_p3), %s131_s14, 1024, %s133_s5, %s121_s16, %s5416_s27, %s5416_s27, %s5417_s3  }
  0x25   : > { %144 = sbr.rel (%p5505_p13) target bundleno = 1552 (0x610), region = 28 }
  0x2a   : > { %5388 = dma.done.wait (%p61_p4), [#allocation8], 48  }
  0x2b   : > { %5390 = vsyncadd (%p61_p4), [#allocation8], 4294967248  ;;  %s5546_s4 = sand.u32 1, %s5405_s10  }
  0x2c   : > { %s4876_s6 = sshll.u32 %s5546_s4, 6  ;;  %s152_s7 = scalar_lea.sflag [#allocation6], %s5546_s4 }
  0x2d   : > { %s5552_s28 = scalar_lea.vmem [#allocation9], %s4876_s6 }
  0x2e   : > { %5392 = dma.done.wait (%p5490_p6), %s152_s7, 1024  }
  0x2f   : > { %5394 = vsyncadd (%p5490_p6), %s152_s7, 4294966272 }
  0x30   : > { %161 = sfence }
  0x31   : > { %v522_v0 = vld [vmem:[%s5552_s28] sm:$0xff]  ;;  %v523_v1 = vld [vmem:[%s5552_s28 + $0x8] sm:$0xff]  ;;  %v524_v2 = vld [vmem:[%s5552_s28 + $0x10] sm:$0xff]  ;;  %vm530_vm0 = vcmask 130048   ;;  %s5418_s20 = smov 3   ;;  %vm622_vm1 = vcmask 1041409  }
  0x32   : > { %v525_v3 = vld [vmem:[%s5552_s28 + $0x18] sm:$0xff]  ;;  %v526_v4 = vld [vmem:[%s5552_s28 + $0x20] sm:$0xff]  ;;  %v527_v5 = vld [vmem:[%s5552_s28 + $0x28] sm:$0xff]  ;;  %v5565_v6 = vsel %vm530_vm0, %v522_v0, -inf  ;;  %v5568_v7 = vsel %vm530_vm0, %v524_v2, -inf  ;;  %v5571_v8 = vsel %vm530_vm0, %v523_v1, -inf }
  0x33   : > { %v528_v9 = vld [vmem:[%s5552_s28 + $0x30] sm:$0xff]  ;;  %v529_v10 = vld [vmem:[%s5552_s28 + $0x38] sm:$0xff]  ;;  %v5576_v11 = vsel %vm530_vm0, %v526_v4, -inf  ;;  %v5579_v12 = vsel %vm530_vm0, %v525_v3, -inf  ;;  %v5582_v13 = vsel %vm530_vm0, %v527_v5, -inf  ;;  %v5595_v18 = vsel %vm530_vm0, %v522_v0, 0.0 }
  0x34   : > { %v534_v14 = vmax.f32 %v5565_v6, %v5576_v11  ;;  %v5587_v15 = vsel %vm530_vm0, %v528_v9, -inf  ;;  %v5590_v16 = vsel %vm530_vm0, %v529_v10, -inf  ;;  %v590_v19 = vmax.f32 %v5565_v6, %v5571_v8  ;;  %s5731_s23 = sld [smem:[#allocation5 + $0x1]]  ;;  %s5422_s14 = smov 127  }
  0x35   : > { %v536_v17 = vmax.f32 %v5568_v7, %v5587_v15  ;;  %v5600_v20 = vsel %vm530_vm0, %v523_v1, 0.0  ;;  %v597_v21 = vmax.f32 %v5568_v7, %v5579_v12  ;;  %v604_v22 = vmax.f32 %v5576_v11, %v5582_v13  ;;  %s4885_s5 = sld [smem:[#allocation5 + $0x8]]  ;;  %s5423_s30 = smov 126  }
  0x36   : > { %v611_v23 = vmax.f32 %v5587_v15, %v5590_v16  ;;  %v5609_v25 = vsel %vm530_vm0, %v524_v2, 0.0  ;;  %v5612_v26 = vsel %vm530_vm0, %v525_v3, 0.0  ;;  %v591_v27 = vrot.slane %v590_v19, 4  ;;  %s4892_s8 = sld [smem:[#allocation5 + $0xf]] }
  0x37   : > { %v537_v24 = vmax.f32 %v534_v14, %v536_v17  ;;  %v598_v28 = vrot.slane %v597_v21, 4  ;;  %v605_v29 = vrot.slane %v604_v22, 4  ;;  %v633_v32 = vadd.f32 %v5600_v20, %v5595_v18  ;;  %s4899_s16 = sld [smem:[#allocation5 + $0x16]] }
  0x38   : > { %v612_v30 = vrot.slane %v611_v23, 4  ;;  %v592_v31 = vmax.f32 %v590_v19, %v591_v27  ;;  %v541_v33 = vmax.f32 %v5571_v8, %v5582_v13  ;;  %v543_v34 = vmax.f32 %v5579_v12, %v5590_v16  ;;  %s4906_s17 = sld [smem:[#allocation5 + $0x1d]] }
  0x39   : > { %547 = vrot.lane.b32.xlu0 %v537_v24, %s5418_s20  ;;  %v599_v35 = vmax.f32 %v597_v21, %v598_v28  ;;  %v606_v36 = vmax.f32 %v604_v22, %v605_v29  ;;  %v640_v37 = vadd.f32 %v5612_v26, %v5609_v25  ;;  %v634_v43 = vrot.slane %v633_v32, 4  ;;  %s4913_s19 = sld [smem:[#allocation5 + $0x24]] }
  0x3a   : > { %v613_v38 = vmax.f32 %v611_v23, %v612_v30  ;;  %v593_v39 = vrot.slane %v592_v31, 2  ;;  %v544_v44 = vmax.f32 %v541_v33, %v543_v34  ;;  %vm624_vm2 = vcmask 1042434   ;;  %s4920_s24 = sld [smem:[#allocation5 + $0x2b]] }
  0x3b   : > { %v600_v40 = vrot.slane %v599_v35, 2  ;;  %v607_v41 = vrot.slane %v606_v36, 2  ;;  %v641_v46 = vrot.slane %v640_v37, 4  ;;  %v5624_v51 = vsel %vm530_vm0, %v526_v4, 0.0  ;;  %s4879_s25 = sld [smem:[#allocation5 + $0x2]] }
  0x3c   : > { %v614_v42 = vrot.slane %v613_v38, 2  ;;  %v594_v45 = vmax.f32 %v592_v31, %v593_v39  ;;  %v5627_v55 = vsel %vm530_vm0, %v528_v9, 0.0  ;;  %v635_v56 = vadd.f32 %v634_v43, %v633_v32  ;;  %s4886_s26 = sld [smem:[#allocation5 + $0x9]] }
  0x3d   : > { %v601_v47 = vmax.f32 %v599_v35, %v600_v40  ;;  %v608_v48 = vmax.f32 %v606_v36, %v607_v41  ;;  %v5631_v58 = vsel %vm530_vm0, %v527_v5, 0.0  ;;  %v5634_v59 = vsel %vm530_vm0, %v529_v10, 0.0  ;;  %s4893_s29 = sld [smem:[#allocation5 + $0x10]] }
  0x3e   : > { %v615_v49 = vmax.f32 %v613_v38, %v614_v42  ;;  %v595_v50 = vrot.slane %v594_v45, 1  ;;  %v642_v60 = vadd.f32 %v641_v46, %v640_v37  ;;  %vm626_vm3 = vcmask 1043459   ;;  %s4900_s27 = sld [smem:[#allocation5 + $0x17]] }
  0x3f   : > { %v602_v52 = vrot.slane %v601_v47, 1  ;;  %v609_v53 = vrot.slane %v608_v48, 1  ;;  %v647_v0 = vadd.f32 %v5631_v58, %v5624_v51  ;;  %v654_v1 = vadd.f32 %v5634_v59, %v5627_v55  ;;  %s4907_s3 = sld [smem:[#allocation5 + $0x1e]] }
  0x40   : > { %v616_v54 = vrot.slane %v615_v49, 1  ;;  %v596_v57 = vmax.f32 %v594_v45, %v595_v50  ;;  %v5419_v3 = vmov 4.0   ;;  %v636_v10 = vrot.slane %v635_v56, 2  ;;  %s4914_s7 = sld [smem:[#allocation5 + $0x25]] }
  0x41   : > { %549 = vrot.lane.b32.xlu0 %v544_v44, %s5418_s20  ;;  %v603_v61 = vmax.f32 %v601_v47, %v602_v52  ;;  %v610_v62 = vmax.f32 %v608_v48, %v609_v53  ;;  %5258 = vrcp.f32 %v5419_v3  ;;  %v648_v5 = vrot.slane %v647_v0, 4 }
  0x42   : > { %v617_v63 = vmax.f32 %v615_v49, %v616_v54  ;;  %v655_v9 = vrot.slane %v654_v1, 4  ;;  %v643_v14 = vrot.slane %v642_v60, 2  ;;  %v5420_v22 = vmov 16.0  }
  0x43   : > { %v623_v2 = vsel %vm622_vm1, %v603_v61, %v596_v57  ;;  %v649_v19 = vadd.f32 %v648_v5, %v647_v0  ;;  %5260 = vrcp.f32 %v5420_v22  ;;  %v558_v23 = vadd.f32 %v5609_v25, %v5595_v18 }
  0x44   : > { %v625_v4 = vsel %vm624_vm2, %v610_v62, %v623_v2  ;;  %v656_v21 = vadd.f32 %v655_v9, %v654_v1  ;;  %v637_v29 = vadd.f32 %v636_v10, %v635_v56  ;;  %v644_v30 = vadd.f32 %v643_v14, %v642_v60 }
  0x45   : > { %v627_v17 = vsel %vm626_vm3, %v617_v63, %v625_v4  ;;  %v650_v24 = vrot.slane %v649_v19, 2  ;;  %v560_v34 = vadd.f32 %v5624_v51, %v558_v23  ;;  %v565_v37 = vadd.f32 %v5612_v26, %v5600_v20 }
  0x46   : > { %628 = vrot.lane.b32.xlu2 %v627_v17, %s5418_s20  ;;  %v657_v27 = vrot.slane %v656_v21, 2  ;;  %v638_v38 = vrot.slane %v637_v29, 1  ;;  %v645_v39 = vrot.slane %v644_v30, 1  ;;  %vm475_vm6 = vcmask 174080  }
  0x47   : > { %v5259_v28 = vpop.eup %5258  ;;  %v651_v32 = vadd.f32 %v650_v24, %v649_v19  ;;  %v562_v44 = vadd.f32 %v5627_v55, %v560_v34  ;;  %v567_v47 = vadd.f32 %v5631_v58, %v565_v37  ;;  %vm480_vm7 = vcmask 23552  }
  0x48   : > { %v571_v31 = vmul.f32 4.0, %v5259_v28  ;;  %v658_v33 = vadd.f32 %v657_v27, %v656_v21  ;;  %vm575_vm4 = vweird.f32 %v5259_v28  ;;  %v639_v48 = vadd.f32 %v638_v38, %v637_v29 }
  0x49   : > { %v5261_v35 = vpop.eup %5260  ;;  %v652_v42 = vrot.slane %v651_v32, 1  ;;  %v646_v49 = vadd.f32 %v645_v39, %v644_v30  ;;  %v569_v60 = vadd.f32 %v5634_v59, %v567_v47  ;;  %v5421_v9 = vmov 0.0  }
  0x4a   : > { %v572_v36 = vsub.f32 1.0, %v571_v31  ;;  %v662_v40 = vmul.f32 16.0, %v5261_v35  ;;  %v659_v43 = vrot.slane %v658_v33, 1  ;;  %vm666_vm5 = vweird.f32 %v5261_v35  ;;  %476 = vst.msk [vmem:[#allocation2] sm:$0x7] %vm475_vm6, %v5421_v9 }
  0x4b   : > { %v653_v53 = vadd.f32 %v652_v42, %v651_v32  ;;  %vm488_vm8 = vcmask 179352   ;;  %481 = vst.msk [vmem:[#allocation2] sm:$0xff] %vm480_vm7, %v5421_v9  ;;  %vm483_vm9 = vcmask 21504   ;;  %vm491_vm10 = vcmask 177304  }
  0x4c   : > { %v573_v41 = vmul.f32 %v5259_v28, %v572_v36  ;;  %v663_v45 = vsub.f32 1.0, %v662_v40  ;;  %v660_v54 = vadd.f32 %v659_v43, %v658_v33  ;;  %482 = vst.msk [vmem:[#allocation2 + $0x8] sm:$0xff] %vm480_vm7, %v5421_v9  ;;  %vm553_vm11 = vcmask 154648  }
  0x4d   : > { %489 = vst.msk [vmem:[#allocation2] sm:$0xff] %vm488_vm8, %v5421_v9  ;;  %vm501_vm12 = vcmask 17408   ;;  %vm506_vm13 = vcmask 173208   ;;  %vm631_vm14 = vcmask 150552   ;;  %vm890_vm15 = vcmask 1046528  }
  0x4e   : > { %v574_v46 = vadd.f32 %v5259_v28, %v573_v41  ;;  %v664_v50 = vmul.f32 %v5261_v35, %v663_v45  ;;  %490 = vst.msk [vmem:[#allocation2 + $0x8] sm:$0xff] %vm488_vm8, %v5421_v9  ;;  %v928_v23 = vstv %s4899_s16  ;;  %v952_v38 = vstv %s4906_s17  ;;  %s5424_s16 = smov 125   ;;  %s4901_s17 = sld [smem:[#allocation5 + $0x18]] }
  0x4f   : > { %477 = vst.msk [vmem:[#allocation2 + $0x18] sm:$0x7] %vm475_vm6, %v5421_v9 }
  0x50   : > { %v576_v52 = vsel %vm575_vm4, %v5259_v28, %v574_v46  ;;  %v665_v57 = vadd.f32 %v5261_v35, %v664_v50  ;;  %478 = vst.msk [vmem:[#allocation2 + $0x13] sm:$0x7] %vm475_vm6, %v5421_v9  ;;  %vm867_vm4 = vcmask 1042432   ;;  %v976_v50 = vstv %s4913_s19  ;;  %s4908_s19 = sld [smem:[#allocation5 + $0x1f]] }
  0x51   : > { %v577_v56 = vmul.f32 %v576_v52, %v562_v44  ;;  %v578_v3 = vmul.f32 %v576_v52, %v569_v60  ;;  %479 = vst.msk [vmem:[#allocation2 + $0x2b] sm:$0x7] %vm475_vm6, %v5421_v9 }
  0x52   : > { %v5653_v61 = vsel %vm666_vm5, %v5261_v35, %v665_v57  ;;  %486 = vst.msk [vmem:[#allocation2 + $0x20] sm:$0xff] %vm480_vm7, %v5421_v9  ;;  %vm1025_vm5 = vcmask 1041408  }
  0x53   : > { %581 = vrot.lane.b32.xlu1 %v577_v56, %s5418_s20  ;;  %v668_v62 = vmul.f32 %v5653_v61, %v639_v48  ;;  %v669_v63 = vmul.f32 %v5653_v61, %v646_v49  ;;  %v670_v0 = vmul.f32 %v5653_v61, %v653_v53  ;;  %v671_v1 = vmul.f32 %v5653_v61, %v660_v54 }
  0x54   : > { %496 = vst.msk [vmem:[#allocation3] sm:$0x7] %vm475_vm6, %v5421_v9 }
  0x55   : > { %v676_v2 = vsel %vm622_vm1, %v669_v63, %v668_v62  ;;  %497 = vst.msk [vmem:[#allocation3 + $0x10] sm:$0x7] %vm475_vm6, %v5421_v9 }
  0x56   : > { %v677_v4 = vsel %vm624_vm2, %v670_v0, %v676_v2  ;;  %498 = vst.msk [vmem:[#allocation3 + $0x7] sm:$0x7] %vm475_vm6, %v5421_v9 }
  0x57   : > { %v678_v5 = vsel %vm626_vm3, %v671_v1, %v677_v4  ;;  %499 = vst.msk [vmem:[#allocation3 + $0x17] sm:$0x7] %vm475_vm6, %v5421_v9  ;;  %v996_v1 = vstv %s4920_s24  ;;  %s4915_s24 = sld [smem:[#allocation5 + $0x26]] }
  0x58   : > { %679 = vrot.lane.b32.xlu2 %v678_v5, %s5418_s20  ;;  %510 = vst.msk [vmem:[#allocation4] sm:$0x7] %vm475_vm6, %v5421_v9 }
  0x59   : > { %511 = vst.msk [vmem:[#allocation4 + $0x10] sm:$0x7] %vm475_vm6, %v5421_v9 }
  0x5a   : > { %512 = vst.msk [vmem:[#allocation4 + $0x7] sm:$0x7] %vm475_vm6, %v5421_v9 }
  0x5b   : > { %583 = vrot.lane.b32.xlu1 %v578_v3, %s5418_s20  ;;  %513 = vst.msk [vmem:[#allocation4 + $0x17] sm:$0x7] %vm475_vm6, %v5421_v9  ;;  %vm1072_vm6 = vcmask 1045504   ;;  %s4921_s20 = sld [smem:[#allocation5 + $0x2c]] }
  0x5c   : > { %484 = vst.msk [vmem:[#allocation2 + $0x10] sm:$0x3f] %vm483_vm9, %v5421_v9 }
  0x5d   : > { %492 = vst.msk [vmem:[#allocation2 + $0x10] sm:$0x3f] %vm491_vm10, %v5421_v9 }
  0x5e   : > { %485 = vst.msk [vmem:[#allocation2 + $0x18] sm:$0xff] %vm480_vm7, %v5421_v9 }
  0x5f   : > { %487 = vst.msk [vmem:[#allocation2 + $0x28] sm:$0x3f] %vm483_vm9, %v5421_v9 }
  0x60   : > { %494 = vst.msk [vmem:[#allocation2 + $0x20] sm:$0xff] %vm488_vm8, %v5421_v9 }
  0x61   : > { %500 = vst.msk [vmem:[#allocation3] sm:$0xff] %vm480_vm7, %v5421_v9 }
  0x62   : > { %503 = vst.msk [vmem:[#allocation3 + $0x10] sm:$0xff] %vm480_vm7, %v5421_v9 }
  0x63   : > { %514 = vst.msk [vmem:[#allocation4] sm:$0xff] %vm480_vm7, %v5421_v9 }
  0x64   : > { %516 = vst.msk [vmem:[#allocation4 + $0x10] sm:$0xff] %vm480_vm7, %v5421_v9  ;;  %vm714_vm7 = vcmask 154712  }
  0x65   : > { %493 = vst.msk [vmem:[#allocation2 + $0x18] sm:$0xff] %vm488_vm8, %v5421_v9 }
  0x66   : > { %495 = vst.msk [vmem:[#allocation2 + $0x28] sm:$0x3f] %vm491_vm10, %v5421_v9 }
  0x67   : > { %505 = vst.msk [vmem:[#allocation3] sm:$0xff] %vm488_vm8, %v5421_v9 }
  0x68   : > { %508 = vst.msk [vmem:[#allocation3 + $0x10] sm:$0xff] %vm488_vm8, %v5421_v9 }
  0x69   : > { %518 = vst.msk [vmem:[#allocation4] sm:$0xff] %vm488_vm8, %v5421_v9 }
  0x6a   : > { %520 = vst.msk [vmem:[#allocation4 + $0x10] sm:$0xff] %vm488_vm8, %v5421_v9  ;;  %vm1183_vm8 = vcmask 1040384  }
  0x6b   : > { %684 = vmax.xlane.f32.xlu0 %v5565_v6  ;;  %502 = vst.msk [vmem:[#allocation3 + $0x8] sm:$0x3] %vm501_vm12, %v5421_v9 }
  0x6c   : > { %507 = vst.msk [vmem:[#allocation3 + $0x8] sm:$0x3] %vm506_vm13, %v5421_v9 }
  0x6d   : > { %517 = vst.msk [vmem:[#allocation4 + $0x18] sm:$0x3] %vm501_vm12, %v5421_v9 }
  0x6e   : > { %521 = vst.msk [vmem:[#allocation4 + $0x18] sm:$0x3] %vm506_vm13, %v5421_v9 }
  0x6f   : > { %504 = vst.msk [vmem:[#allocation3 + $0x18] sm:$0x3] %vm501_vm12, %v5421_v9 }
  0x70   : > { %515 = vst.msk [vmem:[#allocation4 + $0x8] sm:$0x3] %vm501_vm12, %v5421_v9 }
  0x71   : > { %509 = vst.msk [vmem:[#allocation3 + $0x18] sm:$0x3] %vm506_vm13, %v5421_v9 }
  0x72   : > { %519 = vst.msk [vmem:[#allocation4 + $0x8] sm:$0x3] %vm506_vm13, %v5421_v9 }
  0x73   : > { %692 = vmax.xlane.f32.xlu0 %v5576_v11 }
  0x7b   : > { %698 = vmax.xlane.f32.xlu0 %v5590_v16 }
  0x81   : > { %688 = vmax.xlane.f32.xlu2 %v5568_v7 }
  0x83   : > { %734 = vadd.xlane.f32.xlu0 %v5609_v25 }
  0x85   : > { %686 = vmax.xlane.f32.xlu1 %v5571_v8  ;;  %v862_v8 = vstv %s5731_s23  ;;  %s5882_s23 = sld [smem:[#allocation5 + $0x3]] }
  0x89   : > { %690 = vmax.xlane.f32.xlu2 %v5579_v12 }
  0x8b   : > { %740 = vadd.xlane.f32.xlu0 %v5631_v58 }
  0x8d   : > { %694 = vmax.xlane.f32.xlu1 %v5582_v13 }
  0x91   : > { %696 = vmax.xlane.f32.xlu2 %v5587_v15 }
  0x95   : > { %730 = vadd.xlane.f32.xlu1 %v5595_v18  ;;  %v883_v18 = vstv %s4885_s5  ;;  %s4887_s5 = sld [smem:[#allocation5 + $0xa]] }
  0x99   : > { %732 = vadd.xlane.f32.xlu2 %v5600_v20 }
  0x9d   : > { %736 = vadd.xlane.f32.xlu1 %v5612_v26 }
  0xa0   : > { %v629_v7 = vpop.permute.xlu2 %628 }
  0xa1   : > { %738 = vadd.xlane.f32.xlu2 %v5624_v51  ;;  %632 = vst.msk [vmem:[#allocation3 + $0x3] sm:$0xf] %vm631_vm14, %v629_v7  ;;  %v904_v51 = vstv %s4892_s8  ;;  %s4894_s8 = sld [smem:[#allocation5 + $0x11]] }
  0xa5   : > { %742 = vadd.xlane.f32.xlu1 %v5627_v55 }
  0xa9   : > { %744 = vadd.xlane.f32.xlu2 %v5634_v59 }
  0xab   : > { %v548_v6 = vpop.permute.xlu0 %547 }
  0xac   : > { %554 = vst.msk [vmem:[#allocation2 + $0x3] sm:$0xff] %vm553_vm11, %v548_v6 }
  0xb2   : > { %v680_v16 = vpop.permute.xlu2 %679 }
  0xb3   : > { %v5754_v11 = vld [vmem:[#allocation2] sm:$0xff]  ;;  %v550_v12 = vpop.permute.xlu0 %549  ;;  %683 = vst.msk [vmem:[#allocation3 + $0x13] sm:$0xf] %vm631_vm14, %v680_v16 }
  0xb4   : > { %555 = vst.msk [vmem:[#allocation2 + $0xb] sm:$0xff] %vm553_vm11, %v550_v12  ;;  %v863_v13 = vmul.f32 %v862_v8, %v5754_v11  ;;  %v884_v20 = vmul.f32 %v883_v18, %v5754_v11  ;;  %v905_v24 = vmul.f32 %v904_v51, %v5754_v11  ;;  %v929_v34 = vmul.f32 %v928_v23, %v5754_v11 }
  0xb5   : > { %v953_v44 = vmul.f32 %v952_v38, %v5754_v11  ;;  %v977_v57 = vmul.f32 %v976_v50, %v5754_v11  ;;  %v997_v9 = vmul.f32 %v996_v1, %v5754_v11 }
  0xb6   : > { %v868_v15 = vrot.slane %v863_v13, 5  ;;  %v891_v14 = vrot.slane %v884_v20, 1  ;;  %v911_v29 = vrot.slane %v905_v24, 1  ;;  %v935_v37 = vrot.slane %v929_v34, 1 }
  0xb7   : > { %v959_v49 = vrot.slane %v953_v44, 1  ;;  %v983_v0 = vrot.slane %v977_v57, 5  ;;  %v1003_v12 = vrot.slane %v997_v9, 5  ;;  %v1020_v13 = vstv %s4879_s25  ;;  %s4922_s25 = sld [smem:[#allocation5 + $0x2d]] }
  0xb8   : > { %871 = vrot.lane.b32.xlu0 %v868_v15, %s5422_s14  ;;  %v1021_v20 = vmul.f32 %v1020_v13, %v5754_v11  ;;  %v1086_v34 = vstv %s4900_s27  ;;  %s4895_s27 = sld [smem:[#allocation5 + $0x12]] }
  0xbb   : > { %v5770_v25 = vld [vmem:[#allocation2 + $0x8] sm:$0xff]  ;;  %v5772_v26 = vld [vmem:[#allocation2 + $0x10] sm:$0x3f] }
  0xbc   : > { %v907_v55 = vmul.f32 %v904_v51, %v5772_v26  ;;  %v885_v58 = vmul.f32 %v883_v18, %v5770_v25  ;;  %v864_v59 = vmul.f32 %v862_v8, %v5770_v25  ;;  %v906_v21 = vmul.f32 %v904_v51, %v5770_v25 }
  0xbd   : > { %v931_v27 = vmul.f32 %v928_v23, %v5772_v26  ;;  %v930_v33 = vmul.f32 %v928_v23, %v5770_v25  ;;  %v954_v42 = vmul.f32 %v952_v38, %v5770_v25  ;;  %v886_v43 = vmul.f32 %v883_v18, %v5772_v26 }
  0xbe   : > { %v914_v10 = vrot.slane %v907_v55, 1  ;;  %v892_v17 = vrot.slane %v885_v58, 1  ;;  %v869_v22 = vrot.slane %v864_v59, 5  ;;  %v912_v28 = vrot.slane %v906_v21, 1 }
  0xbf   : > { %v938_v30 = vrot.slane %v931_v27, 1  ;;  %v936_v36 = vrot.slane %v930_v33, 1  ;;  %v955_v46 = vmul.f32 %v952_v38, %v5772_v26  ;;  %v960_v47 = vrot.slane %v954_v42, 1 }
  0xc0   : > { %v893_v19 = vsel %vm890_vm15, %v891_v14, %v892_v17  ;;  %920 = vrot.lane.b32.xlu1 %v914_v10, %s5422_s14  ;;  %v913_v32 = vsel %vm890_vm15, %v911_v29, %v912_v28  ;;  %v915_v35 = vsel %vm890_vm15, %v912_v28, %v914_v10  ;;  %v870_v40 = vsel %vm867_vm4, %v868_v15, %v869_v22 }
  0xc1   : > { %896 = vrot.lane.b32.xlu0 %v893_v19, %s5422_s14  ;;  %875 = vrot.lane.b32.xlu2 %v869_v22, %s5422_s14  ;;  %v937_v41 = vsel %vm890_vm15, %v935_v37, %v936_v36  ;;  %v939_v45 = vsel %vm890_vm15, %v936_v36, %v938_v30  ;;  %v894_v48 = vrot.slane %v886_v43, 1  ;;  %v962_v52 = vrot.slane %v955_v46, 1 }
  0xc2   : > { %v961_v54 = vsel %vm890_vm15, %v959_v49, %v960_v47  ;;  %v978_v56 = vmul.f32 %v976_v50, %v5770_v25  ;;  %v979_v62 = vmul.f32 %v976_v50, %v5772_v26  ;;  %v999_v4 = vmul.f32 %v996_v1, %v5772_v26 }
  0xc3   : > { %v895_v53 = vsel %vm890_vm15, %v892_v17, %v894_v48  ;;  %v963_v60 = vsel %vm890_vm15, %v960_v47, %v962_v52  ;;  %v998_v5 = vmul.f32 %v996_v1, %v5770_v25  ;;  %v1022_v18 = vmul.f32 %v1020_v13, %v5770_v25 }
  0xc4   : > { %v984_v63 = vrot.slane %v978_v56, 5  ;;  %v986_v2 = vrot.slane %v979_v62, 5  ;;  %v1006_v7 = vrot.slane %v999_v4, 5  ;;  %v1026_v55 = vrot.slane %v1021_v20, 6 }
  0xc5   : > { %v582_v31 = vpop.permute.xlu1 %581  ;;  %v1004_v8 = vrot.slane %v998_v5, 5  ;;  %v1027_v51 = vrot.slane %v1022_v18, 6  ;;  %v1041_v59 = vstv %s4886_s26  ;;  %v8553_v19 = vlaneseq  ;;  %s4881_s26 = sld [smem:[#allocation5 + $0x4]] }
  0xc6   : > { %588 = vst.msk [vmem:[#allocation2 + $0x1b] sm:$0xff] %vm553_vm11, %v582_v31  ;;  %v985_v3 = vsel %vm867_vm4, %v983_v0, %v984_v63  ;;  %v987_v6 = vsel %vm867_vm4, %v984_v63, %v986_v2  ;;  %v1043_v14 = vmul.f32 %v1041_v59, %v5770_v25  ;;  %v1042_v17 = vmul.f32 %v1041_v59, %v5754_v11 }
  0xc7   : > { %v1005_v15 = vsel %vm867_vm4, %v1003_v12, %v1004_v8  ;;  %v1007_v16 = vsel %vm867_vm4, %v1004_v8, %v1006_v7  ;;  %v1028_v10 = vsel %vm1025_vm5, %v1026_v55, %v1027_v51  ;;  %v1044_v21 = vmul.f32 %v1041_v59, %v5772_v26 }
  0xc8   : > { %944 = vrot.lane.b32.xlu1 %v938_v30, %s5422_s14  ;;  %v1049_v22 = vrot.slane %v1043_v14, 6  ;;  %v1048_v23 = vrot.slane %v1042_v17, 6  ;;  %v709_v24 = vand.u32 127, %v8553_v19  ;;  %v1065_v27 = vstv %s4893_s29  ;;  %s4888_s29 = sld [smem:[#allocation5 + $0xb]] }
  0xc9   : > { %916 = vrot.lane.b32.xlu0 %v913_v32, %s5422_s14  ;;  %918 = vrot.lane.b32.xlu2 %v915_v35, %s5422_s14  ;;  %v1051_v29 = vrot.slane %v1044_v21, 6  ;;  %v1067_v31 = vmul.f32 %v1065_v27, %v5770_v25  ;;  %v1068_v32 = vmul.f32 %v1065_v27, %v5772_v26  ;;  %v1066_v35 = vmul.f32 %v1065_v27, %v5754_v11 }
  0xca   : > { %v1050_v30 = vsel %vm1025_vm5, %v1048_v23, %v1049_v22  ;;  %v5841_v36 = vadd.s32 4294967293, %v709_v24  ;;  %v5843_v37 = vadd.s32 4294967285, %v709_v24  ;;  %v1087_v43 = vmul.f32 %v1086_v34, %v5754_v11 }
  0xcb   : > { %v1076_v42 = vrot.slane %v1068_v32, 2  ;;  %v1073_v44 = vrot.slane %v1066_v35, 2  ;;  %v1110_v1 = vstv %s4907_s3  ;;  %v1134_v59 = vstv %s4914_s7  ;;  %s5425_s3 = smov 124   ;;  %s4902_s7 = sld [smem:[#allocation5 + $0x19]] }
  0xcc   : > { %v1093_v57 = vrot.slane %v1087_v43, 2  ;;  %v1112_v4 = vmul.f32 %v1110_v1, %v5770_v25  ;;  %v1136_v17 = vmul.f32 %v1134_v59, %v5770_v25  ;;  %v1158_v32 = vstv %s4921_s20  ;;  %s4909_s20 = sld [smem:[#allocation5 + $0x20]] }
  0xcd   : > { %v584_v39 = vpop.permute.xlu1 %583 }
  0xce   : > { %589 = vst.msk [vmem:[#allocation2 + $0x23] sm:$0xff] %vm553_vm11, %v584_v39  ;;  %v1088_v39 = vmul.f32 %v1086_v34, %v5770_v25  ;;  %v1118_v13 = vrot.slane %v1112_v4, 2  ;;  %v1142_v27 = vrot.slane %v1136_v17, 2 }
  0xd0   : > { %873 = vrot.lane.b32.xlu1 %v870_v40, %s5422_s14  ;;  %v1052_v40 = vsel %vm1025_vm5, %v1049_v22, %v1051_v29  ;;  %v1094_v48 = vrot.slane %v1088_v39, 2  ;;  %v1137_v29 = vmul.f32 %v1134_v59, %v5772_v26  ;;  %v1178_v39 = vstv %s5882_s23  ;;  %s4916_s23 = sld [smem:[#allocation5 + $0x27]] }
  0xd1   : > { %940 = vrot.lane.b32.xlu0 %v937_v41, %s5422_s14  ;;  %942 = vrot.lane.b32.xlu2 %v939_v45, %s5422_s14  ;;  %v1074_v41 = vrot.slane %v1067_v31, 2 }
  0xd2   : > { %v1144_v35 = vrot.slane %v1137_v29, 2 }
  0xd3   : > { %v1075_v50 = vsel %vm1072_vm6, %v1073_v44, %v1074_v41 }
  0xd8   : > { %898 = vrot.lane.b32.xlu1 %v895_v53, %s5422_s14  ;;  %v1089_v53 = vmul.f32 %v1086_v34, %v5772_v26  ;;  %v1160_v34 = vmul.f32 %v1158_v32, %v5770_v25 }
  0xd9   : > { %964 = vrot.lane.b32.xlu0 %v961_v54, %s5422_s14  ;;  %966 = vrot.lane.b32.xlu2 %v963_v60, %s5422_s14 }
  0xda   : > { %v1096_v5 = vrot.slane %v1089_v53, 2  ;;  %v1179_v53 = vmul.f32 %v1178_v39, %v5754_v11 }
  0xde   : > { %v685_v58 = vpop.xlane.xlu0 %684 }
  0xdf   : > { %v711_v46 = vperm.slane %v685_v58, %v5841_v36 }
  0xe0   : > { %968 = vrot.lane.b32.xlu1 %v962_v52, %s5422_s14  ;;  %v1077_v52 = vsel %vm1072_vm6, %v1074_v41, %v1076_v42 }
  0xe1   : > { %988 = vrot.lane.b32.xlu0 %v985_v3, %s5422_s14  ;;  %990 = vrot.lane.b32.xlu2 %v987_v6, %s5422_s14  ;;  %v1095_v3 = vsel %vm1072_vm6, %v1093_v57, %v1094_v48 }
  0xe6   : > { %v693_v33 = vpop.xlane.xlu0 %692 }
  0xe7   : > { %v719_v56 = vperm.slane %v693_v33, %v5841_v36 }
  0xe8   : > { %1008 = vrot.lane.b32.xlu1 %v1005_v15, %s5422_s14  ;;  %v1097_v15 = vsel %vm1072_vm6, %v1094_v48, %v1096_v5  ;;  %v1161_v48 = vmul.f32 %v1158_v32, %v5772_v26 }
  0xe9   : > { %1010 = vrot.lane.b32.xlu0 %v1007_v16, %s5422_s14  ;;  %1012 = vrot.lane.b32.xlu2 %v1006_v7, %s5422_s14  ;;  %v1111_v7 = vmul.f32 %v1110_v1, %v5754_v11  ;;  %v1113_v16 = vmul.f32 %v1110_v1, %v5772_v26 }
  0xea   : > { %v1168_v1 = vrot.slane %v1161_v48, 6  ;;  %v1268_v48 = vstv %s4908_s19  ;;  %s4896_s19 = sld [smem:[#allocation5 + $0x13]] }
  0xeb   : > { %v1120_v21 = vrot.slane %v1113_v16, 2 }
  0xee   : > { %v699_v0 = vpop.xlane.xlu0 %698 }
  0xef   : > { %v723_v8 = vperm.slane %v699_v0, %v5843_v37  ;;  %v1180_v0 = vmul.f32 %v1178_v39, %v5770_v25 }
  0xf0   : > { %1029 = vrot.lane.b32.xlu1 %v1026_v55, %s5423_s30 }
  0xf1   : > { %1031 = vrot.lane.b32.xlu0 %v1028_v10, %s5423_s30  ;;  %1033 = vrot.lane.b32.xlu2 %v1027_v51, %s5423_s30  ;;  %v1117_v51 = vrot.slane %v1111_v7, 2 }
  0xf3   : > { %v1119_v14 = vsel %vm1072_vm6, %v1117_v51, %v1118_v13 }
  0xf4   : > { %v689_v28 = vpop.xlane.xlu2 %688 }
  0xf5   : > { %v716_v45 = vperm.slane %v689_v28, %v5841_v36  ;;  %v1121_v28 = vsel %vm1072_vm6, %v1118_v13, %v1120_v21  ;;  %v1199_v13 = vstv %s4887_s5  ;;  %s4923_s5 = sld [smem:[#allocation5 + $0x2e]] }
  0xf6   : > { %v735_v22 = vpop.xlane.xlu0 %734 }
  0xf7   : > { %v748_v42 = vmul.f32 %v735_v22, %v5653_v61  ;;  %v1202_v22 = vmul.f32 %v1199_v13, %v5772_v26 }
  0xf8   : > { %1053 = vrot.lane.b32.xlu1 %v1048_v23, %s5423_s30  ;;  %v687_v38 = vpop.xlane.xlu1 %686  ;;  %v1135_v23 = vmul.f32 %v1134_v59, %v5754_v11 }
  0xf9   : > { %1055 = vrot.lane.b32.xlu0 %v1050_v30, %s5423_s30  ;;  %1057 = vrot.lane.b32.xlu2 %v1052_v40, %s5423_s30  ;;  %v713_v47 = vperm.slane %v687_v38, %v5843_v37  ;;  %v1159_v38 = vmul.f32 %v1158_v32, %v5754_v11  ;;  %v765_v57 = vperm.slane %v748_v42, %v5841_v36  ;;  %v1209_v29 = vrot.slane %v1202_v22, 7 }
  0xfa   : > { %v1141_v30 = vrot.slane %v1135_v23, 2 }
  0xfb   : > { %v715_v60 = vsel %vm714_vm7, %v713_v47, %v711_v46  ;;  %v1166_v46 = vrot.slane %v1160_v34, 6  ;;  %v1145_v47 = vsel %vm1072_vm6, %v1142_v27, %v1144_v35 }
  0xfc   : > { %v691_v49 = vpop.xlane.xlu2 %690  ;;  %v1143_v33 = vsel %vm1072_vm6, %v1141_v30, %v1142_v27 }
  0xfd   : > { %v717_v54 = vperm.slane %v691_v49, %v5843_v37 }
  0xfe   : > { %v741_v44 = vpop.xlane.xlu0 %740 }
  0xff   : > { %v718_v62 = vsel %vm714_vm7, %v717_v54, %v716_v45 }
 0x100   : > { %1078 = vrot.lane.b32.xlu1 %v1075_v50, %s5423_s30  ;;  %v695_v63 = vpop.xlane.xlu1 %694  ;;  %v725_v9 = vsel %vm622_vm1, %v718_v62, %v715_v60  ;;  %v751_v50 = vmul.f32 %v741_v44, %v5653_v61 }
 0x101   : > { %1080 = vrot.lane.b32.xlu0 %v1077_v52, %s5423_s30  ;;  %v720_v2 = vperm.slane %v695_v63, %v5843_v37  ;;  %1098 = vrot.lane.b32.xlu2 %v1095_v3, %s5423_s30  ;;  %v1165_v52 = vrot.slane %v1159_v38, 6 }
 0x102   : > { %v769_v4 = vperm.slane %v751_v50, %v5843_v37 }
 0x103   : > { %v721_v6 = vsel %vm714_vm7, %v720_v2, %v719_v56  ;;  %v1167_v63 = vsel %vm1025_vm5, %v1165_v52, %v1166_v46 }
 0x104   : > { %v697_v12 = vpop.xlane.xlu2 %696  ;;  %v726_v18 = vsel %vm624_vm2, %v721_v6, %v725_v9  ;;  %v1184_v6 = vrot.slane %v1179_v53, 7  ;;  %v1271_v53 = vmul.f32 %v1268_v48, %v5772_v26 }
 0x105   : > { %v722_v20 = vperm.slane %v697_v12, %v5841_v36  ;;  %v1169_v12 = vsel %vm1025_vm5, %v1166_v46, %v1168_v1 }
 0x107   : > { %v724_v55 = vsel %vm714_vm7, %v723_v8, %v722_v20  ;;  %v1185_v8 = vrot.slane %v1180_v0, 7 }
 0x108   : > { %1100 = vrot.lane.b32.xlu1 %v1097_v15, %s5423_s30  ;;  %v731_v58 = vpop.xlane.xlu1 %730  ;;  %v727_v10 = vsel %vm626_vm3, %v724_v55, %v726_v18  ;;  %v1200_v55 = vmul.f32 %v1199_v13, %v5754_v11 }
 0x109   : > { %1102 = vrot.lane.b32.xlu0 %v1096_v5, %s5423_s30  ;;  %729 = vst.msk [vmem:[#allocation4 + $0x3] sm:$0xf] %vm631_vm14, %v727_v10  ;;  %1122 = vrot.lane.b32.xlu2 %v1119_v14, %s5423_s30  ;;  %v746_v40 = vmul.f32 %v731_v58, %v5653_v61  ;;  %v1186_v58 = vsel %vm1183_vm8, %v1184_v6, %v1185_v8 }
 0x10a   : > { %v1206_v14 = vrot.slane %v1200_v55, 7 }
 0x10b   : > { %v762_v54 = vperm.slane %v746_v40, %v5841_v36 }
 0x10c   : > { %v733_v24 = vpop.xlane.xlu2 %732 }
 0x10d   : > { %v747_v41 = vmul.f32 %v733_v24, %v5653_v61 }
 0x10f   : > { %v763_v56 = vperm.slane %v747_v41, %v5843_v37 }
 0x110   : > { %1124 = vrot.lane.b32.xlu1 %v1121_v28, %s5423_s30  ;;  %v737_v31 = vpop.xlane.xlu1 %736 }
 0x111   : > { %1126 = vrot.lane.b32.xlu0 %v1120_v21, %s5423_s30  ;;  %1146 = vrot.lane.b32.xlu2 %v1143_v33, %s5423_s30  ;;  %v749_v43 = vmul.f32 %v737_v31, %v5653_v61  ;;  %v764_v5 = vsel %vm714_vm7, %v763_v56, %v762_v54  ;;  %v1223_v21 = vstv %s4894_s8  ;;  %v1247_v31 = vstv %s4901_s17  ;;  %s4882_s8 = sld [smem:[#allocation5 + $0x5]] }
 0x112   : > { %v1224_v24 = vmul.f32 %v1223_v21, %v5754_v11  ;;  %v1225_v28 = vmul.f32 %v1223_v21, %v5770_v25  ;;  %v1226_v38 = vmul.f32 %v1223_v21, %v5772_v26  ;;  %v1248_v39 = vmul.f32 %v1247_v31, %v5754_v11  ;;  %s4889_s17 = sld [smem:[#allocation5 + $0xc]] }
 0x113   : > { %v766_v60 = vperm.slane %v749_v43, %v5843_v37  ;;  %v1250_v42 = vmul.f32 %v1247_v31, %v5772_v26  ;;  %v1270_v54 = vmul.f32 %v1268_v48, %v5770_v25  ;;  %v1269_v56 = vmul.f32 %v1268_v48, %v5754_v11 }
 0x114   : > { %v739_v45 = vpop.xlane.xlu2 %738  ;;  %v1230_v30 = vrot.slane %v1224_v24, 7  ;;  %v1231_v33 = vrot.slane %v1225_v28, 7  ;;  %v1255_v46 = vrot.slane %v1248_v39, 3 }
 0x115   : > { %v750_v49 = vmul.f32 %v739_v45, %v5653_v61  ;;  %v767_v9 = vsel %vm714_vm7, %v766_v60, %v765_v57  ;;  %v1233_v45 = vrot.slane %v1226_v38, 7  ;;  %v1276_v0 = vrot.slane %v1270_v54, 3 }
 0x116   : > { %v774_v18 = vsel %vm622_vm1, %v767_v9, %v764_v5  ;;  %v1232_v43 = vsel %vm1183_vm8, %v1230_v30, %v1231_v33  ;;  %vm1254_vm1 = vcmask 1044480   ;;  %v1275_v1 = vrot.slane %v1269_v56, 3 }
 0x117   : > { %v768_v3 = vperm.slane %v750_v49, %v5841_v36  ;;  %v1234_v50 = vsel %vm1183_vm8, %v1231_v33, %v1233_v45  ;;  %v1391_v56 = vstv %s4902_s7  ;;  %s4917_s7 = sld [smem:[#allocation5 + $0x28]] }
 0x118   : > { %1148 = vrot.lane.b32.xlu1 %v1145_v47, %s5423_s30  ;;  %v743_v62 = vpop.xlane.xlu1 %742  ;;  %v1258_v47 = vrot.slane %v1250_v42, 3 }
 0x119   : > { %1150 = vrot.lane.b32.xlu0 %v1144_v35, %s5423_s30  ;;  %v752_v2 = vmul.f32 %v743_v62, %v5653_v61  ;;  %1170 = vrot.lane.b32.xlu2 %v1167_v63, %s5423_s30  ;;  %v770_v20 = vsel %vm714_vm7, %v769_v4, %v768_v3  ;;  %v1249_v35 = vmul.f32 %v1247_v31, %v5770_v25  ;;  %v1278_v63 = vrot.slane %v1271_v53, 3 }
 0x11a   : > { %v1277_v4 = vsel %vm1254_vm1, %v1275_v1, %v1276_v0  ;;  %v1410_v1 = vstv %s4909_s20  ;;  %s6154_s20 = sld [smem:[#allocation5 + $0x8c]] }
 0x11b   : > { %v771_v15 = vperm.slane %v752_v2, %v5841_v36  ;;  %v1201_v36 = vmul.f32 %v1199_v13, %v5770_v25  ;;  %v1256_v44 = vrot.slane %v1249_v35, 3  ;;  %v1292_v2 = vstv %s4915_s24  ;;  %s5426_s24 = smov 123  }
 0x11c   : > { %v745_v7 = vpop.xlane.xlu2 %744  ;;  %v1279_v5 = vsel %vm1254_vm1, %v1276_v0, %v1278_v63  ;;  %v1295_v9 = vmul.f32 %v1292_v2, %v5772_v26  ;;  %v1353_v35 = vstv %s4888_s29  ;;  %s6129_s29 = sld [smem:[#allocation5 + $0x92]] }
 0x11d   : > { %v753_v16 = vmul.f32 %v745_v7, %v5653_v61  ;;  %v775_v61 = vsel %vm624_vm2, %v770_v20, %v774_v18  ;;  %v1257_v52 = vsel %vm1254_vm1, %v1255_v46, %v1256_v44  ;;  %v1259_v62 = vsel %vm1254_vm1, %v1256_v44, %v1258_v47 }
 0x11e   : > { %v1293_v7 = vmul.f32 %v1292_v2, %v5754_v11  ;;  %v1302_v13 = vrot.slane %v1295_v9, 3  ;;  %v1316_v18 = vstv %s4922_s25  ;;  %v1354_v38 = vmul.f32 %v1353_v35, %v5754_v11  ;;  %s4903_s25 = sld [smem:[#allocation5 + $0x1a]] }
 0x11f   : > { %v772_v51 = vperm.slane %v753_v16, %v5843_v37  ;;  %v1207_v37 = vrot.slane %v1201_v36, 7  ;;  %v1318_v36 = vmul.f32 %v1316_v18, %v5770_v25  ;;  %v1356_v44 = vmul.f32 %v1353_v35, %v5772_v26 }
 0x120   : > { %1172 = vrot.lane.b32.xlu1 %v1169_v12, %s5423_s30  ;;  %v1299_v16 = vrot.slane %v1293_v7, 3  ;;  %v1372_v46 = vstv %s4895_s27  ;;  %v1394_v9 = vmul.f32 %v1391_v56, %v5772_v26  ;;  %vm816_vm2 = vcmask 1043456   ;;  %s6132_s27 = sld [smem:[#allocation5 + $0x8b]] }
 0x121   : > { %1187 = vrot.lane.b32.xlu0 %v1184_v6, %s5424_s16  ;;  %v773_v59 = vsel %vm714_vm7, %v772_v51, %v771_v15  ;;  %1189 = vrot.lane.b32.xlu2 %v1186_v58, %s5424_s16  ;;  %v1208_v27 = vsel %vm1183_vm8, %v1206_v14, %v1207_v37  ;;  %v1210_v34 = vsel %vm1183_vm8, %v1207_v37, %v1209_v29  ;;  %v1324_v37 = vrot.slane %v1318_v36, 3 }
 0x122   : > { %v776_v10 = vsel %vm626_vm3, %v773_v59, %v775_v61  ;;  %v1294_v6 = vmul.f32 %v1292_v2, %v5770_v25  ;;  %v1319_v58 = vmul.f32 %v1316_v18, %v5772_v26  ;;  %v1317_v61 = vmul.f32 %v1316_v18, %v5754_v11 }
 0x123   : > { %779 = vst.msk [vmem:[#allocation4 + $0x13] sm:$0xf] %vm631_vm14, %v776_v10  ;;  %v1373_v47 = vmul.f32 %v1372_v46, %v5754_v11  ;;  %v1375_v53 = vmul.f32 %v1372_v46, %v5772_v26  ;;  %v1412_v2 = vmul.f32 %v1410_v1, %v5770_v25 }
 0x124   : > { %v5932_v17 = vpop.permute.xlu2 %875  ;;  %v1300_v15 = vrot.slane %v1294_v6, 3  ;;  %v1323_v21 = vrot.slane %v1317_v61, 3  ;;  %v1430_v6 = vstv %s4916_s23  ;;  %s6162_s23 = sld [smem:[#allocation5 + $0x2f]] }
 0x125   : > { %8562 = vst [vmem:[#allocation14_spill] sm:$0xff] %v5932_v17  ;;  %v1433_v61 = vmul.f32 %v1430_v6, %v5772_v26 }
 0x126   : > { %v1301_v51 = vsel %vm1254_vm1, %v1299_v16, %v1300_v15  ;;  %v1303_v55 = vsel %vm1254_vm1, %v1300_v15, %v1302_v13  ;;  %v1325_v24 = vsel %vm1254_vm1, %v1323_v21, %v1324_v37  ;;  %v1432_v15 = vmul.f32 %v1430_v6, %v5770_v25 }
 0x127   : > { %v1413_v16 = vmul.f32 %v1410_v1, %v5772_v26 }
 0x128   : > { %1191 = vrot.lane.b32.xlu1 %v1185_v8, %s5424_s16 }
 0x129   : > { %1211 = vrot.lane.b32.xlu0 %v1206_v14, %s5424_s16  ;;  %1213 = vrot.lane.b32.xlu2 %v1208_v27, %s5424_s16  ;;  %v1326_v14 = vrot.slane %v1319_v58, 3 }
 0x12a   : > { %v5937_v23 = vpop.permute.xlu0 %871 }
 0x12b   : > { %8563 = vst [vmem:[#allocation15_spill] sm:$0xff] %v5937_v23  ;;  %v1327_v27 = vsel %vm1254_vm1, %v1324_v37, %v1326_v14  ;;  %v1420_v37 = vrot.slane %v1413_v16, 4  ;;  %v1498_v16 = vstv %s4889_s17  ;;  %s6193_s17 = sld [smem:[#allocation5 + $0x6a]] }
 0x12c   : > { %v5943_v32 = vpop.permute.xlu2 %918 }
 0x12d   : > { %8564 = vst [vmem:[#allocation16_spill] sm:$0xff] %v5943_v32 }
 0x130   : > { %1215 = vrot.lane.b32.xlu1 %v1210_v34, %s5424_s16 }
 0x131   : > { %1235 = vrot.lane.b32.xlu0 %v1230_v30, %s5424_s16  ;;  %1237 = vrot.lane.b32.xlu2 %v1232_v43, %s5424_s16  ;;  %v1340_v30 = vstv %s4881_s26  ;;  %v1355_v43 = vmul.f32 %v1353_v35, %v5770_v25  ;;  %s4910_s26 = sld [smem:[#allocation5 + $0x21]] }
 0x132   : > { %v5951_v40 = vpop.permute.xlu1 %920  ;;  %v1341_v31 = vmul.f32 %v1340_v30, %v5754_v11  ;;  %v1342_v33 = vmul.f32 %v1340_v30, %v5770_v25  ;;  %v1440_v30 = vrot.slane %v1433_v61, 4  ;;  %v1499_v61 = vmul.f32 %v1498_v16, %v5754_v11 }
 0x133   : > { %8565 = vst [vmem:[#allocation17_spill] sm:$0xff] %v5951_v40  ;;  %v5953_v41 = vpop.permute.xlu0 %896 }
 0x134   : > { %8566 = vst [vmem:[#allocation18_spill] sm:$0xff] %v5953_v41  ;;  %v5958_v49 = vpop.permute.xlu2 %942 }
 0x135   : > { %8567 = vst [vmem:[#allocation19_spill] sm:$0xff] %v5958_v49 }
 0x138   : > { %1239 = vrot.lane.b32.xlu1 %v1234_v50, %s5424_s16 }
 0x139   : > { %1260 = vrot.lane.b32.xlu0 %v1257_v52, %s5424_s16  ;;  %1262 = vrot.lane.b32.xlu2 %v1259_v62, %s5424_s16  ;;  %v1374_v52 = vmul.f32 %v1372_v46, %v5770_v25  ;;  %v1392_v62 = vmul.f32 %v1391_v56, %v5754_v11 }
 0x13a   : > { %v5967_v57 = vpop.permute.xlu1 %944 }
 0x13b   : > { %8568 = vst [vmem:[#allocation20_spill] sm:$0xff] %v5967_v57  ;;  %v5969_v60 = vpop.permute.xlu0 %916 }
 0x13c   : > { %8569 = vst [vmem:[#allocation21_spill] sm:$0xff] %v5969_v60  ;;  %v5973_v3 = vpop.permute.xlu2 %966 }
 0x13d   : > { %8570 = vst [vmem:[#allocation22_spill] sm:$0xff] %v5973_v3 }
 0x140   : > { %1280 = vrot.lane.b32.xlu1 %v1277_v4, %s5424_s16  ;;  %v1411_v4 = vmul.f32 %v1410_v1, %v5754_v11 }
 0x141   : > { %1282 = vrot.lane.b32.xlu0 %v1279_v5, %s5424_s16  ;;  %1284 = vrot.lane.b32.xlu2 %v1278_v63, %s5424_s16  ;;  %v1393_v5 = vmul.f32 %v1391_v56, %v5770_v25 }
 0x142   : > { %v5982_v8 = vpop.permute.xlu1 %873  ;;  %v1417_v18 = vrot.slane %v1411_v4, 4 }
 0x143   : > { %8571 = vst [vmem:[#allocation23_spill] sm:$0xff] %v5982_v8  ;;  %v5984_v12 = vpop.permute.xlu0 %940 }
 0x144   : > { %8572 = vst [vmem:[#allocation24_spill] sm:$0xff] %v5984_v12  ;;  %v5987_v20 = vpop.permute.xlu2 %990 }
 0x145   : > { %8573 = vst [vmem:[#allocation25_spill] sm:$0xff] %v5987_v20 }
 0x148   : > { %1304 = vrot.lane.b32.xlu1 %v1301_v51, %s5424_s16  ;;  %v1431_v51 = vmul.f32 %v1430_v6, %v5754_v11 }
 0x149   : > { %1306 = vrot.lane.b32.xlu0 %v1303_v55, %s5424_s16  ;;  %1308 = vrot.lane.b32.xlu2 %v1302_v13, %s5424_s16  ;;  %v1418_v13 = vrot.slane %v1412_v2, 4  ;;  %v1478_v2 = vstv %s4882_s8  ;;  %s6186_s8 = sld [smem:[#allocation5 + $0x6]] }
 0x14a   : > { %v5996_v59 = vpop.permute.xlu1 %898  ;;  %v1437_v21 = vrot.slane %v1431_v51, 4 }
 0x14b   : > { %8574 = vst [vmem:[#allocation26_spill] sm:$0xff] %v5996_v59  ;;  %v5998_v10 = vpop.permute.xlu0 %964  ;;  %v1419_v36 = vsel %vm816_vm2, %v1417_v18, %v1418_v13 }
 0x14c   : > { %8575 = vst [vmem:[#allocation27_spill] sm:$0xff] %v5998_v10  ;;  %v6001_v22 = vpop.permute.xlu2 %1012 }
 0x14d   : > { %8576 = vst [vmem:[#allocation28_spill] sm:$0xff] %v6001_v22 }
 0x150   : > { %1328 = vrot.lane.b32.xlu1 %v1325_v24, %s5424_s16  ;;  %v1454_v24 = vstv %s4923_s5  ;;  %s6169_s5 = sld [smem:[#allocation5 + $0x93]] }
 0x151   : > { %1330 = vrot.lane.b32.xlu0 %v1327_v27, %s5424_s16  ;;  %1332 = vrot.lane.b32.xlu2 %v1326_v14, %s5424_s16  ;;  %v1438_v14 = vrot.slane %v1432_v15, 4  ;;  %v1456_v35 = vmul.f32 %v1454_v24, %v5770_v25 }
 0x152   : > { %v6007_v28 = vpop.permute.xlu1 %968 }
 0x153   : > { %8577 = vst [vmem:[#allocation29_spill] sm:$0xff] %v6007_v28  ;;  %v6009_v29 = vpop.permute.xlu0 %988  ;;  %v1441_v46 = vsel %vm816_vm2, %v1438_v14, %v1440_v30 }
 0x154   : > { %8578 = vst [vmem:[#allocation30_spill] sm:$0xff] %v6009_v29  ;;  %v6014_v34 = vpop.permute.xlu2 %1033 }
 0x155   : > { %8579 = vst [vmem:[#allocation31_spill] sm:$0xff] %v6014_v34 }
 0x158   : > { %1345 = vrot.lane.b32.xlu1 %v1341_v31, %s5425_s3  ;;  %v1421_v31 = vsel %vm816_vm2, %v1418_v13, %v1420_v37  ;;  %v1480_v13 = vmul.f32 %v1478_v2, %v5770_v25 }
 0x159   : > { %1347 = vrot.lane.b32.xlu0 %v1342_v33, %s5425_s3  ;;  %1360 = vrot.lane.b32.xlu2 %v1354_v38, %s5425_s3  ;;  %v1439_v33 = vsel %vm816_vm2, %v1437_v21, %v1438_v14  ;;  %v1455_v38 = vmul.f32 %v1454_v24, %v5754_v11 }
 0x15a   : > { %v6019_v39 = vpop.permute.xlu1 %1008  ;;  %v1484_v51 = vrot.slane %v1480_v13, 5 }
 0x15b   : > { %8580 = vst [vmem:[#allocation32_spill] sm:$0xff] %v6019_v39  ;;  %v6021_v42 = vpop.permute.xlu0 %1010 }
 0x15c   : > { %8581 = vst [vmem:[#allocation33_spill] sm:$0xff] %v6021_v42  ;;  %v6026_v45 = vpop.permute.xlu2 %1057 }
 0x15d   : > { %8582 = vst [vmem:[#allocation34_spill] sm:$0xff] %v6026_v45 }
 0x160   : > { %1362 = vrot.lane.b32.xlu1 %v1355_v43, %s5425_s3 }
 0x161   : > { %1364 = vrot.lane.b32.xlu0 %v1356_v44, %s5425_s3  ;;  %1379 = vrot.lane.b32.xlu2 %v1373_v47, %s5425_s3  ;;  %v1457_v47 = vmul.f32 %v1454_v24, %v5772_v26  ;;  %v1501_v24 = vmul.f32 %v1498_v16, %v5772_v26 }
 0x162   : > { %v6031_v48 = vpop.permute.xlu1 %1029 }
 0x163   : > { %8583 = vst [vmem:[#allocation35_spill] sm:$0xff] %v6031_v48  ;;  %v6033_v50 = vpop.permute.xlu0 %1031 }
 0x164   : > { %8584 = vst [vmem:[#allocation36_spill] sm:$0xff] %v6033_v50  ;;  %v6038_v54 = vpop.permute.xlu2 %1098 }
 0x165   : > { %8585 = vst [vmem:[#allocation37_spill] sm:$0xff] %v6038_v54 }
 0x168   : > { %1381 = vrot.lane.b32.xlu1 %v1374_v52, %s5425_s3  ;;  %v1462_v52 = vrot.slane %v1456_v35, 4 }
 0x169   : > { %1383 = vrot.lane.b32.xlu0 %v1375_v53, %s5425_s3  ;;  %1398 = vrot.lane.b32.xlu2 %v1392_v62, %s5425_s3  ;;  %v1461_v53 = vrot.slane %v1455_v38, 4  ;;  %v1464_v62 = vrot.slane %v1457_v47, 4  ;;  %v1508_v38 = vrot.slane %v1501_v24, 1 }
 0x16a   : > { %v6043_v63 = vpop.permute.xlu1 %1053 }
 0x16b   : > { %8586 = vst [vmem:[#allocation38_spill] sm:$0xff] %v6043_v63  ;;  %v6045_v0 = vpop.permute.xlu0 %1055  ;;  %v1463_v1 = vsel %vm816_vm2, %v1461_v53, %v1462_v52  ;;  %v1465_v6 = vsel %vm816_vm2, %v1462_v52, %v1464_v62 }
 0x16c   : > { %8587 = vst [vmem:[#allocation39_spill] sm:$0xff] %v6045_v0  ;;  %v6052_v7 = vpop.permute.xlu2 %1122 }
 0x16d   : > { %8588 = vst [vmem:[#allocation40_spill] sm:$0xff] %v6052_v7 }
 0x170   : > { %1400 = vrot.lane.b32.xlu1 %v1393_v5, %s5425_s3 }
 0x171   : > { %1402 = vrot.lane.b32.xlu0 %v1394_v9, %s5425_s3  ;;  %1422 = vrot.lane.b32.xlu2 %v1419_v36, %s5425_s3  ;;  %v1479_v9 = vmul.f32 %v1478_v2, %v5754_v11  ;;  %v1500_v36 = vmul.f32 %v1498_v16, %v5770_v25 }
 0x172   : > { %v6059_v55 = vpop.permute.xlu1 %1078 }
 0x173   : > { %8589 = vst [vmem:[#allocation41_spill] sm:$0xff] %v6059_v55  ;;  %v6061_v58 = vpop.permute.xlu0 %1080  ;;  %v1483_v15 = vrot.slane %v1479_v9, 5 }
 0x174   : > { %8590 = vst [vmem:[#allocation42_spill] sm:$0xff] %v6061_v58  ;;  %v6066_v27 = vpop.permute.xlu2 %1146 }
 0x175   : > { %8591 = vst [vmem:[#allocation43_spill] sm:$0xff] %v6066_v27  ;;  %v1485_v21 = vsel %vm867_vm4, %v1483_v15, %v1484_v51 }
 0x178   : > { %1424 = vrot.lane.b32.xlu1 %v1421_v31, %s5425_s3  ;;  %v1505_v31 = vrot.slane %v1499_v61, 1 }
 0x179   : > { %1442 = vrot.lane.b32.xlu0 %v1439_v33, %s5425_s3  ;;  %1444 = vrot.lane.b32.xlu2 %v1441_v46, %s5425_s3  ;;  %v1518_v33 = vstv %s4896_s19  ;;  %s6202_s19 = sld [smem:[#allocation5 + $0x86]] }
 0x17a   : > { %v6074_v43 = vpop.permute.xlu1 %1100  ;;  %v1521_v47 = vmul.f32 %v1518_v33, %v5772_v26  ;;  %v1520_v52 = vmul.f32 %v1518_v33, %v5770_v25  ;;  %v1519_v53 = vmul.f32 %v1518_v33, %v5754_v11 }
 0x17b   : > { %8592 = vst [vmem:[#allocation44_spill] sm:$0xff] %v6074_v43  ;;  %v6076_v44 = vpop.permute.xlu0 %1102 }
 0x17c   : > { %8593 = vst [vmem:[#allocation45_spill] sm:$0xff] %v6076_v44  ;;  %v6081_v56 = vpop.permute.xlu2 %1170  ;;  %v1528_v9 = vrot.slane %v1521_v47, 1  ;;  %v1525_v13 = vrot.slane %v1519_v53, 1  ;;  %v1566_v47 = vstv %s4910_s26  ;;  %s6208_s26 = sld [smem:[#allocation5 + $0x71]] }
 0x17d   : > { %8594 = vst [vmem:[#allocation46_spill] sm:$0xff] %v6081_v56  ;;  %v1590_v56 = vstv %s4917_s7  ;;  %s5427_s7 = smov 122  }
 0x180   : > { %1446 = vrot.lane.b32.xlu1 %v1440_v30, %s5425_s3  ;;  %v1506_v30 = vrot.slane %v1500_v36, 1 }
 0x181   : > { %1466 = vrot.lane.b32.xlu0 %v1463_v1, %s5425_s3  ;;  %1468 = vrot.lane.b32.xlu2 %v1465_v6, %s5425_s3  ;;  %v1526_v6 = vrot.slane %v1520_v52, 1  ;;  %v1568_v52 = vmul.f32 %v1566_v47, %v5770_v25 }
 0x182   : > { %v6086_v4 = vpop.permute.xlu1 %1124  ;;  %v1507_v46 = vsel %vm890_vm15, %v1505_v31, %v1506_v30  ;;  %v1509_v2 = vsel %vm890_vm15, %v1506_v30, %v1508_v38 }
 0x183   : > { %8595 = vst [vmem:[#allocation47_spill] sm:$0xff] %v6086_v4  ;;  %v6088_v5 = vpop.permute.xlu0 %1126  ;;  %v1529_v36 = vsel %vm890_vm15, %v1526_v6, %v1528_v9 }
 0x184   : > { %8596 = vst [vmem:[#allocation48_spill] sm:$0xff] %v6088_v5  ;;  %v6094_v18 = vpop.permute.xlu2 %1189 }
 0x185   : > { %8597 = vst [vmem:[#allocation49_spill] sm:$0xff] %v6094_v18 }
 0x188   : > { %1470 = vrot.lane.b32.xlu1 %v1464_v62, %s5425_s3 }
 0x189   : > { %1486 = vrot.lane.b32.xlu0 %v1483_v15, %s5426_s24  ;;  %1488 = vrot.lane.b32.xlu2 %v1485_v21, %s5426_s24  ;;  %v1542_v15 = vstv %s4903_s25  ;;  %s6205_s25 = sld [smem:[#allocation5 + $0x8d]] }
 0x18a   : > { %v6100_v14 = vpop.permute.xlu1 %1148  ;;  %v1545_v61 = vmul.f32 %v1542_v15, %v5772_v26  ;;  %v1544_v21 = vmul.f32 %v1542_v15, %v5770_v25  ;;  %v1543_v24 = vmul.f32 %v1542_v15, %v5754_v11  ;;  %v6150_v15 = vld [vmem:[#allocation3] sm:$0xff]  ;;  %v3242_v25 = vstv %s6129_s29  ;;  %s4890_s29 = sld [smem:[#allocation5 + $0xd]] }
 0x18b   : > { %8598 = vst [vmem:[#allocation50_spill] sm:$0xff] %v6100_v14  ;;  %v6102_v37 = vpop.permute.xlu0 %1150 }
 0x18c   : > { %8599 = vst [vmem:[#allocation51_spill] sm:$0xff] %v6102_v37  ;;  %v6107_v35 = vpop.permute.xlu2 %1213  ;;  %v1552_v33 = vrot.slane %v1545_v61, 1  ;;  %v1550_v38 = vrot.slane %v1544_v21, 1 }
 0x18d   : > { %8600 = vst [vmem:[#allocation52_spill] sm:$0xff] %v6107_v35  ;;  %v3306_v35 = vstv %s6169_s5  ;;  %s5072_s5 = sld [smem:[#allocation5 + $0xc3]] }
 0x18e   : > { %v3307_v54 = vmul.f32 %v3306_v35, %v6150_v15 }
 0x190   : > { %1490 = vrot.lane.b32.xlu1 %v1484_v51, %s5426_s24  ;;  %v1527_v51 = vsel %vm890_vm15, %v1525_v13, %v1526_v6  ;;  %v1569_v6 = vmul.f32 %v1566_v47, %v5772_v26  ;;  %v6147_v13 = vld [vmem:[#allocation2] sm:$0xff]  ;;  %v1574_v26 = vrot.slane %v1568_v52, 1 }
 0x191   : > { %1510 = vrot.lane.b32.xlu0 %v1507_v46, %s5426_s24  ;;  %1512 = vrot.lane.b32.xlu2 %v1509_v2, %s5426_s24  ;;  %v1549_v46 = vrot.slane %v1543_v24, 1  ;;  %v1553_v2 = vsel %vm890_vm15, %v1550_v38, %v1552_v33  ;;  %v3243_v24 = vmul.f32 %v3242_v25, %v6150_v15 }
 0x192   : > { %v6115_v62 = vpop.permute.xlu1 %1172 }
 0x193   : > { %8601 = vst [vmem:[#allocation53_spill] sm:$0xff] %v6115_v62  ;;  %v6117_v1 = vpop.permute.xlu0 %1187  ;;  %v1551_v11 = vsel %vm890_vm15, %v1549_v46, %v1550_v38  ;;  %v1576_v38 = vrot.slane %v1569_v6, 1 }
 0x194   : > { %8602 = vst [vmem:[#allocation54_spill] sm:$0xff] %v6117_v1  ;;  %v6121_v16 = vpop.permute.xlu2 %1237 }
 0x195   : > { %8603 = vst [vmem:[#allocation55_spill] sm:$0xff] %v6121_v16 }
 0x198   : > { %1530 = vrot.lane.b32.xlu1 %v1527_v51, %s5426_s24  ;;  %v3230_v51 = vstv %s6132_s27  ;;  %s4897_s27 = sld [smem:[#allocation5 + $0x14]] }
 0x199   : > { %1532 = vrot.lane.b32.xlu0 %v1529_v36, %s5426_s24  ;;  %1534 = vrot.lane.b32.xlu2 %v1528_v9, %s5426_s24  ;;  %v1567_v9 = vmul.f32 %v6147_v13, %v1566_v47  ;;  %v6156_v36 = vld [vmem:[#allocation3 + $0x8] sm:$0x3] }
 0x19a   : > { %v6134_v30 = vpop.permute.xlu1 %1191  ;;  %v3244_v46 = vmul.f32 %v3242_v25, %v6156_v36  ;;  %v3232_v19 = vmul.f32 %v3230_v51, %v6156_v36 }
 0x19b   : > { %8604 = vst [vmem:[#allocation56_spill] sm:$0xff] %v6134_v30  ;;  %v6136_v31 = vpop.permute.xlu0 %1211  ;;  %v1573_v47 = vrot.slane %v1567_v9, 1  ;;  %v6175_v9 = vld [vmem:[#allocation2 + $0x8] sm:$0xff] }
 0x19c   : > { %8605 = vst [vmem:[#allocation57_spill] sm:$0xff] %v6136_v31  ;;  %v6140_v53 = vpop.permute.xlu2 %1262  ;;  %v3248_v31 = vrot.slane %v3244_v46, 5  ;;  %v1592_v25 = vmul.f32 %v6175_v9, %v1590_v56 }
 0x19d   : > { %8606 = vst [vmem:[#allocation58_spill] sm:$0xff] %v6140_v53  ;;  %v1575_v52 = vsel %vm890_vm15, %v1573_v47, %v1574_v26  ;;  %v3236_v53 = vrot.slane %v3232_v19, 5  ;;  %v3294_v47 = vstv %s6154_s20  ;;  %s4904_s20 = sld [smem:[#allocation5 + $0x1b]] }
 0x1a0   : > { %1554 = vrot.lane.b32.xlu1 %v1551_v11, %s5426_s24  ;;  %v3247_v11 = vrot.slane %v3243_v24, 5  ;;  %v6178_v24 = vld [vmem:[#allocation2 + $0x10] sm:$0x3f] }
 0x1a1   : > { %1556 = vrot.lane.b32.xlu0 %v1553_v2, %s5426_s24  ;;  %1558 = vrot.lane.b32.xlu2 %v1552_v33, %s5426_s24  ;;  %v3231_v2 = vmul.f32 %v3230_v51, %v6150_v15  ;;  %v1577_v33 = vsel %vm890_vm15, %v1574_v26, %v1576_v38  ;;  %v1593_v51 = vmul.f32 %v6178_v24, %v1590_v56 }
 0x1a2   : > { %v6158_v61 = vpop.permute.xlu1 %1215  ;;  %v6182_v46 = vsel %vm867_vm4, %v3247_v11, %v3248_v31  ;;  %v1591_v26 = vmul.f32 %v6147_v13, %v1590_v56  ;;  %v1610_v31 = vstv %s6162_s23  ;;  %v3295_v11 = vmul.f32 %v3294_v47, %v6150_v15  ;;  %s4911_s23 = sld [smem:[#allocation5 + $0x22]] }
 0x1a3   : > { %8607 = vst [vmem:[#allocation59_spill] sm:$0xff] %v6158_v61  ;;  %v6160_v21 = vpop.permute.xlu0 %1235 }
 0x1a4   : > { %8608 = vst [vmem:[#allocation60_spill] sm:$0xff] %v6160_v21  ;;  %v3235_v21 = vrot.slane %v3231_v2, 5  ;;  %v6172_v6 = vpop.permute.xlu2 %1284  ;;  %v3299_v56 = vrot.slane %v3295_v11, 2  ;;  %v1597_v7 = vrot.slane %v1591_v26, 5  ;;  %v1613_v26 = vmul.f32 %v6178_v24, %v1610_v31 }
 0x1a5   : > { %8609 = vst [vmem:[#allocation61_spill] sm:$0xff] %v6172_v6 }
 0x1a6   : > { %v6189_v19 = vsel %vm867_vm4, %v3235_v21, %v3236_v53  ;;  %v1612_v53 = vmul.f32 %v6175_v9, %v1610_v31  ;;  %v1598_v21 = vrot.slane %v1592_v25, 5  ;;  %v3308_v25 = vmul.f32 %v3306_v35, %v6156_v36 }
 0x1a8   : > { %1578 = vrot.lane.b32.xlu1 %v1575_v52, %s5426_s24  ;;  %v3296_v52 = vmul.f32 %v3294_v47, %v6156_v36  ;;  %v1599_v11 = vsel %vm867_vm4, %v1597_v7, %v1598_v21 }
 0x1a9   : > { %1580 = vrot.lane.b32.xlu0 %v1577_v33, %s5426_s24  ;;  %v1600_v33 = vrot.slane %v1593_v51, 5  ;;  %1582 = vrot.lane.b32.xlu2 %v1576_v38, %s5426_s24  ;;  %v1618_v38 = vrot.slane %v1612_v53, 5  ;;  %v2903_v53 = vstv %s6193_s17  ;;  %s5065_s17 = sld [smem:[#allocation5 + $0xbc]] }
 0x1aa   : > { %v6195_v2 = vpop.permute.xlu1 %1239  ;;  %v3300_v27 = vrot.slane %v3296_v52, 2 }
 0x1ab   : > { %8610 = vst [vmem:[#allocation62_spill] sm:$0xff] %v6195_v2  ;;  %v6197_v1 = vpop.permute.xlu0 %1260  ;;  %v1601_v52 = vsel %vm867_vm4, %v1598_v21, %v1600_v33  ;;  %v1620_v33 = vrot.slane %v1613_v26, 5 }
 0x1ac   : > { %8611 = vst [vmem:[#allocation63_spill] sm:$0xff] %v6197_v1  ;;  %v1611_v1 = vmul.f32 %v6147_v13, %v1610_v31  ;;  %v6213_v47 = vsel %vm1072_vm6, %v3299_v56, %v3300_v27  ;;  %v6217_v51 = vpop.permute.xlu2 %1308  ;;  %v3311_v27 = vrot.slane %v3307_v54, 6  ;;  %v3312_v56 = vrot.slane %v3308_v25, 6 }
 0x1ad   : > { %8612 = vst [vmem:[#allocation64_spill] sm:$0xff] %v6217_v51  ;;  %v1634_v31 = vstv %s6186_s8  ;;  %v2906_v25 = vstv %s6208_s26  ;;  %s4918_s8 = sld [smem:[#allocation5 + $0x29]] }
 0x1ae   : > { %v1617_v35 = vrot.slane %v1611_v1, 5  ;;  %v6229_v7 = vsel %vm1025_vm5, %v3311_v27, %v3312_v56  ;;  %v2907_v62 = vmul.f32 %v2906_v25, %v6150_v15  ;;  %s6320_s26 = sld [smem:[#allocation5 + $0xc4]] }
 0x1b0   : > { %1602 = vrot.lane.b32.xlu1 %v1599_v11, %s5426_s24  ;;  %v1619_v21 = vsel %vm867_vm4, %v1617_v35, %v1618_v38  ;;  %v2918_v11 = vstv %s6202_s19  ;;  %v1635_v35 = vmul.f32 %v6147_v13, %v1634_v31  ;;  %s6305_s19 = sld [smem:[#allocation5 + $0xbd]] }
 0x1b1   : > { %1604 = vrot.lane.b32.xlu0 %v1601_v52, %s5426_s24  ;;  %1622 = vrot.lane.b32.xlu2 %v1619_v21, %s5426_s24  ;;  %v2919_v54 = vmul.f32 %v2918_v11, %v6150_v15  ;;  %v2920_v1 = vmul.f32 %v2918_v11, %v6156_v36  ;;  %v2928_v52 = vstv %s6205_s25  ;;  %v1636_v21 = vmul.f32 %v6175_v9, %v1634_v31  ;;  %s6316_s25 = sld [smem:[#allocation5 + $0x30]] }
 0x1b2   : > { %v6224_v6 = vpop.permute.xlu1 %1280  ;;  %v2929_v27 = vmul.f32 %v2928_v52, %v6150_v15  ;;  %v2930_v56 = vmul.f32 %v2928_v52, %v6156_v36  ;;  %v1621_v11 = vsel %vm867_vm4, %v1618_v38, %v1620_v33  ;;  %v1654_v38 = vstv %s4890_s29  ;;  %s6331_s29 = sld [smem:[#allocation5 + $0xb7]] }
 0x1b3   : > { %8613 = vst [vmem:[#allocation65_spill] sm:$0xff] %v6224_v6  ;;  %v6226_v51 = vpop.permute.xlu0 %1282  ;;  %v2904_v6 = vmul.f32 %v2903_v53, %v6150_v15  ;;  %v2923_v61 = vrot.slane %v2919_v54, 4  ;;  %v2924_v26 = vrot.slane %v2920_v1, 4  ;;  %v1639_v15 = vrot.slane %v1635_v35, 6 }
 0x1b4   : > { %8614 = vst [vmem:[#allocation66_spill] sm:$0xff] %v6226_v51  ;;  %v6245_v55 = vpop.permute.xlu2 %1332  ;;  %v2933_v51 = vrot.slane %v2929_v27, 4  ;;  %v2934_v5 = vrot.slane %v2930_v56, 4  ;;  %v1640_v52 = vrot.slane %v1636_v21, 6 }
 0x1b5   : > { %8615 = vst [vmem:[#allocation67_spill] sm:$0xff] %v6245_v55  ;;  %v2925_v36 = vsel %vm816_vm2, %v2923_v61, %v2924_v26 }
 0x1b6   : > { %v6252_v53 = vadd.f32 %v2925_v36, %v2904_v6  ;;  %v2935_v54 = vsel %vm816_vm2, %v2933_v51, %v2934_v5  ;;  %v1641_v6 = vsel %vm1025_vm5, %v1639_v15, %v1640_v52  ;;  %v1656_v5 = vmul.f32 %v6175_v9, %v1654_v38 }
 0x1b7   : > { %v6259_v31 = vadd.f32 %v2935_v54, %v2907_v62  ;;  %v1657_v51 = vmul.f32 %v6178_v24, %v1654_v38  ;;  %v1678_v62 = vstv %s4897_s27  ;;  %s6344_s27 = sld [smem:[#allocation5 + $0xbe]]  ;;  %v1770_v4 = vstv %s6316_s25 }
 0x1b8   : > { %1624 = vrot.lane.b32.xlu1 %v1621_v11, %s5426_s24  ;;  %v1680_v26 = vmul.f32 %v6175_v9, %v1678_v62  ;;  %v1662_v21 = vrot.slane %v1656_v5, 6  ;;  %v1679_v36 = vmul.f32 %v6147_v13, %v1678_v62  ;;  %s4969_s25 = sld [smem:[#allocation5 + $0x5c]] }
 0x1b9   : > { %1626 = vrot.lane.b32.xlu0 %v1620_v33, %s5426_s24  ;;  %1642 = vrot.lane.b32.xlu2 %v1639_v15, %s5427_s7  ;;  %v1655_v33 = vmul.f32 %v6147_v13, %v1654_v38  ;;  %v1664_v11 = vrot.slane %v1657_v51, 6  ;;  %v1698_v15 = vstv %s4904_s20  ;;  %s4927_s20 = sld [smem:[#allocation5 + $0x32]] }
 0x1ba   : > { %v6255_v1 = vpop.permute.xlu1 %1304  ;;  %v1686_v54 = vrot.slane %v1680_v26, 2  ;;  %v1685_v5 = vrot.slane %v1679_v36, 2  ;;  %v1699_v51 = vmul.f32 %v6147_v13, %v1698_v15 }
 0x1bb   : > { %8616 = vst [vmem:[#allocation68_spill] sm:$0xff] %v6255_v1  ;;  %v6257_v25 = vpop.permute.xlu0 %1306  ;;  %v1661_v27 = vrot.slane %v1655_v33, 6  ;;  %v1665_v33 = vsel %vm1025_vm5, %v1662_v21, %v1664_v11 }
 0x1bc   : > { %8617 = vst [vmem:[#allocation69_spill] sm:$0xff] %v6257_v25  ;;  %v6263_v61 = vpop.permute.xlu2 %1360  ;;  %v3658_v25 = vstv %s5065_s17  ;;  %s4955_s17 = sld [smem:[#allocation5 + $0x4e]] }
 0x1bd   : > { %8618 = vst [vmem:[#allocation70_spill] sm:$0xff] %v6263_v61  ;;  %v1681_v61 = vmul.f32 %v6178_v24, %v1678_v62  ;;  %v1705_v62 = vrot.slane %v1699_v51, 2 }
 0x1bf   : > { %v1688_v11 = vrot.slane %v1681_v61, 2  ;;  %v6300_v61 = vld [vmem:[#allocation3 + $0x10] sm:$0xff] }
 0x1c0   : > { %1644 = vrot.lane.b32.xlu1 %v1641_v6, %s5427_s7  ;;  %v1700_v6 = vmul.f32 %v6175_v9, %v1698_v15 }
 0x1c1   : > { %1646 = vrot.lane.b32.xlu0 %v1640_v52, %s5427_s7  ;;  %1666 = vrot.lane.b32.xlu2 %v1661_v27, %s5427_s7  ;;  %v1663_v52 = vsel %vm1025_vm5, %v1661_v27, %v1662_v21  ;;  %v1701_v27 = vmul.f32 %v6178_v24, %v1698_v15  ;;  %v6302_v15 = vld [vmem:[#allocation3 + $0x18] sm:$0x3] }
 0x1c2   : > { %v6270_v56 = vpop.permute.xlu1 %1328  ;;  %v1706_v21 = vrot.slane %v1700_v6, 2 }
 0x1c3   : > { %8619 = vst [vmem:[#allocation71_spill] sm:$0xff] %v6270_v56  ;;  %v6272_v35 = vpop.permute.xlu0 %1330 }
 0x1c4   : > { %8620 = vst [vmem:[#allocation72_spill] sm:$0xff] %v6272_v35  ;;  %v6277_v38 = vpop.permute.xlu2 %1379  ;;  %v1707_v56 = vsel %vm1072_vm6, %v1705_v62, %v1706_v21 }
 0x1c5   : > { %8621 = vst [vmem:[#allocation73_spill] sm:$0xff] %v6277_v38  ;;  %v1687_v38 = vsel %vm1072_vm6, %v1685_v5, %v1686_v54 }
 0x1c8   : > { %1668 = vrot.lane.b32.xlu1 %v1663_v52, %s5427_s7  ;;  %v1722_v52 = vstv %s4911_s23  ;;  %s4934_s23 = sld [smem:[#allocation5 + $0x39]] }
 0x1c9   : > { %1670 = vrot.lane.b32.xlu0 %v1665_v33, %s5427_s7  ;;  %1690 = vrot.lane.b32.xlu2 %v1687_v38, %s5427_s7  ;;  %v1708_v33 = vrot.slane %v1701_v27, 2  ;;  %v1724_v5 = vmul.f32 %v6175_v9, %v1722_v52  ;;  %v1723_v38 = vmul.f32 %v6147_v13, %v1722_v52  ;;  %v1725_v27 = vmul.f32 %v6178_v24, %v1722_v52 }
 0x1ca   : > { %v6286_v26 = vpop.permute.xlu1 %1345  ;;  %v3660_v52 = vmul.f32 %v3658_v25, %v6302_v15 }
 0x1cb   : > { %8622 = vst [vmem:[#allocation74_spill] sm:$0xff] %v6286_v26  ;;  %v6288_v1 = vpop.permute.xlu0 %1347  ;;  %v1689_v26 = vsel %vm1072_vm6, %v1686_v54, %v1688_v11  ;;  %v1709_v54 = vsel %vm1072_vm6, %v1706_v21, %v1708_v33  ;;  %v1730_v11 = vrot.slane %v1724_v5, 2  ;;  %v3659_v21 = vmul.f32 %v3658_v25, %v6300_v61 }
 0x1cc   : > { %8623 = vst [vmem:[#allocation75_spill] sm:$0xff] %v6288_v1  ;;  %v6293_v36 = vpop.permute.xlu2 %1398  ;;  %v1746_v1 = vstv %s4918_s8  ;;  %s4948_s8 = sld [smem:[#allocation5 + $0x47]] }
 0x1cd   : > { %8624 = vst [vmem:[#allocation76_spill] sm:$0xff] %v6293_v36  ;;  %v1729_v36 = vrot.slane %v1723_v38, 2  ;;  %v1748_v38 = vmul.f32 %v6175_v9, %v1746_v1  ;;  %v1747_v25 = vmul.f32 %v6147_v13, %v1746_v1 }
 0x1cf   : > { %v1731_v63 = vsel %vm1072_vm6, %v1729_v36, %v1730_v11 }
 0x1d0   : > { %1692 = vrot.lane.b32.xlu1 %v1689_v26, %s5427_s7  ;;  %v3670_v26 = vstv %s5072_s5  ;;  %s4941_s5 = sld [smem:[#allocation5 + $0x40]] }
 0x1d1   : > { %1710 = vrot.lane.b32.xlu0 %v1707_v56, %s5427_s7  ;;  %1712 = vrot.lane.b32.xlu2 %v1709_v54, %s5427_s7  ;;  %v3671_v56 = vmul.f32 %v3670_v26, %v6300_v61  ;;  %v3672_v62 = vmul.f32 %v3670_v26, %v6302_v15  ;;  %v1732_v54 = vrot.slane %v1725_v27, 2 }
 0x1d2   : > { %v6307_v6 = vpop.permute.xlu1 %1362 }
 0x1d3   : > { %8625 = vst [vmem:[#allocation77_spill] sm:$0xff] %v6307_v6  ;;  %v6309_v51 = vpop.permute.xlu0 %1364  ;;  %v3675_v6 = vrot.slane %v3671_v56, 4  ;;  %v3663_v56 = vrot.slane %v3659_v21, 4  ;;  %v1749_v21 = vmul.f32 %v6178_v24, %v1746_v1  ;;  %v1772_v1 = vmul.f32 %v6175_v9, %v1770_v4 }
 0x1d4   : > { %8626 = vst [vmem:[#allocation78_spill] sm:$0xff] %v6309_v51  ;;  %v3676_v51 = vrot.slane %v3672_v62, 4  ;;  %v6322_v5 = vpop.permute.xlu2 %1422  ;;  %v3664_v62 = vrot.slane %v3660_v52, 4  ;;  %v1754_v52 = vrot.slane %v1748_v38, 2  ;;  %v1773_v9 = vmul.f32 %v6178_v24, %v1770_v4 }
 0x1d5   : > { %8627 = vst [vmem:[#allocation79_spill] sm:$0xff] %v6322_v5  ;;  %v3722_v5 = vstv %s6305_s19  ;;  %v1778_v30 = vrot.slane %v1772_v1, 6  ;;  %s4962_s19 = sld [smem:[#allocation5 + $0x55]] }
 0x1d6   : > { %v6329_v26 = vsel %vm816_vm2, %v3675_v6, %v3676_v51  ;;  %v3724_v6 = vmul.f32 %v3722_v5, %v6302_v15  ;;  %v1733_v51 = vsel %vm1072_vm6, %v1730_v11, %v1732_v54  ;;  %v1780_v1 = vrot.slane %v1773_v9, 6 }
 0x1d8   : > { %1714 = vrot.lane.b32.xlu1 %v1708_v33, %s5427_s7  ;;  %v6340_v33 = vsel %vm816_vm2, %v3663_v56, %v3664_v62  ;;  %v3728_v55 = vrot.slane %v3724_v6, 5  ;;  %v3734_v62 = vstv %s6320_s26  ;;  %s5122_s26 = sld [smem:[#allocation5 + $0xf5]] }
 0x1d9   : > { %1734 = vrot.lane.b32.xlu0 %v1731_v63, %s5427_s7  ;;  %v3723_v63 = vmul.f32 %v3722_v5, %v6300_v61  ;;  %1736 = vrot.lane.b32.xlu2 %v1733_v51, %s5427_s7  ;;  %v1756_v5 = vrot.slane %v1749_v21, 2  ;;  %v3735_v38 = vmul.f32 %v3734_v62, %v6300_v61 }
 0x1da   : > { %v6335_v27 = vpop.permute.xlu1 %1381 }
 0x1db   : > { %8628 = vst [vmem:[#allocation80_spill] sm:$0xff] %v6335_v27  ;;  %v6337_v36 = vpop.permute.xlu0 %1383  ;;  %v3727_v27 = vrot.slane %v3723_v63, 5  ;;  %v3350_v63 = vstv %s6331_s29  ;;  %s6462_s29 = sld [smem:[#allocation5 + $0x33]] }
 0x1dc   : > { %8629 = vst [vmem:[#allocation81_spill] sm:$0xff] %v6337_v36  ;;  %v1753_v36 = vrot.slane %v1747_v25, 2  ;;  %v6354_v18 = vpop.permute.xlu2 %1444  ;;  %v3736_v25 = vmul.f32 %v3734_v62, %v6302_v15  ;;  %v3351_v6 = vmul.f32 %v3350_v63, %v6300_v61  ;;  %v3352_v51 = vmul.f32 %v3350_v63, %v6302_v15 }
 0x1dd   : > { %v6351_v56 = vsel %vm867_vm4, %v3727_v27, %v3728_v55  ;;  %8630 = vst [vmem:[#allocation82_spill] sm:$0xff] %v6354_v18  ;;  %v1771_v55 = vmul.f32 %v6147_v13, %v1770_v4  ;;  %v3739_v27 = vrot.slane %v3735_v38, 5 }
 0x1de   : > { %v1755_v11 = vsel %vm1072_vm6, %v1753_v36, %v1754_v52  ;;  %v3740_v18 = vrot.slane %v3736_v25, 5  ;;  %v3355_v62 = vrot.slane %v3351_v6, 3  ;;  %v3356_v35 = vrot.slane %v3352_v51, 3 }
 0x1df   : > { %v1913_v51 = vstv %s4927_s20  ;;  %s4935_s20 = sld [smem:[#allocation5 + $0x3a]] }
 0x1e0   : > { %1738 = vrot.lane.b32.xlu1 %v1732_v54, %s5427_s7  ;;  %v3360_v54 = vstv %s6344_s27  ;;  %v6375_v13 = vsel %vm867_vm4, %v3739_v27, %v3740_v18  ;;  %v6380_v4 = vsel %vm1254_vm1, %v3355_v62, %v3356_v35  ;;  %v6394_v35 = vld [vmem:[#allocation2 + $0x18] sm:$0xff]  ;;  %v1781_v27 = vsel %vm1025_vm5, %v1778_v30, %v1780_v1  ;;  %s6470_s27 = sld [smem:[#allocation5 + $0xee]] }
 0x1e1   : > { %1758 = vrot.lane.b32.xlu0 %v1755_v11, %s5427_s7  ;;  %v1757_v11 = vsel %vm1072_vm6, %v1754_v52, %v1756_v5  ;;  %v3361_v38 = vmul.f32 %v3360_v54, %v6300_v61  ;;  %v3362_v63 = vmul.f32 %v3360_v54, %v6302_v15  ;;  %v1926_v54 = vstv %s4934_s23  ;;  %s6481_s23 = sld [smem:[#allocation5 + $0xef]] }
 0x1e2   : > { %v6366_v21 = vpop.permute.xlu1 %1400  ;;  %1760 = vrot.lane.b32.xlu2 %v1757_v11, %s5427_s7  ;;  %v1927_v11 = vmul.f32 %v1926_v54, %v6394_v35  ;;  %v1945_v1 = vstv %s4941_s5  ;;  %s4942_s5 = sld [smem:[#allocation5 + $0x41]] }
 0x1e3   : > { %8631 = vst [vmem:[#allocation83_spill] sm:$0xff] %v6366_v21  ;;  %v6368_v36 = vpop.permute.xlu0 %1402  ;;  %v3365_v24 = vrot.slane %v3361_v38, 3  ;;  %v3366_v25 = vrot.slane %v3362_v63, 3  ;;  %v6412_v38 = vld [vmem:[#allocation2 + $0x28] sm:$0x3f] }
 0x1e4   : > { %8632 = vst [vmem:[#allocation84_spill] sm:$0xff] %v6368_v36  ;;  %v1777_v36 = vrot.slane %v1771_v55, 6  ;;  %v6382_v52 = vpop.permute.xlu2 %1468  ;;  %v6396_v55 = vld [vmem:[#allocation2 + $0x20] sm:$0xff] }
 0x1e5   : > { %8633 = vst [vmem:[#allocation85_spill] sm:$0xff] %v6382_v52  ;;  %v6388_v18 = vsel %vm1254_vm1, %v3365_v24, %v3366_v25  ;;  %v1928_v63 = vmul.f32 %v1926_v54, %v6396_v55  ;;  %v1929_v24 = vmul.f32 %v1926_v54, %v6412_v38 }
 0x1e6   : > { %v1779_v6 = vsel %vm1025_vm5, %v1777_v36, %v1778_v30  ;;  %v1915_v36 = vmul.f32 %v1913_v51, %v6396_v55 }
 0x1e7   : > { %v4176_v48 = vstv %s6481_s23  ;;  %s4970_s23 = sld [smem:[#allocation5 + $0x5d]] }
 0x1e8   : > { %1762 = vrot.lane.b32.xlu1 %v1756_v5, %s5427_s7  ;;  %v1914_v5 = vmul.f32 %v1913_v51, %v6394_v35 }
 0x1e9   : > { %1782 = vrot.lane.b32.xlu0 %v1779_v6, %s5427_s7  ;;  %v1946_v6 = vmul.f32 %v1945_v1, %v6394_v35 }
 0x1ea   : > { %v6390_v61 = vpop.permute.xlu1 %1424  ;;  %1784 = vrot.lane.b32.xlu2 %v1781_v27, %s5427_s7 }
 0x1eb   : > { %8634 = vst [vmem:[#allocation86_spill] sm:$0xff] %v6390_v61  ;;  %v6392_v15 = vpop.permute.xlu0 %1442 }
 0x1ec   : > { %8635 = vst [vmem:[#allocation87_spill] sm:$0xff] %v6392_v15  ;;  %v6402_v9 = vpop.permute.xlu2 %1488 }
 0x1ed   : > { %8636 = vst [vmem:[#allocation88_spill] sm:$0xff] %v6402_v9 }
 0x1f0   : > { %1918 = vrot.lane.b32.xlu1 %v1914_v5, %s5422_s14  ;;  %v1947_v5 = vmul.f32 %v1945_v1, %v6396_v55 }
 0x1f1   : > { %1920 = vrot.lane.b32.xlu0 %v1915_v36, %s5422_s14  ;;  %v1948_v36 = vmul.f32 %v1945_v1, %v6412_v38  ;;  %v2003_v1 = vstv %s4962_s19  ;;  %s6518_s19 = sld [smem:[#allocation5 + $0xe9]] }
 0x1f2   : > { %v6407_v62 = vpop.permute.xlu1 %1446  ;;  %1933 = vrot.lane.b32.xlu2 %v1927_v11, %s5422_s14  ;;  %v1964_v11 = vstv %s4948_s8  ;;  %v2004_v61 = vmul.f32 %v2003_v1, %v6394_v35  ;;  %s6500_s8 = sld [smem:[#allocation5 + $0xf6]] }
 0x1f3   : > { %8637 = vst [vmem:[#allocation89_spill] sm:$0xff] %v6407_v62  ;;  %v6409_v30 = vpop.permute.xlu0 %1466  ;;  %v1966_v52 = vmul.f32 %v1964_v11, %v6396_v55  ;;  %v2006_v62 = vmul.f32 %v2003_v1, %v6412_v38 }
 0x1f4   : > { %8638 = vst [vmem:[#allocation90_spill] sm:$0xff] %v6409_v30  ;;  %v6416_v25 = vpop.permute.xlu2 %1512  ;;  %v1983_v30 = vstv %s4955_s17  ;;  %v2010_v9 = vrot.slane %v2004_v61, 4  ;;  %s6510_s17 = sld [smem:[#allocation5 + $0xcd]] }
 0x1f5   : > { %8639 = vst [vmem:[#allocation91_spill] sm:$0xff] %v6416_v25  ;;  %v1985_v15 = vmul.f32 %v1983_v30, %v6396_v55 }
 0x1f8   : > { %1935 = vrot.lane.b32.xlu1 %v1928_v63, %s5422_s14  ;;  %v1965_v63 = vmul.f32 %v1964_v11, %v6394_v35  ;;  %v4188_v44 = vstv %s6500_s8  ;;  %s4929_s8 = sld [smem:[#allocation5 + $0x34]] }
 0x1f9   : > { %1937 = vrot.lane.b32.xlu0 %v1929_v24, %s5422_s14 }
 0x1fa   : > { %v6421_v27 = vpop.permute.xlu1 %1470  ;;  %1952 = vrot.lane.b32.xlu2 %v1946_v6, %s5422_s14  ;;  %v1984_v6 = vmul.f32 %v1983_v30, %v6394_v35  ;;  %v3785_v20 = vstv %s6510_s17  ;;  %s5171_s17 = sld [smem:[#allocation5 + $0x126]] }
 0x1fb   : > { %8640 = vst [vmem:[#allocation92_spill] sm:$0xff] %v6421_v27  ;;  %v6423_v51 = vpop.permute.xlu0 %1486  ;;  %v2005_v27 = vmul.f32 %v2003_v1, %v6396_v55 }
 0x1fc   : > { %8641 = vst [vmem:[#allocation93_spill] sm:$0xff] %v6423_v51  ;;  %v6428_v54 = vpop.permute.xlu2 %1534  ;;  %v1990_v25 = vrot.slane %v1984_v6, 4 }
 0x1fd   : > { %8642 = vst [vmem:[#allocation94_spill] sm:$0xff] %v6428_v54  ;;  %v1991_v54 = vrot.slane %v1985_v15, 4 }
 0x200   : > { %1954 = vrot.lane.b32.xlu1 %v1947_v5, %s5422_s14  ;;  %v1967_v5 = vmul.f32 %v1964_v11, %v6412_v38  ;;  %v1992_v11 = vsel %vm816_vm2, %v1990_v25, %v1991_v54 }
 0x201   : > { %1956 = vrot.lane.b32.xlu0 %v1948_v36, %s5422_s14 }
 0x202   : > { %v6433_v24 = vpop.permute.xlu1 %1490  ;;  %1971 = vrot.lane.b32.xlu2 %v1965_v63, %s5422_s14 }
 0x203   : > { %8643 = vst [vmem:[#allocation95_spill] sm:$0xff] %v6433_v24  ;;  %v6435_v51 = vpop.permute.xlu0 %1510  ;;  %v2013_v24 = vrot.slane %v2006_v62, 4 }
 0x204   : > { %8644 = vst [vmem:[#allocation96_spill] sm:$0xff] %v6435_v51  ;;  %v6442_v36 = vpop.permute.xlu2 %1558  ;;  %v1986_v51 = vmul.f32 %v1983_v30, %v6412_v38  ;;  %v2027_v30 = vstv %s4969_s25  ;;  %s6521_s25 = sld [smem:[#allocation5 + $0xd4]] }
 0x205   : > { %8645 = vst [vmem:[#allocation97_spill] sm:$0xff] %v6442_v36  ;;  %v2011_v36 = vrot.slane %v2005_v27, 4  ;;  %v2028_v1 = vmul.f32 %v2027_v30, %v6394_v35 }
 0x206   : > { %v1993_v15 = vrot.slane %v1986_v51, 4 }
 0x207   : > { %v2014_v25 = vsel %vm816_vm2, %v2011_v36, %v2013_v24  ;;  %v2034_v51 = vrot.slane %v2028_v1, 4 }
 0x208   : > { %1973 = vrot.lane.b32.xlu1 %v1966_v52, %s5422_s14  ;;  %v1994_v52 = vsel %vm816_vm2, %v1991_v54, %v1993_v15  ;;  %v4124_v54 = vstv %s5122_s26  ;;  %s6528_s26 = sld [smem:[#allocation5 + $0xf0]] }
 0x209   : > { %1975 = vrot.lane.b32.xlu0 %v1967_v5, %s5422_s14  ;;  %v2012_v5 = vsel %vm816_vm2, %v2010_v9, %v2011_v36  ;;  %v2030_v9 = vmul.f32 %v2027_v30, %v6412_v38  ;;  %v6483_v36 = vld [vmem:[#allocation4 + $0x8] sm:$0x3] }
 0x20a   : > { %v6449_v63 = vpop.permute.xlu1 %1530  ;;  %1995 = vrot.lane.b32.xlu2 %v1992_v11, %s5422_s14  ;;  %v6475_v11 = vld [vmem:[#allocation4] sm:$0xff] }
 0x20b   : > { %8646 = vst [vmem:[#allocation98_spill] sm:$0xff] %v6449_v63  ;;  %v6451_v6 = vpop.permute.xlu0 %1532  ;;  %v2029_v63 = vmul.f32 %v2027_v30, %v6396_v55  ;;  %v4126_v30 = vmul.f32 %v4124_v54, %v6483_v36 }
 0x20c   : > { %8647 = vst [vmem:[#allocation99_spill] sm:$0xff] %v6451_v6  ;;  %v6456_v21 = vpop.permute.xlu2 %1582 }
 0x20d   : > { %8648 = vst [vmem:[#allocation100_spill] sm:$0xff] %v6456_v21  ;;  %v2035_v27 = vrot.slane %v2029_v63, 4  ;;  %v4125_v63 = vmul.f32 %v4124_v54, %v6475_v11  ;;  %v4130_v6 = vrot.slane %v4126_v30, 5  ;;  %v2071_v21 = vstv %s4935_s20  ;;  %s4963_s20 = sld [smem:[#allocation5 + $0x56]] }
 0x20e   : > { %v2072_v30 = vmul.f32 %v2071_v21, %v6394_v35  ;;  %v3810_v39 = vstv %s6528_s26  ;;  %s4943_s26 = sld [smem:[#allocation5 + $0x42]] }
 0x210   : > { %1997 = vrot.lane.b32.xlu1 %v1994_v52, %s5422_s14  ;;  %v2037_v52 = vrot.slane %v2030_v9, 4 }
 0x211   : > { %2015 = vrot.lane.b32.xlu0 %v2012_v5, %s5422_s14  ;;  %v2036_v5 = vsel %vm816_vm2, %v2034_v51, %v2035_v27  ;;  %v4129_v51 = vrot.slane %v4125_v63, 5 }
 0x212   : > { %v6466_v61 = vpop.permute.xlu1 %1554  ;;  %2017 = vrot.lane.b32.xlu2 %v2014_v25, %s5422_s14 }
 0x213   : > { %8649 = vst [vmem:[#allocation101_spill] sm:$0xff] %v6466_v61  ;;  %v6468_v62 = vpop.permute.xlu0 %1556  ;;  %v2051_v61 = vstv %s6462_s29  ;;  %s4949_s29 = sld [smem:[#allocation5 + $0x48]] }
 0x214   : > { %8650 = vst [vmem:[#allocation102_spill] sm:$0xff] %v6468_v62  ;;  %v6477_v15 = vpop.permute.xlu2 %1622  ;;  %v2052_v9 = vmul.f32 %v2051_v61, %v6394_v35  ;;  %v2038_v62 = vsel %vm816_vm2, %v2035_v27, %v2037_v52 }
 0x215   : > { %8651 = vst [vmem:[#allocation103_spill] sm:$0xff] %v6477_v15  ;;  %v4112_v15 = vstv %s6470_s27  ;;  %s4956_s27 = sld [smem:[#allocation5 + $0x4f]] }
 0x216   : > { %v4114_v54 = vmul.f32 %v4112_v15, %v6483_v36 }
 0x218   : > { %2019 = vrot.lane.b32.xlu1 %v2013_v24, %s5422_s14  ;;  %v2053_v24 = vmul.f32 %v2051_v61, %v6396_v55  ;;  %v4118_v58 = vrot.slane %v4114_v54, 5  ;;  %v2073_v61 = vmul.f32 %v2071_v21, %v6396_v55 }
 0x219   : > { %2039 = vrot.lane.b32.xlu0 %v2036_v5, %s5422_s14  ;;  %v4113_v5 = vmul.f32 %v4112_v15, %v6475_v11  ;;  %v2091_v15 = vstv %s4942_s5  ;;  %s5164_s5 = sld [smem:[#allocation5 + $0x11f]] }
 0x21a   : > { %v6489_v1 = vpop.permute.xlu1 %1578  ;;  %2041 = vrot.lane.b32.xlu2 %v2038_v62, %s5422_s14  ;;  %v2057_v50 = vrot.slane %v2053_v24, 5  ;;  %v4177_v62 = vmul.f32 %v4176_v48, %v6475_v11  ;;  %v2079_v54 = vrot.slane %v2073_v61, 1  ;;  %v2094_v61 = vmul.f32 %v2091_v15, %v6412_v38 }
 0x21b   : > { %8652 = vst [vmem:[#allocation104_spill] sm:$0xff] %v6489_v1  ;;  %v6491_v25 = vpop.permute.xlu0 %1580  ;;  %v6503_v1 = vsel %vm867_vm4, %v4129_v51, %v4130_v6  ;;  %v4117_v63 = vrot.slane %v4113_v5, 5 }
 0x21c   : > { %8653 = vst [vmem:[#allocation105_spill] sm:$0xff] %v6491_v25  ;;  %v2056_v25 = vrot.slane %v2052_v9, 5  ;;  %v6505_v27 = vpop.permute.xlu2 %1642  ;;  %v4178_v9 = vmul.f32 %v4176_v48, %v6483_v36  ;;  %v4181_v5 = vrot.slane %v4177_v62, 2  ;;  %v2092_v48 = vmul.f32 %v2091_v15, %v6394_v35 }
 0x21d   : > { %8654 = vst [vmem:[#allocation106_spill] sm:$0xff] %v6505_v27  ;;  %v6515_v6 = vsel %vm867_vm4, %v4117_v63, %v4118_v58  ;;  %v2078_v63 = vrot.slane %v2072_v30, 1 }
 0x21e   : > { %v2058_v58 = vsel %vm867_vm4, %v2056_v25, %v2057_v50  ;;  %v4182_v27 = vrot.slane %v4178_v9, 2 }
 0x21f   : > { %v2080_v9 = vsel %vm890_vm15, %v2078_v63, %v2079_v54 }
 0x220   : > { %2043 = vrot.lane.b32.xlu1 %v2037_v52, %s5422_s14  ;;  %v2074_v52 = vmul.f32 %v2071_v21, %v6412_v38  ;;  %v4189_v21 = vmul.f32 %v4188_v44, %v6475_v11 }
 0x221   : > { %2059 = vrot.lane.b32.xlu0 %v2056_v25, %s5423_s30  ;;  %v4190_v25 = vmul.f32 %v4188_v44, %v6483_v36 }
 0x222   : > { %v6523_v51 = vpop.permute.xlu1 %1602  ;;  %2061 = vrot.lane.b32.xlu2 %v2058_v58, %s5423_s30  ;;  %v2081_v62 = vrot.slane %v2074_v52, 1  ;;  %v4193_v58 = vrot.slane %v4189_v21, 6  ;;  %v3788_v52 = vstv %s6521_s25  ;;  %v2101_v21 = vrot.slane %v2094_v61, 1  ;;  %s6630_s25 = sld [smem:[#allocation5 + $0x127]] }
 0x223   : > { %8655 = vst [vmem:[#allocation107_spill] sm:$0xff] %v6523_v51  ;;  %v6525_v24 = vpop.permute.xlu0 %1604  ;;  %v2093_v51 = vmul.f32 %v2091_v15, %v6396_v55  ;;  %v4194_v16 = vrot.slane %v4190_v25, 6  ;;  %v3812_v25 = vmul.f32 %v3810_v39, %v6483_v36 }
 0x224   : > { %8656 = vst [vmem:[#allocation108_spill] sm:$0xff] %v6525_v24  ;;  %v6536_v24 = vsel %vm1072_vm6, %v4181_v5, %v4182_v27  ;;  %v6541_v30 = vpop.permute.xlu2 %1666  ;;  %v2098_v27 = vrot.slane %v2092_v48, 1  ;;  %v2082_v63 = vsel %vm890_vm15, %v2079_v54, %v2081_v62  ;;  %v3811_v48 = vmul.f32 %v3810_v39, %v6475_v11 }
 0x225   : > { %8657 = vst [vmem:[#allocation109_spill] sm:$0xff] %v6541_v30  ;;  %v2099_v5 = vrot.slane %v2093_v51, 1  ;;  %v6547_v2 = vsel %vm1025_vm5, %v4193_v58, %v4194_v16  ;;  %v3800_v30 = vstv %s6518_s19  ;;  %v2115_v51 = vstv %s4949_s29  ;;  %s4936_s19 = sld [smem:[#allocation5 + $0x3b]] }
 0x226   : > { %v3802_v16 = vmul.f32 %v3800_v30, %v6483_v36  ;;  %v3815_v62 = vrot.slane %v3811_v48, 4  ;;  %v2116_v34 = vmul.f32 %v2115_v51, %v6394_v35  ;;  %v2117_v39 = vmul.f32 %v2115_v51, %v6396_v55  ;;  %s6648_s29 = sld [smem:[#allocation5 + $0x120]] }
 0x227   : > { %v2100_v54 = vsel %vm890_vm15, %v2098_v27, %v2099_v5 }
 0x228   : > { %2063 = vrot.lane.b32.xlu1 %v2057_v50, %s5423_s30  ;;  %v3801_v50 = vmul.f32 %v3800_v30, %v6475_v11  ;;  %v3806_v61 = vrot.slane %v3802_v16, 4  ;;  %v2118_v30 = vmul.f32 %v2115_v51, %v6412_v38  ;;  %v2122_v16 = vrot.slane %v2116_v34, 1 }
 0x229   : > { %2083 = vrot.lane.b32.xlu0 %v2080_v9, %s5423_s30  ;;  %v3786_v9 = vmul.f32 %v3785_v20, %v6475_v11  ;;  %v2123_v48 = vrot.slane %v2117_v39, 1  ;;  %v2139_v51 = vstv %s4956_s27  ;;  %s4950_s27 = sld [smem:[#allocation5 + $0x49]] }
 0x22a   : > { %v6549_v44 = vpop.permute.xlu1 %1624  ;;  %2085 = vrot.lane.b32.xlu2 %v2082_v63, %s5423_s30  ;;  %v3805_v58 = vrot.slane %v3801_v50, 4  ;;  %v2102_v63 = vsel %vm890_vm15, %v2099_v5, %v2101_v21  ;;  %v2125_v50 = vrot.slane %v2118_v30, 1  ;;  %v2163_v30 = vstv %s4963_s20  ;;  %s6658_s20 = sld [smem:[#allocation5 + $0x11a]] }
 0x22b   : > { %8658 = vst [vmem:[#allocation110_spill] sm:$0xff] %v6549_v44  ;;  %v6551_v15 = vpop.permute.xlu0 %1626  ;;  %v3816_v44 = vrot.slane %v3812_v25, 4  ;;  %v2140_v25 = vmul.f32 %v2139_v51, %v6394_v35 }
 0x22c   : > { %8659 = vst [vmem:[#allocation111_spill] sm:$0xff] %v6551_v15  ;;  %v3789_v15 = vmul.f32 %v3788_v52, %v6475_v11  ;;  %v6566_v43 = vpop.permute.xlu2 %1690  ;;  %v3807_v20 = vsel %vm816_vm2, %v3805_v58, %v3806_v61  ;;  %v2141_v58 = vmul.f32 %v2139_v51, %v6396_v55 }
 0x22d   : > { %8660 = vst [vmem:[#allocation112_spill] sm:$0xff] %v6566_v43  ;;  %v3817_v11 = vsel %vm816_vm2, %v3815_v62, %v3816_v44  ;;  %v6576_v36 = vadd.f32 %v3807_v20, %v3786_v9  ;;  %v2126_v9 = vsel %vm890_vm15, %v2123_v48, %v2125_v50  ;;  %v2146_v61 = vrot.slane %v2140_v25, 1 }
 0x22e   : > { %v6578_v27 = vadd.f32 %v3817_v11, %v3789_v15  ;;  %v2124_v15 = vsel %vm890_vm15, %v2122_v16, %v2123_v48  ;;  %v2147_v62 = vrot.slane %v2141_v58, 1  ;;  %v2183_v20 = vstv %s4970_s23  ;;  %s6666_s23 = sld [smem:[#allocation5 + $0x121]] }
 0x22f   : > { %v2164_v48 = vmul.f32 %v2163_v30, %v6394_v35  ;;  %v2184_v58 = vmul.f32 %v2183_v20, %v6394_v35 }
 0x230   : > { %2103 = vrot.lane.b32.xlu1 %v2100_v54, %s5423_s30  ;;  %v2142_v54 = vmul.f32 %v2139_v51, %v6412_v38  ;;  %v2148_v39 = vsel %vm890_vm15, %v2146_v61, %v2147_v62  ;;  %v2165_v51 = vmul.f32 %v2163_v30, %v6396_v55 }
 0x231   : > { %2105 = vrot.lane.b32.xlu0 %v2102_v63, %s5423_s30 }
 0x232   : > { %v6580_v52 = vpop.permute.xlu1 %1644  ;;  %2107 = vrot.lane.b32.xlu2 %v2101_v21, %s5423_s30  ;;  %v2149_v63 = vrot.slane %v2142_v54, 1  ;;  %v2170_v54 = vrot.slane %v2164_v48, 5  ;;  %v2171_v61 = vrot.slane %v2165_v51, 5  ;;  %v6622_v48 = vld [vmem:[#allocation4 + $0x18] sm:$0x3]  ;;  %v6624_v51 = vld [vmem:[#allocation4 + $0x10] sm:$0xff] }
 0x233   : > { %8661 = vst [vmem:[#allocation113_spill] sm:$0xff] %v6580_v52  ;;  %v6582_v5 = vpop.permute.xlu0 %1646 }
 0x234   : > { %8662 = vst [vmem:[#allocation114_spill] sm:$0xff] %v6582_v5  ;;  %v6587_v44 = vpop.permute.xlu2 %1712  ;;  %v2150_v16 = vsel %vm890_vm15, %v2147_v62, %v2149_v63 }
 0x235   : > { %8663 = vst [vmem:[#allocation115_spill] sm:$0xff] %v6587_v44 }
 0x238   : > { %2127 = vrot.lane.b32.xlu1 %v2124_v15, %s5423_s30  ;;  %v2166_v15 = vmul.f32 %v2163_v30, %v6412_v38  ;;  %v2190_v30 = vrot.slane %v2184_v58, 5  ;;  %v4540_v58 = vstv %s5164_s5  ;;  %s6686_s5 = sld [smem:[#allocation5 + $0x50]] }
 0x239   : > { %2129 = vrot.lane.b32.xlu0 %v2126_v9, %s5423_s30  ;;  %v2185_v9 = vmul.f32 %v2183_v20, %v6396_v55 }
 0x23a   : > { %v6594_v34 = vpop.permute.xlu1 %1668  ;;  %2131 = vrot.lane.b32.xlu2 %v2125_v50, %s5423_s30  ;;  %v2173_v62 = vrot.slane %v2166_v15, 5 }
 0x23b   : > { %8664 = vst [vmem:[#allocation116_spill] sm:$0xff] %v6594_v34  ;;  %v6596_v21 = vpop.permute.xlu0 %1670  ;;  %v2271_v34 = vstv %s4950_s27  ;;  %s4958_s27 = sld [smem:[#allocation5 + $0x51]] }
 0x23c   : > { %8665 = vst [vmem:[#allocation117_spill] sm:$0xff] %v6596_v21  ;;  %v6600_v11 = vpop.permute.xlu2 %1736 }
 0x23d   : > { %8666 = vst [vmem:[#allocation118_spill] sm:$0xff] %v6600_v11  ;;  %v2174_v11 = vsel %vm867_vm4, %v2171_v61, %v2173_v62 }
 0x240   : > { %2151 = vrot.lane.b32.xlu1 %v2148_v39, %s5423_s30  ;;  %v2191_v39 = vrot.slane %v2185_v9, 5 }
 0x241   : > { %2153 = vrot.lane.b32.xlu0 %v2150_v16, %s5423_s30  ;;  %v2172_v16 = vsel %vm867_vm4, %v2170_v54, %v2171_v61  ;;  %v4542_v61 = vmul.f32 %v4540_v58, %v6622_v48 }
 0x242   : > { %v6608_v25 = vpop.permute.xlu1 %1692  ;;  %2155 = vrot.lane.b32.xlu2 %v2149_v63, %s5423_s30  ;;  %v2192_v9 = vsel %vm867_vm4, %v2190_v30, %v2191_v39 }
 0x243   : > { %8667 = vst [vmem:[#allocation119_spill] sm:$0xff] %v6608_v25  ;;  %v6610_v50 = vpop.permute.xlu0 %1710  ;;  %v4546_v30 = vrot.slane %v4542_v61, 4  ;;  %v4616_v61 = vstv %s6630_s25  ;;  %s4937_s25 = sld [smem:[#allocation5 + $0x3c]] }
 0x244   : > { %8668 = vst [vmem:[#allocation120_spill] sm:$0xff] %v6610_v50  ;;  %v6615_v43 = vpop.permute.xlu2 %1760  ;;  %v2186_v50 = vmul.f32 %v2183_v20, %v6412_v38  ;;  %v2207_v20 = vstv %s4929_s8  ;;  %s4964_s8 = sld [smem:[#allocation5 + $0x57]] }
 0x245   : > { %8669 = vst [vmem:[#allocation121_spill] sm:$0xff] %v6615_v43  ;;  %v2208_v62 = vmul.f32 %v2207_v20, %v6394_v35  ;;  %v2209_v25 = vmul.f32 %v2207_v20, %v6396_v55 }
 0x246   : > { %v2193_v54 = vrot.slane %v2186_v50, 5  ;;  %v4552_v50 = vstv %s5171_s17  ;;  %s4971_s17 = sld [smem:[#allocation5 + $0x5e]] }
 0x247   : > { %v4554_v52 = vmul.f32 %v4552_v50, %v6622_v48 }
 0x248   : > { %2175 = vrot.lane.b32.xlu1 %v2172_v16, %s5423_s30 }
 0x249   : > { %2177 = vrot.lane.b32.xlu0 %v2174_v11, %s5423_s30  ;;  %v4541_v11 = vmul.f32 %v4540_v58, %v6624_v51  ;;  %v4553_v58 = vmul.f32 %v4552_v50, %v6624_v51  ;;  %v2251_v50 = vstv %s4943_s26  ;;  %s4944_s26 = sld [smem:[#allocation5 + $0x43]] }
 0x24a   : > { %v6626_v63 = vpop.permute.xlu1 %1714  ;;  %2195 = vrot.lane.b32.xlu2 %v2192_v9, %s5423_s30  ;;  %v2252_v43 = vmul.f32 %v2251_v50, %v6394_v35 }
 0x24b   : > { %8670 = vst [vmem:[#allocation122_spill] sm:$0xff] %v6626_v63  ;;  %v6628_v15 = vpop.permute.xlu0 %1734  ;;  %v4545_v5 = vrot.slane %v4541_v11, 4  ;;  %v2227_v11 = vstv %s4936_s19  ;;  %v4558_v63 = vrot.slane %v4554_v52, 4  ;;  %s4930_s19 = sld [smem:[#allocation5 + $0x35]] }
 0x24c   : > { %8671 = vst [vmem:[#allocation123_spill] sm:$0xff] %v6628_v15  ;;  %v6637_v16 = vpop.permute.xlu2 %1784  ;;  %v2194_v15 = vsel %vm867_vm4, %v2191_v39, %v2193_v54 }
 0x24d   : > { %8672 = vst [vmem:[#allocation124_spill] sm:$0xff] %v6637_v16  ;;  %v6644_v9 = vsel %vm816_vm2, %v4545_v5, %v4546_v30  ;;  %v2212_v16 = vrot.slane %v2208_v62, 6  ;;  %v4617_v5 = vmul.f32 %v4616_v61, %v6624_v51  ;;  %v4618_v30 = vmul.f32 %v4616_v61, %v6622_v48 }
 0x24e   : > { %v2228_v62 = vmul.f32 %v2227_v11, %v6394_v35 }
 0x24f   : > { %v4621_v52 = vrot.slane %v4617_v5, 5  ;;  %v4604_v5 = vstv %s6648_s29  ;;  %s4951_s29 = sld [smem:[#allocation5 + $0x4a]] }
 0x250   : > { %2197 = vrot.lane.b32.xlu1 %v2194_v15, %s5423_s30  ;;  %v2213_v15 = vrot.slane %v2209_v25, 6  ;;  %v2230_v25 = vmul.f32 %v2227_v11, %v6412_v38 }
 0x251   : > { %2199 = vrot.lane.b32.xlu0 %v2193_v54, %s5423_s30  ;;  %v4557_v54 = vrot.slane %v4553_v58, 4  ;;  %v4622_v58 = vrot.slane %v4618_v30, 5 }
 0x252   : > { %v6650_v39 = vpop.permute.xlu1 %1738  ;;  %2215 = vrot.lane.b32.xlu2 %v2212_v16, %s5424_s16  ;;  %v2214_v61 = vsel %vm1025_vm5, %v2212_v16, %v2213_v15  ;;  %v2237_v16 = vrot.slane %v2230_v25, 6 }
 0x253   : > { %8673 = vst [vmem:[#allocation125_spill] sm:$0xff] %v6650_v39  ;;  %v6652_v20 = vpop.permute.xlu0 %1758  ;;  %v6663_v39 = vsel %vm816_vm2, %v4557_v54, %v4558_v63  ;;  %v6675_v21 = vsel %vm867_vm4, %v4621_v52, %v4622_v58  ;;  %v2234_v63 = vrot.slane %v2228_v62, 6  ;;  %v2258_v52 = vrot.slane %v2252_v43, 2 }
 0x254   : > { %8674 = vst [vmem:[#allocation126_spill] sm:$0xff] %v6652_v20  ;;  %v2229_v20 = vmul.f32 %v2227_v11, %v6396_v55  ;;  %v6668_v44 = vpop.permute.xlu2 %1933  ;;  %v2253_v11 = vmul.f32 %v2251_v50, %v6396_v55  ;;  %v4242_v43 = vstv %s6666_s23  ;;  %s4972_s23 = sld [smem:[#allocation5 + $0x5f]] }
 0x255   : > { %8675 = vst [vmem:[#allocation127_spill] sm:$0xff] %v6668_v44 }
 0x256   : > { %v2235_v54 = vrot.slane %v2229_v20, 6  ;;  %v4232_v20 = vstv %s6658_s20  ;;  %v2259_v37 = vrot.slane %v2253_v11, 2  ;;  %v2272_v11 = vmul.f32 %v2271_v34, %v6394_v35  ;;  %s4965_s20 = sld [smem:[#allocation5 + $0x58]] }
 0x257   : > { %v4234_v25 = vmul.f32 %v4232_v20, %v6622_v48 }
 0x258   : > { %2217 = vrot.lane.b32.xlu1 %v2214_v61, %s5424_s16  ;;  %v4605_v61 = vmul.f32 %v4604_v5, %v6624_v51  ;;  %v2238_v29 = vsel %vm1025_vm5, %v2235_v54, %v2237_v16  ;;  %v2278_v45 = vrot.slane %v2272_v11, 2 }
 0x259   : > { %2219 = vrot.lane.b32.xlu0 %v2213_v15, %s5424_s16  ;;  %v4606_v15 = vmul.f32 %v4604_v5, %v6622_v48  ;;  %v2273_v5 = vmul.f32 %v2271_v34, %v6396_v55 }
 0x25a   : > { %v6679_v30 = vpop.permute.xlu1 %1762  ;;  %2239 = vrot.lane.b32.xlu2 %v2234_v63, %s5424_s16  ;;  %v4609_v62 = vrot.slane %v4605_v61, 5  ;;  %v2254_v61 = vmul.f32 %v2251_v50, %v6412_v38 }
 0x25b   : > { %8676 = vst [vmem:[#allocation128_spill] sm:$0xff] %v6679_v30  ;;  %v6681_v44 = vpop.permute.xlu0 %1782  ;;  %v4610_v58 = vrot.slane %v4606_v15, 5  ;;  %v2236_v30 = vsel %vm1025_vm5, %v2234_v63, %v2235_v54  ;;  %v4238_v63 = vrot.slane %v4234_v25, 3  ;;  %v4243_v54 = vmul.f32 %v4242_v43, %v6624_v51 }
 0x25c   : > { %8677 = vst [vmem:[#allocation129_spill] sm:$0xff] %v6681_v44  ;;  %v4233_v44 = vmul.f32 %v4232_v20, %v6624_v51  ;;  %v6698_v42 = vpop.permute.xlu2 %1952  ;;  %v2295_v51 = vstv %s6686_s5  ;;  %s4931_s5 = sld [smem:[#allocation5 + $0x36]] }
 0x25d   : > { %v6695_v22 = vsel %vm867_vm4, %v4609_v62, %v4610_v58  ;;  %8678 = vst [vmem:[#allocation130_spill] sm:$0xff] %v6698_v42  ;;  %v4244_v62 = vmul.f32 %v4242_v43, %v6622_v48  ;;  %v2260_v58 = vsel %vm1072_vm6, %v2258_v52, %v2259_v37  ;;  %v4247_v25 = vrot.slane %v4243_v54, 3 }
 0x25e   : > { %v4237_v15 = vrot.slane %v4233_v44, 3  ;;  %v2274_v44 = vmul.f32 %v2271_v34, %v6412_v38  ;;  %v2279_v42 = vrot.slane %v2273_v5, 2  ;;  %v2297_v34 = vmul.f32 %v2295_v51, %v6396_v55 }
 0x25f   : > { %v2296_v5 = vmul.f32 %v2295_v51, %v6394_v35 }
 0x260   : > { %2241 = vrot.lane.b32.xlu1 %v2236_v30, %s5424_s16  ;;  %v6706_v16 = vsel %vm1254_vm1, %v4237_v15, %v4238_v63  ;;  %v2261_v30 = vrot.slane %v2254_v61, 2  ;;  %v2281_v48 = vrot.slane %v2274_v44, 2  ;;  %v2280_v63 = vsel %vm1072_vm6, %v2278_v45, %v2279_v42 }
 0x261   : > { %2243 = vrot.lane.b32.xlu0 %v2238_v29, %s5424_s16  ;;  %v4248_v29 = vrot.slane %v4244_v62, 3  ;;  %v2298_v62 = vmul.f32 %v2295_v51, %v6412_v38  ;;  %v2319_v45 = vstv %s4964_s8  ;;  %s4938_s8 = sld [smem:[#allocation5 + $0x3d]] }
 0x262   : > { %v6710_v20 = vpop.permute.xlu1 %1918  ;;  %2263 = vrot.lane.b32.xlu2 %v2260_v58, %s5424_s16  ;;  %v2262_v43 = vsel %vm1072_vm6, %v2259_v37, %v2261_v30  ;;  %v2282_v54 = vsel %vm1072_vm6, %v2279_v42, %v2281_v48  ;;  %v2303_v58 = vrot.slane %v2297_v34, 2  ;;  %v2302_v37 = vrot.slane %v2296_v5, 2 }
 0x263   : > { %8679 = vst [vmem:[#allocation131_spill] sm:$0xff] %v6710_v20  ;;  %v6712_v50 = vpop.permute.xlu0 %1920  ;;  %v6718_v15 = vsel %vm1254_vm1, %v4247_v25, %v4248_v29  ;;  %v2305_v25 = vrot.slane %v2298_v62, 2  ;;  %v2321_v29 = vmul.f32 %v2319_v45, %v6396_v55  ;;  %v2322_v34 = vmul.f32 %v2319_v45, %v6412_v38 }
 0x264   : > { %8680 = vst [vmem:[#allocation132_spill] sm:$0xff] %v6712_v50  ;;  %v6720_v52 = vpop.permute.xlu2 %1971  ;;  %v2304_v30 = vsel %vm1072_vm6, %v2302_v37, %v2303_v58  ;;  %v2343_v62 = vstv %s4971_s17  ;;  %s4945_s17 = sld [smem:[#allocation5 + $0x44]] }
 0x265   : > { %8681 = vst [vmem:[#allocation133_spill] sm:$0xff] %v6720_v52  ;;  %v2327_v5 = vrot.slane %v2321_v29, 2  ;;  %v2344_v20 = vmul.f32 %v2343_v62, %v6394_v35 }
 0x268   : > { %2265 = vrot.lane.b32.xlu1 %v2262_v43, %s5424_s16  ;;  %v2320_v43 = vmul.f32 %v2319_v45, %v6394_v35 }
 0x269   : > { %2283 = vrot.lane.b32.xlu0 %v2280_v63, %s5424_s16  ;;  %v2306_v63 = vsel %vm1072_vm6, %v2303_v58, %v2305_v25 }
 0x26a   : > { %v6728_v61 = vpop.permute.xlu1 %1935  ;;  %2285 = vrot.lane.b32.xlu2 %v2282_v54, %s5424_s16  ;;  %v2326_v54 = vrot.slane %v2320_v43, 2  ;;  %v2346_v43 = vmul.f32 %v2343_v62, %v6412_v38 }
 0x26b   : > { %8682 = vst [vmem:[#allocation134_spill] sm:$0xff] %v6728_v61  ;;  %v6730_v11 = vpop.permute.xlu0 %1937 }
 0x26c   : > { %8683 = vst [vmem:[#allocation135_spill] sm:$0xff] %v6730_v11  ;;  %v6735_v44 = vpop.permute.xlu2 %1995  ;;  %v2353_v50 = vrot.slane %v2346_v43, 6  ;;  %v2383_v43 = vstv %s4937_s25  ;;  %s4959_s25 = sld [smem:[#allocation5 + $0x52]] }
 0x26d   : > { %8684 = vst [vmem:[#allocation136_spill] sm:$0xff] %v6735_v44  ;;  %v2329_v44 = vrot.slane %v2322_v34, 2  ;;  %v2350_v34 = vrot.slane %v2344_v20, 6 }
 0x26f   : > { %v2330_v29 = vsel %vm1072_vm6, %v2327_v5, %v2329_v44 }
 0x270   : > { %2287 = vrot.lane.b32.xlu1 %v2281_v48, %s5424_s16  ;;  %v2328_v48 = vsel %vm1072_vm6, %v2326_v54, %v2327_v5  ;;  %v2363_v54 = vstv %s4930_s19  ;;  %s4952_s19 = sld [smem:[#allocation5 + $0x4b]] }
 0x271   : > { %2307 = vrot.lane.b32.xlu0 %v2304_v30, %s5424_s16  ;;  %v2345_v30 = vmul.f32 %v2343_v62, %v6396_v55 }
 0x272   : > { %v6742_v42 = vpop.permute.xlu1 %1954  ;;  %2309 = vrot.lane.b32.xlu2 %v2306_v63, %s5424_s16 }
 0x273   : > { %8685 = vst [vmem:[#allocation137_spill] sm:$0xff] %v6742_v42  ;;  %v6744_v51 = vpop.permute.xlu0 %1956  ;;  %v2351_v63 = vrot.slane %v2345_v30, 6 }
 0x274   : > { %8686 = vst [vmem:[#allocation138_spill] sm:$0xff] %v6744_v51  ;;  %v6749_v37 = vpop.permute.xlu2 %2017  ;;  %v2364_v51 = vmul.f32 %v2363_v54, %v6394_v35 }
 0x275   : > { %8687 = vst [vmem:[#allocation139_spill] sm:$0xff] %v6749_v37  ;;  %v2354_v62 = vsel %vm1025_vm5, %v2351_v63, %v2353_v50 }
 0x278   : > { %2311 = vrot.lane.b32.xlu1 %v2305_v25, %s5424_s16  ;;  %v2352_v25 = vsel %vm1025_vm5, %v2350_v34, %v2351_v63 }
 0x279   : > { %2331 = vrot.lane.b32.xlu0 %v2328_v48, %s5424_s16  ;;  %v2365_v48 = vmul.f32 %v2363_v54, %v6396_v55 }
 0x27a   : > { %v6756_v58 = vpop.permute.xlu1 %1973  ;;  %2333 = vrot.lane.b32.xlu2 %v2330_v29, %s5424_s16  ;;  %v2368_v29 = vrot.slane %v2364_v51, 7  ;;  %v2386_v51 = vmul.f32 %v2383_v43, %v6412_v38 }
 0x27b   : > { %8688 = vst [vmem:[#allocation140_spill] sm:$0xff] %v6756_v58  ;;  %v6758_v45 = vpop.permute.xlu0 %1975  ;;  %v2369_v30 = vrot.slane %v2365_v48, 7 }
 0x27c   : > { %8689 = vst [vmem:[#allocation141_spill] sm:$0xff] %v6758_v45  ;;  %v6763_v52 = vpop.permute.xlu2 %2041 }
 0x27d   : > { %8690 = vst [vmem:[#allocation142_spill] sm:$0xff] %v6763_v52  ;;  %v2370_v54 = vsel %vm1183_vm8, %v2368_v29, %v2369_v30  ;;  %v2393_v52 = vrot.slane %v2386_v51, 7 }
 0x280   : > { %2335 = vrot.lane.b32.xlu1 %v2329_v44, %s5424_s16  ;;  %v2385_v44 = vmul.f32 %v2383_v43, %v6396_v55 }
 0x281   : > { %2355 = vrot.lane.b32.xlu0 %v2352_v25, %s5424_s16  ;;  %v2384_v25 = vmul.f32 %v2383_v43, %v6394_v35 }
 0x282   : > { %v6770_v5 = vpop.permute.xlu1 %1997  ;;  %2357 = vrot.lane.b32.xlu2 %v2354_v62, %s5424_s16  ;;  %v2391_v63 = vrot.slane %v2385_v44, 7  ;;  %v2407_v62 = vstv %s4944_s26  ;;  %s4966_s26 = sld [smem:[#allocation5 + $0x59]] }
 0x283   : > { %8691 = vst [vmem:[#allocation143_spill] sm:$0xff] %v6770_v5  ;;  %v6772_v20 = vpop.permute.xlu0 %2015  ;;  %v2390_v48 = vrot.slane %v2384_v25, 7  ;;  %v2408_v42 = vmul.f32 %v2407_v62, %v6394_v35 }
 0x284   : > { %8692 = vst [vmem:[#allocation144_spill] sm:$0xff] %v6772_v20  ;;  %v6776_v34 = vpop.permute.xlu2 %2061  ;;  %v2394_v25 = vsel %vm1183_vm8, %v2391_v63, %v2393_v52 }
 0x285   : > { %8693 = vst [vmem:[#allocation145_spill] sm:$0xff] %v6776_v34  ;;  %v2414_v51 = vrot.slane %v2408_v42, 7 }
 0x288   : > { %2371 = vrot.lane.b32.xlu1 %v2368_v29, %s5425_s3  ;;  %v2392_v29 = vsel %vm1183_vm8, %v2390_v48, %v2391_v63 }
 0x289   : > { %2373 = vrot.lane.b32.xlu0 %v2370_v54, %s5425_s3  ;;  %v2409_v54 = vmul.f32 %v2407_v62, %v6396_v55 }
 0x28a   : > { %v6783_v20 = vpop.permute.xlu1 %2019  ;;  %2375 = vrot.lane.b32.xlu2 %v2369_v30, %s5425_s3  ;;  %v2410_v30 = vmul.f32 %v2407_v62, %v6412_v38 }
 0x28b   : > { %8694 = vst [vmem:[#allocation146_spill] sm:$0xff] %v6783_v20  ;;  %v6785_v50 = vpop.permute.xlu0 %2039  ;;  %v2451_v20 = vstv %s4958_s27  ;;  %s4932_s27 = sld [smem:[#allocation5 + $0x37]] }
 0x28c   : > { %8695 = vst [vmem:[#allocation147_spill] sm:$0xff] %v6785_v50  ;;  %v6789_v5 = vpop.permute.xlu2 %2085  ;;  %v2415_v50 = vrot.slane %v2409_v54, 7  ;;  %v2417_v37 = vrot.slane %v2410_v30, 7  ;;  %v2452_v63 = vmul.f32 %v2451_v20, %v6394_v35  ;;  %v2453_v62 = vmul.f32 %v2451_v20, %v6396_v55 }
 0x28d   : > { %8696 = vst [vmem:[#allocation148_spill] sm:$0xff] %v6789_v5  ;;  %v2431_v5 = vstv %s4951_s29  ;;  %s4973_s29 = sld [smem:[#allocation5 + $0x60]] }
 0x28e   : > { %v2418_v54 = vsel %vm1183_vm8, %v2415_v50, %v2417_v37  ;;  %v2475_v37 = vstv %s4965_s20  ;;  %s4939_s20 = sld [smem:[#allocation5 + $0x3e]] }
 0x290   : > { %2395 = vrot.lane.b32.xlu1 %v2390_v48, %s5425_s3  ;;  %v2416_v48 = vsel %vm1183_vm8, %v2414_v51, %v2415_v50 }
 0x291   : > { %2397 = vrot.lane.b32.xlu0 %v2392_v29, %s5425_s3  ;;  %v2432_v29 = vmul.f32 %v2431_v5, %v6394_v35 }
 0x292   : > { %v6796_v43 = vpop.permute.xlu1 %2043  ;;  %2399 = vrot.lane.b32.xlu2 %v2394_v25, %s5425_s3 }
 0x293   : > { %8697 = vst [vmem:[#allocation149_spill] sm:$0xff] %v6796_v43  ;;  %v6798_v44 = vpop.permute.xlu0 %2059  ;;  %v2433_v43 = vmul.f32 %v2431_v5, %v6396_v55  ;;  %v2438_v30 = vrot.slane %v2432_v29, 3  ;;  %v2476_v29 = vmul.f32 %v2475_v37, %v6394_v35 }
 0x294   : > { %8698 = vst [vmem:[#allocation150_spill] sm:$0xff] %v6798_v44  ;;  %v6803_v34 = vpop.permute.xlu2 %2107  ;;  %v2434_v44 = vmul.f32 %v2431_v5, %v6412_v38  ;;  %v2458_v5 = vrot.slane %v2452_v63, 3  ;;  %v2477_v63 = vmul.f32 %v2475_v37, %v6396_v55 }
 0x295   : > { %8699 = vst [vmem:[#allocation151_spill] sm:$0xff] %v6803_v34  ;;  %v2439_v25 = vrot.slane %v2433_v43, 3 }
 0x296   : > { %v2441_v34 = vrot.slane %v2434_v44, 3 }
 0x297   : > { %v2440_v11 = vsel %vm1254_vm1, %v2438_v30, %v2439_v25  ;;  %v2499_v30 = vstv %s4972_s23  ;;  %s4946_s23 = sld [smem:[#allocation5 + $0x45]] }
 0x298   : > { %2419 = vrot.lane.b32.xlu1 %v2414_v51, %s5425_s3  ;;  %v2442_v61 = vsel %vm1254_vm1, %v2439_v25, %v2441_v34  ;;  %v2483_v34 = vrot.slane %v2477_v63, 3 }
 0x299   : > { %2421 = vrot.lane.b32.xlu0 %v2416_v48, %s5425_s3  ;;  %v2459_v48 = vrot.slane %v2453_v62, 3 }
 0x29a   : > { %v6811_v52 = vpop.permute.xlu1 %2063  ;;  %2423 = vrot.lane.b32.xlu2 %v2418_v54, %s5425_s3  ;;  %v2478_v54 = vmul.f32 %v2475_v37, %v6412_v38 }
 0x29b   : > { %8700 = vst [vmem:[#allocation152_spill] sm:$0xff] %v6811_v52  ;;  %v6813_v42 = vpop.permute.xlu0 %2083  ;;  %v2460_v44 = vsel %vm1254_vm1, %v2458_v5, %v2459_v48 }
 0x29c   : > { %8701 = vst [vmem:[#allocation153_spill] sm:$0xff] %v6813_v42  ;;  %v6819_v51 = vpop.permute.xlu2 %2131  ;;  %v2454_v42 = vmul.f32 %v2451_v20, %v6412_v38  ;;  %v2485_v63 = vrot.slane %v2478_v54, 3 }
 0x29d   : > { %8702 = vst [vmem:[#allocation154_spill] sm:$0xff] %v6819_v51 }
 0x29e   : > { %v2461_v62 = vrot.slane %v2454_v42, 3 }
 0x2a0   : > { %2443 = vrot.lane.b32.xlu1 %v2440_v11, %s5425_s3  ;;  %v2482_v11 = vrot.slane %v2476_v29, 3  ;;  %v2501_v29 = vmul.f32 %v2499_v30, %v6396_v55 }
 0x2a1   : > { %2445 = vrot.lane.b32.xlu0 %v2442_v61, %s5425_s3  ;;  %v2462_v61 = vsel %vm1254_vm1, %v2459_v48, %v2461_v62 }
 0x2a2   : > { %v6826_v50 = vpop.permute.xlu1 %2103  ;;  %2463 = vrot.lane.b32.xlu2 %v2460_v44, %s5425_s3  ;;  %v2484_v42 = vsel %vm1254_vm1, %v2482_v11, %v2483_v34  ;;  %v2500_v44 = vmul.f32 %v2499_v30, %v6394_v35 }
 0x2a3   : > { %8703 = vst [vmem:[#allocation155_spill] sm:$0xff] %v6826_v50  ;;  %v6828_v43 = vpop.permute.xlu0 %2105 }
 0x2a4   : > { %8704 = vst [vmem:[#allocation156_spill] sm:$0xff] %v6828_v43  ;;  %v6834_v20 = vpop.permute.xlu2 %2155  ;;  %v2506_v37 = vrot.slane %v2500_v44, 3 }
 0x2a5   : > { %8705 = vst [vmem:[#allocation157_spill] sm:$0xff] %v6834_v20 }
 0x2a8   : > { %2465 = vrot.lane.b32.xlu1 %v2462_v61, %s5425_s3  ;;  %v2507_v61 = vrot.slane %v2501_v29, 3 }
 0x2a9   : > { %2467 = vrot.lane.b32.xlu0 %v2461_v62, %s5425_s3  ;;  %v2486_v62 = vsel %vm1254_vm1, %v2483_v34, %v2485_v63  ;;  %v2523_v34 = vstv %s4931_s5  ;;  %s4953_s5 = sld [smem:[#allocation5 + $0x4c]] }
 0x2aa   : > { %v6840_v25 = vpop.permute.xlu1 %2127  ;;  %2487 = vrot.lane.b32.xlu2 %v2484_v42, %s5425_s3  ;;  %v2508_v54 = vsel %vm1254_vm1, %v2506_v37, %v2507_v61  ;;  %v2536_v37 = vstv %s4938_s8  ;;  %s4960_s8 = sld [smem:[#allocation5 + $0x53]] }
 0x2ab   : > { %8706 = vst [vmem:[#allocation158_spill] sm:$0xff] %v6840_v25  ;;  %v6842_v5 = vpop.permute.xlu0 %2129  ;;  %v2502_v25 = vmul.f32 %v2499_v30, %v6412_v38  ;;  %v2524_v30 = vmul.f32 %v2523_v34, %v6394_v35  ;;  %v6879_v35 = vld [vmem:[#allocation2 + $0x20] sm:$0xff] }
 0x2ac   : > { %8707 = vst [vmem:[#allocation159_spill] sm:$0xff] %v6842_v5  ;;  %v6848_v48 = vpop.permute.xlu2 %2195 }
 0x2ad   : > { %8708 = vst [vmem:[#allocation160_spill] sm:$0xff] %v6848_v48  ;;  %v2509_v42 = vrot.slane %v2502_v25, 3  ;;  %v2525_v25 = vmul.f32 %v2523_v34, %v6396_v55  ;;  %v2539_v55 = vmul.f32 %v2536_v37, %v6412_v38  ;;  %v6899_v38 = vld [vmem:[#allocation2 + $0x28] sm:$0x3f] }
 0x2af   : > { %v2510_v29 = vsel %vm1254_vm1, %v2507_v61, %v2509_v42 }
 0x2b0   : > { %2489 = vrot.lane.b32.xlu1 %v2486_v62, %s5425_s3 }
 0x2b1   : > { %2491 = vrot.lane.b32.xlu0 %v2485_v63, %s5425_s3 }
 0x2b2   : > { %v6854_v11 = vpop.permute.xlu1 %2151  ;;  %2511 = vrot.lane.b32.xlu2 %v2508_v54, %s5425_s3  ;;  %v6872_v54 = vld [vmem:[#allocation2 + $0x18] sm:$0xff] }
 0x2b3   : > { %8709 = vst [vmem:[#allocation161_spill] sm:$0xff] %v6854_v11  ;;  %v6856_v50 = vpop.permute.xlu0 %2153  ;;  %v2537_v61 = vmul.f32 %v6872_v54, %v2536_v37  ;;  %v2574_v11 = vstv %s4952_s19  ;;  %s4974_s19 = sld [smem:[#allocation5 + $0x61]] }
 0x2b4   : > { %8710 = vst [vmem:[#allocation162_spill] sm:$0xff] %v6856_v50  ;;  %v6860_v44 = vpop.permute.xlu2 %2215 }
 0x2b5   : > { %8711 = vst [vmem:[#allocation163_spill] sm:$0xff] %v6860_v44 }
 0x2b8   : > { %2513 = vrot.lane.b32.xlu1 %v2510_v29, %s5425_s3 }
 0x2b9   : > { %2515 = vrot.lane.b32.xlu0 %v2509_v42, %s5425_s3  ;;  %v2538_v42 = vmul.f32 %v6879_v35, %v2536_v37 }
 0x2ba   : > { %v6866_v63 = vpop.permute.xlu1 %2175  ;;  %2528 = vrot.lane.b32.xlu2 %v2524_v30, %s5426_s24  ;;  %v2555_v30 = vstv %s4945_s17  ;;  %s4967_s17 = sld [smem:[#allocation5 + $0x5a]] }
 0x2bb   : > { %8712 = vst [vmem:[#allocation164_spill] sm:$0xff] %v6866_v63  ;;  %v6868_v62 = vpop.permute.xlu0 %2177  ;;  %v2556_v34 = vmul.f32 %v6872_v54, %v2555_v30  ;;  %v2558_v37 = vmul.f32 %v6899_v38, %v2555_v30 }
 0x2bc   : > { %8713 = vst [vmem:[#allocation165_spill] sm:$0xff] %v6868_v62  ;;  %v6875_v44 = vpop.permute.xlu2 %2239 }
 0x2bd   : > { %8714 = vst [vmem:[#allocation166_spill] sm:$0xff] %v6875_v44 }
 0x2c0   : > { %2530 = vrot.lane.b32.xlu1 %v2525_v25, %s5426_s24 }
 0x2c1   : > { %2543 = vrot.lane.b32.xlu0 %v2537_v61, %s5426_s24  ;;  %v2557_v61 = vmul.f32 %v6879_v35, %v2555_v30 }
 0x2c2   : > { %v6882_v29 = vpop.permute.xlu1 %2197  ;;  %2545 = vrot.lane.b32.xlu2 %v2538_v42, %s5426_s24  ;;  %v2593_v42 = vstv %s4959_s25  ;;  %s4977_s25 = sld [smem:[#allocation5 + $0x64]] }
 0x2c3   : > { %8715 = vst [vmem:[#allocation167_spill] sm:$0xff] %v6882_v29  ;;  %v6884_v63 = vpop.permute.xlu0 %2199  ;;  %v2594_v62 = vmul.f32 %v6872_v54, %v2593_v42  ;;  %v2596_v30 = vmul.f32 %v6899_v38, %v2593_v42  ;;  %v2577_v29 = vmul.f32 %v6899_v38, %v2574_v11 }
 0x2c4   : > { %8716 = vst [vmem:[#allocation168_spill] sm:$0xff] %v6884_v63  ;;  %v6889_v25 = vpop.permute.xlu2 %2263 }
 0x2c5   : > { %8717 = vst [vmem:[#allocation169_spill] sm:$0xff] %v6889_v25  ;;  %v2575_v25 = vmul.f32 %v6872_v54, %v2574_v11  ;;  %v2600_v5 = vrot.slane %v2594_v62, 4  ;;  %v2603_v63 = vrot.slane %v2596_v30, 4 }
 0x2c8   : > { %2547 = vrot.lane.b32.xlu1 %v2539_v55, %s5426_s24 }
 0x2c9   : > { %2562 = vrot.lane.b32.xlu0 %v2556_v34, %s5426_s24  ;;  %v2595_v34 = vmul.f32 %v6879_v35, %v2593_v42 }
 0x2ca   : > { %v6894_v44 = vpop.permute.xlu1 %2217  ;;  %2564 = vrot.lane.b32.xlu2 %v2557_v61, %s5426_s24  ;;  %v2576_v61 = vmul.f32 %v6879_v35, %v2574_v11 }
 0x2cb   : > { %8718 = vst [vmem:[#allocation170_spill] sm:$0xff] %v6894_v44  ;;  %v6896_v48 = vpop.permute.xlu0 %2219  ;;  %v2601_v51 = vrot.slane %v2595_v34, 4  ;;  %v2637_v34 = vstv %s4973_s29  ;;  %s4991_s29 = sld [smem:[#allocation5 + $0x72]] }
 0x2cc   : > { %8719 = vst [vmem:[#allocation171_spill] sm:$0xff] %v6896_v48  ;;  %v6903_v55 = vpop.permute.xlu2 %2285 }
 0x2cd   : > { %8720 = vst [vmem:[#allocation172_spill] sm:$0xff] %v6903_v55  ;;  %v2613_v55 = vstv %s4966_s26  ;;  %v2604_v11 = vsel %vm816_vm2, %v2601_v51, %v2603_v63  ;;  %s4984_s26 = sld [smem:[#allocation5 + $0x6b]] }
 0x2ce   : > { %v2616_v43 = vmul.f32 %v6899_v38, %v2613_v55 }
 0x2d0   : > { %2566 = vrot.lane.b32.xlu1 %v2558_v37, %s5426_s24 }
 0x2d1   : > { %2581 = vrot.lane.b32.xlu0 %v2575_v25, %s5426_s24  ;;  %v2602_v25 = vsel %vm816_vm2, %v2600_v5, %v2601_v51 }
 0x2d2   : > { %v6910_v48 = vpop.permute.xlu1 %2241  ;;  %2583 = vrot.lane.b32.xlu2 %v2576_v61, %s5426_s24  ;;  %v2623_v61 = vrot.slane %v2616_v43, 4 }
 0x2d3   : > { %8721 = vst [vmem:[#allocation173_spill] sm:$0xff] %v6910_v48  ;;  %v6912_v44 = vpop.permute.xlu0 %2243  ;;  %v2614_v48 = vmul.f32 %v6872_v54, %v2613_v55 }
 0x2d4   : > { %8722 = vst [vmem:[#allocation174_spill] sm:$0xff] %v6912_v44  ;;  %v6917_v37 = vpop.permute.xlu2 %2309  ;;  %v2615_v44 = vmul.f32 %v6879_v35, %v2613_v55 }
 0x2d5   : > { %8723 = vst [vmem:[#allocation175_spill] sm:$0xff] %v6917_v37  ;;  %v2620_v30 = vrot.slane %v2614_v48, 4  ;;  %v2640_v37 = vmul.f32 %v6899_v38, %v2637_v34 }
 0x2d6   : > { %v2621_v5 = vrot.slane %v2615_v44, 4 }
 0x2d7   : > { %v2647_v48 = vrot.slane %v2640_v37, 4 }
 0x2d8   : > { %2585 = vrot.lane.b32.xlu1 %v2577_v29, %s5426_s24  ;;  %v2622_v29 = vsel %vm816_vm2, %v2620_v30, %v2621_v5 }
 0x2d9   : > { %2605 = vrot.lane.b32.xlu0 %v2602_v25, %s5426_s24  ;;  %v2624_v25 = vsel %vm816_vm2, %v2621_v5, %v2623_v61 }
 0x2da   : > { %v6925_v62 = vpop.permute.xlu1 %2265  ;;  %2607 = vrot.lane.b32.xlu2 %v2604_v11, %s5426_s24  ;;  %v2661_v11 = vstv %s4932_s27  ;;  %s4998_s27 = sld [smem:[#allocation5 + $0x79]] }
 0x2db   : > { %8724 = vst [vmem:[#allocation176_spill] sm:$0xff] %v6925_v62  ;;  %v6927_v42 = vpop.permute.xlu0 %2283  ;;  %v2638_v62 = vmul.f32 %v6872_v54, %v2637_v34 }
 0x2dc   : > { %8725 = vst [vmem:[#allocation177_spill] sm:$0xff] %v6927_v42  ;;  %v6932_v55 = vpop.permute.xlu2 %2333  ;;  %v2639_v42 = vmul.f32 %v6879_v35, %v2637_v34 }
 0x2dd   : > { %8726 = vst [vmem:[#allocation178_spill] sm:$0xff] %v6932_v55  ;;  %v2644_v44 = vrot.slane %v2638_v62, 4 }
 0x2de   : > { %v2645_v63 = vrot.slane %v2639_v42, 4 }
 0x2e0   : > { %2625 = vrot.lane.b32.xlu1 %v2622_v29, %s5426_s24  ;;  %v2646_v34 = vsel %vm816_vm2, %v2644_v44, %v2645_v63  ;;  %v2648_v5 = vsel %vm816_vm2, %v2645_v63, %v2647_v48  ;;  %v2663_v29 = vmul.f32 %v6879_v35, %v2661_v11  ;;  %v2701_v44 = vstv %s4946_s23  ;;  %s5012_s23 = sld [smem:[#allocation5 + $0x87]] }
 0x2e1   : > { %2627 = vrot.lane.b32.xlu0 %v2624_v25, %s5426_s24  ;;  %v2662_v25 = vmul.f32 %v6872_v54, %v2661_v11 }
 0x2e2   : > { %v6940_v51 = vpop.permute.xlu1 %2287  ;;  %2629 = vrot.lane.b32.xlu2 %v2623_v61, %s5426_s24  ;;  %v2667_v42 = vrot.slane %v2663_v29, 5 }
 0x2e3   : > { %8727 = vst [vmem:[#allocation179_spill] sm:$0xff] %v6940_v51  ;;  %v6942_v43 = vpop.permute.xlu0 %2307  ;;  %v2666_v61 = vrot.slane %v2662_v25, 5  ;;  %v2702_v25 = vmul.f32 %v6872_v54, %v2701_v44 }
 0x2e4   : > { %8728 = vst [vmem:[#allocation180_spill] sm:$0xff] %v6942_v43  ;;  %v6945_v30 = vpop.permute.xlu2 %2357  ;;  %v2681_v43 = vstv %s4939_s20  ;;  %s5005_s20 = sld [smem:[#allocation5 + $0x80]] }
 0x2e5   : > { %8729 = vst [vmem:[#allocation181_spill] sm:$0xff] %v6945_v30  ;;  %v2668_v63 = vsel %vm867_vm4, %v2666_v61, %v2667_v42  ;;  %v2682_v11 = vmul.f32 %v6872_v54, %v2681_v43  ;;  %v2708_v55 = vrot.slane %v2702_v25, 1 }
 0x2e8   : > { %2649 = vrot.lane.b32.xlu1 %v2646_v34, %s5426_s24  ;;  %v2683_v34 = vmul.f32 %v6879_v35, %v2681_v43 }
 0x2e9   : > { %2651 = vrot.lane.b32.xlu0 %v2648_v5, %s5426_s24  ;;  %v2684_v5 = vmul.f32 %v6899_v38, %v2681_v43 }
 0x2ea   : > { %v6953_v37 = vpop.permute.xlu1 %2311  ;;  %2653 = vrot.lane.b32.xlu2 %v2647_v48, %s5426_s24 }
 0x2eb   : > { %8730 = vst [vmem:[#allocation182_spill] sm:$0xff] %v6953_v37  ;;  %v6955_v62 = vpop.permute.xlu0 %2331  ;;  %v2688_v37 = vrot.slane %v2682_v11, 1  ;;  %v2691_v51 = vrot.slane %v2684_v5, 1  ;;  %v2725_v11 = vstv %s4953_s5  ;;  %s5019_s5 = sld [smem:[#allocation5 + $0x8e]] }
 0x2ec   : > { %8731 = vst [vmem:[#allocation183_spill] sm:$0xff] %v6955_v62  ;;  %v6958_v30 = vpop.permute.xlu2 %2375  ;;  %v2703_v62 = vmul.f32 %v6879_v35, %v2701_v44  ;;  %v2726_v25 = vmul.f32 %v6872_v54, %v2725_v11 }
 0x2ed   : > { %8732 = vst [vmem:[#allocation184_spill] sm:$0xff] %v6958_v30  ;;  %v2689_v30 = vrot.slane %v2683_v34, 1 }
 0x2f0   : > { %2669 = vrot.lane.b32.xlu1 %v2666_v61, %s5427_s7  ;;  %v2709_v61 = vrot.slane %v2703_v62, 1  ;;  %v2727_v62 = vmul.f32 %v6879_v35, %v2725_v11 }
 0x2f1   : > { %2671 = vrot.lane.b32.xlu0 %v2668_v63, %s5427_s7  ;;  %v2690_v63 = vsel %vm890_vm15, %v2688_v37, %v2689_v30 }
 0x2f2   : > { %v6966_v29 = vpop.permute.xlu1 %2335  ;;  %2673 = vrot.lane.b32.xlu2 %v2667_v42, %s5427_s7  ;;  %v2710_v42 = vsel %vm890_vm15, %v2708_v55, %v2709_v61 }
 0x2f3   : > { %8733 = vst [vmem:[#allocation185_spill] sm:$0xff] %v6966_v29  ;;  %v6968_v48 = vpop.permute.xlu0 %2355  ;;  %v2692_v29 = vsel %vm890_vm15, %v2689_v30, %v2691_v51  ;;  %v2749_v51 = vstv %s4960_s8  ;;  %s4978_s8 = sld [smem:[#allocation5 + $0x65]] }
 0x2f4   : > { %8734 = vst [vmem:[#allocation186_spill] sm:$0xff] %v6968_v48  ;;  %v6973_v43 = vpop.permute.xlu2 %2399  ;;  %v2704_v48 = vmul.f32 %v6899_v38, %v2701_v44  ;;  %v2732_v44 = vrot.slane %v2726_v25, 1  ;;  %v2751_v25 = vmul.f32 %v6879_v35, %v2749_v51 }
 0x2f5   : > { %8735 = vst [vmem:[#allocation187_spill] sm:$0xff] %v6973_v43 }
 0x2f6   : > { %v2711_v37 = vrot.slane %v2704_v48, 1  ;;  %v2750_v48 = vmul.f32 %v6872_v54, %v2749_v51 }
 0x2f8   : > { %2693 = vrot.lane.b32.xlu1 %v2690_v63, %s5427_s7  ;;  %v2733_v63 = vrot.slane %v2727_v62, 1 }
 0x2f9   : > { %2695 = vrot.lane.b32.xlu0 %v2692_v29, %s5427_s7  ;;  %v2712_v29 = vsel %vm890_vm15, %v2709_v61, %v2711_v37  ;;  %v2756_v61 = vrot.slane %v2750_v48, 1 }
 0x2fa   : > { %v6980_v34 = vpop.permute.xlu1 %2371  ;;  %2713 = vrot.lane.b32.xlu2 %v2710_v42, %s5427_s7  ;;  %v2734_v42 = vsel %vm890_vm15, %v2732_v44, %v2733_v63 }
 0x2fb   : > { %8736 = vst [vmem:[#allocation188_spill] sm:$0xff] %v6980_v34  ;;  %v6982_v5 = vpop.permute.xlu0 %2373  ;;  %v2728_v34 = vmul.f32 %v6899_v38, %v2725_v11 }
 0x2fc   : > { %8737 = vst [vmem:[#allocation189_spill] sm:$0xff] %v6982_v5  ;;  %v6988_v30 = vpop.permute.xlu2 %2423  ;;  %v2773_v5 = vstv %s4967_s17  ;;  %s7059_s17 = sld [smem:[#allocation5 + $0x6c]] }
 0x2fd   : > { %8738 = vst [vmem:[#allocation190_spill] sm:$0xff] %v6988_v30  ;;  %v2735_v62 = vrot.slane %v2728_v34, 1  ;;  %v2774_v34 = vmul.f32 %v6872_v54, %v2773_v5  ;;  %v2775_v48 = vmul.f32 %v6879_v35, %v2773_v5 }
 0x300   : > { %2715 = vrot.lane.b32.xlu1 %v2712_v29, %s5427_s7  ;;  %v2757_v29 = vrot.slane %v2751_v25, 1 }
 0x301   : > { %2717 = vrot.lane.b32.xlu0 %v2711_v37, %s5427_s7  ;;  %v2736_v37 = vsel %vm890_vm15, %v2733_v63, %v2735_v62  ;;  %v2793_v63 = vstv %s4974_s19  ;;  %s4992_s19 = sld [smem:[#allocation5 + $0x73]] }
 0x302   : > { %v6994_v55 = vpop.permute.xlu1 %2395  ;;  %2737 = vrot.lane.b32.xlu2 %v2734_v42, %s5427_s7  ;;  %v2758_v42 = vsel %vm890_vm15, %v2756_v61, %v2757_v29 }
 0x303   : > { %8739 = vst [vmem:[#allocation191_spill] sm:$0xff] %v6994_v55  ;;  %v6996_v43 = vpop.permute.xlu0 %2397  ;;  %v2752_v55 = vmul.f32 %v6899_v38, %v2749_v51  ;;  %v2781_v51 = vrot.slane %v2775_v48, 5 }
 0x304   : > { %8740 = vst [vmem:[#allocation192_spill] sm:$0xff] %v6996_v43  ;;  %v7002_v11 = vpop.permute.xlu2 %2463 }
 0x305   : > { %8741 = vst [vmem:[#allocation193_spill] sm:$0xff] %v7002_v11  ;;  %v2759_v25 = vrot.slane %v2752_v55, 1  ;;  %v2780_v11 = vrot.slane %v2774_v34, 5  ;;  %v2796_v34 = vmul.f32 %v6899_v38, %v2793_v63 }
 0x307   : > { %v2782_v48 = vsel %vm867_vm4, %v2780_v11, %v2781_v51  ;;  %v7041_v11 = vld [vmem:[#allocation3] sm:$0xff] }
 0x308   : > { %2739 = vrot.lane.b32.xlu1 %v2736_v37, %s5427_s7  ;;  %v2795_v37 = vmul.f32 %v6879_v35, %v2793_v63 }
 0x309   : > { %2741 = vrot.lane.b32.xlu0 %v2735_v62, %s5427_s7  ;;  %v2760_v62 = vsel %vm890_vm15, %v2757_v29, %v2759_v25 }
 0x30a   : > { %v7008_v44 = vpop.permute.xlu1 %2419  ;;  %2761 = vrot.lane.b32.xlu2 %v2758_v42, %s5427_s7  ;;  %v2801_v29 = vrot.slane %v2795_v37, 5 }
 0x30b   : > { %8742 = vst [vmem:[#allocation194_spill] sm:$0xff] %v7008_v44  ;;  %v7010_v43 = vpop.permute.xlu0 %2421  ;;  %v2776_v44 = vmul.f32 %v6899_v38, %v2773_v5  ;;  %v2803_v5 = vrot.slane %v2796_v34, 5 }
 0x30c   : > { %8743 = vst [vmem:[#allocation195_spill] sm:$0xff] %v7010_v43  ;;  %v7016_v30 = vpop.permute.xlu2 %2487  ;;  %v2794_v43 = vmul.f32 %v6872_v54, %v2793_v63 }
 0x30d   : > { %8744 = vst [vmem:[#allocation196_spill] sm:$0xff] %v7016_v30  ;;  %v2783_v42 = vrot.slane %v2776_v44, 5  ;;  %v2804_v63 = vsel %vm867_vm4, %v2801_v29, %v2803_v5 }
 0x30e   : > { %v2800_v35 = vrot.slane %v2794_v43, 5 }
 0x310   : > { %2763 = vrot.lane.b32.xlu1 %v2760_v62, %s5427_s7  ;;  %v2802_v62 = vsel %vm867_vm4, %v2800_v35, %v2801_v29  ;;  %v2962_v35 = vstv %s4998_s27  ;;  %s5020_s27 = sld [smem:[#allocation5 + $0x8f]] }
 0x311   : > { %2765 = vrot.lane.b32.xlu0 %v2759_v25, %s5427_s7  ;;  %v2784_v25 = vsel %vm867_vm4, %v2781_v51, %v2783_v42  ;;  %v2946_v51 = vstv %s4984_s26  ;;  %v2954_v42 = vstv %s4991_s29  ;;  %s5013_s26 = sld [smem:[#allocation5 + $0x88]] }
 0x312   : > { %v7024_v55 = vpop.permute.xlu1 %2443  ;;  %2785 = vrot.lane.b32.xlu2 %v2782_v48, %s5427_s7  ;;  %v2947_v37 = vmul.f32 %v7041_v11, %v2946_v51  ;;  %v2970_v51 = vstv %s5005_s20  ;;  %s5006_s29 = sld [smem:[#allocation5 + $0x81]] }
 0x313   : > { %8745 = vst [vmem:[#allocation197_spill] sm:$0xff] %v7024_v55  ;;  %v7026_v61 = vpop.permute.xlu0 %2445  ;;  %v2938_v55 = vstv %s4977_s25  ;;  %v2971_v30 = vmul.f32 %v7041_v11, %v2970_v51  ;;  %s4999_s25 = sld [smem:[#allocation5 + $0x7a]] }
 0x314   : > { %8746 = vst [vmem:[#allocation198_spill] sm:$0xff] %v7026_v61  ;;  %v7031_v54 = vpop.permute.xlu2 %2511  ;;  %v2939_v44 = vmul.f32 %v7041_v11, %v2938_v55  ;;  %v2949_v55 = vrot.slane %v2947_v37, 1  ;;  %v7064_v61 = vld [vmem:[#allocation3 + $0x8] sm:$0x3]  ;;  %s7092_s20 = sld [smem:[#allocation5 + $0x66]] }
 0x315   : > { %8747 = vst [vmem:[#allocation199_spill] sm:$0xff] %v7031_v54 }
 0x316   : > { %v2941_v34 = vrot.slane %v2939_v44, 5  ;;  %v2978_v44 = vstv %s5012_s23  ;;  %s4986_s23 = sld [smem:[#allocation5 + $0x6d]] }
 0x318   : > { %2787 = vrot.lane.b32.xlu1 %v2784_v25, %s5427_s7 }
 0x319   : > { %2805 = vrot.lane.b32.xlu0 %v2802_v62, %s5427_s7  ;;  %v2955_v62 = vmul.f32 %v7041_v11, %v2954_v42  ;;  %v2980_v42 = vmul.f32 %v7064_v61, %v2978_v44 }
 0x31a   : > { %v7037_v38 = vpop.permute.xlu1 %2465  ;;  %2807 = vrot.lane.b32.xlu2 %v2804_v63, %s5427_s7  ;;  %v2963_v63 = vmul.f32 %v7041_v11, %v2962_v35 }
 0x31b   : > { %8748 = vst [vmem:[#allocation200_spill] sm:$0xff] %v7037_v38  ;;  %v7039_v43 = vpop.permute.xlu0 %2467  ;;  %v3010_v38 = vstv %s7059_s17  ;;  %s5007_s17 = sld [smem:[#allocation5 + $0x82]] }
 0x31c   : > { %8749 = vst [vmem:[#allocation201_spill] sm:$0xff] %v7039_v43  ;;  %v7047_v48 = vpop.permute.xlu2 %2528  ;;  %v2965_v54 = vrot.slane %v2963_v63, 1 }
 0x31d   : > { %8750 = vst [vmem:[#allocation202_spill] sm:$0xff] %v7047_v48  ;;  %v2990_v48 = vstv %s5019_s5  ;;  %s4993_s5 = sld [smem:[#allocation5 + $0x74]] }
 0x31e   : > { %v2991_v35 = vmul.f32 %v7041_v11, %v2990_v48 }
 0x320   : > { %2809 = vrot.lane.b32.xlu1 %v2803_v5, %s5427_s7  ;;  %v2957_v5 = vrot.slane %v2955_v62, 1  ;;  %v2973_v62 = vrot.slane %v2971_v30, 1  ;;  %v2995_v43 = vrot.slane %v2991_v35, 5 }
 0x321   : > { %2942 = vrot.lane.b32.xlu0 %v2941_v34, %s5422_s14  ;;  %v2979_v34 = vmul.f32 %v7041_v11, %v2978_v44 }
 0x322   : > { %v7051_v25 = vpop.permute.xlu1 %2489  ;;  %2950 = vrot.lane.b32.xlu2 %v2949_v55, %s5422_s14  ;;  %v2992_v55 = vmul.f32 %v7064_v61, %v2990_v48 }
 0x323   : > { %8751 = vst [vmem:[#allocation203_spill] sm:$0xff] %v7051_v25  ;;  %v7053_v29 = vpop.permute.xlu0 %2491  ;;  %v2983_v25 = vrot.slane %v2979_v34, 5 }
 0x324   : > { %8752 = vst [vmem:[#allocation204_spill] sm:$0xff] %v7053_v29  ;;  %v7061_v37 = vpop.permute.xlu2 %2545  ;;  %v3002_v29 = vstv %s4978_s8  ;;  %v2996_v44 = vrot.slane %v2992_v55, 5  ;;  %s5000_s8 = sld [smem:[#allocation5 + $0x7b]] }
 0x325   : > { %8753 = vst [vmem:[#allocation205_spill] sm:$0xff] %v7061_v37  ;;  %v2984_v37 = vrot.slane %v2980_v42, 5  ;;  %v3003_v48 = vmul.f32 %v7041_v11, %v3002_v29  ;;  %v3011_v29 = vmul.f32 %v7041_v11, %v3010_v38  ;;  %v3054_v38 = vstv %s5020_s27  ;;  %s5008_s27 = sld [smem:[#allocation5 + $0x83]] }
 0x326   : > { %v2997_v30 = vsel %vm867_vm4, %v2995_v43, %v2996_v44  ;;  %v3042_v43 = vstv %s5013_s26  ;;  %s4980_s26 = sld [smem:[#allocation5 + $0x67]] }
 0x327   : > { %v3005_v34 = vrot.slane %v3003_v48, 6  ;;  %v3034_v48 = vstv %s5006_s29  ;;  %s4987_s29 = sld [smem:[#allocation5 + $0x6e]] }
 0x328   : > { %2958 = vrot.lane.b32.xlu1 %v2957_v5, %s5422_s14 }
 0x329   : > { %2966 = vrot.lane.b32.xlu0 %v2965_v54, %s5422_s14  ;;  %v2985_v54 = vsel %vm867_vm4, %v2983_v25, %v2984_v37  ;;  %v3026_v25 = vstv %s4999_s25  ;;  %s5021_s25 = sld [smem:[#allocation5 + $0x90]] }
 0x32a   : > { %v7071_v63 = vpop.permute.xlu1 %2513  ;;  %2974 = vrot.lane.b32.xlu2 %v2973_v62, %s5422_s14  ;;  %v3027_v37 = vmul.f32 %v7041_v11, %v3026_v25  ;;  %v3013_v62 = vrot.slane %v3011_v29, 6  ;;  %v3055_v25 = vmul.f32 %v7041_v11, %v3054_v38 }
 0x32b   : > { %8754 = vst [vmem:[#allocation206_spill] sm:$0xff] %v7071_v63  ;;  %v7073_v51 = vpop.permute.xlu0 %2515  ;;  %v3018_v63 = vstv %s4992_s19  ;;  %s5014_s19 = sld [smem:[#allocation5 + $0x89]] }
 0x32c   : > { %8755 = vst [vmem:[#allocation207_spill] sm:$0xff] %v7073_v51  ;;  %v7077_v5 = vpop.permute.xlu2 %2564  ;;  %v3019_v55 = vmul.f32 %v7041_v11, %v3018_v63  ;;  %v3029_v63 = vrot.slane %v3027_v37, 2  ;;  %v3059_v37 = vrot.slane %v3055_v25, 6  ;;  %v3074_v51 = vstv %s4986_s23  ;;  %s5001_s23 = sld [smem:[#allocation5 + $0x7c]] }
 0x32d   : > { %8756 = vst [vmem:[#allocation208_spill] sm:$0xff] %v7077_v5 }
 0x32e   : > { %v3021_v44 = vrot.slane %v3019_v55, 2  ;;  %v3035_v55 = vmul.f32 %v7041_v11, %v3034_v48 }
 0x330   : > { %2986 = vrot.lane.b32.xlu1 %v2985_v54, %s5422_s14 }
 0x331   : > { %2998 = vrot.lane.b32.xlu0 %v2997_v30, %s5422_s14  ;;  %v3043_v30 = vmul.f32 %v7041_v11, %v3042_v43 }
 0x332   : > { %v7084_v42 = vpop.permute.xlu1 %2530  ;;  %3006 = vrot.lane.b32.xlu2 %v3005_v34, %s5423_s30 }
 0x333   : > { %8757 = vst [vmem:[#allocation209_spill] sm:$0xff] %v7084_v42  ;;  %v7086_v35 = vpop.permute.xlu0 %2543  ;;  %v3056_v42 = vmul.f32 %v7064_v61, %v3054_v38  ;;  %v3047_v5 = vrot.slane %v3043_v30, 2  ;;  %v3075_v38 = vmul.f32 %v7041_v11, %v3074_v51 }
 0x334   : > { %8758 = vst [vmem:[#allocation210_spill] sm:$0xff] %v7086_v35  ;;  %v7094_v54 = vpop.permute.xlu2 %2583  ;;  %v3044_v35 = vmul.f32 %v7064_v61, %v3042_v43 }
 0x335   : > { %8759 = vst [vmem:[#allocation211_spill] sm:$0xff] %v7094_v54  ;;  %v3066_v54 = vstv %s7092_s20  ;;  %v3077_v25 = vrot.slane %v3075_v38, 7  ;;  %s4994_s20 = sld [smem:[#allocation5 + $0x75]] }
 0x336   : > { %v3048_v43 = vrot.slane %v3044_v35, 2  ;;  %v3067_v30 = vmul.f32 %v7041_v11, %v3066_v54  ;;  %v3106_v54 = vstv %s5014_s19  ;;  %s7163_s19 = sld [smem:[#allocation5 + $0x6f]] }
 0x337   : > { %v3108_v38 = vmul.f32 %v7064_v61, %v3106_v54 }
 0x338   : > { %3014 = vrot.lane.b32.xlu1 %v3013_v62, %s5423_s30  ;;  %v3037_v62 = vrot.slane %v3035_v55, 2  ;;  %v3069_v55 = vrot.slane %v3067_v30, 7  ;;  %v3107_v30 = vmul.f32 %v7041_v11, %v3106_v54 }
 0x339   : > { %3022 = vrot.lane.b32.xlu0 %v3021_v44, %s5423_s30 }
 0x33a   : > { %v7100_v34 = vpop.permute.xlu1 %2547  ;;  %3030 = vrot.lane.b32.xlu2 %v3029_v63, %s5423_s30 }
 0x33b   : > { %8760 = vst [vmem:[#allocation212_spill] sm:$0xff] %v7100_v34  ;;  %v7102_v29 = vpop.permute.xlu0 %2562  ;;  %v3060_v34 = vrot.slane %v3056_v42, 6  ;;  %v3082_v42 = vstv %s4993_s5  ;;  %s5015_s5 = sld [smem:[#allocation5 + $0x8a]] }
 0x33c   : > { %8761 = vst [vmem:[#allocation213_spill] sm:$0xff] %v7102_v29  ;;  %v7109_v44 = vpop.permute.xlu2 %2607  ;;  %v3049_v29 = vsel %vm1072_vm6, %v3047_v5, %v3048_v43  ;;  %v3083_v5 = vmul.f32 %v7041_v11, %v3082_v42  ;;  %v3090_v43 = vstv %s5000_s8  ;;  %v3118_v42 = vstv %s5021_s25  ;;  %s5022_s8 = sld [smem:[#allocation5 + $0x91]] }
 0x33d   : > { %8762 = vst [vmem:[#allocation214_spill] sm:$0xff] %v7109_v44  ;;  %v3061_v63 = vsel %vm1025_vm5, %v3059_v37, %v3060_v34  ;;  %v3091_v37 = vmul.f32 %v7041_v11, %v3090_v43  ;;  %v3120_v43 = vmul.f32 %v7064_v61, %v3118_v42  ;;  %s4995_s25 = sld [smem:[#allocation5 + $0x76]] }
 0x33e   : > { %v3085_v51 = vrot.slane %v3083_v5, 7  ;;  %v3111_v5 = vrot.slane %v3107_v30, 3  ;;  %v3130_v30 = vstv %s4980_s26  ;;  %s5002_s26 = sld [smem:[#allocation5 + $0x7d]] }
 0x340   : > { %3038 = vrot.lane.b32.xlu1 %v3037_v62, %s5423_s30  ;;  %v3098_v62 = vstv %s5007_s17  ;;  %s4981_s17 = sld [smem:[#allocation5 + $0x68]] }
 0x341   : > { %3050 = vrot.lane.b32.xlu0 %v3049_v29, %s5423_s30 }
 0x342   : > { %v7114_v35 = vpop.permute.xlu1 %2566  ;;  %3062 = vrot.lane.b32.xlu2 %v3061_v63, %s5423_s30  ;;  %v3099_v63 = vmul.f32 %v7041_v11, %v3098_v62 }
 0x343   : > { %8763 = vst [vmem:[#allocation215_spill] sm:$0xff] %v7114_v35  ;;  %v7116_v48 = vpop.permute.xlu0 %2581  ;;  %v3112_v35 = vrot.slane %v3108_v38, 3  ;;  %v3131_v38 = vmul.f32 %v7041_v11, %v3130_v30  ;;  %v3166_v30 = vstv %s5015_s5  ;;  %s5003_s5 = sld [smem:[#allocation5 + $0x7e]] }
 0x344   : > { %8764 = vst [vmem:[#allocation216_spill] sm:$0xff] %v7116_v48  ;;  %v7123_v29 = vpop.permute.xlu2 %2629 }
 0x345   : > { %8765 = vst [vmem:[#allocation217_spill] sm:$0xff] %v7123_v29 }
 0x348   : > { %3070 = vrot.lane.b32.xlu1 %v3069_v55, %s5424_s16  ;;  %v3093_v55 = vrot.slane %v3091_v37, 3 }
 0x349   : > { %3078 = vrot.lane.b32.xlu0 %v3077_v25, %s5424_s16  ;;  %v3101_v25 = vrot.slane %v3099_v63, 3  ;;  %v3124_v63 = vrot.slane %v3120_v43, 3  ;;  %v3158_v43 = vstv %s5008_s27  ;;  %s4982_s27 = sld [smem:[#allocation5 + $0x69]] }
 0x34a   : > { %v7127_v48 = vpop.permute.xlu1 %2585  ;;  %3086 = vrot.lane.b32.xlu2 %v3085_v51, %s5424_s16  ;;  %v3113_v51 = vsel %vm1254_vm1, %v3111_v5, %v3112_v35 }
 0x34b   : > { %8766 = vst [vmem:[#allocation218_spill] sm:$0xff] %v7127_v48  ;;  %v7129_v34 = vpop.permute.xlu0 %2605 }
 0x34c   : > { %8767 = vst [vmem:[#allocation219_spill] sm:$0xff] %v7129_v34  ;;  %v7136_v44 = vpop.permute.xlu2 %2653  ;;  %v3119_v34 = vmul.f32 %v7041_v11, %v3118_v42 }
 0x34d   : > { %8768 = vst [vmem:[#allocation220_spill] sm:$0xff] %v7136_v44  ;;  %v3178_v44 = vstv %s5022_s8  ;;  %s5010_s8 = sld [smem:[#allocation5 + $0x85]] }
 0x34e   : > { %v3123_v37 = vrot.slane %v3119_v34, 3 }
 0x350   : > { %3094 = vrot.lane.b32.xlu1 %v3093_v55, %s5424_s16  ;;  %v3137_v55 = vstv %s4987_s29  ;;  %s5009_s29 = sld [smem:[#allocation5 + $0x84]] }
 0x351   : > { %3102 = vrot.lane.b32.xlu0 %v3101_v25, %s5424_s16  ;;  %v3125_v25 = vsel %vm1254_vm1, %v3123_v37, %v3124_v63  ;;  %v3138_v35 = vmul.f32 %v7041_v11, %v3137_v55  ;;  %v3159_v37 = vmul.f32 %v7041_v11, %v3158_v43 }
 0x352   : > { %v7142_v62 = vpop.permute.xlu1 %2625  ;;  %3114 = vrot.lane.b32.xlu2 %v3113_v51, %s5424_s16  ;;  %v3144_v51 = vstv %s4994_s20  ;;  %s4989_s20 = sld [smem:[#allocation5 + $0x70]] }
 0x353   : > { %8769 = vst [vmem:[#allocation221_spill] sm:$0xff] %v7142_v62  ;;  %v7144_v54 = vpop.permute.xlu0 %2627  ;;  %v3151_v62 = vstv %s5001_s23  ;;  %v3145_v63 = vmul.f32 %v7041_v11, %v3144_v51  ;;  %v3161_v43 = vrot.slane %v3159_v37, 4  ;;  %s4996_s23 = sld [smem:[#allocation5 + $0x77]] }
 0x354   : > { %8770 = vst [vmem:[#allocation222_spill] sm:$0xff] %v7144_v54  ;;  %v7149_v42 = vpop.permute.xlu2 %2673 }
 0x355   : > { %8771 = vst [vmem:[#allocation223_spill] sm:$0xff] %v7149_v42 }
 0x358   : > { %3126 = vrot.lane.b32.xlu1 %v3125_v25, %s5424_s16  ;;  %v3167_v25 = vmul.f32 %v7041_v11, %v3166_v30 }
 0x359   : > { %3133 = vrot.lane.b32.xlu0 %v3131_v38, %s5425_s3  ;;  %v3152_v38 = vmul.f32 %v7041_v11, %v3151_v62 }
 0x35a   : > { %v7155_v34 = vpop.permute.xlu1 %2649  ;;  %3140 = vrot.lane.b32.xlu2 %v3138_v35, %s5425_s3  ;;  %v3180_v35 = vmul.f32 %v7064_v61, %v3178_v44  ;;  %v3171_v29 = vrot.slane %v3167_v25, 4 }
 0x35b   : > { %8772 = vst [vmem:[#allocation224_spill] sm:$0xff] %v7155_v34  ;;  %v7157_v5 = vpop.permute.xlu0 %2651  ;;  %v3168_v34 = vmul.f32 %v7064_v61, %v3166_v30 }
 0x35c   : > { %8773 = vst [vmem:[#allocation225_spill] sm:$0xff] %v7157_v5  ;;  %v7165_v55 = vpop.permute.xlu2 %2713  ;;  %v3179_v5 = vmul.f32 %v7041_v11, %v3178_v44  ;;  %v3184_v30 = vrot.slane %v3180_v35, 4 }
 0x35d   : > { %8774 = vst [vmem:[#allocation226_spill] sm:$0xff] %v7165_v55  ;;  %v3190_v55 = vstv %s4981_s17  ;;  %v3172_v54 = vrot.slane %v3168_v34, 4  ;;  %s5026_s17 = sld [smem:[#allocation5 + $0x95]] }
 0x35e   : > { %v3183_v42 = vrot.slane %v3179_v5, 4  ;;  %v3191_v61 = vmul.f32 %v7041_v11, %v3190_v55 }
 0x360   : > { %3147 = vrot.lane.b32.xlu1 %v3145_v63, %s5425_s3  ;;  %v3173_v63 = vsel %vm816_vm2, %v3171_v29, %v3172_v54  ;;  %v3185_v37 = vsel %vm816_vm2, %v3183_v42, %v3184_v30  ;;  %v3193_v34 = vrot.slane %v3191_v61, 5 }
 0x361   : > { %3154 = vrot.lane.b32.xlu0 %v3152_v38, %s5425_s3  ;;  %v3198_v38 = vstv %s7163_s19  ;;  %s5033_s19 = sld [smem:[#allocation5 + $0x9c]] }
 0x362   : > { %v7173_v62 = vpop.permute.xlu1 %2669  ;;  %3162 = vrot.lane.b32.xlu2 %v3161_v43, %s5425_s3  ;;  %v3199_v55 = vmul.f32 %v7041_v11, %v3198_v38  ;;  %v3214_v43 = vstv %s5002_s26  ;;  %s5040_s26 = sld [smem:[#allocation5 + $0xa3]] }
 0x363   : > { %8775 = vst [vmem:[#allocation227_spill] sm:$0xff] %v7173_v62  ;;  %v7175_v51 = vpop.permute.xlu0 %2671  ;;  %v3206_v62 = vstv %s4995_s25  ;;  %v3215_v29 = vmul.f32 %v7041_v11, %v3214_v43  ;;  %v3262_v43 = vstv %s4989_s20  ;;  %s5054_s25 = sld [smem:[#allocation5 + $0xb1]] }
 0x364   : > { %8776 = vst [vmem:[#allocation228_spill] sm:$0xff] %v7175_v51  ;;  %v7179_v44 = vpop.permute.xlu2 %2737  ;;  %v3207_v35 = vmul.f32 %v7041_v11, %v3206_v62  ;;  %v3201_v54 = vrot.slane %v3199_v55, 1  ;;  %s5068_s20 = sld [smem:[#allocation5 + $0xbf]] }
 0x365   : > { %8777 = vst [vmem:[#allocation229_spill] sm:$0xff] %v7179_v44  ;;  %v3217_v61 = vrot.slane %v3215_v29, 1  ;;  %v3278_v44 = vstv %s5003_s5  ;;  %s7258_s5 = sld [smem:[#allocation5 + $0x9d]] }
 0x366   : > { %v3209_v42 = vrot.slane %v3207_v35, 1  ;;  %v3254_v35 = vstv %s4982_s27  ;;  %s5061_s27 = sld [smem:[#allocation5 + $0xb8]] }
 0x368   : > { %3174 = vrot.lane.b32.xlu1 %v3173_v63, %s5425_s3  ;;  %v3222_v63 = vstv %s5009_s29  ;;  %s5047_s29 = sld [smem:[#allocation5 + $0xaa]] }
 0x369   : > { %3186 = vrot.lane.b32.xlu0 %v3185_v37, %s5425_s3  ;;  %v3223_v38 = vmul.f32 %v7041_v11, %v3222_v63  ;;  %v3263_v63 = vmul.f32 %v7041_v11, %v3262_v43 }
 0x36a   : > { %v7186_v5 = vpop.permute.xlu1 %2693  ;;  %3194 = vrot.lane.b32.xlu2 %v3193_v34, %s5426_s24 }
 0x36b   : > { %8778 = vst [vmem:[#allocation230_spill] sm:$0xff] %v7186_v5  ;;  %v7188_v25 = vpop.permute.xlu0 %2695  ;;  %v3225_v34 = vrot.slane %v3223_v38, 1  ;;  %v3265_v5 = vrot.slane %v3263_v63, 6  ;;  %v3438_v20 = vstv %s7258_s5  ;;  %s7313_s5 = sld [smem:[#allocation5 + $0xac]] }
 0x36c   : > { %8779 = vst [vmem:[#allocation231_spill] sm:$0xff] %v7188_v25  ;;  %v7194_v30 = vpop.permute.xlu2 %2761  ;;  %v3279_v25 = vmul.f32 %v7041_v11, %v3278_v44  ;;  %v3370_v44 = vstv %s5026_s17  ;;  %s5048_s17 = sld [smem:[#allocation5 + $0xab]] }
 0x36d   : > { %8780 = vst [vmem:[#allocation232_spill] sm:$0xff] %v7194_v30 }
 0x370   : > { %3202 = vrot.lane.b32.xlu1 %v3201_v54, %s5426_s24 }
 0x371   : > { %3210 = vrot.lane.b32.xlu0 %v3209_v42, %s5426_s24  ;;  %v3255_v42 = vmul.f32 %v7041_v11, %v3254_v35  ;;  %v3518_v0 = vstv %s7313_s5  ;;  %s7368_s5 = sld [smem:[#allocation5 + $0xc2]] }
 0x372   : > { %v7198_v37 = vpop.permute.xlu1 %2715  ;;  %3218 = vrot.lane.b32.xlu2 %v3217_v61, %s5426_s24  ;;  %v3270_v61 = vstv %s4996_s23  ;;  %s7252_s23 = sld [smem:[#allocation5 + $0x96]] }
 0x373   : > { %8781 = vst [vmem:[#allocation233_spill] sm:$0xff] %v7198_v37  ;;  %v7200_v62 = vpop.permute.xlu0 %2717  ;;  %v3271_v38 = vmul.f32 %v7041_v11, %v3270_v61 }
 0x374   : > { %8782 = vst [vmem:[#allocation234_spill] sm:$0xff] %v7200_v62  ;;  %v7204_v55 = vpop.permute.xlu2 %2785 }
 0x375   : > { %8783 = vst [vmem:[#allocation235_spill] sm:$0xff] %v7204_v55  ;;  %v3257_v55 = vrot.slane %v3255_v42, 6  ;;  %v3273_v30 = vrot.slane %v3271_v38, 2  ;;  %v3281_v42 = vrot.slane %v3279_v25, 2  ;;  %v7239_v25 = vld [vmem:[#allocation3 + $0x10] sm:$0xff] }
 0x378   : > { %3226 = vrot.lane.b32.xlu1 %v3225_v34, %s5426_s24 }
 0x379   : > { %3238 = vrot.lane.b32.xlu0 %v6189_v19, %s5426_s24  ;;  %v3286_v19 = vstv %s5010_s8  ;;  %s5041_s8 = sld [smem:[#allocation5 + $0xa4]] }
 0x37a   : > { %v7209_v29 = vpop.permute.xlu1 %2739  ;;  %3250 = vrot.lane.b32.xlu2 %v6182_v46, %s5426_s24  ;;  %v3287_v46 = vmul.f32 %v7041_v11, %v3286_v19  ;;  %v3377_v19 = vstv %s5033_s19  ;;  %s5062_s19 = sld [smem:[#allocation5 + $0xb9]] }
 0x37b   : > { %8784 = vst [vmem:[#allocation236_spill] sm:$0xff] %v7209_v29  ;;  %v7211_v54 = vpop.permute.xlu0 %2741 }
 0x37c   : > { %8785 = vst [vmem:[#allocation237_spill] sm:$0xff] %v7211_v54  ;;  %v7218_v34 = vpop.permute.xlu2 %2807  ;;  %v3289_v63 = vrot.slane %v3287_v46, 2  ;;  %v3378_v46 = vmul.f32 %v7239_v25, %v3377_v19  ;;  %v3418_v54 = vstv %s5068_s20  ;;  %s5042_s20 = sld [smem:[#allocation5 + $0xa5]] }
 0x37d   : > { %8786 = vst [vmem:[#allocation238_spill] sm:$0xff] %v7218_v34 }
 0x37f   : > { %v3446_v50 = vstv %s5041_s8  ;;  %s5056_s8 = sld [smem:[#allocation5 + $0xb3]] }
 0x380   : > { %3258 = vrot.lane.b32.xlu1 %v3257_v55, %s5427_s7 }
 0x381   : > { %3266 = vrot.lane.b32.xlu0 %v3265_v5, %s5427_s7 }
 0x382   : > { %v7222_v35 = vpop.permute.xlu1 %2763  ;;  %3274 = vrot.lane.b32.xlu2 %v3273_v30, %s5427_s7  ;;  %v3371_v30 = vmul.f32 %v7239_v25, %v3370_v44  ;;  %v3406_v44 = vstv %s5061_s27  ;;  %s5035_s27 = sld [smem:[#allocation5 + $0x9e]] }
 0x383   : > { %8787 = vst [vmem:[#allocation239_spill] sm:$0xff] %v7222_v35  ;;  %v7224_v43 = vpop.permute.xlu0 %2765  ;;  %v3407_v34 = vmul.f32 %v7239_v25, %v3406_v44 }
 0x384   : > { %8788 = vst [vmem:[#allocation240_spill] sm:$0xff] %v7224_v43  ;;  %v7229_v61 = vpop.permute.xlu2 %2950  ;;  %v3430_v43 = vstv %s7252_s23  ;;  %s7311_s23 = sld [smem:[#allocation5 + $0xba]] }
 0x385   : > { %v3411_v35 = vrot.slane %v3407_v34, 4  ;;  %v3526_v12 = vstv %s5056_s8  ;;  %s7370_s8 = sld [smem:[#allocation5 + $0x63]] }
 0x388   : > { %3282 = vrot.lane.b32.xlu1 %v3281_v42, %s5427_s7 }
 0x389   : > { %3290 = vrot.lane.b32.xlu0 %v3289_v63, %s5427_s7 }
 0x38a   : > { %v7233_v5 = vpop.permute.xlu1 %2787  ;;  %3302 = vrot.lane.b32.xlu2 %v6213_v47, %s5427_s7  ;;  %v3398_v47 = vstv %s5054_s25  ;;  %s7277_s25 = sld [smem:[#allocation5 + $0xc0]] }
 0x38b   : > { %8789 = vst [vmem:[#allocation241_spill] sm:$0xff] %v7233_v5  ;;  %v7235_v55 = vpop.permute.xlu0 %2805  ;;  %v3391_v5 = vstv %s5047_s29  ;;  %v3399_v29 = vmul.f32 %v7239_v25, %v3398_v47  ;;  %s7294_s29 = sld [smem:[#allocation5 + $0x97]] }
 0x38c   : > { %8790 = vst [vmem:[#allocation242_spill] sm:$0xff] %v7235_v55  ;;  %v7242_v38 = vpop.permute.xlu2 %2974  ;;  %v3384_v55 = vstv %s5040_s26  ;;  %s5055_s26 = sld [smem:[#allocation5 + $0xb2]] }
 0x390   : > { %3314 = vrot.lane.b32.xlu1 %v6229_v7, %s5427_s7  ;;  %v3385_v7 = vmul.f32 %v7239_v25, %v3384_v55 }
 0x391   : > { %3373 = vrot.lane.b32.xlu0 %v3371_v30, %s5422_s14  ;;  %v3392_v30 = vmul.f32 %v7239_v25, %v3391_v5  ;;  %v3401_v5 = vrot.slane %v3399_v29, 4  ;;  %v3494_v59 = vstv %s7294_s29  ;;  %s7351_s29 = sld [smem:[#allocation5 + $0xad]] }
 0x392   : > { %v7248_v42 = vpop.permute.xlu1 %2809  ;;  %3380 = vrot.lane.b32.xlu2 %v3378_v46, %s5422_s14  ;;  %v3419_v46 = vmul.f32 %v7239_v25, %v3418_v54 }
 0x393   : > { %8791 = vst [vmem:[#allocation243_spill] sm:$0xff] %v7248_v42  ;;  %v7250_v63 = vpop.permute.xlu0 %2942  ;;  %v7263_v42 = vld [vmem:[#allocation3 + $0x18] sm:$0x3] }
 0x394   : > { %v7260_v19 = vpop.permute.xlu2 %3006  ;;  %v3408_v62 = vmul.f32 %v7263_v42, %v3406_v44  ;;  %v3420_v37 = vmul.f32 %v7263_v42, %v3418_v54  ;;  %v3423_v48 = vrot.slane %v3419_v46, 4  ;;  %v3431_v54 = vmul.f32 %v7239_v25, %v3430_v43 }
 0x395   : > { %v3439_v43 = vmul.f32 %v7239_v25, %v3438_v20  ;;  %v3447_v46 = vmul.f32 %v7239_v25, %v3446_v50 }
 0x396   : > { %v3412_v51 = vrot.slane %v3408_v62, 4  ;;  %v3424_v44 = vrot.slane %v3420_v37, 4  ;;  %v3433_v37 = vrot.slane %v3431_v54, 5  ;;  %v3482_v54 = vstv %s7277_s25  ;;  %s5036_s25 = sld [smem:[#allocation5 + $0x9f]] }
 0x397   : > { %v3484_v45 = vmul.f32 %v7263_v42, %v3482_v54 }
 0x398   : > { %3387 = vrot.lane.b32.xlu1 %v3385_v7, %s5422_s14  ;;  %v3413_v29 = vsel %vm816_vm2, %v3411_v35, %v3412_v51  ;;  %v3454_v51 = vstv %s5048_s17  ;;  %s5070_s17 = sld [smem:[#allocation5 + $0xc1]] }
 0x399   : > { %3394 = vrot.lane.b32.xlu0 %v3392_v30, %s5422_s14  ;;  %v3425_v30 = vsel %vm816_vm2, %v3423_v48, %v3424_v44  ;;  %v3470_v48 = vstv %s5062_s19  ;;  %v3455_v35 = vmul.f32 %v7239_v25, %v3454_v51  ;;  %v3449_v44 = vrot.slane %v3447_v46, 1  ;;  %s5029_s19 = sld [smem:[#allocation5 + $0x98]] }
 0x39a   : > { %v7270_v55 = vpop.permute.xlu1 %2958  ;;  %3402 = vrot.lane.b32.xlu2 %v3401_v5, %s5422_s14  ;;  %v3441_v5 = vrot.slane %v3439_v43, 1  ;;  %v3471_v52 = vmul.f32 %v7239_v25, %v3470_v48  ;;  %v3472_v20 = vmul.f32 %v7263_v42, %v3470_v48  ;;  %v3483_v46 = vmul.f32 %v7239_v25, %v3482_v54 }
 0x39b   : > { %v7272_v47 = vpop.permute.xlu0 %2966  ;;  %v3457_v50 = vrot.slane %v3455_v35, 1 }
 0x39c   : > { %v7279_v7 = vpop.permute.xlu2 %3030  ;;  %v3475_v58 = vrot.slane %v3471_v52, 5  ;;  %v3476_v14 = vrot.slane %v3472_v20, 5  ;;  %v3487_v48 = vrot.slane %v3483_v46, 5  ;;  %v3495_v20 = vmul.f32 %v7239_v25, %v3494_v59 }
 0x39e   : > { %v3477_v10 = vsel %vm867_vm4, %v3475_v58, %v3476_v14  ;;  %v3510_v14 = vstv %s5042_s20  ;;  %v3497_v46 = vrot.slane %v3495_v20, 6  ;;  %v3519_v20 = vmul.f32 %v7239_v25, %v3518_v0  ;;  %s7362_s20 = sld [smem:[#allocation5 + $0xb4]] }
 0x39f   : > { %v3511_v58 = vmul.f32 %v7239_v25, %v3510_v14  ;;  %v3546_v14 = vstv %s5070_s17  ;;  %v3558_v60 = vstv %s5029_s19  ;;  %s7373_s17 = sld [smem:[#allocation5 + $0x78]] }
 0x3a0   : > { %3414 = vrot.lane.b32.xlu1 %v3413_v29, %s5422_s14  ;;  %v3521_v3 = vrot.slane %v3519_v20, 2  ;;  %v3547_v8 = vmul.f32 %v7239_v25, %v3546_v14  ;;  %v3548_v0 = vmul.f32 %v7263_v42, %v3546_v14  ;;  %v3566_v20 = vstv %s5036_s25  ;;  %s7398_s19 = sld [smem:[#allocation5 + $0x99]] }
 0x3a1   : > { %3426 = vrot.lane.b32.xlu0 %v3425_v30, %s5422_s14  ;;  %v3462_v30 = vstv %s5055_s26  ;;  %v3513_v59 = vrot.slane %v3511_v58, 2  ;;  %s7345_s26 = sld [smem:[#allocation5 + $0xa6]] }
 0x3a2   : > { %v7286_v62 = vpop.permute.xlu1 %2986  ;;  %3434 = vrot.lane.b32.xlu2 %v3433_v37, %s5423_s30  ;;  %v3463_v51 = vmul.f32 %v7239_v25, %v3462_v30  ;;  %v3502_v30 = vstv %s5035_s27  ;;  %s7355_s27 = sld [smem:[#allocation5 + $0x7f]] }
 0x3a3   : > { %v7288_v34 = vpop.permute.xlu0 %2998  ;;  %s7414_s25 = sld [smem:[#allocation5 + $0xa0]] }
 0x3a4   : > { %v7296_v29 = vpop.permute.xlu2 %3062  ;;  %v3465_v35 = vrot.slane %v3463_v51, 1 }
 0x3a5   : > { %v2909_v23 = vstv %s7373_s17  ;;  %s7467_s17 = sld [smem:[#allocation5 + $0xa2]] }
 0x3a7   : > { %v3574_v14 = vstv %s7345_s26  ;;  %s7417_s26 = sld [smem:[#allocation5 + $0xa7]] }
 0x3a8   : > { %3442 = vrot.lane.b32.xlu1 %v3441_v5, %s5423_s30  ;;  %v3575_v57 = vmul.f32 %v7239_v25, %v3574_v14 }
 0x3a9   : > { %3450 = vrot.lane.b32.xlu0 %v3449_v44, %s5423_s30  ;;  %v3488_v44 = vrot.slane %v3484_v45, 5 }
 0x3aa   : > { %v7303_v37 = vpop.permute.xlu1 %3014  ;;  %3458 = vrot.lane.b32.xlu2 %v3457_v50, %s5423_s30  ;;  %v3503_v50 = vmul.f32 %v7239_v25, %v3502_v30  ;;  %v3577_v40 = vrot.slane %v3575_v57, 7 }
 0x3ab   : > { %v7305_v43 = vpop.permute.xlu0 %3022  ;;  %v3489_v45 = vsel %vm867_vm4, %v3487_v48, %v3488_v44 }
 0x3ac   : > { %v7315_v5 = vpop.permute.xlu2 %3086  ;;  %v3505_v51 = vrot.slane %v3503_v50, 6  ;;  %v3527_v50 = vmul.f32 %v7239_v25, %v3526_v12 }
 0x3b0   : > { %3466 = vrot.lane.b32.xlu1 %v3465_v35, %s5423_s30 }
 0x3b1   : > { %3478 = vrot.lane.b32.xlu0 %v3477_v10, %s5423_s30  ;;  %v3534_v10 = vstv %s7311_s23  ;;  %s7365_s23 = sld [smem:[#allocation5 + $0xbb]] }
 0x3b2   : > { %v7321_v52 = vpop.permute.xlu1 %3038  ;;  %3490 = vrot.lane.b32.xlu2 %v3489_v45, %s5423_s30  ;;  %v3535_v30 = vmul.f32 %v7239_v25, %v3534_v10  ;;  %v3536_v45 = vmul.f32 %v7263_v42, %v3534_v10 }
 0x3b3   : > { %v7323_v54 = vpop.permute.xlu0 %3050 }
 0x3b4   : > { %v7330_v35 = vpop.permute.xlu2 %3114  ;;  %v3540_v28 = vrot.slane %v3536_v45, 2 }
 0x3b8   : > { %3498 = vrot.lane.b32.xlu1 %v3497_v46, %s5424_s16  ;;  %v3539_v46 = vrot.slane %v3535_v30, 2 }
 0x3b9   : > { %3506 = vrot.lane.b32.xlu0 %v3505_v51, %s5424_s16  ;;  %v3529_v51 = vrot.slane %v3527_v50, 2  ;;  %v3551_v50 = vrot.slane %v3547_v8, 6 }
 0x3ba   : > { %v7336_v48 = vpop.permute.xlu1 %3070  ;;  %3514 = vrot.lane.b32.xlu2 %v3513_v59, %s5424_s16  ;;  %v3559_v59 = vmul.f32 %v7239_v25, %v3558_v60  ;;  %v3541_v30 = vsel %vm1072_vm6, %v3539_v46, %v3540_v28  ;;  %v3567_v60 = vmul.f32 %v7239_v25, %v3566_v20  ;;  %v3582_v46 = vstv %s7351_s29  ;;  %s7425_s29 = sld [smem:[#allocation5 + $0xae]] }
 0x3bb   : > { %v7338_v44 = vpop.permute.xlu0 %3078  ;;  %v3590_v20 = vstv %s7362_s20  ;;  %v3583_v41 = vmul.f32 %v7239_v25, %v3582_v46  ;;  %s7449_s20 = sld [smem:[#allocation5 + $0x9a]] }
 0x3bc   : > { %v7347_v58 = vpop.permute.xlu2 %3140  ;;  %v3561_v45 = vrot.slane %v3559_v59, 7  ;;  %v3591_v49 = vmul.f32 %v7239_v25, %v3590_v20 }
 0x3bd   : > { %v3585_v32 = vrot.slane %v3583_v41, 3 }
 0x3c0   : > { %3522 = vrot.lane.b32.xlu1 %v3521_v3, %s5424_s16  ;;  %v3552_v3 = vrot.slane %v3548_v0, 6  ;;  %v3569_v0 = vrot.slane %v3567_v60, 7 }
 0x3c1   : > { %3530 = vrot.lane.b32.xlu0 %v3529_v51, %s5424_s16  ;;  %v2912_v51 = vstv %s7355_s27  ;;  %s7431_s27 = sld [smem:[#allocation5 + $0xb5]] }
 0x3c2   : > { %v7357_v12 = vpop.permute.xlu1 %3094  ;;  %3542 = vrot.lane.b32.xlu2 %v3541_v30, %s5424_s16  ;;  %v3553_v8 = vsel %vm1025_vm5, %v3551_v50, %v3552_v3  ;;  %v2969_v50 = vadd.f32 %v7272_v47, %v6259_v31  ;;  %v3598_v3 = vstv %s7365_s23  ;;  %v2913_v60 = vmul.f32 %v7041_v11, %v2912_v51  ;;  %s7454_s23 = sld [smem:[#allocation5 + $0xa1]] }
 0x3c3   : > { %v7359_v10 = vpop.permute.xlu0 %3102  ;;  %v3599_v14 = vmul.f32 %v7239_v25, %v3598_v3  ;;  %v3600_v46 = vmul.f32 %v7263_v42, %v3598_v3  ;;  %v2961_v51 = vadd.f32 %v7270_v55, %v6252_v53 }
 0x3c4   : > { %v7375_v28 = vpop.permute.xlu2 %3162  ;;  %v3009_v31 = vadd.f32 %v7260_v19, %v2969_v50  ;;  %v2915_v57 = vrot.slane %v2913_v60, 4  ;;  %v2910_v19 = vmul.f32 %v7041_v11, %v2909_v23  ;;  %v3593_v50 = vrot.slane %v3591_v49, 3 }
 0x3c6   : > { %v3041_v20 = vadd.f32 %v7321_v52, %v3009_v31  ;;  %v2945_v52 = vadd.f32 %v7250_v63, %v2910_v19  ;;  %v3622_v31 = vstv %s7398_s19  ;;  %s7472_s19 = sld [smem:[#allocation5 + $0xb6]] }
 0x3c8   : > { %3554 = vrot.lane.b32.xlu1 %v3553_v8, %s5424_s16  ;;  %v3610_v8 = vstv %s7368_s5  ;;  %s5045_s5 = sld [smem:[#allocation5 + $0xa8]] }
 0x3c9   : > { %3562 = vrot.lane.b32.xlu0 %v3561_v45, %s5425_s3  ;;  %v2900_v45 = vstv %s7370_s8  ;;  %v3612_v17 = vmul.f32 %v7263_v42, %v3610_v8  ;;  %s7465_s8 = sld [smem:[#allocation5 + $0xaf]] }
 0x3ca   : > { %v7383_v30 = vpop.permute.xlu1 %3126  ;;  %3570 = vrot.lane.b32.xlu2 %v3569_v0, %s5425_s3  ;;  %v3611_v0 = vmul.f32 %v7239_v25, %v3610_v8  ;;  %v2901_v41 = vmul.f32 %v7041_v11, %v2900_v45  ;;  %v3603_v8 = vrot.slane %v3599_v14, 3  ;;  %v3081_v45 = vadd.f32 %v7338_v44, %v3041_v20 }
 0x3cb   : > { %v7385_v59 = vpop.permute.xlu0 %3133  ;;  %v3616_v53 = vrot.slane %v3612_v17, 3  ;;  %v2977_v14 = vadd.f32 %v7242_v38, %v2945_v52 }
 0x3cc   : > { %v7404_v47 = vpop.permute.xlu2 %3194  ;;  %v3615_v60 = vrot.slane %v3611_v0, 3  ;;  %v2917_v55 = vadd.f32 %v2915_v57, %v2901_v41  ;;  %v3117_v44 = vadd.f32 %v7330_v35, %v3081_v45  ;;  %v3629_v41 = vstv %s7414_s25  ;;  %s7482_s25 = sld [smem:[#allocation5 + $0x94]] }
 0x3cd   : > { %v3636_v57 = vstv %s7417_s26  ;;  %s7486_s26 = sld [smem:[#allocation5 + $0x9b]] }
 0x3ce   : > { %v2953_v49 = vadd.f32 %v7229_v61, %v2917_v55  ;;  %v3617_v17 = vsel %vm1254_vm1, %v3615_v60, %v3616_v53 }
 0x3d0   : > { %3578 = vrot.lane.b32.xlu1 %v3577_v40, %s5425_s3  ;;  %v3604_v40 = vrot.slane %v3600_v46, 3  ;;  %v2989_v63 = vadd.f32 %v7286_v62, %v2953_v49  ;;  %v3643_v62 = vstv %s7425_s29  ;;  %s7490_s29 = sld [smem:[#allocation5 + $0xb0]] }
 0x3d1   : > { %3586 = vrot.lane.b32.xlu0 %v3585_v32, %s5425_s3  ;;  %v3001_v32 = vadd.f32 %v7288_v34, %v2961_v51  ;;  %v3017_v51 = vadd.f32 %v7303_v37, %v2977_v14  ;;  %v3644_v60 = vmul.f32 %v7239_v25, %v3643_v62 }
 0x3d2   : > { %v3148_v3 = vpop.permute.xlu1 %3147  ;;  %3594 = vrot.lane.b32.xlu2 %v3593_v50, %s5425_s3  ;;  %v3605_v23 = vsel %vm1254_vm1, %v3603_v8, %v3604_v40  ;;  %v3025_v20 = vadd.f32 %v7305_v43, %v2989_v63  ;;  %v3650_v43 = vstv %s7431_s27  ;;  %s7494_s27 = sld [smem:[#allocation5 + $0xc7]] }
 0x3d3   : > { %v3155_v42 = vpop.permute.xlu0 %3154  ;;  %v3033_v11 = vadd.f32 %v7279_v7, %v3001_v32  ;;  %v3150_v46 = vadd.f32 %v3148_v3, %v3117_v44  ;;  %v3623_v7 = vmul.f32 %v7239_v25, %v3622_v31  ;;  %v3053_v38 = vadd.f32 %v7323_v54, %v3017_v51 }
 0x3d4   : > { %v3219_v34 = vpop.permute.xlu2 %3218  ;;  %v3637_v3 = vmul.f32 %v7239_v25, %v3636_v57  ;;  %v3065_v8 = vadd.f32 %v7296_v29, %v3025_v20  ;;  %v3714_v57 = vstv %s7472_s19  ;;  %s7532_s19 = sld [smem:[#allocation5 + $0xea]] }
 0x3d5   : > { %v3073_v61 = vadd.f32 %v7336_v48, %v3033_v11  ;;  %v3630_v48 = vmul.f32 %v7239_v25, %v3629_v41  ;;  %v3089_v32 = vadd.f32 %v7315_v5, %v3053_v38  ;;  %v3682_v11 = vstv %s7449_s20  ;;  %s7503_s20 = sld [smem:[#allocation5 + $0xa9]] }
 0x3d6   : > { %v3097_v54 = vadd.f32 %v7357_v12, %v3065_v8  ;;  %v3706_v41 = vstv %s7465_s8  ;;  %v3715_v62 = vmul.f32 %v7239_v25, %v3714_v57  ;;  %v3320_v8 = vstv %s7482_s25  ;;  %s7516_s8 = sld [smem:[#allocation5 + $0xdc]] }
 0x3d7   : > { %v3105_v19 = vadd.f32 %v7359_v10, %v3073_v61  ;;  %v3129_v55 = vadd.f32 %v7383_v30, %v3089_v32  ;;  %v3707_v38 = vmul.f32 %v7239_v25, %v3706_v41  ;;  %s7536_s25 = sld [smem:[#allocation5 + $0xf1]] }
 0x3d8   : > { %3606 = vrot.lane.b32.xlu1 %v3605_v23, %s5425_s3  ;;  %v3136_v52 = vadd.f32 %v7385_v59, %v3097_v54  ;;  %v3717_v32 = vrot.slane %v3715_v62, 1 }
 0x3d9   : > { %3618 = vrot.lane.b32.xlu0 %v3617_v17, %s5425_s3  ;;  %v3143_v37 = vadd.f32 %v7347_v58, %v3105_v19  ;;  %v3651_v58 = vmul.f32 %v7239_v25, %v3650_v43  ;;  %v3157_v12 = vadd.f32 %v3155_v42, %v3129_v55  ;;  %v3709_v54 = vrot.slane %v3707_v38, 1 }
 0x3da   : > { %v3175_v0 = vpop.permute.xlu1 %3174  ;;  %3625 = vrot.lane.b32.xlu2 %v3623_v7, %s5426_s24  ;;  %v3165_v49 = vadd.f32 %v7375_v28, %v3136_v52  ;;  %v3683_v28 = vmul.f32 %v7239_v25, %v3682_v11 }
 0x3db   : > { %v3187_v35 = vpop.permute.xlu0 %3186  ;;  %v3177_v45 = vadd.f32 %v3175_v0, %v3143_v37  ;;  %v3653_v5 = vrot.slane %v3651_v58, 4  ;;  %v3197_v42 = vadd.f32 %v7404_v47, %v3157_v12  ;;  %v3332_v0 = vstv %s7467_s17  ;;  %s7528_s17 = sld [smem:[#allocation5 + $0xe3]] }
 0x3dc   : > { %v3189_v50 = vadd.f32 %v3187_v35, %v3150_v46  ;;  %v3251_v40 = vpop.permute.xlu2 %3250  ;;  %v3698_v46 = vstv %s5045_s5  ;;  %v3685_v47 = vrot.slane %v3683_v28, 5  ;;  %s7511_s5 = sld [smem:[#allocation5 + $0xd5]]  ;;  %v3338_v11 = vstv %s7503_s20 }
 0x3dd   : > { %s5098_s20 = sld [smem:[#allocation5 + $0xdd]] }
 0x3de   : > { %v3221_v10 = vadd.f32 %v3219_v34, %v3189_v50  ;;  %v3690_v34 = vstv %s7454_s23  ;;  %s7506_s23 = sld [smem:[#allocation5 + $0xce]] }
 0x3df   : > { %v3691_v63 = vmul.f32 %v7239_v25, %v3690_v34 }
 0x3e0   : > { %3632 = vrot.lane.b32.xlu1 %v3630_v48, %s5426_s24 }
 0x3e1   : > { %3639 = vrot.lane.b32.xlu0 %v3637_v3, %s5426_s24  ;;  %v3693_v7 = vrot.slane %v3691_v63, 1  ;;  %v3852_v57 = vstv %s7528_s17  ;;  %s7587_s17 = sld [smem:[#allocation5 + $0xc9]] }
 0x3e2   : > { %v3203_v29 = vpop.permute.xlu1 %3202  ;;  %3646 = vrot.lane.b32.xlu2 %v3644_v60, %s5426_s24  ;;  %v3344_v60 = vstv %s7490_s29  ;;  %s7560_s29 = sld [smem:[#allocation5 + $0xcf]] }
 0x3e3   : > { %v3211_v53 = vpop.permute.xlu0 %3210  ;;  %v3205_v59 = vadd.f32 %v3203_v29, %v3165_v49  ;;  %v3345_v52 = vmul.f32 %v7239_v25, %v3344_v60 }
 0x3e4   : > { %v3213_v31 = vadd.f32 %v3211_v53, %v3177_v45  ;;  %v3275_v23 = vpop.permute.xlu2 %3274  ;;  %v3321_v45 = vmul.f32 %v7239_v25, %v3320_v8  ;;  %v3820_v53 = vstv %s7494_s27  ;;  %v7557_v8 = vld [vmem:[#allocation4 + $0x8] sm:$0x3]  ;;  %s7564_s27 = sld [smem:[#allocation5 + $0xd6]] }
 0x3e5   : > { %v3347_v28 = vrot.slane %v3345_v52, 3 }
 0x3e6   : > { %v7474_v30 = vadd.f32 %v3251_v40, %v3213_v31  ;;  %v3326_v40 = vstv %s7486_s26  ;;  %v3323_v31 = vrot.slane %v3321_v45, 7  ;;  %s7549_s26 = sld [smem:[#allocation5 + $0xc8]] }
 0x3e8   : > { %3654 = vrot.lane.b32.xlu1 %v3653_v5, %s5426_s24 }
 0x3e9   : > { %3666 = vrot.lane.b32.xlu0 %v6340_v33, %s5426_s24  ;;  %v3699_v33 = vmul.f32 %v7239_v25, %v3698_v46  ;;  %v3836_v46 = vstv %s7511_s5  ;;  %s7573_s5 = sld [smem:[#allocation5 + $0xf2]] }
 0x3ea   : > { %v3227_v44 = vpop.permute.xlu1 %3226  ;;  %3678 = vrot.lane.b32.xlu2 %v6329_v26, %s5426_s24  ;;  %v3333_v26 = vmul.f32 %v7239_v25, %v3332_v0 }
 0x3eb   : > { %v3239_v17 = vpop.permute.xlu0 %3238  ;;  %v3229_v14 = vadd.f32 %v3227_v44, %v3197_v42  ;;  %v3701_v20 = vrot.slane %v3699_v33, 1  ;;  %v3844_v33 = vstv %s7516_s8  ;;  %s7578_s8 = sld [smem:[#allocation5 + $0xe4]] }
 0x3ec   : > { %v3241_v61 = vadd.f32 %v3239_v17, %v3205_v59  ;;  %v3303_v35 = vpop.permute.xlu2 %3302  ;;  %v3335_v43 = vrot.slane %v3333_v26, 7 }
 0x3ee   : > { %v7496_v51 = vadd.f32 %v3275_v23, %v3241_v61  ;;  %v7524_v23 = vld [vmem:[#allocation4] sm:$0xff]  ;;  %v3339_v61 = vmul.f32 %v7239_v25, %v3338_v11  ;;  %v3892_v11 = vstv %s7560_s29  ;;  %s7603_s29 = sld [smem:[#allocation5 + $0xde]] }
 0x3ef   : > { %v3821_v49 = vmul.f32 %v7524_v23, %v3820_v53  ;;  %v3845_v26 = vmul.f32 %v7524_v23, %v3844_v33  ;;  %v3853_v38 = vmul.f32 %v7524_v23, %v3852_v57 }
 0x3f0   : > { %3686 = vrot.lane.b32.xlu1 %v3685_v47, %s5427_s7 }
 0x3f1   : > { %3694 = vrot.lane.b32.xlu0 %v3693_v7, %s5427_s7  ;;  %v3855_v45 = vrot.slane %v3853_v38, 1  ;;  %v3916_v57 = vstv %s7578_s8  ;;  %s7627_s8 = sld [smem:[#allocation5 + $0xe6]] }
 0x3f2   : > { %v3259_v19 = vpop.permute.xlu1 %3258  ;;  %3702 = vrot.lane.b32.xlu2 %v3701_v20, %s5427_s7  ;;  %v3341_v20 = vrot.slane %v3339_v61, 3  ;;  %v3917_v38 = vmul.f32 %v7524_v23, %v3916_v57 }
 0x3f3   : > { %v3267_v50 = vpop.permute.xlu0 %3266  ;;  %v3261_v48 = vadd.f32 %v3259_v19, %v3221_v10  ;;  %v3327_v10 = vmul.f32 %v7239_v25, %v3326_v40  ;;  %v3837_v25 = vmul.f32 %v7524_v23, %v3836_v46  ;;  %v3860_v19 = vstv %s7532_s19  ;;  %s7592_s19 = sld [smem:[#allocation5 + $0xd0]] }
 0x3f4   : > { %v3269_v3 = vadd.f32 %v3267_v50, %v3229_v14  ;;  %v3381_v29 = vpop.permute.xlu2 %3380  ;;  %v3823_v14 = vrot.slane %v3821_v49, 5  ;;  %v3862_v40 = vmul.f32 %v7557_v8, %v3860_v19  ;;  %v3908_v46 = vstv %s5098_s20  ;;  %s5120_s20 = sld [smem:[#allocation5 + $0xf3]] }
 0x3f5   : > { %v3329_v59 = vrot.slane %v3327_v10, 7  ;;  %v3839_v62 = vrot.slane %v3837_v25, 1  ;;  %v3884_v10 = vstv %s7549_s26  ;;  %s7600_s26 = sld [smem:[#allocation5 + $0xec]] }
 0x3f6   : > { %v3305_v37 = vadd.f32 %v3303_v35, %v3269_v3  ;;  %v3861_v3 = vmul.f32 %v7524_v23, %v3860_v19  ;;  %v3885_v49 = vmul.f32 %v7524_v23, %v3884_v10 }
 0x3f8   : > { %v3337_v58 = vadd.f32 %v3335_v43, %v3305_v37  ;;  %3710 = vrot.lane.b32.xlu1 %v3709_v54, %s5427_s7  ;;  %v3865_v53 = vrot.slane %v3861_v3, 5 }
 0x3f9   : > { %3718 = vrot.lane.b32.xlu0 %v3717_v32, %s5427_s7 }
 0x3fa   : > { %v7521_v55 = vadd.f32 %v6388_v18, %v3337_v58  ;;  %v3283_v12 = vpop.permute.xlu1 %3282  ;;  %v3828_v18 = vstv %s7506_s23  ;;  %3730 = vrot.lane.b32.xlu2 %v6351_v56, %s5427_s7  ;;  %v3866_v58 = vrot.slane %v3862_v40, 5  ;;  %s5112_s23 = sld [smem:[#allocation5 + $0xeb]] }
 0x3fb   : > { %v3291_v5 = vpop.permute.xlu0 %3290  ;;  %v3285_v34 = vadd.f32 %v3283_v12, %v7474_v30  ;;  %v3829_v63 = vmul.f32 %v7524_v23, %v3828_v18  ;;  %v3900_v18 = vstv %s7564_s27  ;;  %s5106_s27 = sld [smem:[#allocation5 + $0xe5]] }
 0x3fc   : > { %v3293_v42 = vadd.f32 %v3291_v5, %v3261_v48  ;;  %v3403_v30 = vpop.permute.xlu2 %3402  ;;  %v3847_v48 = vrot.slane %v3845_v26, 1 }
 0x3fd   : > { %v3325_v44 = vadd.f32 %v3323_v31, %v3285_v34  ;;  %v3831_v0 = vrot.slane %v3829_v63, 1  ;;  %v3893_v63 = vmul.f32 %v7524_v23, %v3892_v11 }
 0x3fe   : > { %v3331_v17 = vadd.f32 %v3329_v59, %v3293_v42  ;;  %v3867_v59 = vsel %vm867_vm4, %v3865_v53, %v3866_v58 }
 0x3ff   : > { %v3349_v7 = vadd.f32 %v3347_v28, %v3325_v44  ;;  %v3887_v44 = vrot.slane %v3885_v49, 6 }
 0x400   : > { %v3359_v47 = vadd.f32 %v6380_v4, %v3331_v17  ;;  %3742 = vrot.lane.b32.xlu1 %v6375_v13, %s5427_s7  ;;  %v3872_v13 = vstv %s7536_s25  ;;  %v3924_v33 = vstv %s5112_s23  ;;  %s5092_s25 = sld [smem:[#allocation5 + $0xd7]] }
 0x401   : > { %3824 = vrot.lane.b32.xlu0 %v3823_v14, %s5422_s14  ;;  %v3383_v56 = vadd.f32 %v3381_v29, %v3349_v7  ;;  %v3873_v43 = vmul.f32 %v7524_v23, %v3872_v13  ;;  %v3874_v54 = vmul.f32 %v7557_v8, %v3872_v13  ;;  %v3901_v14 = vmul.f32 %v7524_v23, %v3900_v18  ;;  %s5079_s23 = sld [smem:[#allocation5 + $0xca]] }
 0x402   : > { %v3315_v35 = vpop.permute.xlu1 %3314  ;;  %3832 = vrot.lane.b32.xlu2 %v3831_v0, %s5422_s14  ;;  %v3895_v7 = vrot.slane %v3893_v63, 6  ;;  %v3925_v25 = vmul.f32 %v7524_v23, %v3924_v33  ;;  %v3926_v26 = vmul.f32 %v7557_v8, %v3924_v33  ;;  %v3988_v18 = vstv %s7600_s26  ;;  %s5121_s26 = sld [smem:[#allocation5 + $0xf4]] }
 0x403   : > { %v3374_v41 = vpop.permute.xlu0 %3373  ;;  %v3317_v4 = vadd.f32 %v3315_v35, %v7496_v51  ;;  %v3877_v12 = vrot.slane %v3873_v43, 5  ;;  %v3878_v5 = vrot.slane %v3874_v54, 5  ;;  %v3903_v0 = vrot.slane %v3901_v14, 2 }
 0x404   : > { %v3435_v51 = vpop.permute.xlu2 %3434  ;;  %v3936_v35 = vstv %s7573_s5  ;;  %v3929_v3 = vrot.slane %v3925_v25, 2  ;;  %v3930_v40 = vrot.slane %v3926_v26, 2  ;;  %v3948_v43 = vstv %s7587_s17  ;;  %s5086_s5 = sld [smem:[#allocation5 + $0xd1]] }
 0x405   : > { %v3343_v50 = vadd.f32 %v3341_v20, %v3317_v4  ;;  %v3879_v42 = vsel %vm867_vm4, %v3877_v12, %v3878_v5  ;;  %v3937_v13 = vmul.f32 %v7524_v23, %v3936_v35  ;;  %s7629_s17 = sld [smem:[#allocation5 + $0xd8]] }
 0x406   : > { %v3964_v58 = vstv %s5092_s25  ;;  %s5114_s25 = sld [smem:[#allocation5 + $0xed]] }
 0x407   : > { %v3376_v37 = vadd.f32 %v3374_v41, %v3343_v50  ;;  %v3938_v50 = vmul.f32 %v7557_v8, %v3936_v35  ;;  %v3965_v11 = vmul.f32 %v7524_v23, %v3964_v58 }
 0x408   : > { %3840 = vrot.lane.b32.xlu1 %v3839_v62, %s5422_s14 }
 0x409   : > { %3848 = vrot.lane.b32.xlu0 %v3847_v48, %s5422_s14  ;;  %v3405_v32 = vadd.f32 %v3403_v30, %v3376_v37  ;;  %v3919_v37 = vrot.slane %v3917_v38, 2  ;;  %v3967_v63 = vrot.slane %v3965_v11, 7  ;;  %v4012_v38 = vstv %s5079_s23  ;;  %s5101_s23 = sld [smem:[#allocation5 + $0xe0]] }
 0x40a   : > { %v3388_v60 = vpop.permute.xlu1 %3387  ;;  %3856 = vrot.lane.b32.xlu2 %v3855_v45, %s5422_s14  ;;  %v3942_v45 = vrot.slane %v3938_v50, 6 }
 0x40b   : > { %v3395_v29 = vpop.permute.xlu0 %3394  ;;  %v3390_v52 = vadd.f32 %v3388_v60, %v3359_v47  ;;  %v3909_v47 = vmul.f32 %v7524_v23, %v3908_v46  ;;  %v3931_v60 = vsel %vm1072_vm6, %v3929_v3, %v3930_v40 }
 0x40c   : > { %v3397_v31 = vadd.f32 %v3395_v29, %v7521_v55  ;;  %v3459_v34 = vpop.permute.xlu2 %3458  ;;  %v3956_v29 = vstv %s7592_s19  ;;  %s5100_s19 = sld [smem:[#allocation5 + $0xdf]] }
 0x40d   : > { %v3911_v4 = vrot.slane %v3909_v47, 2 }
 0x40e   : > { %v3437_v55 = vadd.f32 %v3435_v51, %v3397_v31  ;;  %v3941_v51 = vrot.slane %v3937_v13, 6  ;;  %v3957_v31 = vmul.f32 %v7524_v23, %v3956_v29 }
 0x410   : > { %3868 = vrot.lane.b32.xlu1 %v3867_v59, %s5422_s14  ;;  %v3943_v12 = vsel %vm1025_vm5, %v3941_v51, %v3942_v45  ;;  %v3959_v59 = vrot.slane %v3957_v31, 7  ;;  %v4013_v51 = vmul.f32 %v7524_v23, %v4012_v38 }
 0x411   : > { %3880 = vrot.lane.b32.xlu0 %v3879_v42, %s5422_s14 }
 0x412   : > { %v3415_v17 = vpop.permute.xlu1 %3414  ;;  %3888 = vrot.lane.b32.xlu2 %v3887_v44, %s5423_s30  ;;  %v3972_v44 = vstv %s7603_s29  ;;  %s7640_s29 = sld [smem:[#allocation5 + $0xcb]]  ;;  %v4033_v31 = vstv %s5100_s19 }
 0x413   : > { %v3427_v28 = vpop.permute.xlu0 %3426  ;;  %v3417_v61 = vadd.f32 %v3415_v17, %v3383_v56  ;;  %v3980_v17 = vstv %s5106_s27  ;;  %v3973_v46 = vmul.f32 %v7524_v23, %v3972_v44  ;;  %s7648_s27 = sld [smem:[#allocation5 + $0xd2]] }
 0x414   : > { %v3429_v30 = vadd.f32 %v3427_v28, %v3390_v52  ;;  %v3491_v41 = vpop.permute.xlu2 %3490  ;;  %v3949_v52 = vmul.f32 %v7524_v23, %v3948_v43  ;;  %v3981_v33 = vmul.f32 %v7524_v23, %v3980_v17  ;;  %v4019_v43 = vstv %s5086_s5  ;;  %s5108_s5 = sld [smem:[#allocation5 + $0xe7]] }
 0x415   : > { %v3975_v57 = vrot.slane %v3973_v46, 3  ;;  %s5103_s19 = sld [smem:[#allocation5 + $0xe2]] }
 0x416   : > { %v3461_v56 = vadd.f32 %v3459_v34, %v3429_v30  ;;  %v3951_v34 = vrot.slane %v3949_v52, 7  ;;  %v3990_v30 = vmul.f32 %v7557_v8, %v3988_v18  ;;  %v3983_v25 = vrot.slane %v3981_v33, 3 }
 0x418   : > { %3896 = vrot.lane.b32.xlu1 %v3895_v7, %s5423_s30 }
 0x419   : > { %3904 = vrot.lane.b32.xlu0 %v3903_v0, %s5423_s30  ;;  %v4000_v0 = vstv %s5120_s20  ;;  %s5094_s20 = sld [smem:[#allocation5 + $0xd9]] }
 0x41a   : > { %v3443_v20 = vpop.permute.xlu1 %3442  ;;  %3912 = vrot.lane.b32.xlu2 %v3911_v4, %s5423_s30  ;;  %v4001_v4 = vmul.f32 %v7524_v23, %v4000_v0 }
 0x41b   : > { %v3451_v19 = vpop.permute.xlu0 %3450  ;;  %v3445_v62 = vadd.f32 %v3443_v20, %v3405_v32  ;;  %v4002_v20 = vmul.f32 %v7557_v8, %v4000_v0 }
 0x41c   : > { %v3453_v48 = vadd.f32 %v3451_v19, %v3417_v61  ;;  %v3515_v54 = vpop.permute.xlu2 %3514  ;;  %v3989_v61 = vmul.f32 %v7524_v23, %v3988_v18  ;;  %v4005_v3 = vrot.slane %v4001_v4, 3 }
 0x41d   : > { %v4006_v40 = vrot.slane %v4002_v20, 3 }
 0x41e   : > { %v3493_v10 = vadd.f32 %v3491_v41, %v3453_v48  ;;  %v3993_v35 = vrot.slane %v3989_v61, 3  ;;  %v3994_v41 = vrot.slane %v3990_v30, 3  ;;  %v4072_v61 = vstv %s7640_s29  ;;  %s7672_s29 = sld [smem:[#allocation5 + $0xe1]] }
 0x420   : > { %3920 = vrot.lane.b32.xlu1 %v3919_v37, %s5423_s30 }
 0x421   : > { %3932 = vrot.lane.b32.xlu0 %v3931_v60, %s5423_s30  ;;  %v4020_v60 = vmul.f32 %v7524_v23, %v4019_v43  ;;  %v4104_v43 = vstv %s5108_s5  ;;  %s5096_s5 = sld [smem:[#allocation5 + $0xdb]] }
 0x422   : > { %v3467_v32 = vpop.permute.xlu1 %3466  ;;  %3944 = vrot.lane.b32.xlu2 %v3943_v12, %s5423_s30  ;;  %v4048_v12 = vstv %s5114_s25  ;;  %s5095_s25 = sld [smem:[#allocation5 + $0xda]] }
 0x423   : > { %v3479_v53 = vpop.permute.xlu0 %3478  ;;  %v3469_v5 = vadd.f32 %v3467_v32, %v3437_v55  ;;  %v4040_v32 = vstv %s7627_s8  ;;  %s5081_s8 = sld [smem:[#allocation5 + $0xcc]] }
 0x424   : > { %v3481_v49 = vadd.f32 %v3479_v53, %v3445_v62  ;;  %v3543_v42 = vpop.permute.xlu2 %3542  ;;  %v4026_v53 = vstv %s7629_s17  ;;  %s5088_s17 = sld [smem:[#allocation5 + $0xd3]] }
 0x425   : > { %v4027_v11 = vmul.f32 %v7524_v23, %v4026_v53 }
 0x426   : > { %v3517_v28 = vadd.f32 %v3515_v54, %v3481_v49  ;;  %v4007_v54 = vsel %vm1254_vm1, %v4005_v3, %v4006_v40  ;;  %v4041_v49 = vmul.f32 %v7524_v23, %v4040_v32 }
 0x428   : > { %3952 = vrot.lane.b32.xlu1 %v3951_v34, %s5424_s16  ;;  %v4034_v34 = vmul.f32 %v7524_v23, %v4033_v31 }
 0x429   : > { %3960 = vrot.lane.b32.xlu0 %v3959_v59, %s5424_s16  ;;  %v4049_v59 = vmul.f32 %v7524_v23, %v4048_v12  ;;  %v4136_v31 = vstv %s5081_s8  ;;  %s7691_s8 = sld [smem:[#allocation5 + $0x114]] }
 0x42a   : > { %v3499_v14 = vpop.permute.xlu1 %3498  ;;  %3968 = vrot.lane.b32.xlu2 %v3967_v63, %s5424_s16  ;;  %v4043_v63 = vrot.slane %v4041_v49, 4 }
 0x42b   : > { %v3507_v55 = vpop.permute.xlu0 %3506  ;;  %v3501_v47 = vadd.f32 %v3499_v14, %v3461_v56  ;;  %v3995_v56 = vsel %vm1254_vm1, %v3993_v35, %v3994_v41  ;;  %v4053_v30 = vrot.slane %v4049_v59, 4 }
 0x42c   : > { %v3509_v7 = vadd.f32 %v3507_v55, %v3469_v5  ;;  %v3571_v26 = vpop.permute.xlu2 %3570  ;;  %v4060_v5 = vstv %s5121_s26  ;;  %s7670_s26 = sld [smem:[#allocation5 + $0xc6]] }
 0x42d   : > { %v4061_v44 = vmul.f32 %v7524_v23, %v4060_v5  ;;  %v4062_v17 = vmul.f32 %v7557_v8, %v4060_v5 }
 0x42e   : > { %v3545_v19 = vadd.f32 %v3543_v42, %v3509_v7  ;;  %v4050_v42 = vmul.f32 %v7557_v8, %v4048_v12  ;;  %v4073_v8 = vmul.f32 %v7524_v23, %v4072_v61  ;;  %v4144_v12 = vstv %s5088_s17  ;;  %s7697_s17 = sld [smem:[#allocation5 + $0x106]] }
 0x42f   : > { %v4065_v7 = vrot.slane %v4061_v44, 4  ;;  %v4066_v0 = vrot.slane %v4062_v17, 4  ;;  %v4145_v59 = vmul.f32 %v7524_v23, %v4144_v12  ;;  %v4152_v17 = vstv %s5095_s25  ;;  %s7701_s25 = sld [smem:[#allocation5 + $0x11b]] }
 0x430   : > { %3976 = vrot.lane.b32.xlu1 %v3975_v57, %s5424_s16  ;;  %v4054_v46 = vrot.slane %v4050_v42, 4  ;;  %v4075_v20 = vrot.slane %v4073_v8, 5  ;;  %v3794_v42 = vstv %s5103_s19  ;;  %s7699_s19 = sld [smem:[#allocation5 + $0x10d]] }
 0x431   : > { %3984 = vrot.lane.b32.xlu0 %v3983_v25, %s5424_s16  ;;  %v4067_v57 = vsel %vm816_vm2, %v4065_v7, %v4066_v0  ;;  %v4080_v25 = vstv %s7648_s27  ;;  %s5109_s27 = sld [smem:[#allocation5 + $0xe8]] }
 0x432   : > { %v3523_v13 = vpop.permute.xlu1 %3522  ;;  %3996 = vrot.lane.b32.xlu2 %v3995_v56, %s5424_s16  ;;  %v4055_v41 = vsel %vm816_vm2, %v4053_v30, %v4054_v46  ;;  %v4160_v30 = vstv %s7672_s29  ;;  %s7717_s29 = sld [smem:[#allocation5 + $0xf9]] }
 0x433   : > { %v3531_v50 = vpop.permute.xlu0 %3530  ;;  %v3525_v62 = vadd.f32 %v3523_v13, %v3493_v10  ;;  %v4081_v13 = vmul.f32 %v7524_v23, %v4080_v25 }
 0x434   : > { %v3533_v48 = vadd.f32 %v3531_v50, %v3501_v47  ;;  %v3595_v37 = vpop.permute.xlu2 %3594 }
 0x435   : > { %v4083_v40 = vrot.slane %v4081_v13, 1  ;;  %v4288_v12 = vstv %s7701_s25  ;;  %s5148_s25 = sld [smem:[#allocation5 + $0x10f]] }
 0x436   : > { %v3573_v45 = vadd.f32 %v3571_v26, %v3533_v48  ;;  %v4088_v26 = vstv %s5094_s20  ;;  %v4096_v48 = vstv %s5101_s23  ;;  %s5125_s20 = sld [smem:[#allocation5 + $0xf8]] }
 0x437   : > { %v4089_v50 = vmul.f32 %v7524_v23, %v4088_v26  ;;  %v4097_v3 = vmul.f32 %v7524_v23, %v4096_v48  ;;  %v4168_v46 = vstv %s5109_s27  ;;  %s5132_s23 = sld [smem:[#allocation5 + $0xff]] }
 0x438   : > { %4008 = vrot.lane.b32.xlu1 %v4007_v54, %s5424_s16  ;;  %s7731_s27 = sld [smem:[#allocation5 + $0x100]] }
 0x439   : > { %4015 = vrot.lane.b32.xlu0 %v4013_v51, %s5425_s3  ;;  %v4091_v51 = vrot.slane %v4089_v50, 1 }
 0x43a   : > { %v3555_v29 = vpop.permute.xlu1 %3554  ;;  %4022 = vrot.lane.b32.xlu2 %v4020_v60, %s5425_s3  ;;  %v4099_v60 = vrot.slane %v4097_v3, 1 }
 0x43b   : > { %v3563_v10 = vpop.permute.xlu0 %3562  ;;  %v3557_v58 = vadd.f32 %v3555_v29, %v3517_v28 }
 0x43c   : > { %v3565_v52 = vadd.f32 %v3563_v10, %v3525_v62  ;;  %v3626_v18 = vpop.permute.xlu2 %3625  ;;  %v4105_v10 = vmul.f32 %v7524_v23, %v4104_v43  ;;  %v4252_v3 = vstv %s5125_s20  ;;  %s7734_s20 = sld [smem:[#allocation5 + $0x107]] }
 0x43e   : > { %v3597_v28 = vadd.f32 %v3595_v37, %v3565_v52 }
 0x440   : > { %4029 = vrot.lane.b32.xlu1 %v4027_v11, %s5425_s3 }
 0x441   : > { %4036 = vrot.lane.b32.xlu0 %v4034_v34, %s5425_s3  ;;  %v4137_v34 = vmul.f32 %v7524_v23, %v4136_v31  ;;  %v4273_v31 = vstv %s7699_s19  ;;  %s7755_s19 = sld [smem:[#allocation5 + $0x11c]] }
 0x442   : > { %v3579_v14 = vpop.permute.xlu1 %3578  ;;  %4044 = vrot.lane.b32.xlu2 %v4043_v63, %s5425_s3  ;;  %v3795_v63 = vmul.f32 %v7524_v23, %v3794_v42  ;;  %v7727_v42 = vld [vmem:[#allocation4 + $0x18] sm:$0x3] }
 0x443   : > { %v3587_v55 = vpop.permute.xlu0 %3586  ;;  %v3581_v33 = vadd.f32 %v3579_v14, %v3545_v19  ;;  %v4153_v14 = vmul.f32 %v7524_v23, %v4152_v17 }
 0x444   : > { %v3589_v47 = vadd.f32 %v3587_v55, %v3557_v58  ;;  %v3647_v35 = vpop.permute.xlu2 %3646  ;;  %v4107_v58 = vrot.slane %v4105_v10, 1  ;;  %v4147_v55 = vrot.slane %v4145_v59, 6  ;;  %v3797_v7 = vrot.slane %v3795_v63, 4 }
 0x445   : > { %v4155_v0 = vrot.slane %v4153_v14, 2 }
 0x446   : > { %v3628_v4 = vadd.f32 %v3626_v18, %v3589_v47 }
 0x448   : > { %4056 = vrot.lane.b32.xlu1 %v4055_v41, %s5425_s3  ;;  %v4169_v41 = vmul.f32 %v7524_v23, %v4168_v46  ;;  %v4312_v46 = vstv %s7717_s29  ;;  %s7771_s29 = sld [smem:[#allocation5 + $0x108]] }
 0x449   : > { %4068 = vrot.lane.b32.xlu0 %v4067_v57, %s5425_s3 }
 0x44a   : > { %v3607_v19 = vpop.permute.xlu1 %3606  ;;  %4076 = vrot.lane.b32.xlu2 %v4075_v20, %s5426_s24 }
 0x44b   : > { %v3619_v56 = vpop.permute.xlu0 %3618  ;;  %v3609_v38 = vadd.f32 %v3607_v19, %v3573_v45  ;;  %v4171_v19 = vrot.slane %v4169_v41, 2 }
 0x44c   : > { %v3621_v62 = vadd.f32 %v3619_v56, %v3581_v33  ;;  %v3679_v37 = vpop.permute.xlu2 %3678 }
 0x44e   : > { %v3649_v54 = vadd.f32 %v3647_v35, %v3621_v62  ;;  %v4161_v35 = vmul.f32 %v7524_v23, %v4160_v30 }
 0x450   : > { %4084 = vrot.lane.b32.xlu1 %v4083_v40, %s5426_s24  ;;  %v4163_v20 = vrot.slane %v4161_v35, 2 }
 0x451   : > { %4092 = vrot.lane.b32.xlu0 %v4091_v51, %s5426_s24  ;;  %v7707_v51 = vld [vmem:[#allocation4 + $0x10] sm:$0xff] }
 0x452   : > { %v3633_v29 = vpop.permute.xlu1 %3632  ;;  %4100 = vrot.lane.b32.xlu2 %v4099_v60, %s5426_s24  ;;  %v4259_v60 = vstv %s5132_s23  ;;  %v4274_v59 = vmul.f32 %v7707_v51, %v4273_v31  ;;  %s5147_s23 = sld [smem:[#allocation5 + $0x10e]]  ;;  %v4313_v41 = vmul.f32 %v7707_v51, %v4312_v46  ;;  %v4400_v46 = vstv %s5148_s25 }
 0x453   : > { %v3640_v45 = vpop.permute.xlu0 %3639  ;;  %v3635_v32 = vadd.f32 %v3633_v29, %v3597_v28  ;;  %v3782_v28 = vstv %s7670_s26  ;;  %s7703_s26 = sld [smem:[#allocation5 + $0x122]]  ;;  %v3791_v29 = vstv %s5096_s5 }
 0x454   : > { %v3642_v53 = vadd.f32 %v3640_v45, %v3609_v38  ;;  %v3703_v52 = vpop.permute.xlu2 %3702  ;;  %v3783_v47 = vmul.f32 %v7524_v23, %v3782_v28  ;;  %v4260_v45 = vmul.f32 %v7707_v51, %v4259_v60  ;;  %v3792_v10 = vmul.f32 %v7524_v23, %v3791_v29  ;;  %s5168_s5 = sld [smem:[#allocation5 + $0x123]] }
 0x455   : > { %v4289_v23 = vmul.f32 %v7707_v51, %v4288_v12  ;;  %s5136_s25 = sld [smem:[#allocation5 + $0x103]] }
 0x456   : > { %v3681_v5 = vadd.f32 %v3679_v37, %v3642_v53  ;;  %v4253_v37 = vmul.f32 %v7707_v51, %v4252_v3  ;;  %v4266_v53 = vstv %s7697_s17  ;;  %s5134_s17 = sld [smem:[#allocation5 + $0x101]] }
 0x458   : > { %4108 = vrot.lane.b32.xlu1 %v4107_v58, %s5426_s24 }
 0x459   : > { %4120 = vrot.lane.b32.xlu0 %v6515_v6, %s5426_s24  ;;  %v4139_v6 = vrot.slane %v4137_v34, 6  ;;  %v4267_v34 = vmul.f32 %v7707_v51, %v4266_v53 }
 0x45a   : > { %v3655_v49 = vpop.permute.xlu1 %3654  ;;  %4132 = vrot.lane.b32.xlu2 %v6503_v1, %s5426_s24 }
 0x45b   : > { %v3667_v11 = vpop.permute.xlu0 %3666  ;;  %v3657_v18 = vadd.f32 %v3655_v49, %v3628_v4  ;;  %v3799_v4 = vadd.f32 %v3797_v7, %v3783_v47 }
 0x45c   : > { %v3669_v44 = vadd.f32 %v3667_v11, %v3635_v32  ;;  %v3731_v61 = vpop.permute.xlu2 %3730  ;;  %v4280_v32 = vstv %s7691_s8  ;;  %s5154_s8 = sld [smem:[#allocation5 + $0x115]]  ;;  %v4384_v31 = vstv %s5134_s17 }
 0x45d   : > { %v4281_v11 = vmul.f32 %v7707_v51, %v4280_v32  ;;  %s7808_s17 = sld [smem:[#allocation5 + $0x117]] }
 0x45e   : > { %v3705_v33 = vadd.f32 %v3703_v52, %v3669_v44 }
 0x460   : > { %4140 = vrot.lane.b32.xlu1 %v4139_v6, %s5427_s7 }
 0x461   : > { %4148 = vrot.lane.b32.xlu0 %v4147_v55, %s5427_s7 }
 0x462   : > { %v3687_v1 = vpop.permute.xlu1 %3686  ;;  %4156 = vrot.lane.b32.xlu2 %v4155_v0, %s5427_s7  ;;  %v4344_v29 = vstv %s5154_s8  ;;  %s7800_s8 = sld [smem:[#allocation5 + $0x125]] }
 0x463   : > { %v3695_v8 = vpop.permute.xlu0 %3694  ;;  %v3689_v57 = vadd.f32 %v3687_v1, %v3649_v54  ;;  %v4345_v53 = vmul.f32 %v7707_v51, %v4344_v29 }
 0x464   : > { %v3697_v25 = vadd.f32 %v3695_v8, %v3657_v18  ;;  %v3833_v56 = vpop.permute.xlu2 %3832  ;;  %v4290_v18 = vmul.f32 %v7727_v42, %v4288_v12 }
 0x465   : > { %v7693_v13 = vadd.f32 %v3833_v56, %v3799_v4 }
 0x466   : > { %v3733_v26 = vadd.f32 %v3731_v61, %v3697_v25  ;;  %v4283_v61 = vrot.slane %v4281_v11, 4  ;;  %v4294_v0 = vrot.slane %v4290_v18, 4  ;;  %v4385_v11 = vmul.f32 %v7707_v51, %v4384_v31 }
 0x468   : > { %4164 = vrot.lane.b32.xlu1 %v4163_v20, %s5427_s7  ;;  %v4328_v20 = vstv %s7734_s20  ;;  %s7783_s20 = sld [smem:[#allocation5 + $0x124]] }
 0x469   : > { %4172 = vrot.lane.b32.xlu0 %v4171_v19, %s5427_s7  ;;  %v4315_v19 = vrot.slane %v4313_v41, 5 }
 0x46a   : > { %v3711_v50 = vpop.permute.xlu1 %3710  ;;  %4184 = vrot.lane.b32.xlu2 %v6536_v24, %s5427_s7 }
 0x46b   : > { %v3719_v38 = vpop.permute.xlu0 %3718  ;;  %v3713_v62 = vadd.f32 %v3711_v50, %v3681_v5  ;;  %v4300_v5 = vstv %s7703_s26  ;;  %v4329_v50 = vmul.f32 %v7707_v51, %v4328_v20  ;;  %s7767_s26 = sld [smem:[#allocation5 + $0x11d]] }
 0x46c   : > { %v3721_v48 = vadd.f32 %v3719_v38, %v3689_v57  ;;  %v3857_v43 = vpop.permute.xlu2 %3856  ;;  %v4301_v44 = vmul.f32 %v7707_v51, %v4300_v5  ;;  %v4302_v14 = vmul.f32 %v7727_v42, %v4300_v5  ;;  %v4320_v57 = vstv %s7731_s27  ;;  %s7779_s27 = sld [smem:[#allocation5 + $0x116]] }
 0x46e   : > { %v3751_v40 = vrot.slane %v3721_v48, 1  ;;  %v4305_v1 = vrot.slane %v4301_v44, 4  ;;  %v4306_v8 = vrot.slane %v4302_v14, 4  ;;  %v4336_v48 = vstv %s5147_s23  ;;  %s7787_s23 = sld [smem:[#allocation5 + $0xfb]] }
 0x470   : > { %v3753_v54 = vadd.f32 %v3751_v40, %v3713_v62  ;;  %4196 = vrot.lane.b32.xlu1 %v6547_v2, %s5427_s7  ;;  %v4307_v4 = vsel %vm816_vm2, %v4305_v1, %v4306_v8  ;;  %v4364_v40 = vstv %s5168_s5  ;;  %v4401_v1 = vmul.f32 %v7707_v51, %v4400_v46  ;;  %s7792_s5 = sld [smem:[#allocation5 + $0x109]] }
 0x471   : > { %4255 = vrot.lane.b32.xlu0 %v4253_v37, %s5422_s14  ;;  %v4337_v37 = vmul.f32 %v7707_v51, %v4336_v48 }
 0x472   : > { %v3743_v24 = vpop.permute.xlu1 %3742  ;;  %4262 = vrot.lane.b32.xlu2 %v4260_v45, %s5422_s14  ;;  %v3755_v28 = vrot.slane %v3753_v54, 2  ;;  %v4331_v54 = vrot.slane %v4329_v50, 1  ;;  %v4365_v45 = vmul.f32 %v7707_v51, %v4364_v40  ;;  %v4403_v20 = vrot.slane %v4401_v1, 2 }
 0x473   : > { %v3745_v58 = vadd.f32 %v3743_v24, %v3705_v33  ;;  %v3825_v52 = vpop.permute.xlu0 %3824  ;;  %v4293_v33 = vrot.slane %v4289_v23, 4 }
 0x474   : > { %v3827_v49 = vadd.f32 %v3825_v52, %v3792_v10  ;;  %v3889_v17 = vpop.permute.xlu2 %3888  ;;  %v4339_v10 = vrot.slane %v4337_v37, 1  ;;  %v4369_v12 = vrot.slane %v4365_v45, 5  ;;  %v4428_v37 = vstv %s7783_s20  ;;  %s5157_s20 = sld [smem:[#allocation5 + $0x118]] }
 0x475   : > { %v3747_v2 = vrot.slane %v3745_v58, 1 }
 0x476   : > { %v3859_v6 = vadd.f32 %v3857_v43, %v3827_v49  ;;  %v4456_v29 = vstv %s7792_s5  ;;  %s7850_s5 = sld [smem:[#allocation5 + $0x104]] }
 0x477   : > { %v3749_v63 = vadd.f32 %v3747_v2, %v3733_v26  ;;  %v4295_v26 = vsel %vm816_vm2, %v4293_v33, %v4294_v0  ;;  %v4352_v2 = vstv %s7755_s19  ;;  %v4416_v0 = vstv %s7767_s26  ;;  %s7817_s19 = sld [smem:[#allocation5 + $0x11e]] }
 0x478   : > { %4269 = vrot.lane.b32.xlu1 %v4267_v34, %s5422_s14  ;;  %v4347_v34 = vrot.slane %v4345_v53, 1  ;;  %v4353_v44 = vmul.f32 %v7707_v51, %v4352_v2  ;;  %s5129_s26 = sld [smem:[#allocation5 + $0xfc]] }
 0x479   : > { %4276 = vrot.lane.b32.xlu0 %v4274_v59, %s5422_s14  ;;  %v7738_v55 = vadd.f32 %v3755_v28, %v3749_v63  ;;  %v4387_v63 = vrot.slane %v4385_v11, 6 }
 0x47a   : > { %v3841_v30 = vpop.permute.xlu1 %3840  ;;  %4284 = vrot.lane.b32.xlu2 %v4283_v61, %s5422_s14  ;;  %v4357_v33 = vrot.slane %v4353_v44, 5 }
 0x47b   : > { %v3843_v47 = vadd.f32 %v3841_v30, %v6576_v36  ;;  %v3849_v7 = vpop.permute.xlu0 %3848 }
 0x47c   : > { %v3851_v35 = vadd.f32 %v3849_v7, %v6578_v27  ;;  %v3913_v25 = vpop.permute.xlu2 %3912  ;;  %v4321_v27 = vmul.f32 %v7707_v51, %v4320_v57 }
 0x47e   : > { %v3891_v36 = vadd.f32 %v3889_v17, %v3851_v35  ;;  %v4323_v43 = vrot.slane %v4321_v27, 1  ;;  %v4354_v17 = vmul.f32 %v7727_v42, %v4352_v2  ;;  %v4392_v35 = vstv %s7771_s29  ;;  %s5143_s29 = sld [smem:[#allocation5 + $0x10a]] }
 0x480   : > { %4296 = vrot.lane.b32.xlu1 %v4295_v26, %s5422_s14  ;;  %v4418_v26 = vmul.f32 %v7727_v42, %v4416_v0 }
 0x481   : > { %4308 = vrot.lane.b32.xlu0 %v4307_v4, %s5422_s14  ;;  %s7758_s14 = sld [smem:[#allocation5 + $0xfa]] }
 0x482   : > { %v3869_v56 = vpop.permute.xlu1 %3868  ;;  %4316 = vrot.lane.b32.xlu2 %v4315_v19, %s5423_s30  ;;  %v4408_v19 = vstv %s7779_s27  ;;  %s5130_s27 = sld [smem:[#allocation5 + $0xfd]] }
 0x483   : > { %v3871_v38 = vadd.f32 %v3869_v56, %v7693_v13  ;;  %v3881_v62 = vpop.permute.xlu0 %3880  ;;  %v4366_v13 = vmul.f32 %v7727_v42, %v4364_v40  ;;  %v4393_v56 = vmul.f32 %v7707_v51, %v4392_v35 }
 0x484   : > { %v3883_v3 = vadd.f32 %v3881_v62, %v3843_v47  ;;  %v3945_v60 = vpop.permute.xlu2 %3944  ;;  %v4358_v47 = vrot.slane %v4354_v17, 5  ;;  %v4422_v62 = vrot.slane %v4418_v26, 2 }
 0x485   : > { %v4370_v5 = vrot.slane %v4366_v13, 5  ;;  %v4395_v40 = vrot.slane %v4393_v56, 2 }
 0x486   : > { %v3915_v24 = vadd.f32 %v3913_v25, %v3883_v3  ;;  %v4359_v57 = vsel %vm867_vm4, %v4357_v33, %v4358_v47  ;;  %v4417_v25 = vmul.f32 %v7707_v51, %v4416_v0  ;;  %v4409_v3 = vmul.f32 %v7707_v51, %v4408_v19 }
 0x487   : > { %v4376_v59 = vstv %s7758_s14  ;;  %v4371_v18 = vsel %vm867_vm4, %v4369_v12, %v4370_v5  ;;  %s5149_s14 = sld [smem:[#allocation5 + $0x110]]  ;;  %v4480_v47 = vstv %s7817_s19 }
 0x488   : > { %4324 = vrot.lane.b32.xlu1 %v4323_v43, %s5423_s30  ;;  %v4411_v13 = vrot.slane %v4409_v3, 2  ;;  %s7858_s19 = sld [smem:[#allocation5 + $0xfe]] }
 0x489   : > { %4332 = vrot.lane.b32.xlu0 %v4331_v54, %s5423_s30 }
 0x48a   : > { %v3897_v32 = vpop.permute.xlu1 %3896  ;;  %4340 = vrot.lane.b32.xlu2 %v4339_v10, %s5423_s30  ;;  %v4429_v10 = vmul.f32 %v7707_v51, %v4428_v37 }
 0x48b   : > { %v3899_v58 = vadd.f32 %v3897_v32, %v3859_v6  ;;  %v3905_v52 = vpop.permute.xlu0 %3904  ;;  %v4377_v6 = vmul.f32 %v7707_v51, %v4376_v59  ;;  %v4430_v32 = vmul.f32 %v7727_v42, %v4428_v37  ;;  %v4492_v59 = vstv %s7800_s8  ;;  %s5151_s8 = sld [smem:[#allocation5 + $0x112]] }
 0x48c   : > { %v3907_v49 = vadd.f32 %v3905_v52, %v3871_v38  ;;  %v3969_v23 = vpop.permute.xlu2 %3968  ;;  %v4421_v38 = vrot.slane %v4417_v25, 2  ;;  %v4433_v5 = vrot.slane %v4429_v10, 6  ;;  %v4482_v25 = vmul.f32 %v7727_v42, %v4480_v47 }
 0x48d   : > { %v4379_v8 = vrot.slane %v4377_v6, 6 }
 0x48e   : > { %v3947_v28 = vadd.f32 %v3945_v60, %v3907_v49  ;;  %v4423_v54 = vsel %vm1072_vm6, %v4421_v38, %v4422_v62  ;;  %v4440_v60 = vstv %s7787_s23  ;;  %v4434_v49 = vrot.slane %v4430_v32, 6  ;;  %s5144_s23 = sld [smem:[#allocation5 + $0x10b]] }
 0x48f   : > { %v4441_v53 = vmul.f32 %v7707_v51, %v4440_v60 }
 0x490   : > { %4348 = vrot.lane.b32.xlu1 %v4347_v34, %s5423_s30 }
 0x491   : > { %4372 = vrot.lane.b32.xlu0 %v4371_v18, %s5423_s30  ;;  %v4443_v2 = vrot.slane %v4441_v53, 7  ;;  %v4472_v18 = vstv %s7808_s17  ;;  %v4518_v53 = vstv %s5143_s29  ;;  %s5124_s17 = sld [smem:[#allocation5 + $0xf7]] }
 0x492   : > { %v3921_v14 = vpop.permute.xlu1 %3920  ;;  %4388 = vrot.lane.b32.xlu2 %v4387_v63, %s5424_s16  ;;  %v4494_v63 = vmul.f32 %v7727_v42, %v4492_v59  ;;  %v4473_v6 = vmul.f32 %v7707_v51, %v4472_v18  ;;  %s4884_s29 = sld [smem:[#allocation5 + $0x7]] }
 0x493   : > { %v3923_v61 = vadd.f32 %v3921_v14, %v3891_v36  ;;  %v3933_v30 = vpop.permute.xlu0 %3932 }
 0x494   : > { %v3935_v7 = vadd.f32 %v3933_v30, %v3899_v58  ;;  %v3997_v41 = vpop.permute.xlu2 %3996  ;;  %v4457_v58 = vmul.f32 %v7707_v51, %v4456_v29  ;;  %v4498_v0 = vrot.slane %v4494_v63, 3 }
 0x496   : > { %v3971_v4 = vadd.f32 %v3969_v23, %v3935_v7  ;;  %v4459_v11 = vrot.slane %v4457_v58, 7  ;;  %v4564_v58 = vstv %s5130_s27  ;;  %s4891_s27 = sld [smem:[#allocation5 + $0xe]] }
 0x498   : > { %4360 = vrot.lane.b32.xlu1 %v4359_v57, %s5423_s30  ;;  %s7803_s30 = sld [smem:[#allocation5 + $0x102]]  ;;  %v4481_v57 = vmul.f32 %v7707_v51, %v4480_v47 }
 0x499   : > { %4380 = vrot.lane.b32.xlu0 %v4379_v8, %s5424_s16  ;;  %v4475_v8 = vrot.slane %v4473_v6, 3 }
 0x49a   : > { %v3953_v36 = vpop.permute.xlu1 %3952  ;;  %4404 = vrot.lane.b32.xlu2 %v4403_v20, %s5424_s16 }
 0x49b   : > { %v3955_v27 = vadd.f32 %v3953_v36, %v3915_v24  ;;  %v3961_v50 = vpop.permute.xlu0 %3960 }
 0x49c   : > { %v3963_v48 = vadd.f32 %v3961_v50, %v3923_v61  ;;  %v4023_v43 = vpop.permute.xlu2 %4022  ;;  %v4435_v61 = vsel %vm1025_vm5, %v4433_v5, %v4434_v49  ;;  %v4486_v50 = vrot.slane %v4482_v25, 3  ;;  %v4565_v5 = vmul.f32 %v7707_v51, %v4564_v58 }
 0x49e   : > { %v3999_v45 = vadd.f32 %v3997_v41, %v3963_v48  ;;  %v4448_v23 = vstv %s7803_s30  ;;  %v4464_v41 = vstv %s5149_s14  ;;  %v4511_v48 = vstv %s5136_s25  ;;  %s5138_s30 = sld [smem:[#allocation5 + $0x105]] }
 0x49f   : > { %v4449_v14 = vmul.f32 %v7707_v51, %v4448_v23  ;;  %v4465_v20 = vmul.f32 %v7707_v51, %v4464_v41  ;;  %v4512_v37 = vmul.f32 %v7707_v51, %v4511_v48  ;;  %v4567_v23 = vrot.slane %v4565_v5, 5  ;;  %s5152_s14 = sld [smem:[#allocation5 + $0x113]] }
 0x4a0   : > { %4424 = vrot.lane.b32.xlu1 %v4423_v54, %s5424_s16  ;;  %s5145_s25 = sld [smem:[#allocation5 + $0x10c]] }
 0x4a1   : > { %4396 = vrot.lane.b32.xlu0 %v4395_v40, %s5424_s16  ;;  %v4451_v1 = vrot.slane %v4449_v14, 7  ;;  %v4467_v42 = vrot.slane %v4465_v20, 3 }
 0x4a2   : > { %v3977_v24 = vpop.permute.xlu1 %3976  ;;  %4412 = vrot.lane.b32.xlu2 %v4411_v13, %s5424_s16 }
 0x4a3   : > { %v3979_v52 = vadd.f32 %v3977_v24, %v3947_v28  ;;  %v3985_v31 = vpop.permute.xlu0 %3984  ;;  %v4493_v28 = vmul.f32 %v7707_v51, %v4492_v59 }
 0x4a4   : > { %v3987_v12 = vadd.f32 %v3985_v31, %v3955_v27  ;;  %v4045_v34 = vpop.permute.xlu2 %4044  ;;  %v4485_v27 = vrot.slane %v4481_v57, 3  ;;  %v4519_v31 = vmul.f32 %v7707_v51, %v4518_v53 }
 0x4a5   : > { %v4497_v7 = vrot.slane %v4493_v28, 3 }
 0x4a6   : > { %v4025_v44 = vadd.f32 %v4023_v43, %v3987_v12  ;;  %v4487_v3 = vsel %vm1254_vm1, %v4485_v27, %v4486_v50  ;;  %v4208_v27 = vstv %s7858_s19  ;;  %s7998_s19 = sld [smem:[#allocation5 + $0x46]] }
 0x4a7   : > { %v4499_v36 = vsel %vm1254_vm1, %v4497_v7, %v4498_v0  ;;  %v4572_v7 = vstv %s7850_s5  ;;  %v4588_v0 = vstv %s5151_s8  ;;  %s7939_s5 = sld [smem:[#allocation5 + $0x38]] }
 0x4a8   : > { %4444 = vrot.lane.b32.xlu1 %v4443_v2, %s5425_s3  ;;  %v4589_v25 = vmul.f32 %v7707_v51, %v4588_v0  ;;  %s7953_s8 = sld [smem:[#allocation5 + $0x54]] }
 0x4a9   : > { %4460 = vrot.lane.b32.xlu0 %v4459_v11, %s5425_s3  ;;  %v4532_v11 = vstv %s5157_s20  ;;  %s7926_s20 = sld [smem:[#allocation5]] }
 0x4aa   : > { %v4009_v17 = vpop.permute.xlu1 %4008  ;;  %4436 = vrot.lane.b32.xlu2 %v4435_v61, %s5424_s16  ;;  %s5150_s16 = sld [smem:[#allocation5 + $0x111]]  ;;  %v4533_v59 = vmul.f32 %v7707_v51, %v4532_v11  ;;  %v4591_v50 = vrot.slane %v4589_v25, 1 }
 0x4ab   : > { %v4011_v30 = vadd.f32 %v4009_v17, %v3971_v4  ;;  %v4016_v46 = vpop.permute.xlu0 %4015 }
 0x4ac   : > { %v4018_v33 = vadd.f32 %v4016_v46, %v3979_v52  ;;  %v4077_v35 = vpop.permute.xlu2 %4076  ;;  %v4535_v28 = vrot.slane %v4533_v59, 4 }
 0x4ae   : > { %v4047_v26 = vadd.f32 %v4045_v34, %v4018_v33 }
 0x4b0   : > { %4452 = vrot.lane.b32.xlu1 %v4451_v1, %s5425_s3  ;;  %v4525_v29 = vstv %s5150_s16  ;;  %s4905_s16 = sld [smem:[#allocation5 + $0x1c]] }
 0x4b1   : > { %4476 = vrot.lane.b32.xlu0 %v4475_v8, %s5425_s3  ;;  %v4526_v24 = vmul.f32 %v7707_v51, %v4525_v29  ;;  %v4214_v8 = vstv %s5138_s30  ;;  %s7974_s30 = sld [smem:[#allocation5 + $0x3f]] }
 0x4b2   : > { %v4030_v4 = vpop.permute.xlu1 %4029  ;;  %4500 = vrot.lane.b32.xlu2 %v4499_v36, %s5425_s3 }
 0x4b3   : > { %v4032_v19 = vadd.f32 %v4030_v4, %v3999_v45  ;;  %v4037_v56 = vpop.permute.xlu0 %4036  ;;  %v4504_v45 = vstv %s5129_s26  ;;  %s4898_s26 = sld [smem:[#allocation5 + $0x15]] }
 0x4b4   : > { %v4039_v38 = vadd.f32 %v4037_v56, %v4011_v30  ;;  %v4101_v62 = vpop.permute.xlu2 %4100  ;;  %v4505_v10 = vmul.f32 %v7707_v51, %v4504_v45 }
 0x4b6   : > { %v4079_v40 = vadd.f32 %v4077_v35, %v4039_v38  ;;  %v4573_v35 = vmul.f32 %v7707_v51, %v4572_v7 }
 0x4b8   : > { %4468 = vrot.lane.b32.xlu1 %v4467_v42, %s5425_s3  ;;  %v4575_v56 = vrot.slane %v4573_v35, 1  ;;  %v4226_v42 = vstv %s5152_s14  ;;  %s8144_s14 = sld [smem:[#allocation5 + $0x128]] }
 0x4b9   : > { %4488 = vrot.lane.b32.xlu0 %v4487_v3, %s5425_s3  ;;  %s5158_s3 = sld [smem:[#allocation5 + $0x119]]  ;;  %v4209_v3 = vmul.f32 %v7707_v51, %v4208_v27 }
 0x4ba   : > { %v4057_v43 = vpop.permute.xlu1 %4056  ;;  %4514 = vrot.lane.b32.xlu2 %v4512_v37, %s5426_s24  ;;  %v4227_v37 = vmul.f32 %v7707_v51, %v4226_v42 }
 0x4bb   : > { %v4059_v54 = vadd.f32 %v4057_v43, %v4025_v44  ;;  %v4069_v60 = vpop.permute.xlu0 %4068  ;;  %v4580_v44 = vstv %s5144_s23  ;;  %s7932_s23 = sld [smem:[#allocation5 + $0x4d]] }
 0x4bc   : > { %v4071_v13 = vadd.f32 %v4069_v60, %v4032_v19  ;;  %v4133_v32 = vpop.permute.xlu2 %4132  ;;  %v4581_v14 = vmul.f32 %v7707_v51, %v4580_v44  ;;  %v4202_v19 = vstv %s5124_s17  ;;  %v4229_v53 = vrot.slane %v4227_v37, 3  ;;  %s7979_s17 = sld [smem:[#allocation5 + $0x5b]] }
 0x4bd   : > { %v4203_v48 = vmul.f32 %v7707_v51, %v4202_v19 }
 0x4be   : > { %v4103_v52 = vadd.f32 %v4101_v62, %v4071_v13  ;;  %v4583_v47 = vrot.slane %v4581_v14, 1  ;;  %v4211_v13 = vrot.slane %v4209_v3, 7 }
 0x4bf   : > { %v4596_v30 = vstv %s5158_s3  ;;  %v4205_v60 = vrot.slane %v4203_v48, 7  ;;  %s7935_s3 = sld [smem:[#allocation5 + $0x31]] }
 0x4c0   : > { %4528 = vrot.lane.b32.xlu1 %v4526_v24, %s5426_s24  ;;  %v4597_v33 = vmul.f32 %v7707_v51, %v4596_v30 }
 0x4c1   : > { %4507 = vrot.lane.b32.xlu0 %v4505_v10, %s5426_s24  ;;  %v4220_v10 = vstv %s5145_s25  ;;  %s8417_s25 = sld [smem:[#allocation5 + $0xc5]] }
 0x4c2   : > { %v4085_v12 = vpop.permute.xlu1 %4084  ;;  %4521 = vrot.lane.b32.xlu2 %v4519_v31, %s5426_s24  ;;  %v4599_v41 = vrot.slane %v4597_v33, 1  ;;  %v4221_v31 = vmul.f32 %v7707_v51, %v4220_v10 }
 0x4c3   : > { %v4087_v49 = vadd.f32 %v4085_v12, %v4047_v26  ;;  %v4093_v2 = vpop.permute.xlu0 %4092  ;;  %v4215_v26 = vmul.f32 %v7707_v51, %v4214_v8 }
 0x4c4   : > { %v4095_v34 = vadd.f32 %v4093_v2, %v4059_v54  ;;  %v4157_v18 = vpop.permute.xlu2 %4156  ;;  %v4223_v11 = vrot.slane %v4221_v31, 3 }
 0x4c5   : > { %v4217_v38 = vrot.slane %v4215_v26, 7 }
 0x4c6   : > { %v4135_v17 = vadd.f32 %v4133_v32, %v4095_v34 }
 0x4c8   : > { %4548 = vrot.lane.b32.xlu1 %v6644_v9, %s5426_s24 }
 0x4c9   : > { %4568 = vrot.lane.b32.xlu0 %v4567_v23, %s5427_s7 }
 0x4ca   : > { %v4109_v63 = vpop.permute.xlu1 %4108  ;;  %4536 = vrot.lane.b32.xlu2 %v4535_v28, %s5426_s24 }
 0x4cb   : > { %v4111_v6 = vadd.f32 %v4109_v63, %v4079_v40  ;;  %v4121_v61 = vpop.permute.xlu0 %4120 }
 0x4cc   : > { %v4123_v46 = vadd.f32 %v4121_v61, %v4087_v49  ;;  %v4185_v9 = vpop.permute.xlu2 %4184 }
 0x4ce   : > { %v4159_v1 = vadd.f32 %v4157_v18, %v4123_v46 }
 0x4d0   : > { %4560 = vrot.lane.b32.xlu1 %v6663_v39, %s5426_s24  ;;  %s4912_s24 = sld [smem:[#allocation5 + $0x23]] }
 0x4d1   : > { %4584 = vrot.lane.b32.xlu0 %v4583_v47, %s5427_s7 }
 0x4d2   : > { %v4141_v57 = vpop.permute.xlu1 %4140  ;;  %4600 = vrot.lane.b32.xlu2 %v4599_v41, %s5427_s7 }
 0x4d3   : > { %v4143_v4 = vadd.f32 %v4141_v57, %v4103_v52  ;;  %v4149_v20 = vpop.permute.xlu0 %4148 }
 0x4d4   : > { %v4151_v36 = vadd.f32 %v4149_v20, %v4111_v6  ;;  %v4263_v62 = vpop.permute.xlu2 %4262 }
 0x4d6   : > { %v4187_v39 = vadd.f32 %v4185_v9, %v4151_v36 }
 0x4d8   : > { %4576 = vrot.lane.b32.xlu1 %v4575_v56, %s5427_s7  ;;  %v4219_v40 = vadd.f32 %v4217_v38, %v4187_v39  ;;  %v826_v39 = vstv %s4912_s24  ;;  %v7922_v38 = vld [vmem:[#allocation2 + $0x8] sm:$0xff]  ;;  %s8445_s24 = sld [smem:[#allocation5 + $0x62]] }
 0x4d9   : > { %4592 = vrot.lane.b32.xlu0 %v4591_v50, %s5427_s7  ;;  %v828_v42 = vmul.f32 %v7922_v38, %v826_v39 }
 0x4da   : > { %v4165_v43 = vpop.permute.xlu1 %4164  ;;  %v4251_v54 = vadd.f32 %v6718_v15, %v4219_v40  ;;  %4624 = vrot.lane.b32.xlu2 %v6675_v21, %s5427_s7 }
 0x4db   : > { %v4167_v29 = vadd.f32 %v4165_v43, %v4135_v17  ;;  %v4173_v45 = vpop.permute.xlu0 %4172 }
 0x4dc   : > { %v4175_v24 = vadd.f32 %v4173_v45, %v4143_v4  ;;  %v4285_v52 = vpop.permute.xlu2 %4284 }
 0x4dd   : > { %v4207_v32 = vadd.f32 %v4205_v60, %v4167_v29 }
 0x4de   : > { %v4213_v58 = vadd.f32 %v4211_v13, %v4175_v24  ;;  %v809_v24 = vstv %s4905_s16 }
 0x4df   : > { %v4231_v12 = vadd.f32 %v4229_v53, %v4207_v32  ;;  %v811_v10 = vmul.f32 %v7922_v38, %v809_v24  ;;  %v802_v32 = vstv %s4898_s26  ;;  %v788_v53 = vstv %s4884_s29 }
 0x4e0   : > { %4612 = vrot.lane.b32.xlu1 %v6695_v22, %s5427_s7  ;;  %v4241_v15 = vadd.f32 %v6706_v16, %v4213_v58  ;;  %s4919_s7 = sld [smem:[#allocation5 + $0x2a]] }
 0x4e1   : > { %v4265_v5 = vadd.f32 %v4263_v62, %v4231_v12  ;;  %v5293_v62 = vld [vmem:[#allocation2 + $0x10] sm:$0x3f]  ;;  %v795_v12 = vstv %s4891_s27 }
 0x4e2   : > { %v4197_v49 = vpop.permute.xlu1 %4196  ;;  %v829_v48 = vmul.f32 %v5293_v62, %v826_v39  ;;  %v812_v58 = vmul.f32 %v5293_v62, %v809_v24 }
 0x4e3   : > { %v4199_v2 = vadd.f32 %v4197_v49, %v4159_v1  ;;  %v4256_v21 = vpop.permute.xlu0 %4255 }
 0x4e4   : > { %v4317_v59 = vpop.permute.xlu2 %4316  ;;  %v836_v60 = vrot.slane %v829_v48, 4 }
 0x4e5   : > { %v4225_v34 = vadd.f32 %v4223_v11, %v4199_v2  ;;  %v783_v2 = vstv %s7926_s20 }
 0x4e6   : > { %v844_v3 = vstv %s4919_s7  ;;  %s8488_s7 = scalar_lea.vmem [#allocation10], %s4876_s6  ;;  %s5180_s6 = sshll.u32 %s5466_s13, 6 }
 0x4e7   : > { %v4258_v23 = vadd.f32 %v4256_v21, %v4225_v34  ;;  %v846_v40 = vmul.f32 %v7922_v38, %v844_v3  ;;  %v847_v37 = vmul.f32 %v5293_v62, %v844_v3  ;;  %s4778_s29 = scalar_lea.hbm %s8552_s2, %s5180_s6  ;;  %s4779_s27 = sshll.u32 %s8488_s7, 4  ;;  %s4780_s27 = int_to_ptr.vmem [resolvable:$true] %s4779_s27 }
 0x4e8   : > { %s4781_s20 = sshll.u32 %s4778_s29, 4  ;;  %s4767_s13 = scalar_lea.sflag [#allocation7], %s5546_s4  ;;  %s4782_s20 = int_to_ptr.hbm [resolvable:$true] %s4781_s20 }
 0x4e9   : > { %v4287_v18 = vadd.f32 %v4285_v52, %v4258_v23  ;;  %v852_v45 = vrot.slane %v846_v40, 4  ;;  %v854_v13 = vrot.slane %v847_v37, 4  ;;  %v790_v52 = vmul.f32 %v7922_v38, %v788_v53 }
 0x4ea   : > { %v4270_v44 = vpop.permute.xlu1 %4269  ;;  %v791_v23 = vmul.f32 %v5293_v62, %v788_v53  ;;  %v798_v40 = vmul.f32 %v5293_v62, %v795_v12 }
 0x4eb   : > { %v4272_v17 = vadd.f32 %v4270_v44, %v4241_v15  ;;  %v4277_v28 = vpop.permute.xlu0 %4276  ;;  %v5294_v15 = vld [vmem:[#allocation2] sm:$0xff]  ;;  %v855_v49 = vsel %vm816_vm2, %v852_v45, %v854_v13  ;;  %v805_v44 = vmul.f32 %v5293_v62, %v802_v32  ;;  %v1807_v62 = vstv %s7939_s5 }
 0x4ec   : > { %v4279_v63 = vadd.f32 %v4277_v28, %v4251_v54  ;;  %v4341_v51 = vpop.permute.xlu2 %4340  ;;  %v834_v54 = vrot.slane %v828_v42, 4  ;;  %v827_v11 = vmul.f32 %v5294_v15, %v826_v39  ;;  %v845_v21 = vmul.f32 %v5294_v15, %v844_v3 }
 0x4ed   : > { %v803_v28 = vmul.f32 %v5294_v15, %v802_v32  ;;  %v7951_v42 = vstv %s7932_s23  ;;  %v789_v37 = vmul.f32 %v5294_v15, %v788_v53  ;;  %v7977_v53 = vmul.f32 %v7922_v38, %v802_v32  ;;  %s5357_s23 = sshra.s32 %s4782_s20, 4  ;;  %s5358_s23 = int_to_ptr.hbm [resolvable:$true] %s5357_s23 }
 0x4ee   : > { %v7882_v14 = vadd.f32 %v4317_v59, %v4279_v63  ;;  %v837_v31 = vsel %vm816_vm2, %v834_v54, %v836_v60  ;;  %v797_v59 = vmul.f32 %v7922_v38, %v795_v12  ;;  %v820_v63 = vrot.slane %v812_v58, 4  ;;  %p5364_p0 = scmp.lt.s32.totalorder %s5358_s23, %s8552_s2 }
 0x4ef   : > { %v851_v39 = vrot.slane %v845_v21, 4 }
 0x4f2   : > { %v4297_v6 = vpop.permute.xlu1 %4296 }
 0x4f3   : > { %v4299_v22 = vadd.f32 %v4297_v6, %v4265_v5  ;;  %v4309_v61 = vpop.permute.xlu0 %4308  ;;  %v810_v5 = vmul.f32 %v5294_v15, %v809_v24  ;;  %v860_v6 = vadd.f32 %v855_v49, %v797_v59  ;;  %v8792_v59 = vld [vmem:[#allocation14_spill] sm:$0xff] }
 0x4f4   : > { %v4311_v16 = vadd.f32 %v4309_v61, %v4272_v17  ;;  %v7884_v30 = vpop.permute.xlu2 %4388  ;;  %v842_v17 = vadd.f32 %v837_v31, %v790_v52  ;;  %v1793_v52 = vstv %s7935_s3  ;;  %v785_v31 = vmul.f32 %v7922_v38, %v783_v2  ;;  %s5359_s3 = scalar_lea.hbm %s5358_s23, 64 }
 0x4f5   : > { %v817_v61 = vrot.slane %v810_v5, 4  ;;  %v7963_v5 = vld [vmem:[#allocation2 + $0x18] sm:$0xff]  ;;  %p5360_p4 = scmp.ne.s32.totalorder %s5358_s23, %s5359_s3 }
 0x4f6   : > { %v7886_v46 = vadd.f32 %v4341_v51, %v4311_v16  ;;  %v784_v16 = vmul.f32 %v5294_v15, %v783_v2  ;;  %v1860_v49 = vmul.f32 %v7963_v5, %v7951_v42  ;;  %v7987_v21 = vmul.f32 %v7963_v5, %v1793_v52 }
 0x4f7   : > { %v7996_v38 = vmul.f32 %v7963_v5, %v1807_v62  ;;  %p5361_p6 = pnand %p5360_p4, %p5497_p11 }
 0x4f9   : > { %p5362_p13 = pneg %p5361_p6 }
 0x4fa   : > { %v4325_v33 = vpop.permute.xlu1 %4324 }
 0x4fb   : > { %v7888_v47 = vadd.f32 %v4325_v33, %v4287_v18  ;;  %v4333_v7 = vpop.permute.xlu0 %4332  ;;  %v818_v18 = vrot.slane %v811_v10, 4  ;;  %v853_v10 = vsel %vm816_vm2, %v851_v39, %v852_v45  ;;  %v861_v45 = vadd.f32 %v854_v13, %v798_v40 }
 0x4fc   : > { %v7890_v9 = vadd.f32 %v4333_v7, %v4299_v22  ;;  %v7892_v0 = vpop.permute.xlu2 %4404  ;;  %v843_v22 = vadd.f32 %v836_v60, %v791_v23  ;;  %v833_v7 = vrot.slane %v827_v11, 4  ;;  %v796_v60 = vmul.f32 %v5294_v15, %v795_v12 }
 0x4fd   : > { %v819_v3 = vsel %vm816_vm2, %v817_v61, %v818_v18  ;;  %v821_v58 = vsel %vm816_vm2, %v818_v18, %v820_v63  ;;  %v7990_v23 = vadd.f32 %v8792_v59, %v805_v44  ;;  %v8793_v63 = vld [vmem:[#allocation15_spill] sm:$0xff]  ;;  %v8015_v40 = vstv %s7953_s8 }
 0x4fe   : > { %v835_v24 = vsel %vm816_vm2, %v833_v7, %v834_v54  ;;  %v824_v54 = vadd.f32 %v819_v3, %v784_v16  ;;  %v7982_v2 = vadd.f32 %v853_v10, %v796_v60  ;;  %v7984_v11 = vadd.f32 %v821_v58, %v785_v31  ;;  %v8796_v10 = vld [vmem:[#allocation19_spill] sm:$0xff] }
 0x4ff   : > { %v841_v15 = vadd.f32 %v835_v24, %v789_v37  ;;  %v8006_v61 = vadd.f32 %v8793_v63, %v803_v28  ;;  %v1866_v16 = vrot.slane %v1860_v49, 3  ;;  %v8795_v37 = vld [vmem:[#allocation17_spill] sm:$0xff]  ;;  %v1798_v24 = vrot.slane %v7987_v21, 7 }
 0x500   : > { %v8021_v60 = vadd.f32 %v8795_v37, %v843_v22  ;;  %v8031_v58 = vadd.f32 %v8796_v10, %v860_v6  ;;  %v8045_v31 = vmul.f32 %v7963_v5, %v8015_v40  ;;  %v1825_v49 = vstv %s7974_s30  ;;  %s5363_s30 = scalar_lea.hbm %s8552_s2, 128 }
 0x501   : > { %p5365_p3 = scmp.lt.s32.totalorder %s5363_s30, %s5359_s3 }
 0x502   : > { %v7894_v1 = vpop.permute.xlu1 %4348 }
 0x503   : > { %v7896_v8 = vpop.permute.xlu0 %4372  ;;  %v4351_v48 = vadd.f32 %v7894_v1, %v7882_v14  ;;  %v7967_v14 = vld [vmem:[#allocation2 + $0x20] sm:$0xff]  ;;  %p5366_p5 = por %p5365_p3, %p5364_p0 }
 0x504   : > { %v7898_v35 = vpop.permute.xlu2 %4412  ;;  %v7971_v1 = vmul.f32 %v7967_v14, %v7951_v42  ;;  %v7993_v13 = vmul.f32 %v7967_v14, %v1793_v52  ;;  %v4375_v7 = vadd.f32 %v7896_v8, %v7890_v9  ;;  %v8025_v9 = vmul.f32 %v7967_v14, %v1807_v62  ;;  %v8027_v8 = vld [vmem:[#allocation2 + $0x28] sm:$0x3f]  ;;  %v8797_v52 = vld [vmem:[#allocation18_spill] sm:$0xff] }
 0x505   : > { %v4391_v12 = vadd.f32 %v7884_v30, %v4351_v48  ;;  %v8794_v48 = vld [vmem:[#allocation16_spill] sm:$0xff]  ;;  %p5367_p8 = pnand %p5366_p5, %p5362_p13 }
 0x506   : > { %v8555_v44 = vrot.slane %v7971_v1, 3  ;;  %v8012_v3 = vadd.f32 %v8794_v48, %v842_v17  ;;  %v1810_v17 = vmul.f32 %v8027_v8, %v1807_v62  ;;  %v4407_v6 = vadd.f32 %v7892_v0, %v4375_v7 }
 0x507   : > { %v8051_v62 = vmul.f32 %v7967_v14, %v8015_v40  ;;  %v8063_v0 = vmul.f32 %v7963_v5, %v1825_v49  ;;  %v8066_v7 = vstv %s7998_s19 }
 0x508   : > { %v8041_v22 = vsel %vm1254_vm1, %v1866_v16, %v8555_v44  ;;  %v1817_v63 = vrot.slane %v1810_v17, 7  ;;  %v1827_v17 = vmul.f32 %v7967_v14, %v1825_v49 }
 0x50a   : > { %v7900_v41 = vpop.permute.xlu1 %4360 }
 0x50b   : > { %v7902_v57 = vpop.permute.xlu0 %4380  ;;  %v4363_v16 = vadd.f32 %v7900_v41, %v7888_v47 }
 0x50c   : > { %v7904_v25 = vpop.permute.xlu2 %4436 }
 0x512   : > { %v7906_v26 = vpop.permute.xlu1 %4424 }
 0x513   : > { %v7908_v4 = vpop.permute.xlu0 %4396  ;;  %v4427_v30 = vadd.f32 %v7906_v26, %v4391_v12  ;;  %v4383_v26 = vadd.f32 %v7902_v57, %v7886_v46  ;;  %v8034_v46 = vadd.f32 %v8797_v52, %v824_v54  ;;  %v1799_v57 = vrot.slane %v7993_v13, 7 }
 0x514   : > { %v7914_v19 = vpop.permute.xlu2 %4500  ;;  %v8054_v54 = vstv %s7979_s17  ;;  %v4399_v47 = vadd.f32 %v7908_v4, %v4363_v16  ;;  %v1828_v52 = vmul.f32 %v8027_v8, %v1825_v49  ;;  %v1846_v4 = vmul.f32 %v8027_v8, %v8066_v7 }
 0x515   : > { %v4415_v12 = vadd.f32 %v7898_v35, %v4383_v26  ;;  %v8798_v26 = vld [vmem:[#allocation20_spill] sm:$0xff]  ;;  %v8896_v13 = vrot.slane %v8025_v9, 7 }
 0x516   : > { %v1853_v49 = vrot.slane %v1846_v4, 3 }
 0x51a   : > { %v7910_v20 = vpop.permute.xlu1 %4444 }
 0x51b   : > { %v7912_v36 = vpop.permute.xlu0 %4460  ;;  %v4447_v48 = vadd.f32 %v7910_v20, %v4407_v6 }
 0x51c   : > { %v7920_v50 = vpop.permute.xlu2 %4514  ;;  %v4463_v28 = vadd.f32 %v7912_v36, %v4427_v30  ;;  %v8554_v30 = vrot.slane %v8025_v9, 7 }
 0x51e   : > { %v4503_v59 = vadd.f32 %v7914_v19, %v4463_v28  ;;  %v8071_v19 = vadd.f32 %v8798_v26, %v861_v45  ;;  %v8075_v28 = vmul.f32 %v7963_v5, %v8054_v54  ;;  %v8086_v26 = vmul.f32 %v7967_v14, %v8066_v7 }
 0x522   : > { %v7916_v56 = vpop.permute.xlu1 %4452 }
 0x523   : > { %v7918_v27 = vpop.permute.xlu0 %4476  ;;  %v4455_v37 = vadd.f32 %v7916_v56, %v4415_v12  ;;  %v8799_v12 = vld [vmem:[#allocation21_spill] sm:$0xff] }
 0x524   : > { %v7943_v34 = vpop.permute.xlu2 %4521  ;;  %v4479_v41 = vadd.f32 %v7918_v27, %v4447_v48  ;;  %v925_v45 = vadd.f32 %v8799_v12, %v841_v15  ;;  %v8800_v27 = vld [vmem:[#allocation23_spill] sm:$0xff]  ;;  %v1835_v12 = vrot.slane %v1828_v52, 7  ;;  %v8802_v48 = vld [vmem:[#allocation22_spill] sm:$0xff] }
 0x525   : > { %v881_v16 = vadd.f32 %v8800_v27, %v7977_v53  ;;  %v1833_v53 = vrot.slane %v1827_v17, 7 }
 0x527   : > { %v974_v15 = vadd.f32 %v8802_v48, %v881_v16 }
 0x52a   : > { %v7928_v43 = vpop.permute.xlu1 %4468 }
 0x52b   : > { %v7930_v29 = vpop.permute.xlu0 %4488 }
 0x52c   : > { %v8001_v32 = vpop.permute.xlu2 %4536 }
 0x532   : > { %v7946_v51 = vpop.permute.xlu1 %4528 }
 0x533   : > { %v7948_v33 = vpop.permute.xlu0 %4507  ;;  %v4531_v10 = vadd.f32 %v7946_v51, %v4503_v59  ;;  %v4491_v51 = vadd.f32 %v7930_v29, %v4455_v37  ;;  %v8096_v29 = vsel %vm1183_vm8, %v8554_v30, %v1817_v63  ;;  %v4439_v37 = vadd.f32 %v7904_v25, %v4399_v47 }
 0x534   : > { %v4601_v56 = vpop.permute.xlu2 %4600  ;;  %v1851_v63 = vrot.slane %v8086_v26, 3  ;;  %v8115_v25 = vmul.f32 %v8027_v8, %v7951_v42  ;;  %v8805_v42 = vld [vmem:[#allocation26_spill] sm:$0xff] }
 0x535   : > { %v4524_v59 = vadd.f32 %v7943_v34, %v4491_v51  ;;  %v4471_v36 = vadd.f32 %v7928_v43, %v4439_v37  ;;  %v8803_v34 = vld [vmem:[#allocation24_spill] sm:$0xff] }
 0x537   : > { %v4510_v43 = vadd.f32 %v7948_v33, %v4471_v36  ;;  %v8139_v33 = vsel %vm1183_vm8, %v1798_v24, %v1799_v57  ;;  %v8807_v36 = vld [vmem:[#allocation50_spill] sm:$0xff] }
 0x53a   : > { %v8003_v18 = vpop.permute.xlu1 %4548 }
 0x53b   : > { %v4569_v39 = vpop.permute.xlu0 %4568 }
 0x53c   : > { %v4571_v6 = vadd.f32 %v4569_v39, %v4531_v10  ;;  %v8101_v39 = vmul.f32 %v7967_v14, %v8054_v54  ;;  %v4517_v10 = vadd.f32 %v7920_v50, %v4479_v41  ;;  %v8801_v14 = vld [vmem:[#allocation29_spill] sm:$0xff]  ;;  %v949_v41 = vadd.f32 %v8803_v34, %v7982_v2  ;;  %v4625_v48 = vpop.permute.xlu2 %4624 }
 0x53d   : > { %v975_v44 = vadd.f32 %v8801_v14, %v7990_v23  ;;  %v8123_v23 = vsel %vm1183_vm8, %v1833_v53, %v1835_v12  ;;  %v8132_v2 = vsel %vm1254_vm1, %v1851_v63, %v1853_v49  ;;  %v8809_v49 = vld [vmem:[#allocation33_spill] sm:$0xff]  ;;  %v8810_v14 = vld [vmem:[#allocation28_spill] sm:$0xff] }
 0x53e   : > { %v4603_v27 = vadd.f32 %v4601_v56, %v4571_v6  ;;  %v4551_v30 = vadd.f32 %v8003_v18, %v4517_v10  ;;  %v1903_v17 = vrot.slane %v8101_v39, 3  ;;  %v8804_v56 = vld [vmem:[#allocation39_spill] sm:$0xff]  ;;  %v1018_v37 = vadd.f32 %v8809_v49, %v8012_v3  ;;  %v8956_v39 = vld [vmem:[#allocation165_spill] sm:$0xff] }
 0x53f   : > { %v1063_v51 = vadd.f32 %v8804_v56, %v974_v15  ;;  %v8150_v10 = vmul.f32 %v8027_v8, %v8015_v40  ;;  %v8814_v3 = vld [vmem:[#allocation31_spill] sm:$0xff] }
 0x540   : > { %v4633_v6 = vrot.slane %v4603_v27, 1  ;;  %v4539_v27 = vadd.f32 %v8001_v32, %v4510_v43  ;;  %v1040_v40 = vadd.f32 %v8814_v3, %v8071_v19  ;;  %v8816_v32 = vlaneseq }
 0x542   : > { %v4561_v35 = vpop.permute.xlu1 %4560  ;;  %v8167_v43 = vshrl.u32 %v8816_v32, 7 }
 0x543   : > { %v4585_v20 = vpop.permute.xlu0 %4584  ;;  %v4563_v50 = vadd.f32 %v4561_v35, %v4524_v59  ;;  %v903_v35 = vadd.f32 %v8805_v42, %v7984_v11  ;;  %v8806_v59 = vld [vmem:[#allocation27_spill] sm:$0xff]  ;;  %v1869_v11 = vrot.slane %v8115_v25, 3  ;;  %v8911_v25 = vld [vmem:[#allocation120_spill] sm:$0xff] }
 0x544   : > { %v4587_v52 = vadd.f32 %v4585_v20, %v4551_v30  ;;  %v973_v16 = vadd.f32 %v8806_v59, %v8006_v61  ;;  %v1156_v30 = vadd.f32 %v8807_v36, %v1063_v51  ;;  %v8808_v20 = vld [vmem:[#allocation34_spill] sm:$0xff]  ;;  %v8813_v51 = vrot.slane %v8063_v0, 7  ;;  %v8818_v36 = vld [vmem:[#allocation25_spill] sm:$0xff]  ;;  %5254 = vset.pattern.permute.xlu1 %v8167_v43  ;;  %5252 = vset.pattern.permute.xlu0 %v8167_v43 }
 0x545   : > { %v1064_v15 = vadd.f32 %v8808_v20, %v975_v44  ;;  %v8811_v44 = vld [vmem:[#allocation30_spill] sm:$0xff]  ;;  %v8177_v19 = vadd.s32 8, %v8167_v43 }
 0x546   : > { %v4627_v12 = vadd.f32 %v4625_v48, %v4587_v52  ;;  %v994_v34 = vadd.f32 %v8811_v44, %v8034_v46  ;;  %v995_v46 = vadd.f32 %v8818_v36, %v903_v35  ;;  %v8819_v20 = vld [vmem:[#allocation62_spill] sm:$0xff]  ;;  %v8820_v48 = vld [vmem:[#allocation55_spill] sm:$0xff]  ;;  %v8823_v35 = vld [vmem:[#allocation36_spill] sm:$0xff] }
 0x547   : > { %v1245_v49 = vadd.f32 %v8820_v48, %v1156_v30  ;;  %5253 = vset.pattern.permute.xlu2 %v8177_v19  ;;  %v8828_v36 = vld [vmem:[#allocation47_spill] sm:$0xff] }
 0x548   : > { %v8829_v48 = vld [vmem:[#allocation83_spill] sm:$0xff] }
 0x54a   : > { %v4577_v47 = vpop.permute.xlu1 %4576 }
 0x54b   : > { %v4593_v18 = vpop.permute.xlu0 %4592  ;;  %v4579_v42 = vadd.f32 %v4577_v47, %v4539_v27  ;;  %v8824_v27 = vld [vmem:[#allocation42_spill] sm:$0xff] }
 0x54c   : > { %v4595_v4 = vadd.f32 %v4593_v18, %v4563_v50  ;;  %v1019_v50 = vadd.f32 %v8810_v14, %v8021_v60  ;;  %v8812_v18 = vld [vmem:[#allocation51_spill] sm:$0xff]  ;;  %v8817_v60 = vld [vmem:[#allocation32_spill] sm:$0xff]  ;;  %v1085_v30 = vadd.f32 %v8824_v27, %v995_v46 }
 0x54d   : > { %v1157_v56 = vadd.f32 %v8812_v18, %v1064_v15  ;;  %v1017_v59 = vadd.f32 %v8817_v60, %v925_v45  ;;  %v4629_v18 = vrot.slane %v4627_v12, 1  ;;  %v8822_v45 = vld [vmem:[#allocation35_spill] sm:$0xff]  ;;  %v8832_v46 = vld [vmem:[#allocation48_spill] sm:$0xff] }
 0x54e   : > { %v4635_v61 = vadd.f32 %v4633_v6, %v4595_v4  ;;  %v8161_v6 = vsel %vm1183_vm8, %v8813_v51, %v1833_v53  ;;  %v8815_v4 = vld [vmem:[#allocation44_spill] sm:$0xff]  ;;  %v8821_v53 = vld [vmem:[#allocation45_spill] sm:$0xff]  ;;  %v1038_v47 = vadd.f32 %v8822_v45, %v949_v41  ;;  %v8830_v41 = vld [vmem:[#allocation67_spill] sm:$0xff]  ;;  %v4640_v45 = vstv %s8144_s14 }
 0x54f   : > { %v1108_v52 = vadd.f32 %v8815_v4, %v1018_v37  ;;  %v1246_v15 = vadd.f32 %v8819_v20, %v1157_v56  ;;  %v1109_v44 = vadd.f32 %v8821_v53, %v1019_v50  ;;  %v1039_v37 = vadd.f32 %v8823_v35, %v8031_v58  ;;  %v8825_v56 = vld [vmem:[#allocation72_spill] sm:$0xff]  ;;  %v8827_v4 = vld [vmem:[#allocation49_spill] sm:$0xff]  ;;  %v8831_v58 = vld [vmem:[#allocation38_spill] sm:$0xff] }
 0x550   : > { %v1338_v3 = vadd.f32 %v8825_v56, %v1245_v49  ;;  %v8826_v50 = vld [vmem:[#allocation56_spill] sm:$0xff]  ;;  %v4637_v32 = vrot.slane %v4635_v61, 2  ;;  %v1062_v35 = vadd.f32 %v8831_v58, %v973_v16  ;;  %v1133_v27 = vadd.f32 %v8832_v46, %v1040_v40  ;;  %v8833_v49 = vld [vmem:[#allocation66_spill] sm:$0xff]  ;;  %v8835_v61 = vld [vmem:[#allocation53_spill] sm:$0xff] }
 0x551   : > { %v1198_v12 = vadd.f32 %v8826_v50, %v1109_v44  ;;  %v1132_v20 = vadd.f32 %v8828_v36, %v1039_v37  ;;  %v1339_v53 = vadd.f32 %v8830_v41, %v1246_v15  ;;  %v8834_v50 = vld [vmem:[#allocation41_spill] sm:$0xff]  ;;  %v8199_v37 = vmul.f32 %v8027_v8, %v8054_v54  ;;  %v8846_v54 = vld [vmem:[#allocation78_spill] sm:$0xff] }
 0x552   : > { %v4613_v14 = vpop.permute.xlu1 %4612  ;;  %v8838_v36 = vld [vmem:[#allocation77_spill] sm:$0xff] }
 0x553   : > { %v4615_v51 = vadd.f32 %v4613_v14, %v4579_v42  ;;  %v1197_v42 = vadd.f32 %v8827_v4, %v1108_v52  ;;  %v1408_v14 = vadd.f32 %v8829_v48, %v1338_v3  ;;  %v1084_v52 = vadd.f32 %v8834_v50, %v994_v34  ;;  %v8837_v3 = vld [vmem:[#allocation59_spill] sm:$0xff]  ;;  %v8839_v16 = vld [vmem:[#allocation61_spill] sm:$0xff] }
 0x554   : > { %v1222_v15 = vadd.f32 %v8837_v3, %v1133_v27  ;;  %v1291_v41 = vadd.f32 %v8839_v16, %v1198_v12  ;;  %v8840_v58 = vld [vmem:[#allocation37_spill] sm:$0xff]  ;;  %v8842_v34 = vld [vmem:[#allocation95_spill] sm:$0xff]  ;;  %v8847_v3 = vld [vmem:[#allocation54_spill] sm:$0xff] }
 0x555   : > { %v4631_v60 = vadd.f32 %v4629_v18, %v4615_v51  ;;  %v1290_v56 = vadd.f32 %v8833_v49, %v1197_v42  ;;  %v1177_v18 = vadd.f32 %v8835_v61, %v1085_v30  ;;  %v8836_v51 = vld [vmem:[#allocation84_spill] sm:$0xff]  ;;  %v1107_v42 = vadd.f32 %v8840_v58, %v1017_v59  ;;  %v8845_v61 = vld [vmem:[#allocation43_spill] sm:$0xff]  ;;  %v8850_v59 = vld [vmem:[#allocation105_spill] sm:$0xff] }
 0x556   : > { %v1409_v4 = vadd.f32 %v8836_v51, %v1339_v53  ;;  %v8843_v30 = vld [vmem:[#allocation88_spill] sm:$0xff]  ;;  %v1155_v8 = vadd.f32 %v8845_v61, %v1062_v35  ;;  %v1371_v51 = vadd.f32 %v8846_v54, %v1291_v41 }
 0x557   : > { %v4639_v44 = vadd.f32 %v4637_v32, %v4631_v60  ;;  %v1370_v48 = vadd.f32 %v8838_v36, %v1290_v56  ;;  %v8841_v32 = vld [vmem:[#allocation52_spill] sm:$0xff]  ;;  %v1496_v49 = vadd.f32 %v8843_v30, %v1408_v14  ;;  %v1196_v56 = vadd.f32 %v8847_v3, %v1107_v42  ;;  %v8848_v36 = vld [vmem:[#allocation69_spill] sm:$0xff]  ;;  %v8853_v14 = vld [vmem:[#allocation82_spill] sm:$0xff] }
 0x558   : > { %v1221_v60 = vadd.f32 %v8841_v32, %v1132_v20  ;;  %v1497_v46 = vadd.f32 %v8842_v34, %v1409_v4  ;;  %v8844_v53 = vld [vmem:[#allocation40_spill] sm:$0xff]  ;;  %v8852_v4 = vld [vmem:[#allocation89_spill] sm:$0xff] }
 0x559   : > { %v4641_v40 = vadd.f32 %v4640_v45, %v4639_v44  ;;  %v1131_v50 = vadd.f32 %v8844_v53, %v1038_v47  ;;  %v8849_v45 = vld [vmem:[#allocation58_spill] sm:$0xff]  ;;  %v1588_v16 = vadd.f32 %v8850_v59, %v1496_v49  ;;  %v8851_v20 = vld [vmem:[#allocation64_spill] sm:$0xff]  ;;  %v1453_v32 = vadd.f32 %v8852_v4, %v1371_v51  ;;  %v8860_v49 = vld [vmem:[#allocation99_spill] sm:$0xff] }
 0x55a   : > { %v1314_v12 = vadd.f32 %v8848_v36, %v1221_v60  ;;  %v1267_v44 = vadd.f32 %v8849_v45, %v1177_v18  ;;  %v1315_v58 = vadd.f32 %v8851_v20, %v1222_v15  ;;  %v1452_v34 = vadd.f32 %v8853_v14, %v1370_v48  ;;  %v8854_v30 = vld [vmem:[#allocation60_spill] sm:$0xff]  ;;  %v8858_v60 = vld [vmem:[#allocation75_spill] sm:$0xff]  ;;  %v8859_v18 = vld [vmem:[#allocation81_spill] sm:$0xff] }
 0x55b   : > { %v4642_v27 = vsub.f32 0.0, %v4641_v40  ;;  %v1244_v35 = vadd.f32 %v8854_v30, %v1155_v8  ;;  %v8855_v53 = vld [vmem:[#allocation80_spill] sm:$0xff]  ;;  %v8861_v15 = vld [vmem:[#allocation46_spill] sm:$0xff]  ;;  %v8862_v59 = vld [vmem:[#allocation65_spill] sm:$0xff] }
 0x55c   : > { %v1389_v41 = vadd.f32 %v8855_v53, %v1314_v12  ;;  %v8856_v40 = vld [vmem:[#allocation116_spill] sm:$0xff]  ;;  %v1352_v3 = vadd.f32 %v8858_v60, %v1267_v44  ;;  %v1390_v36 = vadd.f32 %v8859_v18, %v1315_v58  ;;  %v1540_v45 = vadd.f32 %v8860_v49, %v1452_v34  ;;  %v8864_v8 = vld [vmem:[#allocation117_spill] sm:$0xff]  ;;  %v8865_v12 = vld [vmem:[#allocation86_spill] sm:$0xff] }
 0x55d   : > { %v4643_v47 = vmul.f32 1.442695, %v4642_v27  ;;  %v1676_v61 = vadd.f32 %v8856_v40, %v1588_v16  ;;  %v8857_v42 = vld [vmem:[#allocation100_spill] sm:$0xff]  ;;  %v1176_v51 = vadd.f32 %v8861_v15, %v1084_v52  ;;  %v1289_v48 = vadd.f32 %v8862_v59, %v1196_v56  ;;  %v8863_v27 = vld [vmem:[#allocation71_spill] sm:$0xff]  ;;  %v8868_v44 = vld [vmem:[#allocation94_spill] sm:$0xff] }
 0x55e   : > { %v1589_v54 = vadd.f32 %v8857_v42, %v1497_v46  ;;  %v1337_v20 = vadd.f32 %v8863_v27, %v1244_v35  ;;  %v1429_v14 = vadd.f32 %v8865_v12, %v1352_v3  ;;  %v8866_v16 = vld [vmem:[#allocation92_spill] sm:$0xff]  ;;  %v8867_v46 = vld [vmem:[#allocation110_spill] sm:$0xff]  ;;  %v1541_v40 = vadd.f32 %v8868_v44, %v1453_v32  ;;  %v8869_v58 = vld [vmem:[#allocation57_spill] sm:$0xff] }
 0x55f   : > { %5262 = vpow2.f32 %v4643_v47  ;;  %v1477_v30 = vadd.f32 %v8866_v16, %v1390_v36  ;;  %v1632_v53 = vadd.f32 %v8867_v46, %v1540_v45  ;;  %v1220_v42 = vadd.f32 %v8869_v58, %v1131_v50  ;;  %v8870_v34 = vld [vmem:[#allocation85_spill] sm:$0xff]  ;;  %v8872_v18 = vld [vmem:[#allocation128_spill] sm:$0xff]  ;;  %v8873_v49 = vld [vmem:[#allocation63_spill] sm:$0xff] }
 0x560   : > { %v1677_v4 = vadd.f32 %v8864_v8, %v1589_v54  ;;  %v1476_v47 = vadd.f32 %v8870_v34, %v1389_v41  ;;  %v8871_v60 = vld [vmem:[#allocation121_spill] sm:$0xff]  ;;  %v1266_v35 = vadd.f32 %v8873_v49, %v1176_v51  ;;  %v8874_v15 = vld [vmem:[#allocation111_spill] sm:$0xff]  ;;  %v1887_v3 = vrot.slane %v8150_v10, 3  ;;  %v8875_v59 = vld [vmem:[#allocation68_spill] sm:$0xff] }
 0x561   : > { %v1768_v52 = vadd.f32 %v8871_v60, %v1676_v61  ;;  %v1633_v54 = vadd.f32 %v8874_v15, %v1541_v40  ;;  %v1905_v36 = vrot.slane %v8199_v37, 3  ;;  %v1313_v45 = vadd.f32 %v8875_v59, %v1220_v42  ;;  %v8876_v27 = vld [vmem:[#allocation70_spill] sm:$0xff]  ;;  %v8877_v8 = vld [vmem:[#allocation76_spill] sm:$0xff]  ;;  %v8879_v61 = vld [vmem:[#allocation91_spill] sm:$0xff] }
 0x562   : > { %v1769_v56 = vadd.f32 %v8872_v18, %v1677_v4  ;;  %v1369_v32 = vadd.f32 %v8876_v27, %v1289_v48  ;;  %v1407_v50 = vadd.f32 %v8877_v8, %v1337_v20  ;;  %v8878_v12 = vld [vmem:[#allocation102_spill] sm:$0xff]  ;;  %v1517_v46 = vadd.f32 %v8879_v61, %v1429_v14  ;;  %v8880_v4 = vld [vmem:[#allocation115_spill] sm:$0xff]  ;;  %v8881_v51 = vld [vmem:[#allocation97_spill] sm:$0xff] }
 0x563   : > { %v1564_v41 = vadd.f32 %v8878_v12, %v1476_v47  ;;  %v1720_v44 = vadd.f32 %v8880_v4, %v1632_v53  ;;  %v1565_v58 = vadd.f32 %v8881_v51, %v1477_v30  ;;  %v8882_v40 = vld [vmem:[#allocation122_spill] sm:$0xff]  ;;  %v8883_v10 = vld [vmem:[#allocation113_spill] sm:$0xff]  ;;  %v1841_v42 = vadd.f32 %v8161_v6, %v1768_v52  ;;  %v8885_v47 = vld [vmem:[#allocation108_spill] sm:$0xff] }
 0x564   : > { %v1721_v34 = vadd.f32 %v8882_v40, %v1633_v54  ;;  %v1842_v37 = vadd.f32 %v8123_v23, %v1769_v56  ;;  %v8884_v20 = vld [vmem:[#allocation74_spill] sm:$0xff]  ;;  %v1609_v49 = vadd.f32 %v8885_v47, %v1517_v46  ;;  %v1906_v30 = vsel %vm1254_vm1, %v1903_v17, %v1905_v36  ;;  %v8887_v53 = vld [vmem:[#allocation87_spill] sm:$0xff]  ;;  %v8888_v59 = vld [vmem:[#allocation73_spill] sm:$0xff] }
 0x565   : > { %v5263_v16 = vpop.eup %5262  ;;  %v1652_v60 = vadd.f32 %v8883_v10, %v1564_v41  ;;  %v1351_v18 = vadd.f32 %v8884_v20, %v1266_v35  ;;  %v8886_v15 = vld [vmem:[#allocation114_spill] sm:$0xff]  ;;  %v1451_v54 = vadd.f32 %v8887_v53, %v1369_v32  ;;  %v1388_v27 = vadd.f32 %v8888_v59, %v1313_v45  ;;  %v8889_v8 = vld [vmem:[#allocation93_spill] sm:$0xff]  ;;  %v8890_v6 = vld [vmem:[#allocation119_spill] sm:$0xff] }
 0x566   : > { %v8252_v48 = vadd.f32 1.0, %v5263_v16  ;;  %v1653_v14 = vadd.f32 %v8886_v15, %v1565_v58  ;;  %v1495_v23 = vadd.f32 %v8889_v8, %v1407_v50  ;;  %v1697_v52 = vadd.f32 %v8890_v6, %v1609_v49  ;;  %v8891_v35 = vld [vmem:[#allocation125_spill] sm:$0xff]  ;;  %v8892_v16 = vld [vmem:[#allocation98_spill] sm:$0xff]  ;;  %v8894_v45 = vld [vmem:[#allocation79_spill] sm:$0xff] }
 0x567   : > { %v1806_v56 = vadd.f32 %v1799_v57, %v1721_v34  ;;  %v1805_v41 = vadd.f32 %v8139_v33, %v1720_v44  ;;  %v1539_v61 = vadd.f32 %v8892_v16, %v1451_v54  ;;  %v8893_v46 = vld [vmem:[#allocation118_spill] sm:$0xff]  ;;  %v1911_v32 = vadd.f32 %v1906_v30, %v1841_v42  ;;  %v8901_v42 = vld [vmem:[#allocation140_spill] sm:$0xff]  ;;  %v8905_v59 = vld [vmem:[#allocation103_spill] sm:$0xff] }
 0x568   : > { %5264 = vrcp.f32 %v8252_v48  ;;  %v1745_v12 = vadd.f32 %v8891_v35, %v1653_v14  ;;  %v1744_v4 = vadd.f32 %v8893_v46, %v1652_v60  ;;  %v1912_v51 = vadd.f32 %v1905_v36, %v1842_v37  ;;  %v8899_v10 = vld [vmem:[#allocation90_spill] sm:$0xff]  ;;  %v8900_v60 = vld [vmem:[#allocation104_spill] sm:$0xff]  ;;  %v8907_v35 = vld [vmem:[#allocation101_spill] sm:$0xff] }
 0x569   : > { %v1428_v58 = vadd.f32 %v8894_v45, %v1351_v18  ;;  %v8895_v50 = vrot.slane %v7971_v1, 3  ;;  %v8897_v57 = vrot.slane %v7996_v38, 7  ;;  %v8898_v44 = vrot.slane %v8051_v62, 3  ;;  %v8902_v18 = vld [vmem:[#allocation141_spill] sm:$0xff]  ;;  %v8903_v47 = vld [vmem:[#allocation124_spill] sm:$0xff]  ;;  %v8908_v46 = vld [vmem:[#allocation134_spill] sm:$0xff] }
 0x56a   : > { %v1475_v36 = vadd.f32 %v8899_v10, %v1388_v27  ;;  %v1587_v37 = vadd.f32 %v8900_v60, %v1495_v23  ;;  %v1981_v20 = vadd.f32 %v8901_v42, %v1911_v32  ;;  %v1982_v1 = vadd.f32 %v8902_v18, %v1912_v51  ;;  %v8904_v53 = vld [vmem:[#allocation96_spill] sm:$0xff]  ;;  %v8909_v51 = vld [vmem:[#allocation135_spill] sm:$0xff] }
 0x56b   : > { %v1870_v40 = vsel %vm1254_vm1, %v8895_v50, %v1869_v11  ;;  %v1816_v33 = vsel %vm1183_vm8, %v8897_v57, %v8896_v13  ;;  %v1888_v34 = vsel %vm1254_vm1, %v8898_v44, %v1887_v3  ;;  %v1789_v49 = vadd.f32 %v8903_v47, %v1697_v52  ;;  %v8906_v6 = vld [vmem:[#allocation152_spill] sm:$0xff]  ;;  %v8915_v44 = vld [vmem:[#allocation162_spill] sm:$0xff]  ;;  %v8917_v18 = vld [vmem:[#allocation139_spill] sm:$0xff] }
 0x56c   : > { %v1824_v9 = vadd.f32 %v8096_v29, %v1745_v12  ;;  %v1875_v15 = vadd.f32 %v1870_v40, %v1805_v41  ;;  %v1876_v14 = vadd.f32 %v1869_v11, %v1806_v56  ;;  %v1516_v54 = vadd.f32 %v8904_v53, %v1428_v58  ;;  %v8910_v12 = vld [vmem:[#allocation107_spill] sm:$0xff]  ;;  %v8912_v56 = vld [vmem:[#allocation109_spill] sm:$0xff]  ;;  %v8914_v40 = vld [vmem:[#allocation146_spill] sm:$0xff] }
 0x56d   : > { %v1631_v8 = vadd.f32 %v8905_v59, %v1539_v61  ;;  %v1823_v27 = vadd.f32 %v1816_v33, %v1744_v4  ;;  %v2070_v23 = vadd.f32 %v8906_v6, %v1982_v1  ;;  %v1563_v16 = vadd.f32 %v8907_v35, %v1475_v36  ;;  %v8913_v58 = vld [vmem:[#allocation145_spill] sm:$0xff]  ;;  %v8922_v53 = vld [vmem:[#allocation156_spill] sm:$0xff]  ;;  %v8923_v59 = vld [vmem:[#allocation151_spill] sm:$0xff] }
 0x56e   : > { %v5265_v30 = vpop.eup %5264  ;;  %v1943_v32 = vadd.f32 %v8908_v46, %v1875_v15  ;;  %v1944_v52 = vadd.f32 %v8909_v51, %v1876_v14  ;;  %v8301_v41 = vadd.f32 %v8910_v12, %v1516_v54  ;;  %v1675_v45 = vadd.f32 %v8912_v56, %v1587_v37  ;;  %v8916_v36 = vld [vmem:[#allocation157_spill] sm:$0xff]  ;;  %v8921_v14 = vld [vmem:[#allocation174_spill] sm:$0xff] }
 0x56f   : > { %v4647_v29 = vmul.f32 %v5265_v30, %v8252_v48  ;;  %v1719_v11 = vadd.f32 %v8911_v25, %v1631_v8  ;;  %v2069_v61 = vadd.f32 %v8913_v58, %v1981_v20  ;;  %v1858_v4 = vadd.f32 %v8132_v2, %v1789_v49  ;;  %v8918_v20 = vld [vmem:[#allocation137_spill] sm:$0xff]  ;;  %v8919_v2 = vld [vmem:[#allocation138_spill] sm:$0xff]  ;;  %v8928_v25 = vld [vmem:[#allocation168_spill] sm:$0xff] }
 0x570   : > { %v1894_v50 = vadd.f32 %v1887_v3, %v1824_v9  ;;  %v2026_v13 = vadd.f32 %v8914_v40, %v1944_v52  ;;  %v1893_v33 = vadd.f32 %v1888_v34, %v1823_v27  ;;  %v2162_v60 = vadd.f32 %v8916_v36, %v2070_v23  ;;  %v8920_v49 = vld [vmem:[#allocation173_spill] sm:$0xff]  ;;  %v8924_v6 = vld [vmem:[#allocation126_spill] sm:$0xff]  ;;  %v8933_v36 = vld [vmem:[#allocation179_spill] sm:$0xff] }
 0x571   : > { %v4648_v57 = vsub.f32 1.0, %v4647_v29  ;;  %v2161_v10 = vadd.f32 %v8915_v44, %v2069_v61  ;;  %v4657_v42 = vand.u32 2147483648, %v8252_v48  ;;  %v2025_v1 = vadd.f32 %v8917_v18, %v1943_v32  ;;  %v8925_v35 = vld [vmem:[#allocation149_spill] sm:$0xff]  ;;  %v8927_v29 = vld [vmem:[#allocation167_spill] sm:$0xff]  ;;  %v8929_v61 = vld [vmem:[#allocation132_spill] sm:$0xff] }
 0x572   : > { %vm4652_vm3 = vweird.f32 %v5265_v30  ;;  %v4655_v37 = vand.u32 2147483647, %v8252_v48  ;;  %v1962_v15 = vadd.f32 %v8918_v20, %v1893_v33  ;;  %v1963_v3 = vadd.f32 %v8919_v2, %v1894_v50  ;;  %v8926_v32 = vld [vmem:[#allocation185_spill] sm:$0xff]  ;;  %v8930_v40 = vld [vmem:[#allocation142_spill] sm:$0xff]  ;;  %v8934_v18 = vld [vmem:[#allocation143_spill] sm:$0xff] }
 0x573   : > { %v4649_v47 = vmul.f32 %v5265_v30, %v4648_v57  ;;  %v2249_v9 = vadd.f32 %v8920_v49, %v2161_v10  ;;  %v2250_v34 = vadd.f32 %v8921_v14, %v2162_v60  ;;  %v2113_v54 = vadd.f32 %v8922_v53, %v2025_v1  ;;  %v8931_v57 = vld [vmem:[#allocation178_spill] sm:$0xff]  ;;  %v8939_v49 = vld [vmem:[#allocation172_spill] sm:$0xff] }
 0x574   : > { %v2114_v8 = vadd.f32 %v8923_v59, %v2026_v13  ;;  %vm4651_vm9 = vweird.f32 %v8252_v48  ;;  %v1767_v23 = vadd.f32 %v8924_v6, %v1675_v45  ;;  %v2050_v46 = vadd.f32 %v8925_v35, %v1963_v3  ;;  %v8932_v44 = vld [vmem:[#allocation106_spill] sm:$0xff]  ;;  %v8943_v59 = vld [vmem:[#allocation207_spill] sm:$0xff]  ;;  %v8945_v35 = vld [vmem:[#allocation189_spill] sm:$0xff] }
 0x575   : > { %v4650_v27 = vadd.f32 %v5265_v30, %v4649_v47  ;;  %v2342_v51 = vadd.f32 %v8926_v32, %v2250_v34  ;;  %vm4653_vm10 = vmor %vm4651_vm9, %vm4652_vm3  ;;  %v4658_v52 = vor.u32 1.1754944e-38, %v4657_v42  ;;  %v2205_v12 = vadd.f32 %v8927_v29, %v2113_v54  ;;  %v8937_v20 = vld [vmem:[#allocation190_spill] sm:$0xff] }
 0x576   : > { %v2206_v56 = vadd.f32 %v8928_v25, %v2114_v8  ;;  %vm4656_vm11 = vcmp.eq.f32.partialorder %v4655_v37, 8.507059e+37  ;;  %v1925_v50 = vadd.f32 %v8929_v61, %v1858_v4  ;;  %v2049_v13 = vadd.f32 %v8930_v40, %v1962_v15  ;;  %v8936_v37 = vld [vmem:[#allocation195_spill] sm:$0xff]  ;;  %v8938_v2 = vld [vmem:[#allocation154_spill] sm:$0xff]  ;;  %v8950_v25 = vld [vmem:[#allocation148_spill] sm:$0xff] }
 0x577   : > { %v4654_v58 = vsel %vm4653_vm10, %v5265_v30, %v4650_v27  ;;  %v2341_v48 = vadd.f32 %v8931_v57, %v2249_v9  ;;  %v1804_v45 = vadd.f32 %v1798_v24, %v1719_v11  ;;  %v1651_v10 = vadd.f32 %v8932_v44, %v1563_v16  ;;  %v8935_v30 = vld [vmem:[#allocation159_spill] sm:$0xff]  ;;  %v8941_v14 = vld [vmem:[#allocation170_spill] sm:$0xff] }
 0x578   : > { %v4659_v33 = vsel %vm4656_vm11, %v4658_v52, %v4654_v58  ;;  %v2294_v60 = vadd.f32 %v8933_v36, %v2206_v56  ;;  %v2002_v1 = vadd.f32 %v8934_v18, %v1925_v50  ;;  %v2137_v47 = vadd.f32 %v8935_v30, %v2049_v13  ;;  %v8942_v53 = vld [vmem:[#allocation206_spill] sm:$0xff]  ;;  %v8944_v27 = vld [vmem:[#allocation171_spill] sm:$0xff]  ;;  %v8959_v30 = vld [vmem:[#allocation112_spill] sm:$0xff] }
 0x579   : > { %v8332_v42 = vmul.f32 0.33333334, %v4659_v33  ;;  %v2429_v4 = vadd.f32 %v8936_v37, %v2341_v48  ;;  %v2430_v15 = vadd.f32 %v8937_v20, %v2342_v51  ;;  %v2138_v3 = vadd.f32 %v8938_v2, %v2050_v46  ;;  %v8946_v46 = vld [vmem:[#allocation184_spill] sm:$0xff]  ;;  %v8951_v58 = vld [vmem:[#allocation218_spill] sm:$0xff]  ;;  %v8952_v50 = vld [vmem:[#allocation123_spill] sm:$0xff] }
 0x57a   : > { %v2293_v9 = vadd.f32 %v8939_v49, %v2205_v12  ;;  %v8940_v16 = vrot.slane %v8063_v0, 7  ;;  %v2225_v34 = vadd.f32 %v8941_v14, %v2137_v47  ;;  %v2382_v51 = vadd.f32 %v8946_v46, %v2294_v60  ;;  %v8953_v13 = vld [vmem:[#allocation182_spill] sm:$0xff]  ;;  %v8960_v37 = vld [vmem:[#allocation212_spill] sm:$0xff]  ;;  %v8964_v49 = vld [vmem:[#allocation223_spill] sm:$0xff] }
 0x57b   : > { %v4695_v21 = vperm.slane %v8332_v42, 1  ;;  %v4682_v24 = vperm.slane %v8332_v42, 0  ;;  %v2521_v54 = vadd.f32 %v8942_v53, %v2429_v4  ;;  %v2522_v8 = vadd.f32 %v8943_v59, %v2430_v15  ;;  %v8961_v20 = vld [vmem:[#allocation176_spill] sm:$0xff] }
 0x57c   : > { %v1840_v11 = vadd.f32 %v8940_v16, %v1767_v23  ;;  %v2226_v6 = vadd.f32 %v8944_v27, %v2138_v3  ;;  %v2381_v32 = vadd.f32 %v8945_v35, %v2293_v9  ;;  %v8947_v52 = vrot.slane %v8051_v62, 3  ;;  %v8954_v62 = vld [vmem:[#allocation200_spill] sm:$0xff] }
 0x57d   : > { %4700 = vperm.xlu1 %5254, %v4695_v21   ;;  %4693 = vperm.xlu2 %5253, %v4682_v24   ;;  %v8948_v29 = vrot.slane %v8045_v31, 3  ;;  %v8949_v23 = vrot.slane %v8075_v28, 3  ;;  %v2090_v56 = vadd.f32 %v8950_v25, %v2002_v1  ;;  %v2592_v61 = vadd.f32 %v8951_v58, %v2522_v8  ;;  %v8955_v31 = vld [vmem:[#allocation201_spill] sm:$0xff]  ;;  %v8957_v28 = vld [vmem:[#allocation175_spill] sm:$0xff]  ;;  %v8962_v2 = vld [vmem:[#allocation192_spill] sm:$0xff] }
 0x57e   : > { %4687 = vperm.xlu0 %5252, %v4682_v24   ;;  %v1743_v40 = vadd.f32 %v8952_v50, %v1651_v10  ;;  %v2318_v57 = vadd.f32 %v8953_v13, %v2226_v6  ;;  %v2473_v48 = vadd.f32 %v8954_v62, %v2381_v32  ;;  %v2474_v33 = vadd.f32 %v8955_v31, %v2382_v51  ;;  %v8970_v8 = vld [vmem:[#allocation239_spill] sm:$0xff]  ;;  %v8971_v6 = vld [vmem:[#allocation240_spill] sm:$0xff]  ;;  %v8973_v51 = vld [vmem:[#allocation222_spill] sm:$0xff] }
 0x57f   : > { %v1886_v0 = vsel %vm1254_vm1, %v8948_v29, %v8947_v52  ;;  %v1904_v12 = vsel %vm1254_vm1, %v8949_v23, %v1903_v17  ;;  %v1874_v44 = vadd.f32 %v8041_v22, %v1804_v45  ;;  %v2182_v36 = vadd.f32 %v8956_v39, %v2090_v56  ;;  %v8958_v17 = vld [vmem:[#allocation211_spill] sm:$0xff]  ;;  %v8963_v22 = vld [vmem:[#allocation228_spill] sm:$0xff]  ;;  %v8974_v52 = vld [vmem:[#allocation217_spill] sm:$0xff] }
 0x580   : > { %v2317_v60 = vadd.f32 %v8957_v28, %v2225_v34  ;;  %v2591_v18 = vadd.f32 %v8958_v17, %v2521_v54  ;;  %v1910_v1 = vadd.f32 %v1904_v12, %v1840_v11  ;;  %v1696_v47 = vadd.f32 %v8959_v30, %v8301_v41  ;;  %v8966_v11 = vld [vmem:[#allocation187_spill] sm:$0xff]  ;;  %v8967_v34 = vld [vmem:[#allocation205_spill] sm:$0xff]  ;;  %v8972_v32 = vld [vmem:[#allocation204_spill] sm:$0xff] }
 0x581   : > { %v1844_v10 = vmul.f32 %v7963_v5, %v8066_v7  ;;  %v2554_v4 = vadd.f32 %v8960_v37, %v2474_v33  ;;  %v2270_v15 = vadd.f32 %v8961_v20, %v2182_v36  ;;  %v2680_v9 = vadd.f32 %v8964_v49, %v2592_v61  ;;  %v8968_v5 = vld [vmem:[#allocation127_spill] sm:$0xff]  ;;  %v8975_v23 = vld [vmem:[#allocation133_spill] sm:$0xff]  ;;  %v8981_v33 = vld [vmem:[#allocation234_spill] sm:$0xff] }
 0x582   : > { %v2405_v3 = vadd.f32 %v8962_v2, %v2317_v60  ;;  %v2679_v45 = vadd.f32 %v8963_v22, %v2591_v18  ;;  %v8965_v24 = vrot.slane %v7996_v38, 7  ;;  %v2406_v14 = vadd.f32 %v8966_v11, %v2318_v57  ;;  %v8969_v54 = vld [vmem:[#allocation203_spill] sm:$0xff]  ;;  %v8976_v25 = vld [vmem:[#allocation129_spill] sm:$0xff]  ;;  %v8982_v39 = vld [vmem:[#allocation150_spill] sm:$0xff] }
 0x583   : > { %v2553_v41 = vadd.f32 %v8967_v34, %v2473_v48  ;;  %v4708_v53 = vperm.slane %v8332_v42, 2  ;;  %v1942_v7 = vadd.f32 %v8968_v5, %v1874_v44  ;;  %v2772_v35 = vadd.f32 %v8971_v6, %v2680_v9  ;;  %v8977_v61 = vld [vmem:[#allocation181_spill] sm:$0xff]  ;;  %v8979_v57 = vld [vmem:[#allocation215_spill] sm:$0xff]  ;;  %v8990_v9 = vld [vmem:[#allocation238_spill] sm:$0xff] }
 0x584   : > { %v1822_v16 = vadd.f32 %v8965_v24, %v1743_v40  ;;  %v2497_v59 = vadd.f32 %v8969_v54, %v2405_v3  ;;  %v8387_v27 = vadd.f32 %v8970_v8, %v2679_v45  ;;  %v2498_v46 = vadd.f32 %v8972_v32, %v2406_v14  ;;  %v8978_v40 = vld [vmem:[#allocation144_spill] sm:$0xff]  ;;  %v8980_v48 = vld [vmem:[#allocation233_spill] sm:$0xff]  ;;  %v8986_v37 = vld [vmem:[#allocation155_spill] sm:$0xff] }
 0x585   : > { %v2635_v38 = vadd.f32 %v8973_v51, %v2553_v41  ;;  %v2636_v29 = vadd.f32 %v8974_v52, %v2554_v4  ;;  %4713 = vperm.xlu1 %5254, %v4708_v53   ;;  %4706 = vperm.xlu2 %5253, %v4695_v21   ;;  %v1980_v12 = vadd.f32 %v8975_v23, %v1910_v1  ;;  %v1850_v58 = vrot.slane %v1844_v10, 3  ;;  %v8983_v21 = vld [vmem:[#allocation198_spill] sm:$0xff]  ;;  %v8984_v1 = vld [vmem:[#allocation208_spill] sm:$0xff]  ;;  %v8987_v20 = vld [vmem:[#allocation161_spill] sm:$0xff] }
 0x586   : > { %v1788_v56 = vadd.f32 %v8976_v25, %v1696_v47  ;;  %v2362_v50 = vadd.f32 %v8977_v61, %v2270_v15  ;;  %5255 = vset.pattern.permute.xlu0 %v8177_v19  ;;  %v2024_v13 = vadd.f32 %v8978_v40, %v1942_v7  ;;  %v2573_v62 = vadd.f32 %v8979_v57, %v2498_v46  ;;  %v8985_v47 = vld [vmem:[#allocation243_spill] sm:$0xff]  ;;  %v8988_v2 = vld [vmem:[#allocation209_spill] sm:$0xff]  ;;  %v8992_v34 = vld [vmem:[#allocation130_spill] sm:$0xff] }
 0x587   : > { %v2723_v31 = vadd.f32 %v8980_v48, %v2635_v38  ;;  %v2724_v44 = vadd.f32 %v8981_v33, %v2636_v29  ;;  %v2068_v36 = vadd.f32 %v8982_v39, %v1980_v12  ;;  %v2833_v60 = vrot.slane %v8387_v27, 1  ;;  %v8989_v45 = vld [vmem:[#allocation225_spill] sm:$0xff]  ;;  %v8993_v5 = vld [vmem:[#allocation236_spill] sm:$0xff]  ;;  %v8997_v32 = vld [vmem:[#allocation166_spill] sm:$0xff] }
 0x588   : > { %v2450_v28 = vadd.f32 %v8983_v21, %v2362_v50  ;;  %v2835_v17 = vrot.slane %v2772_v35, 1  ;;  %v1892_v18 = vadd.f32 %v1886_v0, %v1822_v16  ;;  %v2572_v30 = vadd.f32 %v8984_v1, %v2497_v59  ;;  %v8991_v0 = vld [vmem:[#allocation220_spill] sm:$0xff]  ;;  %v8994_v7 = vld [vmem:[#allocation237_spill] sm:$0xff]  ;;  %v8995_v59 = vld [vmem:[#allocation131_spill] sm:$0xff] }
 0x589   : > { %v2816_v10 = vadd.f32 %v8985_v47, %v2724_v44  ;;  %v2112_v4 = vadd.f32 %v8986_v37, %v2024_v13  ;;  %v2160_v15 = vadd.f32 %v8987_v20, %v2068_v36  ;;  %v1852_v22 = vsel %vm1254_vm1, %v1850_v58, %v1851_v63  ;;  %v8996_v6 = vld [vmem:[#allocation160_spill] sm:$0xff]  ;;  %v8998_v51 = vld [vmem:[#allocation214_spill] sm:$0xff]  ;;  %v8999_v52 = vld [vmem:[#allocation147_spill] sm:$0xff] }
 0x58a   : > { %v2535_v3 = vadd.f32 %v8988_v2, %v2450_v28  ;;  %v2659_v49 = vadd.f32 %v8989_v45, %v2572_v30  ;;  %v8414_v24 = vadd.f32 %v8990_v9, %v2723_v31  ;;  %v2660_v16 = vadd.f32 %v8991_v0, %v2573_v62  ;;  %v9002_v61 = vld [vmem:[#allocation231_spill] sm:$0xff]  ;;  %v9003_v40 = vld [vmem:[#allocation158_spill] sm:$0xff]  ;;  %v9004_v62 = vld [vmem:[#allocation136_spill] sm:$0xff] }
 0x58b   : > { %v1857_v11 = vadd.f32 %v1852_v22, %v1788_v56  ;;  %v2836_v14 = vsel %vm890_vm15, %v2833_v60, %v2835_v17  ;;  %v1961_v41 = vadd.f32 %v8992_v34, %v1892_v18  ;;  %v2823_v54 = vrot.slane %v2816_v10, 1  ;;  %v9005_v48 = vld [vmem:[#allocation188_spill] sm:$0xff]  ;;  %v9006_v33 = vld [vmem:[#allocation194_spill] sm:$0xff]  ;;  %v9007_v39 = vld [vmem:[#allocation241_spill] sm:$0xff] }
 0x58c   : > { %v2747_v26 = vadd.f32 %v8993_v5, %v2659_v49  ;;  %v2748_v63 = vadd.f32 %v8994_v7, %v2660_v16  ;;  %v2204_v35 = vadd.f32 %v8996_v6, %v2112_v4  ;;  %v2248_v46 = vadd.f32 %v8997_v32, %v2160_v15  ;;  %v9008_v1 = vld [vmem:[#allocation153_spill] sm:$0xff]  ;;  %v9009_v10 = vld [vmem:[#allocation163_spill] sm:$0xff]  ;;  %v9010_v4 = vld [vmem:[#allocation164_spill] sm:$0xff] }
 0x58d   : > { %5257 = vset.pattern.permute.xlu1 %v8177_v19  ;;  %5256 = vset.pattern.permute.xlu2 %v8167_v43  ;;  %v1924_v8 = vadd.f32 %v8995_v59, %v1857_v11  ;;  %v2612_v38 = vadd.f32 %v8998_v51, %v2535_v3  ;;  %v2048_v29 = vadd.f32 %v8999_v52, %v1961_v41  ;;  %v2821_v23 = vrot.slane %v8414_v24, 1  ;;  %v9000_v19 = vld [vmem:[#allocation177_spill] sm:$0xff]  ;;  %v9001_v43 = vld [vmem:[#allocation183_spill] sm:$0xff]  ;;  %v9012_v22 = vld [vmem:[#allocation180_spill] sm:$0xff] }
 0x58e   : > { %4719 = vperm.xlu0 %5255, %v4708_v53   ;;  %v8433_v12 = vadd.f32 %v2836_v14, %v2747_v26  ;;  %v2842_v25 = vadd.f32 %v2835_v17, %v2748_v63  ;;  %v2292_v56 = vadd.f32 %v9000_v19, %v2204_v35  ;;  %v2340_v58 = vadd.f32 %v9001_v43, %v2248_v46  ;;  %v9011_v15 = vld [vmem:[#allocation199_spill] sm:$0xff]  ;;  %v9013_v49 = vld [vmem:[#allocation193_spill] sm:$0xff]  ;;  %v9014_v24 = vld [vmem:[#allocation216_spill] sm:$0xff] }
 0x58f   : > { %v2700_v50 = vadd.f32 %v9002_v61, %v2612_v38  ;;  %v2136_v13 = vadd.f32 %v9003_v40, %v2048_v29  ;;  %v2824_v57 = vsel %vm890_vm15, %v2821_v23, %v2823_v54  ;;  %v2001_v53 = vadd.f32 %v9004_v62, %v1924_v8  ;;  %v9015_v11 = vld [vmem:[#allocation191_spill] sm:$0xff]  ;;  %v9016_v34 = vld [vmem:[#allocation210_spill] sm:$0xff]  ;;  %v9017_v5 = vld [vmem:[#allocation169_spill] sm:$0xff] }
 0x590   : > { %v2380_v31 = vadd.f32 %v9005_v48, %v2292_v56  ;;  %v2428_v44 = vadd.f32 %v9006_v33, %v2340_v58  ;;  %v2847_v21 = vrot.slane %v8433_v12, 2  ;;  %v2849_v28 = vrot.slane %v2842_v25, 2  ;;  %v9018_v7 = vld [vmem:[#allocation227_spill] sm:$0xff]  ;;  %v9019_v59 = vld [vmem:[#allocation221_spill] sm:$0xff]  ;;  %v9020_v6 = vld [vmem:[#allocation186_spill] sm:$0xff] }
 0x591   : > { %v2792_v36 = vadd.f32 %v9007_v39, %v2700_v50  ;;  %v3758_v17 = vstv %s8417_s25  ;;  %v4721_v18 = vperm.slane %v8332_v42, 3  ;;  %v2089_v30 = vadd.f32 %v9008_v1, %v2001_v53  ;;  %v9021_v46 = vld [vmem:[#allocation196_spill] sm:$0xff]  ;;  %v9022_v38 = vld [vmem:[#allocation197_spill] sm:$0xff]  ;;  %v9025_v43 = vld [vmem:[#allocation226_spill] sm:$0xff] }
 0x592   : > { %v2224_v37 = vadd.f32 %v9009_v10, %v2136_v13  ;;  %v2520_v2 = vadd.f32 %v9011_v15, %v2428_v44  ;;  %v3759_v3 = vadd.f32 %v3758_v17, %v7738_v55  ;;  %v2472_v9 = vadd.f32 %v9013_v49, %v2380_v31  ;;  %v9023_v29 = vld [vmem:[#allocation232_spill] sm:$0xff]  ;;  %v9024_v19 = vld [vmem:[#allocation213_spill] sm:$0xff]  ;;  %v9027_v13 = vld [vmem:[#allocation242_spill] sm:$0xff] }
 0x593   : > { %v2828_v47 = vadd.f32 %v2824_v57, %v2792_v36  ;;  %v2181_v20 = vadd.f32 %v9010_v4, %v2089_v30  ;;  %v2850_v42 = vsel %vm1072_vm6, %v2847_v21, %v2849_v28  ;;  %v2855_v8 = vstv %s8445_s24  ;;  %v9026_v50 = vld [vmem:[#allocation224_spill] sm:$0xff]  ;;  %v9028_v62 = vld [vmem:[#allocation202_spill] sm:$0xff]  ;;  %v9029_v31 = vld [vmem:[#allocation219_spill] sm:$0xff] }
 0x594   : > { %v2316_v45 = vadd.f32 %v9012_v22, %v2224_v37  ;;  %v2590_v0 = vadd.f32 %v9014_v24, %v2520_v2  ;;  %v2552_v41 = vadd.f32 %v9016_v34, %v2472_v9  ;;  %v3760_v54 = vsub.f32 0.0, %v3759_v3  ;;  %v9030_v36 = vld [vmem:[#allocation229_spill] sm:$0xff]  ;;  %v9032_v37 = vld [vmem:[#allocation235_spill] sm:$0xff] }
 0x595   : > { %4732 = vperm.xlu1 %5257, %v4721_v18   ;;  %4726 = vperm.xlu2 %5256, %v4721_v18   ;;  %v2854_v16 = vadd.f32 %v2850_v42, %v2828_v47  ;;  %v2269_v26 = vadd.f32 %v9017_v5, %v2181_v20  ;;  %v9031_v18 = vld [vmem:[#allocation230_spill] sm:$0xff] }
 0x596   : > { %v2404_v14 = vadd.f32 %v9015_v11, %v2316_v45  ;;  %v2678_v63 = vadd.f32 %v9018_v7, %v2590_v0  ;;  %v2634_v55 = vadd.f32 %v9019_v59, %v2552_v41  ;;  %v3761_v25 = vmul.f32 1.442695, %v3760_v54 }
 0x597   : > { %v2361_v35 = vadd.f32 %v9020_v6, %v2269_v26  ;;  %v2857_v32 = vadd.f32 %v2855_v8, %v2854_v16 }
 0x598   : > { %v2496_v51 = vadd.f32 %v9021_v46, %v2404_v14  ;;  %v2770_v12 = vadd.f32 %v9023_v29, %v2678_v63  ;;  %v2722_v58 = vadd.f32 %v9025_v43, %v2634_v55  ;;  %5266 = vpow2.f32 %v3761_v25 }
 0x599   : > { %v2449_v52 = vadd.f32 %v9022_v38, %v2361_v35  ;;  %v2859_v61 = vsub.f32 0.0, %v2857_v32 }
 0x59a   : > { %v2571_v56 = vadd.f32 %v9024_v19, %v2496_v51  ;;  %v2814_v57 = vadd.f32 %v9027_v13, %v2722_v58  ;;  %v2832_v48 = vrot.slane %v2770_v12, 1 }
 0x59b   : > { %v2534_v53 = vadd.f32 %v9028_v62, %v2449_v52  ;;  %v2862_v39 = vmul.f32 1.442695, %v2859_v61  ;;  %v4745_v62 = vld [vmem:[%s5552_s28 + $0x18] sm:$0xff] }
 0x59c   : > { %v2658_v40 = vadd.f32 %v9026_v50, %v2571_v56  ;;  %v2834_v44 = vsel %vm890_vm15, %v2832_v48, %v2833_v60  ;;  %v2820_v17 = vrot.slane %v2814_v57, 1  ;;  %v4743_v56 = vld [vmem:[%s5552_s28 + $0x8] sm:$0xff] }
 0x59d   : > { %v2611_v33 = vadd.f32 %v9029_v31, %v2534_v53  ;;  %5268 = vpow2.f32 %v2862_v39 }
 0x59e   : > { %v2746_v28 = vadd.f32 %v9030_v36, %v2658_v40  ;;  %v5267_v47 = vpop.eup %5266  ;;  %v2822_v10 = vsel %vm890_vm15, %v2820_v17, %v2821_v23 }
 0x59f   : > { %v2699_v1 = vadd.f32 %v9031_v18, %v2611_v33  ;;  %v3763_v15 = vadd.f32 1.0, %v5267_v47 }
 0x5a0   : > { %v2840_v30 = vadd.f32 %v2834_v44, %v2746_v28 }
 0x5a1   : > { %v2791_v4 = vadd.f32 %v9032_v37, %v2699_v1  ;;  %5270 = vrcp.f32 %v3763_v15  ;;  %v3775_v41 = vand.u32 2147483648, %v3763_v15  ;;  %vm3769_vm13 = vweird.f32 %v3763_v15 }
 0x5a2   : > { %v2846_v20 = vrot.slane %v2840_v30, 2 }
 0x5a3   : > { %v2827_v2 = vadd.f32 %v2822_v10, %v2791_v4  ;;  %v5269_v3 = vpop.eup %5268  ;;  %v3776_v54 = vor.u32 1.1754944e-38, %v3775_v41  ;;  %v4744_v4 = vld [vmem:[%s5552_s28 + $0x10] sm:$0xff] }
 0x5a4   : > { %v2848_v27 = vsel %vm1072_vm6, %v2846_v20, %v2847_v21  ;;  %v2865_v22 = vadd.f32 1.0, %v5269_v3  ;;  %v3773_v21 = vand.u32 2147483647, %v3763_v15 }
 0x5a5   : > { %v2853_v60 = vadd.f32 %v2848_v27, %v2827_v2 }
 0x5a6   : > { %5272 = vrcp.f32 %v2865_v22  ;;  %vm3774_vm15 = vcmp.eq.f32.partialorder %v3773_v21, 8.507059e+37  ;;  %vm2886_vm5 = vweird.f32 %v2865_v22  ;;  %v2890_v6 = vand.u32 2147483647, %v2865_v22 }
 0x5a7   : > { %v2856_v45 = vadd.f32 %v2855_v8, %v2853_v60  ;;  %v5271_v49 = vpop.eup %5270  ;;  %v2892_v8 = vand.u32 2147483648, %v2865_v22 }
 0x5a8   : > { %v3765_v42 = vmul.f32 %v5271_v49, %v3763_v15  ;;  %vm3770_vm12 = vweird.f32 %v5271_v49  ;;  %vm2891_vm7 = vcmp.eq.f32.partialorder %v2890_v6, 8.507059e+37  ;;  %v4748_v15 = vld [vmem:[%s5552_s28 + $0x30] sm:$0xff] }
 0x5a9   : > { %v2858_v9 = vsub.f32 0.0, %v2856_v45  ;;  %vm3771_vm14 = vmor %vm3769_vm13, %vm3770_vm12  ;;  %v2893_v46 = vor.u32 1.1754944e-38, %v2892_v8 }
 0x5aa   : > { %v3766_v16 = vsub.f32 1.0, %v3765_v42 }
 0x5ab   : > { %v2860_v0 = vmul.f32 1.442695, %v2858_v9 }
 0x5ac   : > { %v5273_v24 = vpop.eup %5272  ;;  %v3767_v11 = vmul.f32 %v5271_v49, %v3766_v16 }
 0x5ad   : > { %v2882_v23 = vmul.f32 %v5273_v24, %v2865_v22  ;;  %5274 = vpow2.f32 %v2860_v0  ;;  %vm2887_vm4 = vweird.f32 %v5273_v24  ;;  %v4742_v22 = vld [vmem:[%s5552_s28] sm:$0xff] }
 0x5ae   : > { %v3768_v34 = vadd.f32 %v5271_v49, %v3767_v11  ;;  %vm2888_vm6 = vmor %vm2886_vm5, %vm2887_vm4 }
 0x5af   : > { %v2883_v14 = vsub.f32 1.0, %v2882_v23  ;;  %v4746_v23 = vld [vmem:[%s5552_s28 + $0x20] sm:$0xff] }
 0x5b0   : > { %v3772_v7 = vsel %vm3771_vm14, %v5271_v49, %v3768_v34 }
 0x5b1   : > { %v2884_v26 = vmul.f32 %v5273_v24, %v2883_v14  ;;  %v3777_v55 = vsel %vm3774_vm15, %v3776_v54, %v3772_v7  ;;  %v4749_v54 = vld [vmem:[%s5552_s28 + $0x38] sm:$0xff] }
 0x5b2   : > { %v3779_v35 = vmul.f32 0.33333334, %v3777_v55 }
 0x5b3   : > { %v5275_v5 = vpop.eup %5274  ;;  %v2885_v59 = vadd.f32 %v5273_v24, %v2884_v26 }
 0x5b4   : > { %v2864_v63 = vadd.f32 1.0, %v5275_v5  ;;  %v4666_v38 = vperm.slane %v3779_v35, 0  ;;  %v4663_v25 = vrot.slane %v3779_v35, 1  ;;  %v4665_v28 = vrot.slane %v3779_v35, 3  ;;  %v4747_v5 = vld [vmem:[%s5552_s28 + $0x28] sm:$0xff] }
 0x5b5   : > { %v2889_v32 = vsel %vm2888_vm6, %v5273_v24, %v2885_v59  ;;  %v4664_v37 = vrot.slane %v3779_v35, 2 }
 0x5b6   : > { %5276 = vrcp.f32 %v2864_v63  ;;  %v2894_v51 = vsel %vm2891_vm7, %v2893_v46, %v2889_v32  ;;  %v4667_v50 = vperm.slane %v4663_v25, 0  ;;  %v2877_v44 = vand.u32 2147483648, %v2864_v63 }
 0x5b7   : > { %v8482_v29 = vmul.f32 0.33333334, %v2894_v51  ;;  %vm2871_vm1 = vweird.f32 %v2864_v63  ;;  %v2875_v39 = vand.u32 2147483647, %v2864_v63  ;;  %v4669_v1 = vperm.slane %v4665_v28, 0 }
 0x5b8   : > { %v2878_v17 = vor.u32 1.1754944e-38, %v2877_v44  ;;  %v4668_v24 = vperm.slane %v4664_v37, 0 }
 0x5b9   : > { %v4675_v12 = vadd.f32 %v4666_v38, %v8482_v29  ;;  %v4677_v13 = vadd.f32 %v4667_v50, %v8482_v29  ;;  %vm2876_vm3 = vcmp.eq.f32.partialorder %v2875_v39, 8.507059e+37 }
 0x5ba   : > { %v4679_v41 = vadd.f32 %v4668_v24, %v8482_v29 }
 0x5bc   : > { %v5277_v52 = vpop.eup %5276 }
 0x5bd   : > { %v2867_v19 = vmul.f32 %v5277_v52, %v2864_v63  ;;  %vm2872_vm8 = vweird.f32 %v5277_v52  ;;  %v4681_v63 = vadd.f32 %v4669_v1, %v8482_v29 }
 0x5be   : > { %vm2873_vm2 = vmor %vm2871_vm1, %vm2872_vm8 }
 0x5bf   : > { %v2868_v40 = vsub.f32 1.0, %v2867_v19 }
 0x5c1   : > { %v2869_v57 = vmul.f32 %v5277_v52, %v2868_v40 }
 0x5c3   : > { %v2870_v33 = vadd.f32 %v5277_v52, %v2869_v57 }
 0x5c5   : > { %v2874_v36 = vsel %vm2873_vm2, %v5277_v52, %v2870_v33 }
 0x5c6   : > { %v2879_v18 = vsel %vm2876_vm3, %v2878_v17, %v2874_v36 }
 0x5c7   : > { %v2896_v30 = vmul.f32 0.33333334, %v2879_v18 }
 0x5c9   : > { %v4676_v47 = vadd.f32 %v4667_v50, %v2896_v30  ;;  %v4680_v10 = vadd.f32 %v4669_v1, %v2896_v30  ;;  %v4674_v3 = vadd.f32 %v4666_v38, %v2896_v30  ;;  %v4678_v16 = vadd.f32 %v4668_v24, %v2896_v30 }
 0x5d7   : > { %v4694_v43 = vpop.permute.xlu2 %4693 }
 0x5d8   : > { %v4735_v58 = vadd.f32 %v4694_v43, %v4675_v12 }
 0x5da   : > { %v4751_v61 = vmul.f32 %v4743_v56, %v4735_v58 }
 0x5dc   : > { %4759 = vst.msk [vmem:[%s8488_s7 + $0x8] sm:$0xff] %vm530_vm0, %v4751_v61 }
 0x5df   : > { %v4707_v53 = vpop.permute.xlu2 %4706 }
 0x5e0   : > { %v4737_v48 = vadd.f32 %v4707_v53, %v4677_v13 }
 0x5e2   : > { %v4753_v31 = vmul.f32 %v4745_v62, %v4737_v48 }
 0x5e4   : > { %4761 = vst.msk [vmem:[%s8488_s7 + $0x18] sm:$0xff] %vm530_vm0, %v4753_v31 }
 0x5ef   : > { %v4701_v20 = vpop.permute.xlu1 %4700  ;;  %v4727_v2 = vpop.permute.xlu2 %4726 }
 0x5f0   : > { %v4736_v27 = vadd.f32 %v4701_v20, %v4676_v47  ;;  %v4740_v60 = vadd.f32 %v4727_v2, %v4680_v10  ;;  %v4688_v45 = vpop.permute.xlu0 %4687 }
 0x5f1   : > { %v4734_v49 = vadd.f32 %v4688_v45, %v4674_v3 }
 0x5f2   : > { %v4752_v9 = vmul.f32 %v4744_v4, %v4736_v27  ;;  %v4756_v42 = vmul.f32 %v4748_v15, %v4740_v60 }
 0x5f3   : > { %v4750_v0 = vmul.f32 %v4742_v22, %v4734_v49 }
 0x5f4   : > { %4760 = vst.msk [vmem:[%s8488_s7 + $0x10] sm:$0xff] %vm530_vm0, %v4752_v9 }
 0x5f5   : > { %4764 = vst.msk [vmem:[%s8488_s7 + $0x30] sm:$0xff] %vm530_vm0, %v4756_v42 }
 0x5f6   : > { %4758 = vst.msk [vmem:[%s8488_s7] sm:$0xff] %vm530_vm0, %v4750_v0 }
 0x5f7   : > { %v4714_v11 = vpop.permute.xlu1 %4713 }
 0x5f8   : > { %v4738_v14 = vadd.f32 %v4714_v11, %v4678_v16 }
 0x5fa   : > { %v4754_v34 = vmul.f32 %v4746_v23, %v4738_v14 }
 0x5fc   : > { %4762 = vst.msk [vmem:[%s8488_s7 + $0x20] sm:$0xff] %vm530_vm0, %v4754_v34 }
 0x600   : > { %v4720_v21 = vpop.permute.xlu0 %4719 }
 0x601   : > { %v4739_v26 = vadd.f32 %v4720_v21, %v4679_v41 }
 0x603   : > { %v4755_v7 = vmul.f32 %v4747_v5, %v4739_v26 }
 0x605   : > { %4763 = vst.msk [vmem:[%s8488_s7 + $0x28] sm:$0xff] %vm530_vm0, %v4755_v7 }
 0x607   : > { %v4733_v59 = vpop.permute.xlu1 %4732 }
 0x608   : > { %v4741_v55 = vadd.f32 %v4733_v59, %v4681_v63 }
 0x60a   : > { %v4757_v8 = vmul.f32 %v4749_v54, %v4741_v55 }
 0x60c   : > { %4765 = vst.msk [vmem:[%s8488_s7 + $0x38] sm:$0xff] %vm530_vm0, %v4757_v8 }
 0x60d   : > { %5370 = shalt.err (!%p5367_p8)
}
 0x60e   : > { %s5428_s4 = smov 128   ;;  %s5429_s19 = smov 8  }
 0x60f   : > { %5187 = dma.vmem_to_hbm [thread:$0]  (%p5497_p11), %s4780_s27, 1024, %s4782_s20, %s4767_s13, %s5428_s4, %s5428_s4, %s5429_s19  }
 0x610 PF: > { %s4796_s14 = sand.u32 1, %s5401_s9   ;;  %p9033_p9 = scmp.ge.s32.totalorder %s5413_s12, 2 }
 0x611   : > { %s4797_s25 = scalar_lea.sflag [#allocation7], %s4796_s14 }
 0x612   : > { %p5198_p10 = pnand %p9033_p9, %p5501_p12 }
 0x614   : > { %p5199_p1 = pneg %p5198_p10 }
 0x616   : > { %5396 = dma.done.wait (%p5199_p1), %s4797_s25, 1024  }
 0x617   : > { %5398 = vsyncadd (%p5199_p1), %s4797_s25, 4294966272  ;;  %p16_p2 = scmp.ge.s32.totalorder %s5470_s15, 4   ;;  %s9034_s9 = smov %s5405_s10 }
 0x618   : > { %s9035_s10 = smov %s5409_s11  ;;  %s9036_s11 = smov %s5482_s18 }
 0x619   : > { %s9037_s12 = smov %s5470_s15  ;;  %18 = sbr.rel (!%p16_p2) target bundleno = 6 (0x6), region = 81 }
 0x61e   :  { %4803 = vsyncpa [#allocation6], 1 }
 0x61f   :  { %4805 = vsyncpa [#allocation6 + $0x1], 1 }
 0x620   :  { %4806 = vsyncpa [#allocation7], 1 }
 0x621   :  { %4808 = vsyncpa [#allocation7 + $0x1], 1 }
 0x622   :  { %4809 = vsyncpa [#allocation8], 1 }
 0x623   :  { %4811 = vsyncpa [#allocation8 + $0x1], 1 }

</bundles_post_ra>
